<compile_context>
chip_gen: v7x
topology: tpu7x:2x2x1
jax: 0.10.0
libtpu: 0.0.40
codegen_flags: <defaults>
</compile_context>

<pallas_src>
import functools

import jax
import jax.numpy as jnp
import numpy as np
from jax.experimental import pallas as pl
from jax.experimental.pallas import tpu as pltpu


# ----------------------------- fused Pallas kernel ------------------------- #

def _fused_maskhead_kernel(x_ref,
                           w1_ref, b1_ref, w2_ref, b2_ref,
                           w3_ref, b3_ref, w4_ref, b4_ref,
                           wtT_ref, btc_ref, wmT_ref, bmc_ref,
                           o_ref,
                           pad1_ref, padC_ref):
    """One batch element per grid step; all activations stay in VMEM.

    x_ref   : (1, H, W, Cin)           input image (NHWC, compute dtype)
    wN_ref  : (9*Cin_layer, C)         im2col-reshaped 3x3 conv weights
    bN_ref  : (1, C)                   conv biases (f32)
    wtT_ref : (2, 2, C, C)             transposed-conv weights, per-tap transposed
    btc_ref : (C, 1)                   transposed-conv bias (column, f32)
    wmT_ref : (nc, C)                  maskout 1x1 weights, transposed
    bmc_ref : (nc, 1)                  maskout bias (column, f32)
    o_ref   : (1, 2, 2, nc, H*W)       output, lane-dense along H*W
    pad1_ref: (H+2, W+2, Cin)  scratch padded buffer (layer 1)
    padC_ref: (H+2, W+2, C)    scratch padded buffer (layers 2-4)
    """
    _, H, W, _ = x_ref.shape
    C = b1_ref.shape[1]
    cdt = pad1_ref.dtype                       # matmul input dtype (bf16 / f32)

    def conv3x3_relu(pad_ref, a3d, w_ref, b_ref):
        # a3d: (H, W, Cp) activation; pad_ref has a zero border.
        cp = pad_ref.shape[-1]
        pad_ref[1:H + 1, 1:W + 1, :] = a3d.astype(cdt)
        xp = pad_ref[...]
        # im2col, channel index = (dy*3 + dx)*Cp + ci  == w.reshape(9*Cp, C) rows
        cols = jnp.concatenate(
            [xp[:, 0:W, :], xp[:, 1:W + 1, :], xp[:, 2:W + 2, :]], axis=-1)
        patches = jnp.concatenate(
            [cols[0:H], cols[1:H + 1], cols[2:H + 2]], axis=-1)
        patches = patches.reshape(H * W, 9 * cp)
        acc = jnp.dot(patches, w_ref[...], preferred_element_type=jnp.float32)
        return jnp.maximum(acc + b_ref[...], 0.0)          # (H*W, C) f32

    # Zero the padded scratch buffers once; the interior is overwritten each
    # layer and the border stays zero.
    pad1_ref[...] = jnp.zeros_like(pad1_ref)
    padC_ref[...] = jnp.zeros_like(padC_ref)

    # conv1..conv4 (+ ReLU), single K=9*Cin matmul each.
    a = conv3x3_relu(pad1_ref, x_ref[0], w1_ref, b1_ref)
    for w_ref, b_ref in ((w2_ref, b2_ref), (w3_ref, b3_ref), (w4_ref, b4_ref)):
        a = conv3x3_relu(padC_ref, a.reshape(H, W, C), w_ref, b_ref)

    # Upsample (convT 2x2 stride 2) + ReLU, fused with the 1x1 maskout.
    # Channel-major layout so the output store is lane-dense along H*W.
    aT = a.T.astype(cdt)                                   # (C, H*W)
    for dy in range(2):
        for dx in range(2):
            y = jnp.dot(wtT_ref[dy, dx], aT,
                        preferred_element_type=jnp.float32)           # (C, H*W)
            y = jnp.maximum(y + btc_ref[...], 0.0)                    # act5
            z = jnp.dot(wmT_ref[...], y.astype(cdt),
                        preferred_element_type=jnp.float32)           # (nc, H*W)
            o_ref[0, dy, dx] = z + bmc_ref[...]


# ----------------------------- wrapper -------------------------------------- #

def mask_predictor_forward(x_nchw, params, *, compute_dtype=jnp.bfloat16):
    """Full MaskPredictor forward in one pallas_call. Returns NCHW f32."""
    N, Cin, H, W = x_nchw.shape
    w1, _ = params["conv1"]
    C = w1.shape[-1]
    wm, bm = params["maskout"]
    nc = wm.shape[-1]
    cdt = compute_dtype

    x = jnp.transpose(x_nchw, (0, 2, 3, 1)).astype(cdt)              # NHWC

    def conv_w(name):
        w, b = params[name]                       # (3,3,cin,C), (1,C)
        cin = w.shape[2]
        return w.reshape(9 * cin, C).astype(cdt), b.astype(jnp.float32)

    w1m, b1v = conv_w("conv1")
    w2m, b2v = conv_w("conv2")
    w3m, b3v = conv_w("conv3")
    w4m, b4v = conv_w("conv4")

    wt, bt = params["upsample"]                                      # (2,2,C,C)
    wtT = jnp.transpose(wt, (0, 1, 3, 2)).astype(cdt)  # wtT[dy,dx] = wt[dy,dx].T
    btc = bt.reshape(C, 1).astype(jnp.float32)
    wmT = wm.T.astype(cdt)                                           # (nc, C)
    bmc = bm.reshape(nc, 1).astype(jnp.float32)

    out = pl.pallas_call(
        _fused_maskhead_kernel,
        out_shape=jax.ShapeDtypeStruct((N, 2, 2, nc, H * W), jnp.float32),
        grid=(N,),
        in_specs=[
            pl.BlockSpec((1, H, W, Cin), lambda n: (n, 0, 0, 0)),
            pl.BlockSpec((9 * Cin, C), lambda n: (0, 0)),
            pl.BlockSpec((1, C), lambda n: (0, 0)),
            pl.BlockSpec((9 * C, C), lambda n: (0, 0)),
            pl.BlockSpec((1, C), lambda n: (0, 0)),
            pl.BlockSpec((9 * C, C), lambda n: (0, 0)),
            pl.BlockSpec((1, C), lambda n: (0, 0)),
            pl.BlockSpec((9 * C, C), lambda n: (0, 0)),
            pl.BlockSpec((1, C), lambda n: (0, 0)),
            pl.BlockSpec((2, 2, C, C), lambda n: (0, 0, 0, 0)),
            pl.BlockSpec((C, 1), lambda n: (0, 0)),
            pl.BlockSpec((nc, C), lambda n: (0, 0)),
            pl.BlockSpec((nc, 1), lambda n: (0, 0)),
        ],
        out_specs=pl.BlockSpec((1, 2, 2, nc, H * W),
                               lambda n: (n, 0, 0, 0, 0)),
        scratch_shapes=[
            pltpu.VMEM((H + 2, W + 2, Cin), cdt),
            pltpu.VMEM((H + 2, W + 2, C), cdt),
        ],
        compiler_params=pltpu.CompilerParams(
            dimension_semantics=("parallel",)),
    )(x, w1m, b1v, w2m, b2v, w3m, b3v, w4m, b4v, wtT, btc, wmT, bmc)

    # (N, dy, dx, c, H*W) -> (N, c, 2H, 2W)   (tiny tensor, cheap XLA reshuffle)
    out = out.reshape(N, 2, 2, nc, H, W)
    out = out.transpose(0, 3, 4, 1, 5, 2).reshape(N, nc, 2 * H, 2 * W)
    return out


# ----------------------------- Module --------------------------------------- #

class MaskPredictorPallas:
    """Pallas TPU port of MaskPredictor (kaiming-normal weights, zero biases)."""

    def __init__(self, input_size, representation_size, num_classes, key):
        insize = representation_size
        keys = jax.random.split(key, 8)

        def kaiming(k, shape, fan_out):
            std = (2.0 / fan_out) ** 0.5
            return std * jax.random.normal(k, shape, jnp.float32)

        self.params = {}
        cin = input_size
        for i in range(4):
            w = kaiming(keys[i], (3, 3, cin, insize), fan_out=insize * 9)
            b = jnp.zeros((1, insize), jnp.float32)
            self.params[f"conv{i + 1}"] = (w, b)
            cin = insize
        # ConvTranspose2d(insize, insize, 2, stride=2): stored as (kH,kW,Cin,Cout)
        wt = kaiming(keys[4], (2, 2, insize, insize), fan_out=insize * 4)
        bt = 0.01 * jax.random.normal(keys[5], (1, insize), jnp.float32)
        self.params["upsample"] = (wt, bt)
        # maskout: 1x1 conv
        wm = kaiming(keys[6], (insize, num_classes), fan_out=num_classes)
        bm = jnp.zeros((1, num_classes), jnp.float32)
        self.params["maskout"] = (wm, bm)

    def __call__(self, x_nchw, compute_dtype=jnp.bfloat16):
        return mask_predictor_forward(x_nchw, self.params,
                                      compute_dtype=compute_dtype)


# ----------------------------- Pure-JAX reference --------------------------- #

def reference_forward(x_nchw, params):
    x = jnp.transpose(x_nchw, (0, 2, 3, 1)).astype(jnp.float32)
    for i in range(4):
        w, b = params[f"conv{i + 1}"]
        x = jax.lax.conv_general_dilated(
            x, w, (1, 1), "SAME",
            dimension_numbers=("NHWC", "HWIO", "NHWC")) + b[0]
        x = jnp.maximum(x, 0.0)
    wt, bt = params["upsample"]
    N, H, W, C = x.shape
    Cout = wt.shape[-1]
    y = jnp.einsum("nhwc,ijcd->nhiwjd", x, wt).reshape(N, 2 * H, 2 * W, Cout)
    y = jnp.maximum(y + bt[0], 0.0)
    wm, bm = params["maskout"]
    y = jnp.einsum("nhwc,cd->nhwd", y, wm) + bm[0]
    return jnp.transpose(y, (0, 3, 1, 2))


# ----------------------------- Main ------------------------------------------ #

if __name__ == "__main__":
    batch = 2
    input_size = 4          # input channels
    spatial = 16            # H = W
    representation_size = 32
    num_classes = 5

    key = jax.random.PRNGKey(0)
    kx, kp = jax.random.split(key)
    x = jax.random.normal(kx, (batch, input_size, spatial, spatial), jnp.float32)

    model = MaskPredictorPallas(input_size, representation_size, num_classes, kp)

    # Fast path (bf16 MXU inputs, f32 accumulation) — the optimized kernel.
    fwd_bf16 = jax.jit(functools.partial(
        mask_predictor_forward, params=model.params, compute_dtype=jnp.bfloat16))
    out = jax.block_until_ready(fwd_bf16(x))

    # shape check: (N, num_classes, 2H, 2W)
    assert out.shape == (batch, num_classes, 2 * spatial, 2 * spatial), out.shape

    ref = np.asarray(jax.block_until_ready(reference_forward(x, model.params)))

    # Exact-math check of the fused kernel with f32 compute (tight tolerance).
    fwd_f32 = jax.jit(functools.partial(
        mask_predictor_forward, params=model.params, compute_dtype=jnp.float32))
    out_f32 = np.asarray(jax.block_until_ready(fwd_f32(x)))
    assert np.allclose(out_f32, ref, rtol=1e-4, atol=1e-4), \
        "Pallas (f32) output mismatch vs reference"

    # bf16 fast path: loose tolerance (bf16 inputs, f32 accumulation).
    err = float(np.max(np.abs(np.asarray(out) - ref)))
    scale = float(np.max(np.abs(ref)))
    assert err <= 0.08 * scale + 2e-2, \
        f"Pallas (bf16) output mismatch vs reference: max_err={err}, scale={scale}"

    print("KERNEL_OK")
</pallas_src>

<mosaic_0001>
module attributes {stable_mosaic.version = 11 : i64} {
  func.func @_fused_maskhead_kernel(%arg0: i32, %arg1: memref<1x16x16x4xbf16, #tpu.memory_space<vmem>>, %arg2: memref<36x32xbf16, #tpu.memory_space<vmem>>, %arg3: memref<1x32xf32, #tpu.memory_space<vmem>>, %arg4: memref<288x32xbf16, #tpu.memory_space<vmem>>, %arg5: memref<1x32xf32, #tpu.memory_space<vmem>>, %arg6: memref<288x32xbf16, #tpu.memory_space<vmem>>, %arg7: memref<1x32xf32, #tpu.memory_space<vmem>>, %arg8: memref<288x32xbf16, #tpu.memory_space<vmem>>, %arg9: memref<1x32xf32, #tpu.memory_space<vmem>>, %arg10: memref<2x2x32x32xbf16, #tpu.memory_space<vmem>>, %arg11: memref<32x1xf32, #tpu.memory_space<vmem>>, %arg12: memref<5x32xbf16, #tpu.memory_space<vmem>>, %arg13: memref<5x1xf32, #tpu.memory_space<vmem>>, %arg14: memref<1x2x2x5x256xf32, #tpu.memory_space<vmem>>, %arg15: memref<18x18x4xbf16, #tpu.memory_space<vmem>>, %arg16: memref<18x18x32xbf16, #tpu.memory_space<vmem>>) attributes {dimension_semantics = [#tpu.dimension_semantics<parallel>], iteration_bounds = array<i64: 2>, scalar_prefetch = 0 : i64, scratch_operands = 2 : i64, tpu.core_type = #tpu.core_type<tc>, window_params = [{transform_indices = @transform_0, window_bounds = array<i64: 1, 16, 16, 4>}, {pipeline_mode = #tpu.pipeline_mode<synchronous>, transform_indices = @transform_1, window_bounds = array<i64: 36, 32>}, {pipeline_mode = #tpu.pipeline_mode<synchronous>, transform_indices = @transform_2, window_bounds = array<i64: 1, 32>}, {pipeline_mode = #tpu.pipeline_mode<synchronous>, transform_indices = @transform_3, window_bounds = array<i64: 288, 32>}, {pipeline_mode = #tpu.pipeline_mode<synchronous>, transform_indices = @transform_4, window_bounds = array<i64: 1, 32>}, {pipeline_mode = #tpu.pipeline_mode<synchronous>, transform_indices = @transform_5, window_bounds = array<i64: 288, 32>}, {pipeline_mode = #tpu.pipeline_mode<synchronous>, transform_indices = @transform_6, window_bounds = array<i64: 1, 32>}, {pipeline_mode = #tpu.pipeline_mode<synchronous>, transform_indices = @transform_7, window_bounds = array<i64: 288, 32>}, {pipeline_mode = #tpu.pipeline_mode<synchronous>, transform_indices = @transform_8, window_bounds = array<i64: 1, 32>}, {pipeline_mode = #tpu.pipeline_mode<synchronous>, transform_indices = @transform_9, window_bounds = array<i64: 2, 2, 32, 32>}, {pipeline_mode = #tpu.pipeline_mode<synchronous>, transform_indices = @transform_10, window_bounds = array<i64: 32, 1>}, {pipeline_mode = #tpu.pipeline_mode<synchronous>, transform_indices = @transform_11, window_bounds = array<i64: 5, 32>}, {pipeline_mode = #tpu.pipeline_mode<synchronous>, transform_indices = @transform_12, window_bounds = array<i64: 5, 1>}, {transform_indices = @transform_13, window_bounds = array<i64: 1, 2, 2, 5, 256>}]} {
    %cst = arith.constant 0.000000e+00 : bf16
    %0 = vector.broadcast %cst : bf16 to vector<18x18x4xbf16>
    %c0 = arith.constant 0 : index
    %c0_0 = arith.constant 0 : index
    %c0_1 = arith.constant 0 : index
    %1 = vector.load %arg15[%c0, %c0_0, %c0_1] : memref<18x18x4xbf16, #tpu.memory_space<vmem>>, vector<18x18x4xbf16>
    tpu.vector_store %arg15[%c0, %c0_0, %c0_1], %0 {strides = array<i32>} : memref<18x18x4xbf16, #tpu.memory_space<vmem>>, vector<18x18x4xbf16>,
    %cst_2 = arith.constant 0.000000e+00 : bf16
    %2 = vector.broadcast %cst_2 : bf16 to vector<18x18x32xbf16>
    %c0_3 = arith.constant 0 : index
    %c0_4 = arith.constant 0 : index
    %c0_5 = arith.constant 0 : index
    %3 = vector.load %arg16[%c0_3, %c0_4, %c0_5] : memref<18x18x32xbf16, #tpu.memory_space<vmem>>, vector<18x18x32xbf16>
    tpu.vector_store %arg16[%c0_3, %c0_4, %c0_5], %2 {strides = array<i32>} : memref<18x18x32xbf16, #tpu.memory_space<vmem>>, vector<18x18x32xbf16>,
    %c0_6 = arith.constant 0 : index
    %c0_7 = arith.constant 0 : index
    %c0_8 = arith.constant 0 : index
    %c0_9 = arith.constant 0 : index
    %4 = vector.load %arg1[%c0_6, %c0_7, %c0_8, %c0_9] : memref<1x16x16x4xbf16, #tpu.memory_space<vmem>>, vector<1x16x16x4xbf16>
    %5 = vector.shape_cast %4 : vector<1x16x16x4xbf16> to vector<16x16x4xbf16>
    %c1 = arith.constant 1 : index
    %c1_10 = arith.constant 1 : index
    %c0_11 = arith.constant 0 : index
    %6 = vector.load %arg15[%c1, %c1_10, %c0_11] : memref<18x18x4xbf16, #tpu.memory_space<vmem>>, vector<16x16x4xbf16>
    tpu.vector_store %arg15[%c1, %c1_10, %c0_11], %5 {strides = array<i32>} : memref<18x18x4xbf16, #tpu.memory_space<vmem>>, vector<16x16x4xbf16>,
    %c0_12 = arith.constant 0 : index
    %c0_13 = arith.constant 0 : index
    %c0_14 = arith.constant 0 : index
    %7 = vector.load %arg15[%c0_12, %c0_13, %c0_14] : memref<18x18x4xbf16, #tpu.memory_space<vmem>>, vector<18x18x4xbf16>
    %8 = vector.extract_strided_slice %7 {offsets = [0, 0, 0], sizes = [18, 16, 4], strides = [1, 1, 1]} : vector<18x18x4xbf16> to vector<18x16x4xbf16>
    %9 = vector.extract_strided_slice %7 {offsets = [0, 1, 0], sizes = [18, 16, 4], strides = [1, 1, 1]} : vector<18x18x4xbf16> to vector<18x16x4xbf16>
    %10 = vector.extract_strided_slice %7 {offsets = [0, 2, 0], sizes = [18, 16, 4], strides = [1, 1, 1]} : vector<18x18x4xbf16> to vector<18x16x4xbf16>
    %11 = tpu.concatenate %8, %9, %10 in 2 : vector<18x16x4xbf16>, vector<18x16x4xbf16>, vector<18x16x4xbf16> -> vector<18x16x12xbf16>
    %12 = vector.extract_strided_slice %11 {offsets = [0, 0, 0], sizes = [16, 16, 12], strides = [1, 1, 1]} : vector<18x16x12xbf16> to vector<16x16x12xbf16>
    %13 = vector.extract_strided_slice %11 {offsets = [1, 0, 0], sizes = [16, 16, 12], strides = [1, 1, 1]} : vector<18x16x12xbf16> to vector<16x16x12xbf16>
    %14 = vector.extract_strided_slice %11 {offsets = [2, 0, 0], sizes = [16, 16, 12], strides = [1, 1, 1]} : vector<18x16x12xbf16> to vector<16x16x12xbf16>
    %15 = tpu.concatenate %12, %13, %14 in 2 : vector<16x16x12xbf16>, vector<16x16x12xbf16>, vector<16x16x12xbf16> -> vector<16x16x36xbf16>
    %16 = vector.shape_cast %15 : vector<16x16x36xbf16> to vector<256x36xbf16>
    %c0_15 = arith.constant 0 : index
    %c0_16 = arith.constant 0 : index
    %17 = vector.load %arg2[%c0_15, %c0_16] : memref<36x32xbf16, #tpu.memory_space<vmem>>, vector<36x32xbf16>
    %cst_17 = arith.constant dense<0.000000e+00> : vector<256x32xf32>
    %18 = tpu.matmul %16, %17, %cst_17 {dimension_numbers = #tpu.dot_dimension_numbers<[1], [0], [0], [1], [0, 0, 1, 1], [], []>} : vector<256x36xbf16>, vector<36x32xbf16>, vector<256x32xf32> -> vector<256x32xf32>
    %c0_18 = arith.constant 0 : index
    %c0_19 = arith.constant 0 : index
    %19 = vector.load %arg3[%c0_18, %c0_19] : memref<1x32xf32, #tpu.memory_space<vmem>>, vector<1x32xf32>
    %20 = vector.broadcast %19 : vector<1x32xf32> to vector<256x32xf32>
    %21 = arith.addf %18, %20 : vector<256x32xf32>
    %cst_20 = arith.constant 0.000000e+00 : f32
    %22 = vector.broadcast %cst_20 : f32 to vector<256x32xf32>
    %23 = arith.maximumf %21, %22 : vector<256x32xf32>
    %24 = vector.shape_cast %23 : vector<256x32xf32> to vector<16x16x32xf32>
    %25 = arith.truncf %24 : vector<16x16x32xf32> to vector<16x16x32xbf16>
    %c1_21 = arith.constant 1 : index
    %c1_22 = arith.constant 1 : index
    %c0_23 = arith.constant 0 : index
    %26 = vector.load %arg16[%c1_21, %c1_22, %c0_23] : memref<18x18x32xbf16, #tpu.memory_space<vmem>>, vector<16x16x32xbf16>
    tpu.vector_store %arg16[%c1_21, %c1_22, %c0_23], %25 {strides = array<i32>} : memref<18x18x32xbf16, #tpu.memory_space<vmem>>, vector<16x16x32xbf16>,
    %c0_24 = arith.constant 0 : index
    %c0_25 = arith.constant 0 : index
    %c0_26 = arith.constant 0 : index
    %27 = vector.load %arg16[%c0_24, %c0_25, %c0_26] : memref<18x18x32xbf16, #tpu.memory_space<vmem>>, vector<18x18x32xbf16>
    %28 = vector.extract_strided_slice %27 {offsets = [0, 0, 0], sizes = [18, 16, 32], strides = [1, 1, 1]} : vector<18x18x32xbf16> to vector<18x16x32xbf16>
    %29 = vector.extract_strided_slice %27 {offsets = [0, 1, 0], sizes = [18, 16, 32], strides = [1, 1, 1]} : vector<18x18x32xbf16> to vector<18x16x32xbf16>
    %30 = vector.extract_strided_slice %27 {offsets = [0, 2, 0], sizes = [18, 16, 32], strides = [1, 1, 1]} : vector<18x18x32xbf16> to vector<18x16x32xbf16>
    %31 = tpu.concatenate %28, %29, %30 in 2 : vector<18x16x32xbf16>, vector<18x16x32xbf16>, vector<18x16x32xbf16> -> vector<18x16x96xbf16>
    %32 = vector.extract_strided_slice %31 {offsets = [0, 0, 0], sizes = [16, 16, 96], strides = [1, 1, 1]} : vector<18x16x96xbf16> to vector<16x16x96xbf16>
    %33 = vector.extract_strided_slice %31 {offsets = [1, 0, 0], sizes = [16, 16, 96], strides = [1, 1, 1]} : vector<18x16x96xbf16> to vector<16x16x96xbf16>
    %34 = vector.extract_strided_slice %31 {offsets = [2, 0, 0], sizes = [16, 16, 96], strides = [1, 1, 1]} : vector<18x16x96xbf16> to vector<16x16x96xbf16>
    %35 = tpu.concatenate %32, %33, %34 in 2 : vector<16x16x96xbf16>, vector<16x16x96xbf16>, vector<16x16x96xbf16> -> vector<16x16x288xbf16>
    %36 = vector.shape_cast %35 : vector<16x16x288xbf16> to vector<256x288xbf16>
    %c0_27 = arith.constant 0 : index
    %c0_28 = arith.constant 0 : index
    %37 = vector.load %arg4[%c0_27, %c0_28] : memref<288x32xbf16, #tpu.memory_space<vmem>>, vector<288x32xbf16>
    %cst_29 = arith.constant dense<0.000000e+00> : vector<256x32xf32>
    %38 = tpu.matmul %36, %37, %cst_29 {dimension_numbers = #tpu.dot_dimension_numbers<[1], [0], [0], [1], [0, 0, 1, 1], [], []>} : vector<256x288xbf16>, vector<288x32xbf16>, vector<256x32xf32> -> vector<256x32xf32>
    %c0_30 = arith.constant 0 : index
    %c0_31 = arith.constant 0 : index
    %39 = vector.load %arg5[%c0_30, %c0_31] : memref<1x32xf32, #tpu.memory_space<vmem>>, vector<1x32xf32>
    %40 = vector.broadcast %39 : vector<1x32xf32> to vector<256x32xf32>
    %41 = arith.addf %38, %40 : vector<256x32xf32>
    %cst_32 = arith.constant 0.000000e+00 : f32
    %42 = vector.broadcast %cst_32 : f32 to vector<256x32xf32>
    %43 = arith.maximumf %41, %42 : vector<256x32xf32>
    %44 = vector.shape_cast %43 : vector<256x32xf32> to vector<16x16x32xf32>
    %45 = arith.truncf %44 : vector<16x16x32xf32> to vector<16x16x32xbf16>
    %c1_33 = arith.constant 1 : index
    %c1_34 = arith.constant 1 : index
    %c0_35 = arith.constant 0 : index
    %46 = vector.load %arg16[%c1_33, %c1_34, %c0_35] : memref<18x18x32xbf16, #tpu.memory_space<vmem>>, vector<16x16x32xbf16>
    tpu.vector_store %arg16[%c1_33, %c1_34, %c0_35], %45 {strides = array<i32>} : memref<18x18x32xbf16, #tpu.memory_space<vmem>>, vector<16x16x32xbf16>,
    %c0_36 = arith.constant 0 : index
    %c0_37 = arith.constant 0 : index
    %c0_38 = arith.constant 0 : index
    %47 = vector.load %arg16[%c0_36, %c0_37, %c0_38] : memref<18x18x32xbf16, #tpu.memory_space<vmem>>, vector<18x18x32xbf16>
    %48 = vector.extract_strided_slice %47 {offsets = [0, 0, 0], sizes = [18, 16, 32], strides = [1, 1, 1]} : vector<18x18x32xbf16> to vector<18x16x32xbf16>
    %49 = vector.extract_strided_slice %47 {offsets = [0, 1, 0], sizes = [18, 16, 32], strides = [1, 1, 1]} : vector<18x18x32xbf16> to vector<18x16x32xbf16>
    %50 = vector.extract_strided_slice %47 {offsets = [0, 2, 0], sizes = [18, 16, 32], strides = [1, 1, 1]} : vector<18x18x32xbf16> to vector<18x16x32xbf16>
    %51 = tpu.concatenate %48, %49, %50 in 2 : vector<18x16x32xbf16>, vector<18x16x32xbf16>, vector<18x16x32xbf16> -> vector<18x16x96xbf16>
    %52 = vector.extract_strided_slice %51 {offsets = [0, 0, 0], sizes = [16, 16, 96], strides = [1, 1, 1]} : vector<18x16x96xbf16> to vector<16x16x96xbf16>
    %53 = vector.extract_strided_slice %51 {offsets = [1, 0, 0], sizes = [16, 16, 96], strides = [1, 1, 1]} : vector<18x16x96xbf16> to vector<16x16x96xbf16>
    %54 = vector.extract_strided_slice %51 {offsets = [2, 0, 0], sizes = [16, 16, 96], strides = [1, 1, 1]} : vector<18x16x96xbf16> to vector<16x16x96xbf16>
    %55 = tpu.concatenate %52, %53, %54 in 2 : vector<16x16x96xbf16>, vector<16x16x96xbf16>, vector<16x16x96xbf16> -> vector<16x16x288xbf16>
    %56 = vector.shape_cast %55 : vector<16x16x288xbf16> to vector<256x288xbf16>
    %c0_39 = arith.constant 0 : index
    %c0_40 = arith.constant 0 : index
    %57 = vector.load %arg6[%c0_39, %c0_40] : memref<288x32xbf16, #tpu.memory_space<vmem>>, vector<288x32xbf16>
    %cst_41 = arith.constant dense<0.000000e+00> : vector<256x32xf32>
    %58 = tpu.matmul %56, %57, %cst_41 {dimension_numbers = #tpu.dot_dimension_numbers<[1], [0], [0], [1], [0, 0, 1, 1], [], []>} : vector<256x288xbf16>, vector<288x32xbf16>, vector<256x32xf32> -> vector<256x32xf32>
    %c0_42 = arith.constant 0 : index
    %c0_43 = arith.constant 0 : index
    %59 = vector.load %arg7[%c0_42, %c0_43] : memref<1x32xf32, #tpu.memory_space<vmem>>, vector<1x32xf32>
    %60 = vector.broadcast %59 : vector<1x32xf32> to vector<256x32xf32>
    %61 = arith.addf %58, %60 : vector<256x32xf32>
    %cst_44 = arith.constant 0.000000e+00 : f32
    %62 = vector.broadcast %cst_44 : f32 to vector<256x32xf32>
    %63 = arith.maximumf %61, %62 : vector<256x32xf32>
    %64 = vector.shape_cast %63 : vector<256x32xf32> to vector<16x16x32xf32>
    %65 = arith.truncf %64 : vector<16x16x32xf32> to vector<16x16x32xbf16>
    %c1_45 = arith.constant 1 : index
    %c1_46 = arith.constant 1 : index
    %c0_47 = arith.constant 0 : index
    %66 = vector.load %arg16[%c1_45, %c1_46, %c0_47] : memref<18x18x32xbf16, #tpu.memory_space<vmem>>, vector<16x16x32xbf16>
    tpu.vector_store %arg16[%c1_45, %c1_46, %c0_47], %65 {strides = array<i32>} : memref<18x18x32xbf16, #tpu.memory_space<vmem>>, vector<16x16x32xbf16>,
    %c0_48 = arith.constant 0 : index
    %c0_49 = arith.constant 0 : index
    %c0_50 = arith.constant 0 : index
    %67 = vector.load %arg16[%c0_48, %c0_49, %c0_50] : memref<18x18x32xbf16, #tpu.memory_space<vmem>>, vector<18x18x32xbf16>
    %68 = vector.extract_strided_slice %67 {offsets = [0, 0, 0], sizes = [18, 16, 32], strides = [1, 1, 1]} : vector<18x18x32xbf16> to vector<18x16x32xbf16>
    %69 = vector.extract_strided_slice %67 {offsets = [0, 1, 0], sizes = [18, 16, 32], strides = [1, 1, 1]} : vector<18x18x32xbf16> to vector<18x16x32xbf16>
    %70 = vector.extract_strided_slice %67 {offsets = [0, 2, 0], sizes = [18, 16, 32], strides = [1, 1, 1]} : vector<18x18x32xbf16> to vector<18x16x32xbf16>
    %71 = tpu.concatenate %68, %69, %70 in 2 : vector<18x16x32xbf16>, vector<18x16x32xbf16>, vector<18x16x32xbf16> -> vector<18x16x96xbf16>
    %72 = vector.extract_strided_slice %71 {offsets = [0, 0, 0], sizes = [16, 16, 96], strides = [1, 1, 1]} : vector<18x16x96xbf16> to vector<16x16x96xbf16>
    %73 = vector.extract_strided_slice %71 {offsets = [1, 0, 0], sizes = [16, 16, 96], strides = [1, 1, 1]} : vector<18x16x96xbf16> to vector<16x16x96xbf16>
    %74 = vector.extract_strided_slice %71 {offsets = [2, 0, 0], sizes = [16, 16, 96], strides = [1, 1, 1]} : vector<18x16x96xbf16> to vector<16x16x96xbf16>
    %75 = tpu.concatenate %72, %73, %74 in 2 : vector<16x16x96xbf16>, vector<16x16x96xbf16>, vector<16x16x96xbf16> -> vector<16x16x288xbf16>
    %76 = vector.shape_cast %75 : vector<16x16x288xbf16> to vector<256x288xbf16>
    %c0_51 = arith.constant 0 : index
    %c0_52 = arith.constant 0 : index
    %77 = vector.load %arg8[%c0_51, %c0_52] : memref<288x32xbf16, #tpu.memory_space<vmem>>, vector<288x32xbf16>
    %cst_53 = arith.constant dense<0.000000e+00> : vector<256x32xf32>
    %78 = tpu.matmul %76, %77, %cst_53 {dimension_numbers = #tpu.dot_dimension_numbers<[1], [0], [0], [1], [0, 0, 1, 1], [], []>} : vector<256x288xbf16>, vector<288x32xbf16>, vector<256x32xf32> -> vector<256x32xf32>
    %c0_54 = arith.constant 0 : index
    %c0_55 = arith.constant 0 : index
    %79 = vector.load %arg9[%c0_54, %c0_55] : memref<1x32xf32, #tpu.memory_space<vmem>>, vector<1x32xf32>
    %80 = vector.broadcast %79 : vector<1x32xf32> to vector<256x32xf32>
    %81 = arith.addf %78, %80 : vector<256x32xf32>
    %cst_56 = arith.constant 0.000000e+00 : f32
    %82 = vector.broadcast %cst_56 : f32 to vector<256x32xf32>
    %83 = arith.maximumf %81, %82 : vector<256x32xf32>
    %84 = tpu.transpose %83, [1, 0] : vector<256x32xf32> -> vector<32x256xf32>
    %85 = arith.truncf %84 : vector<32x256xf32> to vector<32x256xbf16>
    %c0_57 = arith.constant 0 : index
    %c0_58 = arith.constant 0 : index
    %c0_59 = arith.constant 0 : index
    %c0_60 = arith.constant 0 : index
    %86 = vector.load %arg10[%c0_57, %c0_58, %c0_59, %c0_60] : memref<2x2x32x32xbf16, #tpu.memory_space<vmem>>, vector<1x1x32x32xbf16>
    %87 = vector.shape_cast %86 : vector<1x1x32x32xbf16> to vector<32x32xbf16>
    %cst_61 = arith.constant dense<0.000000e+00> : vector<32x256xf32>
    %88 = tpu.matmul %87, %85, %cst_61 {dimension_numbers = #tpu.dot_dimension_numbers<[1], [0], [0], [1], [0, 0, 1, 1], [], []>} : vector<32x32xbf16>, vector<32x256xbf16>, vector<32x256xf32> -> vector<32x256xf32>
    %c0_62 = arith.constant 0 : index
    %c0_63 = arith.constant 0 : index
    %89 = vector.load %arg11[%c0_62, %c0_63] : memref<32x1xf32, #tpu.memory_space<vmem>>, vector<32x1xf32>
    %90 = vector.broadcast %89 : vector<32x1xf32> to vector<32x256xf32>
    %91 = arith.addf %88, %90 : vector<32x256xf32>
    %cst_64 = arith.constant 0.000000e+00 : f32
    %92 = vector.broadcast %cst_64 : f32 to vector<32x256xf32>
    %93 = arith.maximumf %91, %92 : vector<32x256xf32>
    %c0_65 = arith.constant 0 : index
    %c0_66 = arith.constant 0 : index
    %94 = vector.load %arg12[%c0_65, %c0_66] : memref<5x32xbf16, #tpu.memory_space<vmem>>, vector<5x32xbf16>
    %95 = arith.truncf %93 : vector<32x256xf32> to vector<32x256xbf16>
    %cst_67 = arith.constant dense<0.000000e+00> : vector<5x256xf32>
    %96 = tpu.matmul %94, %95, %cst_67 {dimension_numbers = #tpu.dot_dimension_numbers<[1], [0], [0], [1], [0, 0, 1, 1], [], []>} : vector<5x32xbf16>, vector<32x256xbf16>, vector<5x256xf32> -> vector<5x256xf32>
    %c0_68 = arith.constant 0 : index
    %c0_69 = arith.constant 0 : index
    %97 = vector.load %arg13[%c0_68, %c0_69] : memref<5x1xf32, #tpu.memory_space<vmem>>, vector<5x1xf32>
    %98 = vector.broadcast %97 : vector<5x1xf32> to vector<5x256xf32>
    %99 = arith.addf %96, %98 : vector<5x256xf32>
    %c0_70 = arith.constant 0 : index
    %c0_71 = arith.constant 0 : index
    %c0_72 = arith.constant 0 : index
    %c0_73 = arith.constant 0 : index
    %c0_74 = arith.constant 0 : index
    %100 = vector.load %arg14[%c0_70, %c0_71, %c0_72, %c0_73, %c0_74] : memref<1x2x2x5x256xf32, #tpu.memory_space<vmem>>, vector<1x1x1x5x256xf32>
    %101 = vector.shape_cast %100 : vector<1x1x1x5x256xf32> to vector<5x256xf32>
    %102 = vector.shape_cast %99 : vector<5x256xf32> to vector<1x1x1x5x256xf32>
    tpu.vector_store %arg14[%c0_70, %c0_71, %c0_72, %c0_73, %c0_74], %102 {strides = array<i32>} : memref<1x2x2x5x256xf32, #tpu.memory_space<vmem>>, vector<1x1x1x5x256xf32>,
    %c0_75 = arith.constant 0 : index
    %c1_76 = arith.constant 1 : index
    %c0_77 = arith.constant 0 : index
    %c0_78 = arith.constant 0 : index
    %103 = vector.load %arg10[%c0_75, %c1_76, %c0_77, %c0_78] : memref<2x2x32x32xbf16, #tpu.memory_space<vmem>>, vector<1x1x32x32xbf16>
    %104 = vector.shape_cast %103 : vector<1x1x32x32xbf16> to vector<32x32xbf16>
    %cst_79 = arith.constant dense<0.000000e+00> : vector<32x256xf32>
    %105 = tpu.matmul %104, %85, %cst_79 {dimension_numbers = #tpu.dot_dimension_numbers<[1], [0], [0], [1], [0, 0, 1, 1], [], []>} : vector<32x32xbf16>, vector<32x256xbf16>, vector<32x256xf32> -> vector<32x256xf32>
    %c0_80 = arith.constant 0 : index
    %c0_81 = arith.constant 0 : index
    %106 = vector.load %arg11[%c0_80, %c0_81] : memref<32x1xf32, #tpu.memory_space<vmem>>, vector<32x1xf32>
    %107 = vector.broadcast %106 : vector<32x1xf32> to vector<32x256xf32>
    %108 = arith.addf %105, %107 : vector<32x256xf32>
    %cst_82 = arith.constant 0.000000e+00 : f32
    %109 = vector.broadcast %cst_82 : f32 to vector<32x256xf32>
    %110 = arith.maximumf %108, %109 : vector<32x256xf32>
    %c0_83 = arith.constant 0 : index
    %c0_84 = arith.constant 0 : index
    %111 = vector.load %arg12[%c0_83, %c0_84] : memref<5x32xbf16, #tpu.memory_space<vmem>>, vector<5x32xbf16>
    %112 = arith.truncf %110 : vector<32x256xf32> to vector<32x256xbf16>
    %cst_85 = arith.constant dense<0.000000e+00> : vector<5x256xf32>
    %113 = tpu.matmul %111, %112, %cst_85 {dimension_numbers = #tpu.dot_dimension_numbers<[1], [0], [0], [1], [0, 0, 1, 1], [], []>} : vector<5x32xbf16>, vector<32x256xbf16>, vector<5x256xf32> -> vector<5x256xf32>
    %c0_86 = arith.constant 0 : index
    %c0_87 = arith.constant 0 : index
    %114 = vector.load %arg13[%c0_86, %c0_87] : memref<5x1xf32, #tpu.memory_space<vmem>>, vector<5x1xf32>
    %115 = vector.broadcast %114 : vector<5x1xf32> to vector<5x256xf32>
    %116 = arith.addf %113, %115 : vector<5x256xf32>
    %c0_88 = arith.constant 0 : index
    %c0_89 = arith.constant 0 : index
    %c1_90 = arith.constant 1 : index
    %c0_91 = arith.constant 0 : index
    %c0_92 = arith.constant 0 : index
    %117 = vector.load %arg14[%c0_88, %c0_89, %c1_90, %c0_91, %c0_92] : memref<1x2x2x5x256xf32, #tpu.memory_space<vmem>>, vector<1x1x1x5x256xf32>
    %118 = vector.shape_cast %117 : vector<1x1x1x5x256xf32> to vector<5x256xf32>
    %119 = vector.shape_cast %116 : vector<5x256xf32> to vector<1x1x1x5x256xf32>
    tpu.vector_store %arg14[%c0_88, %c0_89, %c1_90, %c0_91, %c0_92], %119 {strides = array<i32>} : memref<1x2x2x5x256xf32, #tpu.memory_space<vmem>>, vector<1x1x1x5x256xf32>,
    %c1_93 = arith.constant 1 : index
    %c0_94 = arith.constant 0 : index
    %c0_95 = arith.constant 0 : index
    %c0_96 = arith.constant 0 : index
    %120 = vector.load %arg10[%c1_93, %c0_94, %c0_95, %c0_96] : memref<2x2x32x32xbf16, #tpu.memory_space<vmem>>, vector<1x1x32x32xbf16>
    %121 = vector.shape_cast %120 : vector<1x1x32x32xbf16> to vector<32x32xbf16>
    %cst_97 = arith.constant dense<0.000000e+00> : vector<32x256xf32>
    %122 = tpu.matmul %121, %85, %cst_97 {dimension_numbers = #tpu.dot_dimension_numbers<[1], [0], [0], [1], [0, 0, 1, 1], [], []>} : vector<32x32xbf16>, vector<32x256xbf16>, vector<32x256xf32> -> vector<32x256xf32>
    %c0_98 = arith.constant 0 : index
    %c0_99 = arith.constant 0 : index
    %123 = vector.load %arg11[%c0_98, %c0_99] : memref<32x1xf32, #tpu.memory_space<vmem>>, vector<32x1xf32>
    %124 = vector.broadcast %123 : vector<32x1xf32> to vector<32x256xf32>
    %125 = arith.addf %122, %124 : vector<32x256xf32>
    %cst_100 = arith.constant 0.000000e+00 : f32
    %126 = vector.broadcast %cst_100 : f32 to vector<32x256xf32>
    %127 = arith.maximumf %125, %126 : vector<32x256xf32>
    %c0_101 = arith.constant 0 : index
    %c0_102 = arith.constant 0 : index
    %128 = vector.load %arg12[%c0_101, %c0_102] : memref<5x32xbf16, #tpu.memory_space<vmem>>, vector<5x32xbf16>
    %129 = arith.truncf %127 : vector<32x256xf32> to vector<32x256xbf16>
    %cst_103 = arith.constant dense<0.000000e+00> : vector<5x256xf32>
    %130 = tpu.matmul %128, %129, %cst_103 {dimension_numbers = #tpu.dot_dimension_numbers<[1], [0], [0], [1], [0, 0, 1, 1], [], []>} : vector<5x32xbf16>, vector<32x256xbf16>, vector<5x256xf32> -> vector<5x256xf32>
    %c0_104 = arith.constant 0 : index
    %c0_105 = arith.constant 0 : index
    %131 = vector.load %arg13[%c0_104, %c0_105] : memref<5x1xf32, #tpu.memory_space<vmem>>, vector<5x1xf32>
    %132 = vector.broadcast %131 : vector<5x1xf32> to vector<5x256xf32>
    %133 = arith.addf %130, %132 : vector<5x256xf32>
    %c0_106 = arith.constant 0 : index
    %c1_107 = arith.constant 1 : index
    %c0_108 = arith.constant 0 : index
    %c0_109 = arith.constant 0 : index
    %c0_110 = arith.constant 0 : index
    %134 = vector.load %arg14[%c0_106, %c1_107, %c0_108, %c0_109, %c0_110] : memref<1x2x2x5x256xf32, #tpu.memory_space<vmem>>, vector<1x1x1x5x256xf32>
    %135 = vector.shape_cast %134 : vector<1x1x1x5x256xf32> to vector<5x256xf32>
    %136 = vector.shape_cast %133 : vector<5x256xf32> to vector<1x1x1x5x256xf32>
    tpu.vector_store %arg14[%c0_106, %c1_107, %c0_108, %c0_109, %c0_110], %136 {strides = array<i32>} : memref<1x2x2x5x256xf32, #tpu.memory_space<vmem>>, vector<1x1x1x5x256xf32>,
    %c1_111 = arith.constant 1 : index
    %c1_112 = arith.constant 1 : index
    %c0_113 = arith.constant 0 : index
    %c0_114 = arith.constant 0 : index
    %137 = vector.load %arg10[%c1_111, %c1_112, %c0_113, %c0_114] : memref<2x2x32x32xbf16, #tpu.memory_space<vmem>>, vector<1x1x32x32xbf16>
    %138 = vector.shape_cast %137 : vector<1x1x32x32xbf16> to vector<32x32xbf16>
    %cst_115 = arith.constant dense<0.000000e+00> : vector<32x256xf32>
    %139 = tpu.matmul %138, %85, %cst_115 {dimension_numbers = #tpu.dot_dimension_numbers<[1], [0], [0], [1], [0, 0, 1, 1], [], []>} : vector<32x32xbf16>, vector<32x256xbf16>, vector<32x256xf32> -> vector<32x256xf32>
    %c0_116 = arith.constant 0 : index
    %c0_117 = arith.constant 0 : index
    %140 = vector.load %arg11[%c0_116, %c0_117] : memref<32x1xf32, #tpu.memory_space<vmem>>, vector<32x1xf32>
    %141 = vector.broadcast %140 : vector<32x1xf32> to vector<32x256xf32>
    %142 = arith.addf %139, %141 : vector<32x256xf32>
    %cst_118 = arith.constant 0.000000e+00 : f32
    %143 = vector.broadcast %cst_118 : f32 to vector<32x256xf32>
    %144 = arith.maximumf %142, %143 : vector<32x256xf32>
    %c0_119 = arith.constant 0 : index
    %c0_120 = arith.constant 0 : index
    %145 = vector.load %arg12[%c0_119, %c0_120] : memref<5x32xbf16, #tpu.memory_space<vmem>>, vector<5x32xbf16>
    %146 = arith.truncf %144 : vector<32x256xf32> to vector<32x256xbf16>
    %cst_121 = arith.constant dense<0.000000e+00> : vector<5x256xf32>
    %147 = tpu.matmul %145, %146, %cst_121 {dimension_numbers = #tpu.dot_dimension_numbers<[1], [0], [0], [1], [0, 0, 1, 1], [], []>} : vector<5x32xbf16>, vector<32x256xbf16>, vector<5x256xf32> -> vector<5x256xf32>
    %c0_122 = arith.constant 0 : index
    %c0_123 = arith.constant 0 : index
    %148 = vector.load %arg13[%c0_122, %c0_123] : memref<5x1xf32, #tpu.memory_space<vmem>>, vector<5x1xf32>
    %149 = vector.broadcast %148 : vector<5x1xf32> to vector<5x256xf32>
    %150 = arith.addf %147, %149 : vector<5x256xf32>
    %c0_124 = arith.constant 0 : index
    %c1_125 = arith.constant 1 : index
    %c1_126 = arith.constant 1 : index
    %c0_127 = arith.constant 0 : index
    %c0_128 = arith.constant 0 : index
    %151 = vector.load %arg14[%c0_124, %c1_125, %c1_126, %c0_127, %c0_128] : memref<1x2x2x5x256xf32, #tpu.memory_space<vmem>>, vector<1x1x1x5x256xf32>
    %152 = vector.shape_cast %151 : vector<1x1x1x5x256xf32> to vector<5x256xf32>
    %153 = vector.shape_cast %150 : vector<5x256xf32> to vector<1x1x1x5x256xf32>
    tpu.vector_store %arg14[%c0_124, %c1_125, %c1_126, %c0_127, %c0_128], %153 {strides = array<i32>} : memref<1x2x2x5x256xf32, #tpu.memory_space<vmem>>, vector<1x1x1x5x256xf32>,
    return
  }
  func.func @transform_0(%arg0: i32) -> (i32, i32, i32, i32) {
    %c0_i32 = arith.constant 0 : i32
    %c0_i32_0 = arith.constant 0 : i32
    %c0_i32_1 = arith.constant 0 : i32
    %c0_i32_2 = arith.constant 0 : i32
    return %arg0, %c0_i32, %c0_i32_0, %c0_i32_1 : i32, i32, i32, i32
  }
  func.func @transform_1(%arg0: i32) -> (i32, i32) {
    %c0_i32 = arith.constant 0 : i32
    %c0_i32_0 = arith.constant 0 : i32
    %c0_i32_1 = arith.constant 0 : i32
    return %c0_i32, %c0_i32_0 : i32, i32
  }
  func.func @transform_2(%arg0: i32) -> (i32, i32) {
    %c0_i32 = arith.constant 0 : i32
    %c0_i32_0 = arith.constant 0 : i32
    %c0_i32_1 = arith.constant 0 : i32
    return %c0_i32, %c0_i32_0 : i32, i32
  }
  func.func @transform_3(%arg0: i32) -> (i32, i32) {
    %c0_i32 = arith.constant 0 : i32
    %c0_i32_0 = arith.constant 0 : i32
    %c0_i32_1 = arith.constant 0 : i32
    return %c0_i32, %c0_i32_0 : i32, i32
  }
  func.func @transform_4(%arg0: i32) -> (i32, i32) {
    %c0_i32 = arith.constant 0 : i32
    %c0_i32_0 = arith.constant 0 : i32
    %c0_i32_1 = arith.constant 0 : i32
    return %c0_i32, %c0_i32_0 : i32, i32
  }
  func.func @transform_5(%arg0: i32) -> (i32, i32) {
    %c0_i32 = arith.constant 0 : i32
    %c0_i32_0 = arith.constant 0 : i32
    %c0_i32_1 = arith.constant 0 : i32
    return %c0_i32, %c0_i32_0 : i32, i32
  }
  func.func @transform_6(%arg0: i32) -> (i32, i32) {
    %c0_i32 = arith.constant 0 : i32
    %c0_i32_0 = arith.constant 0 : i32
    %c0_i32_1 = arith.constant 0 : i32
    return %c0_i32, %c0_i32_0 : i32, i32
  }
  func.func @transform_7(%arg0: i32) -> (i32, i32) {
    %c0_i32 = arith.constant 0 : i32
    %c0_i32_0 = arith.constant 0 : i32
    %c0_i32_1 = arith.constant 0 : i32
    return %c0_i32, %c0_i32_0 : i32, i32
  }
  func.func @transform_8(%arg0: i32) -> (i32, i32) {
    %c0_i32 = arith.constant 0 : i32
    %c0_i32_0 = arith.constant 0 : i32
    %c0_i32_1 = arith.constant 0 : i32
    return %c0_i32, %c0_i32_0 : i32, i32
  }
  func.func @transform_9(%arg0: i32) -> (i32, i32, i32, i32) {
    %c0_i32 = arith.constant 0 : i32
    %c0_i32_0 = arith.constant 0 : i32
    %c0_i32_1 = arith.constant 0 : i32
    %c0_i32_2 = arith.constant 0 : i32
    %c0_i32_3 = arith.constant 0 : i32
    return %c0_i32, %c0_i32_0, %c0_i32_1, %c0_i32_2 : i32, i32, i32, i32
  }
  func.func @transform_10(%arg0: i32) -> (i32, i32) {
    %c0_i32 = arith.constant 0 : i32
    %c0_i32_0 = arith.constant 0 : i32
    %c0_i32_1 = arith.constant 0 : i32
    return %c0_i32, %c0_i32_0 : i32, i32
  }
  func.func @transform_11(%arg0: i32) -> (i32, i32) {
    %c0_i32 = arith.constant 0 : i32
    %c0_i32_0 = arith.constant 0 : i32
    %c0_i32_1 = arith.constant 0 : i32
    return %c0_i32, %c0_i32_0 : i32, i32
  }
  func.func @transform_12(%arg0: i32) -> (i32, i32) {
    %c0_i32 = arith.constant 0 : i32
    %c0_i32_0 = arith.constant 0 : i32
    %c0_i32_1 = arith.constant 0 : i32
    return %c0_i32, %c0_i32_0 : i32, i32
  }
  func.func @transform_13(%arg0: i32) -> (i32, i32, i32, i32, i32) {
    %c0_i32 = arith.constant 0 : i32
    %c0_i32_0 = arith.constant 0 : i32
    %c0_i32_1 = arith.constant 0 : i32
    %c0_i32_2 = arith.constant 0 : i32
    %c0_i32_3 = arith.constant 0 : i32
    return %arg0, %c0_i32, %c0_i32_0, %c0_i32_1, %c0_i32_2 : i32, i32, i32, i32, i32
  }
}

</mosaic_0001>

<bundles_post_ra>
// kernel: mask_predictor_forward.1
= control target key start
LH: loop header
LB: loop body
LE: loop exit
PB: predicated region body
PF: predicated region fallthrough
CT: control target
= control target key end

     0   :  { %18 = vsyncpa [#allocation5], 0  ;;  %s9916_s25 = smov 0   ;;  %s12741_s0 = inlined_call_operand.vmem [shape: bf16[2,16,16,4], index: 0, kind: input, shape index: {}]   ;;  %s12742_s1 = inlined_call_operand.vmem [shape: bf16[36,32], index: 1, kind: input, shape index: {}]   ;;  %s12743_s2 = inlined_call_operand.vmem [shape: f32[1,32], index: 2, kind: input, shape index: {}, may-alias: {2,4,6,8}]   ;;  %s12744_s3 = inlined_call_operand.vmem [shape: bf16[288,32], index: 3, kind: input, shape index: {}]   ;;  %s12745_s4 = inlined_call_operand.vmem [shape: f32[1,32], index: 4, kind: input, shape index: {}, may-alias: {2,4,6,8}]   ;;  %s12746_s5 = inlined_call_operand.vmem [shape: bf16[288,32], index: 5, kind: input, shape index: {}]   ;;  %s12747_s6 = inlined_call_operand.vmem [shape: f32[1,32], index: 6, kind: input, shape index: {}, may-alias: {2,4,6,8}]   ;;  %s12748_s7 = inlined_call_operand.vmem [shape: bf16[288,32], index: 7, kind: input, shape index: {}]   ;;  %s12749_s8 = inlined_call_operand.vmem [shape: f32[1,32], index: 8, kind: input, shape index: {}, may-alias: {2,4,6,8}]   ;;  %s12750_s9 = inlined_call_operand.vmem [shape: bf16[2,2,32,32], index: 9, kind: input, shape index: {}]   ;;  %s12751_s10 = inlined_call_operand.vmem [shape: f32[32,1], index: 10, kind: input, shape index: {}]   ;;  %s12752_s11 = inlined_call_operand.hbm [shape: bf16[5,32], index: 11, kind: input, shape index: {}]   ;;  %s12753_s12 = inlined_call_operand.vmem [shape: f32[5,1], index: 12, kind: input, shape index: {}]   ;;  %s12754_s13 = inlined_call_operand.vmem [shape: f32[2,2,2,5,256], index: 13, kind: output, shape index: {}]  }
   0x1 LB: > { %s9922_s26 = sadd.s32 4294967295, %s9835_s25   ;;  %p8421_p0 = scmp.ge.s32.totalorder %s9835_s25, 1  ;;  %s9835_s25 = sphi %s9916_s25, %s24_s25  }
   0x2   : > { %p333_p1 = scmp.lt.s32.totalorder %s9835_s25, 3  ;;  %p12755_p3 = scmp.eq.s32.totalorder %s9922_s26, 0 }
   0x3   : > { %s9837_s28 = smov [#allocation4]   ;;  %s9797_s16 = scalar_lea.hbm %s12752_s11, 64 }
   0x4   : > { %p9926_p2 = pnand %p8421_p0, %p333_p1  ;;  %s376_s29 = sshll.u32 %s9837_s28, 4  ;;  %s377_s29 = int_to_ptr.vmem [resolvable:$true] %s376_s29 }
   0x5   : > { %p9798_p6 = scmp.ne.s32.totalorder %s12752_s11, %s9797_s16  ;;  %p9804_p10 = scmp.lt.u32.totalorder %s9797_s16, %s12752_s11 }
   0x6   : > { %s12757_s27 = scalar_select %p9926_p2, 1, 0 }
   0x7   : > { %p9493_p4 = pneg %p9926_p2 }
   0x9   : > { %p9935_p5 = pnand %p12755_p3, %p9493_p4 }
   0xb   : > { %p9799_p7 = pneg %p9935_p5 }
   0xd   : > { %p9800_p8 = pnand %p9799_p7, %p9798_p6 }
   0xf   : > { %p9801_p9 = pneg %p9800_p8 }
  0x11   : > { %p9806_p11 = pnand %p9804_p10, %p9801_p9 }
  0x13   : > { %9809 = shalt.err (!%p9806_p11)
}
  0x14   : > { %s9810_s21 = scalar_lea.vmem %s377_s29, 64  ;;  %p9818_p1 = scmp.lt.s32.totalorder %s377_s29, %s377_s29 }
  0x15   : > { %p9811_p12 = scmp.ne.s32.totalorder %s377_s29, %s9810_s21  ;;  %p9819_p4 = scmp.lt.s32.totalorder %s9810_s21, %s9810_s21 }
  0x17   : > { %p9813_p13 = pnand %p9811_p12, %p9799_p7  ;;  %p9820_p3 = por %p9819_p4, %p9818_p1 }
  0x19   : > { %p9814_p0 = pneg %p9813_p13 }
  0x1b   : > { %p9821_p2 = pnand %p9820_p3, %p9814_p0 }
  0x1d   : > { %9824 = shalt.err (!%p9821_p2)
}
  0x1e   : > { %9496 = dma.hbm_to_vmem [thread:$0]  (!%p9935_p5), %s12752_s11, 64, %s377_s29, [#allocation5]  }
  0x1f   : > { %p12759_p6 = scmp.ne.s32.totalorder %s12757_s27, 0 }
  0x20   : > { %p12760_p8 = scmp.eq.s32.totalorder (!%p12759_p6), %s9922_s26, 0 }
  0x21   : > { %400 = sbr.rel (%p12759_p6) target bundleno = 3337 (0xd09), region = 72 }
  0x28   : > { %9830 = dma.done.wait (%p12760_p8), [#allocation5], 64   ;;  %p12761_p7 = pmov %p12760_p8 }
  0x29   : > { %p444_p9 = scmp.lt.s32.totalorder %s9922_s26, 1  ;;  %vm455_vm0 = vcmask 27648   ;;  %vm458_vm1 = vcmask 24576   ;;  %v9838_v0 = vmov 0   ;;  %vm511_vm2 = vcmask 257024   ;;  %s9839_s30 = smov 8  }
  0x2a   : > { %9832 = vsyncadd (%p12761_p7), [#allocation5], 4294967232  ;;  %460 = vst.msk [vmem:[#allocation2 + $0xc] sm:$0xf] %vm455_vm0, %v9838_v0  ;;  %vm514_vm3 = vcmask 253952   ;;  %9568 = vset.pattern.permute.xlu1 %v9838_v0  ;;  %vm1491_vm11 = vcmask 1046528  }
  0x2b   : > { %461 = vst.msk [vmem:[#allocation2 + $0x10] sm:$0xf] %vm455_vm0, %v9838_v0  ;;  %456 = vst.msk [vmem:[#allocation2] sm:$0xf] %vm455_vm0, %v9838_v0  ;;  %s12773_s26 = smov (!%p444_p9, %s9922_s26), 1  ;;  %s9840_s14 = smov 4  }
  0x2c   : > { %462 = vst.msk [vmem:[#allocation2 + $0x14] sm:$0x1] %vm458_vm1, %v9838_v0  ;;  %459 = vst.msk [vmem:[#allocation2 + $0x8] sm:$0x1] %vm458_vm1, %v9838_v0  ;;  %s8835_s24 = sshll.u32 %s12773_s26, 7  ;;  %vm1582_vm13 = vcmask 31744  }
  0x2d   : > { %457 = vst.msk [vmem:[#allocation2 + $0x4] sm:$0xf] %vm455_vm0, %v9838_v0  ;;  %463 = vst.msk [vmem:[#allocation2 + $0x18] sm:$0xf] %vm455_vm0, %v9838_v0  ;;  %s10188_s29 = scalar_lea.vmem %s12741_s0, %s8835_s24  ;;  %vm599_vm4 = vsmask.f32 256 }
  0x2e   : > { %464 = vst.msk [vmem:[#allocation2 + $0x1c] sm:$0xf] %vm455_vm0, %v9838_v0  ;;  %466 = vst.msk [vmem:[#allocation2 + $0x24] sm:$0xf] %vm455_vm0, %v9838_v0  ;;  %vm600_vm5 = vsmask.f32 4368 }
  0x2f   : > { %465 = vst.msk [vmem:[#allocation2 + $0x20] sm:$0x1] %vm458_vm1, %v9838_v0  ;;  %468 = vst.msk [vmem:[#allocation2 + $0x2c] sm:$0x1] %vm458_vm1, %v9838_v0  ;;  %vm924_vm6 = vsmask.f32 7938 }
  0x30   : > { %467 = vst.msk [vmem:[#allocation2 + $0x28] sm:$0xf] %vm455_vm0, %v9838_v0  ;;  %469 = vst.msk [vmem:[#allocation2 + $0x30] sm:$0xf] %vm455_vm0, %v9838_v0  ;;  %v567_v2 = vld [vmem:[%s10188_s29] sm:$0xf] }
  0x31   : > { %470 = vst.msk [vmem:[#allocation2 + $0x34] sm:$0xf] %vm455_vm0, %v9838_v0  ;;  %472 = vst.msk [vmem:[#allocation2 + $0x3c] sm:$0xf] %vm455_vm0, %v9838_v0  ;;  %v568_v3 = vld [vmem:[%s10188_s29 + $0x4] sm:$0xf] }
  0x32   : > { %471 = vst.msk [vmem:[#allocation2 + $0x38] sm:$0x1] %vm458_vm1, %v9838_v0  ;;  %474 = vst.msk [vmem:[#allocation2 + $0x44] sm:$0x1] %vm458_vm1, %v9838_v0  ;;  %v569_v4 = vld [vmem:[%s10188_s29 + $0x8] sm:$0xf] }
  0x33   : > { %473 = vst.msk [vmem:[#allocation2 + $0x40] sm:$0xf] %vm455_vm0, %v9838_v0  ;;  %475 = vst.msk [vmem:[#allocation2 + $0x48] sm:$0xf] %vm455_vm0, %v9838_v0  ;;  %v603_v5 = vshrl.u32 %v567_v2, 16  ;;  %v606_v6 = vshll.u32 %v567_v2, 16 }
  0x34   : > { %476 = vst.msk [vmem:[#allocation2 + $0x4c] sm:$0xf] %vm455_vm0, %v9838_v0  ;;  %478 = vst.msk [vmem:[#allocation2 + $0x54] sm:$0xf] %vm455_vm0, %v9838_v0  ;;  %v611_v7 = vshrl.u32 %v568_v3, 16  ;;  %v614_v8 = vshll.u32 %v568_v3, 16 }
  0x35   : > { %477 = vst.msk [vmem:[#allocation2 + $0x50] sm:$0x1] %vm458_vm1, %v9838_v0  ;;  %480 = vst.msk [vmem:[#allocation2 + $0x5c] sm:$0x1] %vm458_vm1, %v9838_v0  ;;  %v570_v10 = vld [vmem:[%s10188_s29 + $0xc] sm:$0xf] }
  0x36   : > { %479 = vst.msk [vmem:[#allocation2 + $0x58] sm:$0xf] %vm455_vm0, %v9838_v0  ;;  %481 = vst.msk [vmem:[#allocation2 + $0x60] sm:$0xf] %vm455_vm0, %v9838_v0  ;;  %v620_v11 = vshrl.u32 %v569_v4, 16  ;;  %v623_v12 = vshll.u32 %v569_v4, 16 }
  0x37   : > { %482 = vst.msk [vmem:[#allocation2 + $0x64] sm:$0xf] %vm455_vm0, %v9838_v0  ;;  %484 = vst.msk [vmem:[#allocation2 + $0x6c] sm:$0xf] %vm455_vm0, %v9838_v0  ;;  %v605_v13 = vrot.slane %v603_v5, 7  ;;  %v613_v14 = vrot.slane %v611_v7, 7 }
  0x38   : > { %483 = vst.msk [vmem:[#allocation2 + $0x68] sm:$0x1] %vm458_vm1, %v9838_v0  ;;  %486 = vst.msk [vmem:[#allocation2 + $0x74] sm:$0x1] %vm458_vm1, %v9838_v0  ;;  %v926_v16 = vld [vmem:[#allocation2 + $0xc] sm:$0xf] }
  0x39   : > { %485 = vst.msk [vmem:[#allocation2 + $0x70] sm:$0xf] %vm455_vm0, %v9838_v0  ;;  %487 = vst.msk [vmem:[#allocation2 + $0x78] sm:$0xf] %vm455_vm0, %v9838_v0  ;;  %v628_v17 = vshrl.u32 %v570_v10, 16  ;;  %v622_v20 = vrot.slane %v620_v11, 7  ;;  %v608_v23 = vor.u32 %v606_v6, %v605_v13  ;;  %v616_v25 = vor.u32 %v614_v8, %v613_v14 }
  0x3a   : > { %488 = vst.msk [vmem:[#allocation2 + $0x7c] sm:$0xf] %vm455_vm0, %v9838_v0  ;;  %490 = vst.msk [vmem:[#allocation2 + $0x84] sm:$0xf] %vm455_vm0, %v9838_v0  ;;  %v932_v19 = vld [vmem:[#allocation2 + $0x14] sm:$0x1] }
  0x3b   : > { %489 = vst.msk [vmem:[#allocation2 + $0x80] sm:$0x1] %vm458_vm1, %v9838_v0  ;;  %492 = vst.msk [vmem:[#allocation2 + $0x8c] sm:$0x1] %vm458_vm1, %v9838_v0  ;;  %v631_v21 = vshll.u32 %v570_v10, 16  ;;  %v609_v24 = vrot.slane %v605_v13, 4  ;;  %v625_v28 = vor.u32 %v623_v12, %v622_v20 }
  0x3c   : > { %491 = vst.msk [vmem:[#allocation2 + $0x88] sm:$0xf] %vm455_vm0, %v9838_v0  ;;  %493 = vst.msk [vmem:[#allocation2 + $0x90] sm:$0xf] %vm455_vm0, %v9838_v0  ;;  %v571_v22 = vld [vmem:[%s10188_s29 + $0x10] sm:$0xf] }
  0x3d   : > { %494 = vst.msk [vmem:[#allocation2 + $0x94] sm:$0xf] %vm455_vm0, %v9838_v0  ;;  %496 = vst.msk [vmem:[#allocation2 + $0x9c] sm:$0xf] %vm455_vm0, %v9838_v0  ;;  %v618_v26 = vrot.slane %v613_v14, 4  ;;  %v626_v29 = vrot.slane %v622_v20, 4 }
  0x3e   : > { %495 = vst.msk [vmem:[#allocation2 + $0x98] sm:$0x1] %vm458_vm1, %v9838_v0  ;;  %498 = vst.msk [vmem:[#allocation2 + $0xa4] sm:$0x1] %vm458_vm1, %v9838_v0  ;;  %v935_v27 = vld [vmem:[#allocation2 + $0x18] sm:$0xf] }
  0x3f   : > { %497 = vst.msk [vmem:[#allocation2 + $0xa0] sm:$0xf] %vm455_vm0, %v9838_v0  ;;  %499 = vst.msk [vmem:[#allocation2 + $0xa8] sm:$0xf] %vm455_vm0, %v9838_v0  ;;  %v630_v30 = vrot.slane %v628_v17, 7  ;;  %v637_v32 = vshrl.u32 %v571_v22, 16 }
  0x40   : > { %500 = vst.msk [vmem:[#allocation2 + $0xac] sm:$0xf] %vm455_vm0, %v9838_v0  ;;  %502 = vst.msk [vmem:[#allocation2 + $0xb4] sm:$0xf] %vm455_vm0, %v9838_v0  ;;  %v572_v31 = vld [vmem:[%s10188_s29 + $0x14] sm:$0xf] }
  0x41   : > { %501 = vst.msk [vmem:[#allocation2 + $0xb0] sm:$0x1] %vm458_vm1, %v9838_v0  ;;  %504 = vst.msk [vmem:[#allocation2 + $0xbc] sm:$0x1] %vm458_vm1, %v9838_v0  ;;  %v939_v36 = vld [vmem:[#allocation2 + $0x20] sm:$0x1]  ;;  %v633_v39 = vor.u32 %v631_v21, %v630_v30 }
  0x42   : > { %503 = vst.msk [vmem:[#allocation2 + $0xb8] sm:$0xf] %vm455_vm0, %v9838_v0  ;;  %505 = vst.msk [vmem:[#allocation2 + $0xc0] sm:$0xf] %vm455_vm0, %v9838_v0  ;;  %v640_v37 = vshll.u32 %v571_v22, 16  ;;  %v635_v40 = vrot.slane %v630_v30, 4 }
  0x43   : > { %506 = vst.msk [vmem:[#allocation2 + $0xc4] sm:$0xf] %vm455_vm0, %v9838_v0  ;;  %508 = vst.msk [vmem:[#allocation2 + $0xcc] sm:$0xf] %vm455_vm0, %v9838_v0  ;;  %v573_v38 = vld [vmem:[%s10188_s29 + $0x18] sm:$0xf] }
  0x44   : > { %507 = vst.msk [vmem:[#allocation2 + $0xc8] sm:$0x1] %vm458_vm1, %v9838_v0  ;;  %510 = vst.msk [vmem:[#allocation2 + $0xd4] sm:$0x1] %vm458_vm1, %v9838_v0  ;;  %v639_v42 = vrot.slane %v637_v32, 7  ;;  %v645_v45 = vshrl.u32 %v572_v31, 16 }
  0x45   : > { %509 = vst.msk [vmem:[#allocation2 + $0xd0] sm:$0xf] %vm455_vm0, %v9838_v0  ;;  %vm10192_vm7 = vmand %vm514_vm3, %vm599_vm4  ;;  %v942_v43 = vld [vmem:[#allocation2 + $0x24] sm:$0xf]  ;;  %v574_v44 = vld [vmem:[%s10188_s29 + $0x1c] sm:$0xf] }
  0x46   : > { %512 = vst.msk [vmem:[#allocation3] sm:$0xf] %vm511_vm2, %v9838_v0  ;;  %513 = vst.msk [vmem:[#allocation3 + $0x4] sm:$0xf] %vm511_vm2, %v9838_v0  ;;  %v648_v46 = vshll.u32 %v572_v31, 16  ;;  %v654_v47 = vshrl.u32 %v573_v38, 16  ;;  %v642_v52 = vor.u32 %v640_v37, %v639_v42 }
  0x47   : > { %515 = vst.msk [vmem:[#allocation3 + $0x8] sm:$0x1] %vm514_vm3, %v9838_v0  ;;  %518 = vst.msk [vmem:[#allocation3 + $0x14] sm:$0x1] %vm514_vm3, %v9838_v0  ;;  %v657_v48 = vshll.u32 %v573_v38, 16  ;;  %v643_v53 = vrot.slane %v639_v42, 4 }
  0x48   : > { %516 = vst.msk [vmem:[#allocation3 + $0xc] sm:$0xf] %vm511_vm2, %v9838_v0  ;;  %517 = vst.msk [vmem:[#allocation3 + $0x10] sm:$0xf] %vm511_vm2, %v9838_v0  ;;  %v575_v49 = vld [vmem:[%s10188_s29 + $0x20] sm:$0xf] }
  0x49   : > { %519 = vst.msk [vmem:[#allocation3 + $0x18] sm:$0xf] %vm511_vm2, %v9838_v0  ;;  %520 = vst.msk [vmem:[#allocation3 + $0x1c] sm:$0xf] %vm511_vm2, %v9838_v0  ;;  %v576_v54 = vld [vmem:[%s10188_s29 + $0x24] sm:$0xf] }
  0x4a   : > { %521 = vst.msk [vmem:[#allocation3 + $0x20] sm:$0x1] %vm514_vm3, %v9838_v0  ;;  %524 = vst.msk [vmem:[#allocation3 + $0x2c] sm:$0x1] %vm514_vm3, %v9838_v0  ;;  %v647_v55 = vrot.slane %v645_v45, 7  ;;  %v656_v57 = vrot.slane %v654_v47, 7 }
  0x4b   : > { %522 = vst.msk [vmem:[#allocation3 + $0x24] sm:$0xf] %vm511_vm2, %v9838_v0  ;;  %523 = vst.msk [vmem:[#allocation3 + $0x28] sm:$0xf] %vm511_vm2, %v9838_v0  ;;  %v946_v56 = vld [vmem:[#allocation2 + $0x2c] sm:$0x1] }
  0x4c   : > { %525 = vst.msk [vmem:[#allocation3 + $0x30] sm:$0xf] %vm511_vm2, %v9838_v0  ;;  %526 = vst.msk [vmem:[#allocation3 + $0x34] sm:$0xf] %vm511_vm2, %v9838_v0  ;;  %v662_v58 = vshrl.u32 %v574_v44, 16  ;;  %v665_v59 = vshll.u32 %v574_v44, 16  ;;  %v650_v3 = vor.u32 %v648_v46, %v647_v55  ;;  %v659_v5 = vor.u32 %v657_v48, %v656_v57 }
  0x4d   : > { %527 = vst.msk [vmem:[#allocation3 + $0x38] sm:$0x1] %vm514_vm3, %v9838_v0  ;;  %530 = vst.msk [vmem:[#allocation3 + $0x44] sm:$0x1] %vm514_vm3, %v9838_v0  ;;  %v949_v61 = vld [vmem:[#allocation2 + $0x30] sm:$0xf] }
  0x4e   : > { %528 = vst.msk [vmem:[#allocation3 + $0x3c] sm:$0xf] %vm511_vm2, %v9838_v0  ;;  %529 = vst.msk [vmem:[#allocation3 + $0x40] sm:$0xf] %vm511_vm2, %v9838_v0  ;;  %v671_v62 = vshrl.u32 %v575_v49, 16  ;;  %v674_v63 = vshll.u32 %v575_v49, 16 }
  0x4f   : > { %531 = vst.msk [vmem:[#allocation3 + $0x48] sm:$0xf] %vm511_vm2, %v9838_v0  ;;  %532 = vst.msk [vmem:[#allocation3 + $0x4c] sm:$0xf] %vm511_vm2, %v9838_v0  ;;  %v679_v2 = vshrl.u32 %v576_v54, 16  ;;  %v652_v4 = vrot.slane %v647_v55, 4 }
  0x50   : > { %533 = vst.msk [vmem:[#allocation3 + $0x50] sm:$0x1] %vm514_vm3, %v9838_v0  ;;  %536 = vst.msk [vmem:[#allocation3 + $0x5c] sm:$0x1] %vm514_vm3, %v9838_v0  ;;  %vm1238_vm12 = vsmask.f32 7424 }
  0x51   : > { %534 = vst.msk [vmem:[#allocation3 + $0x54] sm:$0xf] %vm511_vm2, %v9838_v0  ;;  %535 = vst.msk [vmem:[#allocation3 + $0x58] sm:$0xf] %vm511_vm2, %v9838_v0  ;;  %v660_v6 = vrot.slane %v656_v57, 4  ;;  %v664_v7 = vrot.slane %v662_v58, 7 }
  0x52   : > { %537 = vst.msk [vmem:[#allocation3 + $0x60] sm:$0xf] %vm511_vm2, %v9838_v0  ;;  %538 = vst.msk [vmem:[#allocation3 + $0x64] sm:$0xf] %vm511_vm2, %v9838_v0  ;;  %v953_v8 = vld [vmem:[#allocation2 + $0x38] sm:$0x1] }
  0x53   : > { %539 = vst.msk [vmem:[#allocation3 + $0x68] sm:$0x1] %vm514_vm3, %v9838_v0  ;;  %542 = vst.msk [vmem:[#allocation3 + $0x74] sm:$0x1] %vm514_vm3, %v9838_v0  ;;  %v673_v10 = vrot.slane %v671_v62, 7  ;;  %v681_v11 = vrot.slane %v679_v2, 7  ;;  %v667_v22 = vor.u32 %v665_v59, %v664_v7 }
  0x54   : > { %540 = vst.msk [vmem:[#allocation3 + $0x6c] sm:$0xf] %vm511_vm2, %v9838_v0  ;;  %541 = vst.msk [vmem:[#allocation3 + $0x70] sm:$0xf] %vm511_vm2, %v9838_v0  ;;  %v682_v12 = vshll.u32 %v576_v54, 16  ;;  %v9606_v15 = vld [vmem:[%s12742_s1] sm:$0xff]  }
  0x55   : > { %543 = vst.msk [vmem:[#allocation3 + $0x78] sm:$0xf] %vm511_vm2, %v9838_v0  ;;  %544 = vst.msk [vmem:[#allocation3 + $0x7c] sm:$0xf] %vm511_vm2, %v9838_v0  ;;  %v10240_v13 = vld [vmem:[%s10188_s29 + $0x28] sm:$0xf]  ;;  %9342 = vmatprep.subr.bf16.mxu0 %v9606_v15 }
  0x56   : > { %545 = vst.msk [vmem:[#allocation3 + $0x80] sm:$0x1] %vm514_vm3, %v9838_v0  ;;  %548 = vst.msk [vmem:[#allocation3 + $0x8c] sm:$0x1] %vm514_vm3, %v9838_v0  ;;  %v691_v2 = vshll.u32 %v10240_v13, 16  ;;  %9343 = vmatpush3.bf16.msra.mxu0 %v9606_v15  ;;  %vm1863_vm14 = vcmask 1041408  }
  0x57   : > { %546 = vst.msk [vmem:[#allocation3 + $0x84] sm:$0xf] %vm511_vm2, %v9838_v0  ;;  %547 = vst.msk [vmem:[#allocation3 + $0x88] sm:$0xf] %vm511_vm2, %v9838_v0  ;;  %vm1619_vm15 = vcmask 64512   ;;  %s9841_s21 = smov 12  }
  0x58   : > { %549 = vst.msk [vmem:[#allocation3 + $0x90] sm:$0xf] %vm511_vm2, %v9838_v0  ;;  %550 = vst.msk [vmem:[#allocation3 + $0x94] sm:$0xf] %vm511_vm2, %v9838_v0  ;;  %s9842_s22 = smov 24   ;;  %s9843_s27 = smov 32  }
  0x59   : > { %551 = vst.msk [vmem:[#allocation3 + $0x98] sm:$0x1] %vm514_vm3, %v9838_v0  ;;  %554 = vst.msk [vmem:[#allocation3 + $0xa4] sm:$0x1] %vm514_vm3, %v9838_v0  ;;  %s9844_s28 = smov 64   ;;  %s9845_s24 = smov 96  }
  0x5a   : > { %552 = vst.msk [vmem:[#allocation3 + $0x9c] sm:$0xf] %vm511_vm2, %v9838_v0  ;;  %553 = vst.msk [vmem:[#allocation3 + $0xa0] sm:$0xf] %vm511_vm2, %v9838_v0 }
  0x5b   : > { %555 = vst.msk [vmem:[#allocation3 + $0xa8] sm:$0xf] %vm511_vm2, %v9838_v0  ;;  %556 = vst.msk [vmem:[#allocation3 + $0xac] sm:$0xf] %vm511_vm2, %v9838_v0 }
  0x5c   : > { %557 = vst.msk [vmem:[#allocation3 + $0xb0] sm:$0x1] %vm514_vm3, %v9838_v0  ;;  %560 = vst.msk [vmem:[#allocation3 + $0xbc] sm:$0x1] %vm514_vm3, %v9838_v0 }
  0x5d   : > { %558 = vst.msk [vmem:[#allocation3 + $0xb4] sm:$0xf] %vm511_vm2, %v9838_v0  ;;  %559 = vst.msk [vmem:[#allocation3 + $0xb8] sm:$0xf] %vm511_vm2, %v9838_v0 }
  0x5e   : > { %561 = vst.msk [vmem:[#allocation3 + $0xc0] sm:$0xf] %vm511_vm2, %v9838_v0  ;;  %562 = vst.msk [vmem:[#allocation3 + $0xc4] sm:$0xf] %vm511_vm2, %v9838_v0 }
  0x5f   : > { %563 = vst.msk [vmem:[#allocation3 + $0xc8] sm:$0x1] %vm514_vm3, %v9838_v0  ;;  %566 = vst.msk [vmem:[#allocation3 + $0xd4] sm:$0x1] %vm514_vm3, %v9838_v0  ;;  %vm1830_vm3 = vcmask 293888  }
  0x60   : > { %564 = vst.msk [vmem:[#allocation3 + $0xcc] sm:$0xf] %vm511_vm2, %v9838_v0  ;;  %565 = vst.msk [vmem:[#allocation3 + $0xd0] sm:$0xf] %vm511_vm2, %v9838_v0 }
  0x61   : > { %vm10200_vm8 = vmor %vm599_vm4, %vm600_vm5  ;;  %vm3133_vm5 = vcmask 261120  }
  0x62   : > { %vm10207_vm9 = vmand %vm455_vm0, %vm924_vm6  ;;  %v617_v33 = vsel %vm10200_vm8, %v609_v24, %v616_v25  ;;  %v634_v50 = vsel %vm10200_vm8, %v626_v29, %v633_v39  ;;  %v651_v14 = vsel %vm10200_vm8, %v643_v53, %v650_v3  ;;  %v684_v24 = vor.u32 %v682_v12, %v681_v11 }
  0x63   : > { %vm10213_vm10 = vmand %vm458_vm1, %vm599_vm4  ;;  %v927_v34 = vsel %vm10207_vm9, %v608_v23, %v926_v16  ;;  %929 = vst.msk [vmem:[#allocation2 + $0x10] sm:$0xf] %vm455_vm0, %v617_v33  ;;  %v936_v41 = vsel %vm10207_vm9, %v625_v28, %v935_v27  ;;  %v943_v60 = vsel %vm10207_vm9, %v642_v52, %v942_v43  ;;  %v950_v17 = vsel %vm10207_vm9, %v659_v5, %v949_v61  ;;  %v960_v28 = vld [vmem:[#allocation2 + $0x44] sm:$0x1] }
  0x64   : > { %v933_v35 = vsel %vm10213_vm10, %v618_v26, %v932_v19  ;;  %928 = vst [vmem:[#allocation2 + $0xc] sm:$0xf] %v927_v34  ;;  %937 = vst [vmem:[#allocation2 + $0x18] sm:$0xf] %v936_v41  ;;  %v940_v51 = vsel %vm10213_vm10, %v635_v40, %v939_v36  ;;  %v947_v16 = vsel %vm10213_vm10, %v652_v4, %v946_v56  ;;  %v956_v19 = vld [vmem:[#allocation2 + $0x3c] sm:$0xf] }
  0x65   : > { %934 = vst [vmem:[#allocation2 + $0x14] sm:$0x1] %v933_v35  ;;  %938 = vst.msk [vmem:[#allocation2 + $0x1c] sm:$0xf] %vm455_vm0, %v634_v50  ;;  %v676_v23 = vor.u32 %v674_v63, %v673_v10  ;;  %v669_v25 = vrot.slane %v664_v7, 4  ;;  %v677_v26 = vrot.slane %v673_v10, 4  ;;  %v668_v36 = vsel %vm10200_vm8, %v660_v6, %v667_v22 }
  0x66   : > { %941 = vst [vmem:[#allocation2 + $0x20] sm:$0x1] %v940_v51  ;;  %944 = vst [vmem:[#allocation2 + $0x24] sm:$0xf] %v943_v60  ;;  %v686_v27 = vrot.slane %v681_v11, 4  ;;  %v688_v29 = vshrl.u32 %v10240_v13, 16 }
  0x67   : > { %945 = vst.msk [vmem:[#allocation2 + $0x28] sm:$0xf] %vm455_vm0, %v651_v14  ;;  %948 = vst [vmem:[#allocation2 + $0x2c] sm:$0x1] %v947_v16  ;;  %v954_v37 = vsel %vm10213_vm10, %v669_v25, %v953_v8  ;;  %v685_v38 = vsel %vm10200_vm8, %v677_v26, %v684_v24  ;;  %v957_v42 = vsel %vm10207_vm9, %v676_v23, %v956_v19  ;;  %v578_v63 = vld [vmem:[%s10188_s29 + $0x2c] sm:$0xf] }
  0x68   : > { %951 = vst [vmem:[#allocation2 + $0x30] sm:$0xf] %v950_v17  ;;  %952 = vst.msk [vmem:[#allocation2 + $0x34] sm:$0xf] %vm455_vm0, %v668_v36  ;;  %v961_v43 = vsel %vm10213_vm10, %v686_v27, %v960_v28  ;;  %v10264_v51 = vrot.slane %v688_v29, 7  ;;  %v696_v27 = vshrl.u32 %v578_v63, 16 }
  0x69   : > { %955 = vst [vmem:[#allocation2 + $0x38] sm:$0x1] %v954_v37  ;;  %959 = vst.msk [vmem:[#allocation2 + $0x40] sm:$0xf] %vm455_vm0, %v685_v38  ;;  %v963_v4 = vld [vmem:[#allocation2 + $0x48] sm:$0xf] }
  0x6a   : > { %958 = vst [vmem:[#allocation2 + $0x3c] sm:$0xf] %v957_v42  ;;  %962 = vst [vmem:[#allocation2 + $0x44] sm:$0x1] %v961_v43  ;;  %v694_v3 = vrot.slane %v10264_v51, 4  ;;  %v693_v11 = vor.u32 %v691_v2, %v10264_v51  ;;  %vm1770_vm1 = vcmask 195584  }
  0x6b   : > { %v9570_v20 = vld [vmem:[#allocation2 + $0xc] sm:$0xff]   ;;  %v580_v37 = vld [vmem:[%s10188_s29 + $0x34] sm:$0xf]  ;;  %v581_v42 = vld [vmem:[%s10188_s29 + $0x38] sm:$0xf] }
  0x6c   : > { %v9571_v21 = vld [vmem:[#allocation2 + $0x14] ss:$0 sps:$4 sm:$0x11]   ;;  %v1252_v30 = vshrl.u32 %v9570_v20, 16  ;;  %v1254_v31 = vshll.u32 %v9570_v20, 16  ;;  %v1495_v33 = vrot.slane %v9570_v20, 1  ;;  %v964_v23 = vsel %vm10207_vm9, %v693_v11, %v963_v4  ;;  %vm10732_vm4 = vmand %vm511_vm2, %vm924_vm6 }
  0x6d   : > { %v1259_v32 = vshll.u32 %v9571_v21, 16  ;;  %v1496_v34 = vrot.slane %v9571_v21, 1  ;;  %v9572_v35 = vld [vmem:[#allocation2 + $0x18] sm:$0xff]   ;;  %v9573_v41 = vld [vmem:[#allocation2 + $0x20] ss:$0 sps:$4 sm:$0x11]  }
  0x6e   : > { %v1256_v39 = vrot.slane %v1254_v31, 1  ;;  %v1264_v45 = vshrl.u32 %v9572_v35, 16  ;;  %v1266_v46 = vshll.u32 %v9572_v35, 16  ;;  %v1498_v47 = vrot.slane %v9572_v35, 1  ;;  %v9574_v53 = vld [vmem:[#allocation2 + $0x24] sm:$0xff]  }
  0x6f   : > { %v1261_v40 = vrot.slane %v1259_v32, 1  ;;  %v1497_v44 = vsel %vm1491_vm11, %v1495_v33, %v1496_v34  ;;  %v1271_v49 = vshll.u32 %v9573_v41, 16  ;;  %v1499_v50 = vrot.slane %v9573_v41, 1  ;;  %v9575_v56 = vld [vmem:[#allocation2 + $0x2c] ss:$0 sps:$4 sm:$0x11]  }
  0x70   : > { %v1257_v48 = vor.u32 %v1256_v39, %v1252_v30  ;;  %1548 = vrot.lane.b32.xlu1 %v1497_v44, %s9839_s30  ;;  %v1268_v52 = vrot.slane %v1266_v46, 1  ;;  %v1276_v58 = vshrl.u32 %v9574_v53, 16  ;;  %v1278_v59 = vshll.u32 %v9574_v53, 16  ;;  %v9576_v7 = vld [vmem:[#allocation2 + $0x30] sm:$0xff]   ;;  %965 = vst [vmem:[#allocation2 + $0x48] sm:$0xf] %v964_v23 }
  0x71   : > { %v1273_v55 = vrot.slane %v1271_v49, 1  ;;  %v1501_v60 = vrot.slane %v9574_v53, 1  ;;  %v1283_v61 = vshll.u32 %v9575_v56, 16  ;;  %v1502_v62 = vrot.slane %v9575_v56, 1  ;;  %v9578_v20 = vld [vmem:[#allocation2 + $0x3c] sm:$0xff]  }
  0x72   : > { %v1262_v54 = vsel %vm1238_vm12, %v1257_v48, %v1261_v40  ;;  %v1269_v57 = vor.u32 %v1268_v52, %v1264_v45  ;;  %v1280_v6 = vrot.slane %v1278_v59, 1  ;;  %v9577_v10 = vld [vmem:[#allocation2 + $0x38] ss:$0 sps:$4 sm:$0x11]   ;;  %v1500_v14 = vsel %vm1491_vm11, %v1498_v47, %v1499_v50  ;;  %v579_v32 = vld [vmem:[%s10188_s29 + $0x30] sm:$0xf] }
  0x73   : > { %1457 = vrot.lane.b32.xlu0 %v1262_v54, %s9840_s14  ;;  %v1285_v8 = vrot.slane %v1283_v61, 1  ;;  %v1288_v16 = vshrl.u32 %v9576_v7, 16  ;;  %v1290_v17 = vshll.u32 %v9576_v7, 16  ;;  %v1503_v13 = vsel %vm1491_vm11, %v1501_v60, %v1502_v62  ;;  %v9579_v21 = vld [vmem:[#allocation2 + $0x44] ss:$0 sps:$4 sm:$0x11]  }
  0x74   : > { %v1274_v5 = vsel %vm1238_vm12, %v1269_v57, %v1273_v55  ;;  %v1281_v12 = vor.u32 %v1280_v6, %v1276_v58  ;;  %v1295_v19 = vshll.u32 %v9577_v10, 16  ;;  %v1504_v22 = vrot.slane %v9576_v7, 1  ;;  %v967_v45 = vld [vmem:[#allocation2 + $0x50] sm:$0x1]  ;;  %v970_v52 = vld [vmem:[#allocation2 + $0x54] sm:$0xf] }
  0x75   : > { %v1292_v25 = vrot.slane %v1290_v17, 1  ;;  %v1505_v26 = vrot.slane %v9577_v10, 1  ;;  %v1300_v29 = vshrl.u32 %v9578_v20, 16  ;;  %v1302_v30 = vshll.u32 %v9578_v20, 16  ;;  %v582_v53 = vld [vmem:[%s10188_s29 + $0x3c] sm:$0xf] }
  0x76   : > { %v1286_v24 = vsel %vm1238_vm12, %v1281_v12, %v1285_v8  ;;  %v1297_v28 = vrot.slane %v1295_v19, 1  ;;  %v1307_v31 = vshll.u32 %v9579_v21, 16  ;;  %v1507_v35 = vrot.slane %v9578_v20, 1  ;;  %v583_v58 = vld [vmem:[%s10188_s29 + $0x40] sm:$0xf] }
  0x77   : > { %1459 = vrot.lane.b32.xlu0 %v1274_v5, %s9840_s14  ;;  %1461 = vrot.lane.b32.xlu1 %v1286_v24, %s9840_s14  ;;  %v1293_v33 = vor.u32 %v1292_v25, %v1288_v16  ;;  %v1506_v34 = vsel %vm1491_vm11, %v1504_v22, %v1505_v26  ;;  %v1508_v36 = vrot.slane %v9579_v21, 1  ;;  %v1304_v38 = vrot.slane %v1302_v30, 1  ;;  %v977_v7 = vld [vmem:[#allocation2 + $0x60] sm:$0xf]  ;;  %v981_v19 = vld [vmem:[#allocation2 + $0x68] sm:$0x1] }
  0x78   : > { %v1309_v39 = vrot.slane %v1307_v31, 1  ;;  %v698_v40 = vrot.slane %v696_v27, 7  ;;  %v699_v41 = vshll.u32 %v578_v63, 16  ;;  %v705_v46 = vshrl.u32 %v579_v32, 16  ;;  %v974_v63 = vld [vmem:[#allocation2 + $0x5c] sm:$0x1] }
  0x79   : > { %v1298_v43 = vsel %vm1238_vm12, %v1293_v33, %v1297_v28  ;;  %v1509_v44 = vsel %vm1491_vm11, %v1507_v35, %v1508_v36  ;;  %v708_v47 = vshll.u32 %v579_v32, 16  ;;  %v1305_v48 = vor.u32 %v1304_v38, %v1300_v29  ;;  %v585_v20 = vld [vmem:[%s10188_s29 + $0x48] sm:$0xf]  ;;  %v984_v29 = vld [vmem:[#allocation2 + $0x6c] sm:$0xf] }
  0x7a   : > { %v701_v49 = vor.u32 %v699_v41, %v698_v40  ;;  %v703_v50 = vrot.slane %v698_v40, 4  ;;  %v713_v51 = vshrl.u32 %v580_v37, 16  ;;  %v707_v54 = vrot.slane %v705_v46, 7  ;;  %v586_v33 = vld [vmem:[%s10188_s29 + $0x4c] sm:$0xf] }
  0x7b   : > { %1550 = vrot.lane.b32.xlu0 %v1500_v14, %s9839_s30  ;;  %1552 = vrot.lane.b32.xlu1 %v1503_v13, %s9839_s30  ;;  %v716_v55 = vshll.u32 %v580_v37, 16  ;;  %v722_v56 = vshrl.u32 %v581_v42, 16  ;;  %v725_v57 = vshll.u32 %v581_v42, 16  ;;  %v1310_v59 = vsel %vm1238_vm12, %v1305_v48, %v1309_v39  ;;  %v988_v38 = vld [vmem:[#allocation2 + $0x74] sm:$0x1] }
  0x7c   : > { %v702_v60 = vsel %vm10200_vm8, %v694_v3, %v701_v49  ;;  %v968_v61 = vsel %vm10213_vm10, %v703_v50, %v967_v45  ;;  %v715_v62 = vrot.slane %v713_v51, 7  ;;  %v710_v2 = vor.u32 %v708_v47, %v707_v54  ;;  %v584_v3 = vld [vmem:[%s10188_s29 + $0x44] sm:$0xf]  ;;  %v991_v40 = vld [vmem:[#allocation2 + $0x78] sm:$0xf] }
  0x7d   : > { %966 = vst.msk [vmem:[#allocation2 + $0x4c] sm:$0xf] %vm455_vm0, %v702_v60  ;;  %969 = vst [vmem:[#allocation2 + $0x50] sm:$0x1] %v968_v61  ;;  %v711_v4 = vrot.slane %v707_v54, 4  ;;  %v724_v5 = vrot.slane %v722_v56, 7 }
  0x7e   : > { %v730_v6 = vshrl.u32 %v582_v53, 16  ;;  %v718_v8 = vor.u32 %v716_v55, %v715_v62  ;;  %v720_v10 = vrot.slane %v715_v62, 4  ;;  %v733_v11 = vshll.u32 %v582_v53, 16 }
  0x7f   : > { %1463 = vrot.lane.b32.xlu0 %v1298_v43, %s9840_s14  ;;  %1465 = vrot.lane.b32.xlu1 %v1310_v59, %s9840_s14  ;;  %v739_v12 = vshrl.u32 %v583_v58, 16  ;;  %v971_v14 = vsel %vm10207_vm9, %v710_v2, %v970_v52  ;;  %v727_v16 = vor.u32 %v725_v57, %v724_v5  ;;  %v728_v17 = vrot.slane %v724_v5, 4  ;;  %v587_v5 = vld [vmem:[%s10188_s29 + $0x50] sm:$0xf] }
  0x80   : > { %v732_v13 = vrot.slane %v730_v6, 7  ;;  %v719_v21 = vsel %vm10200_vm8, %v711_v4, %v718_v8  ;;  %972 = vst [vmem:[#allocation2 + $0x54] sm:$0xf] %v971_v14  ;;  %v975_v22 = vsel %vm10213_vm10, %v720_v10, %v974_v63  ;;  %v742_v24 = vshll.u32 %v583_v58, 16 }
  0x81   : > { %v741_v23 = vrot.slane %v739_v12, 7  ;;  %973 = vst.msk [vmem:[#allocation2 + $0x58] sm:$0xf] %vm455_vm0, %v719_v21  ;;  %976 = vst [vmem:[#allocation2 + $0x5c] sm:$0x1] %v975_v22  ;;  %v978_v27 = vsel %vm10207_vm9, %v727_v16, %v977_v7  ;;  %v747_v28 = vshrl.u32 %v584_v3, 16 }
  0x82   : > { %v735_v25 = vor.u32 %v733_v11, %v732_v13  ;;  %v737_v26 = vrot.slane %v732_v13, 4  ;;  %979 = vst [vmem:[#allocation2 + $0x60] sm:$0xf] %v978_v27  ;;  %v750_v32 = vshll.u32 %v584_v3, 16  ;;  %v759_v39 = vshll.u32 %v585_v20, 16 }
  0x83   : > { %1554 = vrot.lane.b32.xlu0 %v1506_v34, %s9839_s30  ;;  %1556 = vrot.lane.b32.xlu1 %v1509_v44, %s9839_s30  ;;  %v744_v30 = vor.u32 %v742_v24, %v741_v23  ;;  %v745_v31 = vrot.slane %v741_v23, 4  ;;  %v756_v34 = vshrl.u32 %v585_v20, 16  ;;  %v749_v37 = vrot.slane %v747_v28, 7  ;;  %v995_v23 = vld [vmem:[#allocation2 + $0x80] sm:$0x1] }
  0x84   : > { %v736_v35 = vsel %vm10200_vm8, %v728_v17, %v735_v25  ;;  %v982_v36 = vsel %vm10213_vm10, %v737_v26, %v981_v19  ;;  %v9580_v41 = vld [vmem:[#allocation2 + $0x48] sm:$0xff]   ;;  %v9581_v44 = vld [vmem:[#allocation2 + $0x50] ss:$0 sps:$4 sm:$0x11]   ;;  %v764_v47 = vshrl.u32 %v586_v33, 16  ;;  %v767_v48 = vshll.u32 %v586_v33, 16 }
  0x85   : > { %980 = vst.msk [vmem:[#allocation2 + $0x64] sm:$0xf] %vm455_vm0, %v736_v35  ;;  %983 = vst [vmem:[#allocation2 + $0x68] sm:$0x1] %v982_v36  ;;  %v985_v42 = vsel %vm10207_vm9, %v744_v30, %v984_v29  ;;  %v10319_v43 = vrot.slane %v756_v34, 7  ;;  %v752_v45 = vor.u32 %v750_v32, %v749_v37  ;;  %v754_v46 = vrot.slane %v749_v37, 4 }
  0x86   : > { %986 = vst [vmem:[#allocation2 + $0x6c] sm:$0xf] %v985_v42  ;;  %v1312_v49 = vshrl.u32 %v9580_v41, 16  ;;  %v1314_v50 = vshll.u32 %v9580_v41, 16  ;;  %v1510_v51 = vrot.slane %v9580_v41, 1  ;;  %v1319_v53 = vshll.u32 %v9581_v44, 16 }
  0x87   : > { %v761_v52 = vor.u32 %v759_v39, %v10319_v43  ;;  %v1511_v54 = vrot.slane %v9581_v44, 1  ;;  %v753_v55 = vsel %vm10200_vm8, %v745_v31, %v752_v45  ;;  %v989_v56 = vsel %vm10213_vm10, %v754_v46, %v988_v38  ;;  %v588_v28 = vld [vmem:[%s10188_s29 + $0x54] sm:$0xf]  ;;  %v10357_v42 = vld [vmem:[#allocation2] sm:$0xff]  }
  0x88   : > { %v1316_v57 = vrot.slane %v1314_v50, 1  ;;  %v10326_v58 = vld [vmem:[#allocation2 + $0x54] sm:$0xff]   ;;  %987 = vst.msk [vmem:[#allocation2 + $0x70] sm:$0xf] %vm455_vm0, %v753_v55  ;;  %990 = vst [vmem:[#allocation2 + $0x74] sm:$0x1] %v989_v56 }
  0x89   : > { %v992_v59 = vsel %vm10207_vm9, %v761_v52, %v991_v40  ;;  %v1321_v60 = vrot.slane %v1319_v53, 1  ;;  %v9583_v61 = vld [vmem:[#allocation2 + $0x5c] ss:$0 sps:$4 sm:$0x11]   ;;  %v1324_v63 = vshrl.u32 %v10326_v58, 16  ;;  %v1326_v2 = vshll.u32 %v10326_v58, 16 }
  0x8a   : > { %993 = vst [vmem:[#allocation2 + $0x78] sm:$0xf] %v992_v59  ;;  %v1317_v62 = vor.u32 %v1316_v57, %v1312_v49  ;;  %v1513_v4 = vrot.slane %v10326_v58, 1  ;;  %v1331_v6 = vshll.u32 %v9583_v61, 16  ;;  %v1514_v7 = vrot.slane %v9583_v61, 1 }
  0x8b   : > { %v1328_v10 = vrot.slane %v1326_v2, 1  ;;  %v1512_v11 = vsel %vm1491_vm11, %v1510_v51, %v1511_v54  ;;  %v762_v16 = vrot.slane %v10319_v43, 4  ;;  %v766_v17 = vrot.slane %v764_v47, 7  ;;  %v10362_v47 = vld [vmem:[#allocation2 + $0x8] ss:$0 sps:$4 sm:$0x11]  }
  0x8c   : > { %v1322_v8 = vsel %vm1238_vm12, %v1317_v62, %v1321_v60  ;;  %v10337_v3 = vld [vmem:[#allocation2 + $0x60] sm:$0xff]   ;;  %v9585_v12 = vld [vmem:[#allocation2 + $0x68] ss:$0 sps:$4 sm:$0x11]   ;;  %v1333_v14 = vrot.slane %v1331_v6, 1  ;;  %v773_v13 = vshrl.u32 %v587_v5, 16  ;;  %v1515_v24 = vsel %vm1491_vm11, %v1513_v4, %v1514_v7 }
  0x8d   : > { %1467 = vrot.lane.b32.xlu0 %v1322_v8, %s9840_s14  ;;  %v1329_v19 = vor.u32 %v1328_v10, %v1324_v63  ;;  %v1516_v20 = vrot.slane %v10337_v3, 1  ;;  %v1517_v21 = vrot.slane %v9585_v12, 1  ;;  %v1336_v22 = vshrl.u32 %v10337_v3, 16  ;;  %v589_v51 = vld [vmem:[%s10188_s29 + $0x58] sm:$0xf] }
  0x8e   : > { %v1338_v26 = vshll.u32 %v10337_v3, 16  ;;  %v769_v27 = vor.u32 %v767_v48, %v766_v17  ;;  %v1343_v32 = vshll.u32 %v9585_v12, 16  ;;  %v771_v33 = vrot.slane %v766_v17, 4  ;;  %v998_v56 = vld [vmem:[#allocation2 + $0x84] sm:$0xf] }
  0x8f   : > { %v10344_v25 = vld [vmem:[#allocation2 + $0x6c] sm:$0xff]   ;;  %v1334_v29 = vsel %vm1238_vm12, %v1329_v19, %v1333_v14  ;;  %v1518_v30 = vsel %vm1491_vm11, %v1516_v20, %v1517_v21  ;;  %v9587_v31 = vld [vmem:[#allocation2 + $0x74] ss:$0 sps:$4 sm:$0x11]   ;;  %v775_v46 = vrot.slane %v773_v13, 7  ;;  %v776_v49 = vshll.u32 %v587_v5, 16 }
  0x90   : > { %1469 = vrot.lane.b32.xlu1 %v1334_v29, %s9840_s14  ;;  %v1519_v34 = vrot.slane %v10344_v25, 1  ;;  %v1340_v35 = vrot.slane %v1338_v26, 1  ;;  %v1348_v36 = vshrl.u32 %v10344_v25, 16  ;;  %v1350_v37 = vshll.u32 %v10344_v25, 16  ;;  %v590_v62 = vld [vmem:[%s10188_s29 + $0x5c] sm:$0xf] }
  0x91   : > { %1558 = vrot.lane.b32.xlu0 %v1512_v11, %s9839_s30  ;;  %v1520_v38 = vrot.slane %v9587_v31, 1  ;;  %v1345_v39 = vrot.slane %v1343_v32, 1  ;;  %v1355_v40 = vshll.u32 %v9587_v31, 16  ;;  %v770_v41 = vsel %vm10200_vm8, %v762_v16, %v769_v27  ;;  %v1002_v63 = vld [vmem:[#allocation2 + $0x8c] sm:$0x1] }
  0x92   : > { %v1341_v43 = vor.u32 %v1340_v35, %v1336_v22  ;;  %v1352_v44 = vrot.slane %v1350_v37, 1  ;;  %994 = vst.msk [vmem:[#allocation2 + $0x7c] sm:$0xf] %vm455_vm0, %v770_v41  ;;  %v996_v45 = vsel %vm10213_vm10, %v771_v33, %v995_v23  ;;  %v781_v50 = vshrl.u32 %v588_v28, 16  ;;  %v1005_v16 = vld [vmem:[#allocation2 + $0x90] sm:$0xf] }
  0x93   : > { %v1521_v48 = vsel %vm1491_vm11, %v1519_v34, %v1520_v38  ;;  %997 = vst [vmem:[#allocation2 + $0x80] sm:$0x1] %v996_v45  ;;  %v1357_v54 = vrot.slane %v1355_v40, 1  ;;  %v784_v55 = vshll.u32 %v588_v28, 16  ;;  %v778_v57 = vor.u32 %v776_v49, %v775_v46  ;;  %v591_v21 = vld [vmem:[%s10188_s29 + $0x60] sm:$0xf] }
  0x94   : > { %1560 = vrot.lane.b32.xlu1 %v1515_v24, %s9839_s30  ;;  %v1346_v52 = vsel %vm1238_vm12, %v1341_v43, %v1345_v39  ;;  %v1353_v53 = vor.u32 %v1352_v44, %v1348_v36  ;;  %v779_v59 = vrot.slane %v775_v46, 4  ;;  %v783_v60 = vrot.slane %v781_v50, 7  ;;  %v592_v31 = vld [vmem:[%s10188_s29 + $0x64] sm:$0xf]  ;;  %v593_v40 = vld [vmem:[%s10188_s29 + $0x68] sm:$0xf] }
  0x95   : > { %1562 = vrot.lane.b32.xlu0 %v1518_v30, %s9839_s30  ;;  %v1242_v61 = vshll.u32 %v10357_v42, 16  ;;  %v1240_v2 = vshrl.u32 %v10357_v42, 16  ;;  %v1247_v4 = vshll.u32 %v10362_v47, 16  ;;  %v790_v5 = vshrl.u32 %v589_v51, 16  ;;  %v1009_v30 = vld [vmem:[#allocation2 + $0x98] sm:$0x1] }
  0x96   : > { %v793_v6 = vshll.u32 %v589_v51, 16  ;;  %v786_v7 = vor.u32 %v784_v55, %v783_v60  ;;  %v788_v8 = vrot.slane %v783_v60, 4  ;;  %v999_v10 = vsel %vm10207_vm9, %v778_v57, %v998_v56 }
  0x97   : > { %v1244_v11 = vrot.slane %v1242_v61, 1  ;;  %1000 = vst [vmem:[#allocation2 + $0x84] sm:$0xf] %v999_v10  ;;  %v792_v12 = vrot.slane %v790_v5, 7  ;;  %v798_v14 = vshrl.u32 %v590_v62, 16  ;;  %v1358_v17 = vsel %vm1238_vm12, %v1353_v53, %v1357_v54 }
  0x98   : > { %1564 = vrot.lane.b32.xlu1 %v1521_v48, %s9839_s30  ;;  %v787_v19 = vsel %vm10200_vm8, %v779_v59, %v786_v7  ;;  %v1003_v20 = vsel %vm10213_vm10, %v788_v8, %v1002_v63  ;;  %v801_v24 = vshll.u32 %v590_v62, 16  ;;  %v1249_v29 = vrot.slane %v1247_v4, 1  ;;  %v1012_v53 = vld [vmem:[#allocation2 + $0x9c] sm:$0xf]  ;;  %v594_v54 = vld [vmem:[%s10188_s29 + $0x6c] sm:$0xf] }
  0x99   : > { %1471 = vrot.lane.b32.xlu0 %v1346_v52, %s9840_s14  ;;  %v10378_v13 = vld [vmem:[#allocation2 + $0x78] sm:$0xff]   ;;  %1001 = vst.msk [vmem:[#allocation2 + $0x88] sm:$0xf] %vm455_vm0, %v787_v19  ;;  %1004 = vst [vmem:[#allocation2 + $0x8c] sm:$0x1] %v1003_v20  ;;  %v795_v23 = vor.u32 %v793_v6, %v792_v12  ;;  %v1245_v28 = vor.u32 %v1244_v11, %v1240_v2  ;;  %v796_v33 = vrot.slane %v792_v12, 4 }
  0x9a   : > { %v9589_v22 = vld [vmem:[#allocation2 + $0x80] ss:$0 sps:$4 sm:$0x11]   ;;  %v1360_v26 = vshrl.u32 %v10378_v13, 16  ;;  %v1362_v27 = vshll.u32 %v10378_v13, 16  ;;  %v800_v34 = vrot.slane %v798_v14, 7 }
  0x9b   : > { %v1367_v32 = vshll.u32 %v9589_v22, 16  ;;  %v1006_v35 = vsel %vm10207_vm9, %v795_v23, %v1005_v16  ;;  %v1522_v37 = vrot.slane %v10378_v13, 1  ;;  %v1523_v38 = vrot.slane %v9589_v22, 1  ;;  %v1016_v61 = vld [vmem:[#allocation2 + $0xa4] sm:$0x1] }
  0x9c   : > { %1473 = vrot.lane.b32.xlu1 %v1358_v17, %s9840_s14  ;;  %v1364_v36 = vrot.slane %v1362_v27, 1  ;;  %1007 = vst [vmem:[#allocation2 + $0x90] sm:$0xf] %v1006_v35  ;;  %v807_v39 = vshrl.u32 %v591_v21, 16  ;;  %v803_v43 = vor.u32 %v801_v24, %v800_v34  ;;  %v805_v44 = vrot.slane %v800_v34, 4 }
  0x9d   : > { %v1369_v41 = vrot.slane %v1367_v32, 1  ;;  %v810_v48 = vshll.u32 %v591_v21, 16  ;;  %v815_v51 = vshrl.u32 %v592_v31, 16  ;;  %v818_v52 = vshll.u32 %v592_v31, 16  ;;  %v595_v11 = vld [vmem:[%s10188_s29 + $0x70] sm:$0xf] }
  0x9e   : > { %v1365_v45 = vor.u32 %v1364_v36, %v1360_v26  ;;  %v809_v46 = vrot.slane %v807_v39, 7  ;;  %v804_v49 = vsel %vm10200_vm8, %v796_v33, %v803_v43  ;;  %v1010_v50 = vsel %vm10213_vm10, %v805_v44, %v1009_v30  ;;  %v1019_v19 = vld [vmem:[#allocation2 + $0xa8] sm:$0xf]  ;;  %v596_v34 = vld [vmem:[%s10188_s29 + $0x74] sm:$0xf] }
  0x9f   : > { %v1250_v57 = vsel %vm1238_vm12, %v1245_v28, %v1249_v29  ;;  %1008 = vst.msk [vmem:[#allocation2 + $0x94] sm:$0xf] %vm455_vm0, %v804_v49  ;;  %1011 = vst [vmem:[#allocation2 + $0x98] sm:$0x1] %v1010_v50  ;;  %v1492_v59 = vrot.slane %v10357_v42, 1  ;;  %v1524_v63 = vsel %vm1491_vm11, %v1522_v37, %v1523_v38  ;;  %v817_v4 = vrot.slane %v815_v51, 7 }
  0xa0   : > { %v1370_v55 = vsel %vm1238_vm12, %v1365_v45, %v1369_v41  ;;  %v10400_v56 = vld [vmem:[#allocation2 + $0x84] sm:$0xff]   ;;  %v812_v60 = vor.u32 %v810_v48, %v809_v46  ;;  %v9591_v62 = vld [vmem:[#allocation2 + $0x8c] ss:$0 sps:$4 sm:$0x11]   ;;  %v813_v2 = vrot.slane %v809_v46, 4  ;;  %v824_v5 = vshrl.u32 %v593_v40, 16 }
  0xa1   : > { %1475 = vrot.lane.b32.xlu0 %v1370_v55, %s9840_s14  ;;  %v1372_v6 = vshrl.u32 %v10400_v56, 16  ;;  %v1374_v7 = vshll.u32 %v10400_v56, 16  ;;  %v827_v10 = vshll.u32 %v593_v40, 16  ;;  %v1379_v12 = vshll.u32 %v9591_v62, 16  ;;  %v1023_v29 = vld [vmem:[#allocation2 + $0xb0] sm:$0x1] }
  0xa2   : > { %v1013_v8 = vsel %vm10207_vm9, %v812_v60, %v1012_v53  ;;  %v1525_v14 = vrot.slane %v10400_v56, 1  ;;  %v820_v16 = vor.u32 %v818_v52, %v817_v4  ;;  %v822_v17 = vrot.slane %v817_v4, 4  ;;  %v597_v37 = vld [vmem:[%s10188_s29 + $0x78] sm:$0xf]  ;;  %v598_v53 = vld [vmem:[%s10188_s29 + $0x7c] sm:$0xf] }
  0xa3   : > { %1014 = vst [vmem:[#allocation2 + $0x9c] sm:$0xf] %v1013_v8  ;;  %v1376_v20 = vrot.slane %v1374_v7, 1  ;;  %v826_v21 = vrot.slane %v824_v5, 7  ;;  %v832_v22 = vshrl.u32 %v594_v54, 16  ;;  %v835_v23 = vshll.u32 %v594_v54, 16 }
  0xa4   : > { %v1381_v24 = vrot.slane %v1379_v12, 1  ;;  %v1526_v26 = vrot.slane %v9591_v62, 1  ;;  %v821_v27 = vsel %vm10200_vm8, %v813_v2, %v820_v16  ;;  %v1017_v28 = vsel %vm10213_vm10, %v822_v17, %v1016_v61  ;;  %v1026_v61 = vld [vmem:[#allocation2 + $0xb4] sm:$0xf] }
  0xa5   : > { %1566 = vrot.lane.b32.xlu0 %v1524_v63, %s9839_s30  ;;  %v1377_v30 = vor.u32 %v1376_v20, %v1372_v6  ;;  %1015 = vst.msk [vmem:[#allocation2 + $0xa0] sm:$0xf] %vm455_vm0, %v821_v27  ;;  %1018 = vst [vmem:[#allocation2 + $0xa4] sm:$0x1] %v1017_v28  ;;  %v829_v31 = vor.u32 %v827_v10, %v826_v21  ;;  %v830_v32 = vrot.slane %v826_v21, 4  ;;  %v834_v33 = vrot.slane %v832_v22, 7 }
  0xa6   : > { %v10420_v35 = vld [vmem:[#allocation2 + $0x90] sm:$0xff]   ;;  %v841_v36 = vshrl.u32 %v595_v11, 16  ;;  %v10424_v39 = vld [vmem:[#allocation2 + $0x98] ss:$0 sps:$4 sm:$0x11]   ;;  %v1493_v46 = vrot.slane %v10362_v47, 1  ;;  %v1527_v49 = vsel %vm1491_vm11, %v1525_v14, %v1526_v26 }
  0xa7   : > { %v1382_v38 = vsel %vm1238_vm12, %v1377_v30, %v1381_v24  ;;  %v837_v40 = vor.u32 %v835_v23, %v834_v33  ;;  %v839_v41 = vrot.slane %v834_v33, 4  ;;  %v1020_v43 = vsel %vm10207_vm9, %v829_v31, %v1019_v19  ;;  %v1030_v6 = vld [vmem:[#allocation2 + $0xbc] sm:$0x1]  ;;  %v1033_v23 = vld [vmem:[#allocation2 + $0xc0] sm:$0xf] }
  0xa8   : > { %1477 = vrot.lane.b32.xlu1 %v1382_v38, %s9840_s14  ;;  %v1384_v44 = vshrl.u32 %v10420_v35, 16  ;;  %v1386_v45 = vshll.u32 %v10420_v35, 16  ;;  %1021 = vst [vmem:[#allocation2 + $0xa8] sm:$0xf] %v1020_v43  ;;  %v843_v48 = vrot.slane %v841_v36, 7  ;;  %v1391_v50 = vshll.u32 %v10424_v39, 16 }
  0xa9   : > { %1455 = vrot.lane.b32.xlu0 %v1250_v57, %s9840_s14  ;;  %v838_v51 = vsel %vm10200_vm8, %v830_v32, %v837_v40  ;;  %v1024_v52 = vsel %vm10213_vm10, %v839_v41, %v1023_v29  ;;  %v844_v55 = vshll.u32 %v595_v11, 16  ;;  %v849_v57 = vshrl.u32 %v596_v34, 16  ;;  %v1037_v38 = vld [vmem:[#allocation2 + $0xc8] sm:$0x1] }
  0xaa   : > { %v1388_v54 = vrot.slane %v1386_v45, 1  ;;  %1022 = vst.msk [vmem:[#allocation2 + $0xac] sm:$0xf] %vm455_vm0, %v838_v51  ;;  %1025 = vst [vmem:[#allocation2 + $0xb0] sm:$0x1] %v1024_v52  ;;  %v1393_v47 = vrot.slane %v1391_v50, 1  ;;  %v1494_v7 = vsel %vm1491_vm11, %v1492_v59, %v1493_v46 }
  0xab   : > { %v852_v60 = vshll.u32 %v596_v34, 16  ;;  %v858_v62 = vshrl.u32 %v597_v37, 16  ;;  %v846_v4 = vor.u32 %v844_v55, %v843_v48  ;;  %v851_v5 = vrot.slane %v849_v57, 7  ;;  %v9608_v45 = vld [vmem:[%s12742_s1 + $0x10] ss:$0 sps:$4 sm:$0x33]  }
  0xac   : > { %1568 = vrot.lane.b32.xlu1 %v1527_v49, %s9839_s30  ;;  %v1389_v63 = vor.u32 %v1388_v54, %v1384_v44  ;;  %v10442_v2 = vld [vmem:[#allocation2 + $0x9c] sm:$0xff]   ;;  %v10447_v8 = vld [vmem:[#allocation2 + $0xa4] ss:$0 sps:$4 sm:$0x11]   ;;  %v847_v10 = vrot.slane %v843_v48, 4  ;;  %v861_v12 = vshll.u32 %v597_v37, 16 }
  0xad   : > { %v860_v11 = vrot.slane %v858_v62, 7  ;;  %v1396_v16 = vshrl.u32 %v10442_v2, 16  ;;  %v1398_v17 = vshll.u32 %v10442_v2, 16  ;;  %v866_v19 = vshrl.u32 %v598_v53, 16  ;;  %v9607_v44 = vld [vmem:[%s12742_s1 + $0x8] sm:$0xff]   ;;  %v9780_v55 = vld [vmem:[#allocation2 + $0x18] sm:$0xff]  }
  0xae   : > { %v1394_v14 = vsel %vm1238_vm12, %v1389_v63, %v1393_v47  ;;  %v1403_v20 = vshll.u32 %v10447_v8, 16  ;;  %v854_v21 = vor.u32 %v852_v60, %v851_v5  ;;  %v856_v22 = vrot.slane %v851_v5, 4  ;;  %9344 = vmatprep.subr.bf16.mxu0 %v9607_v44  ;;  %v9779_v49 = vld [vmem:[#allocation2 + $0xc] sm:$0xff]   ;;  %v9781_v62 = vld [vmem:[#allocation2 + $0x24] sm:$0xff]  }
  0xaf   : > { %1479 = vrot.lane.b32.xlu0 %v1394_v14, %s9840_s14  ;;  %v1400_v59 = vrot.slane %v1398_v17, 1  ;;  %v1027_v24 = vsel %vm10207_vm9, %v846_v4, %v1026_v61  ;;  %v863_v26 = vor.u32 %v861_v12, %v860_v11  ;;  %v864_v30 = vrot.slane %v860_v11, 4  ;;  %9345 = vmatpush3.bf16.msra.mxu0 %v9607_v44  ;;  %v9782_v11 = vld [vmem:[#allocation2 + $0x30] sm:$0xff]   ;;  %v9784_v44 = vld [vmem:[#allocation2 + $0x48] sm:$0xff]  }
  0xb0   : > { %1546 = vrot.lane.b32.xlu1 %v1494_v7, %s9839_s30  ;;  %v1405_v27 = vrot.slane %v1403_v20, 1  ;;  %v855_v28 = vsel %vm10200_vm8, %v847_v10, %v854_v21  ;;  %1028 = vst [vmem:[#allocation2 + $0xb4] sm:$0xf] %v1027_v24  ;;  %v1031_v29 = vsel %vm10213_vm10, %v856_v22, %v1030_v6  ;;  %v868_v32 = vrot.slane %v866_v19, 7  ;;  %9488 = vmatprep.subr.msk.bf16.mxu0 %vm1863_vm14, %v9608_v45  ;;  %v9783_v24 = vld [vmem:[#allocation2 + $0x3c] sm:$0xff]  }
  0xb1   : > { %v1401_v31 = vor.u32 %v1400_v59, %v1396_v16  ;;  %1029 = vst.msk [vmem:[#allocation2 + $0xb8] sm:$0xf] %vm455_vm0, %v855_v28  ;;  %1032 = vst [vmem:[#allocation2 + $0xbc] sm:$0x1] %v1031_v29  ;;  %v869_v33 = vshll.u32 %v598_v53, 16  ;;  %v1034_v34 = vsel %vm10207_vm9, %v863_v26, %v1033_v23  ;;  %v1865_v46 = vsel %vm1863_vm14, %v9608_v45, 0 }
  0xb2   : > { %1035 = vst [vmem:[#allocation2 + $0xc0] sm:$0xf] %v1034_v34  ;;  %v873_v40 = vrot.slane %v868_v32, 4  ;;  %v10486_v53 = vld [vmem:[#allocation2 + $0xa8] sm:$0xff]   ;;  %v1528_v14 = vrot.slane %v10420_v35, 1  ;;  %v1529_v16 = vrot.slane %v10424_v39, 1 }
  0xb3   : > { %v1406_v36 = vsel %vm1238_vm12, %v1401_v31, %v1405_v27  ;;  %v871_v37 = vor.u32 %v869_v33, %v868_v32  ;;  %9347 = vmatpush3.bf16.msra.mxu0 %v1865_v46  ;;  %v10489_v60 = vld [vmem:[#allocation2 + $0xb0] ss:$0 sps:$4 sm:$0x11]   ;;  %v1410_v4 = vshll.u32 %v10486_v53, 16  ;;  %v1408_v20 = vshrl.u32 %v10486_v53, 16 }
  0xb4   : > { %1481 = vrot.lane.b32.xlu1 %v1406_v36, %s9840_s14  ;;  %v1038_v43 = vsel %vm10213_vm10, %v873_v40, %v1037_v38  ;;  %v1415_v17 = vshll.u32 %v10489_v60, 16  ;;  %v1530_v39 = vsel %vm1491_vm11, %v1528_v14, %v1529_v16  ;;  %v1531_v28 = vrot.slane %v10442_v2, 1 }
  0xb5   : > { %v872_v41 = vsel %vm10200_vm8, %v864_v30, %v871_v37  ;;  %1039 = vst [vmem:[#allocation2 + $0xc8] sm:$0x1] %v1038_v43  ;;  %v1412_v21 = vrot.slane %v1410_v4, 1  ;;  %v1532_v29 = vrot.slane %v10447_v8, 1  ;;  %v1535_v46 = vrot.slane %v10489_v60, 1 }
  0xb6   : > { %1036 = vst.msk [vmem:[#allocation2 + $0xc4] sm:$0xf] %vm455_vm0, %v872_v41  ;;  %v1417_v30 = vrot.slane %v1415_v17, 1  ;;  %vm1737_vm0 = vcmask 97280   ;;  %vm3170_vm6 = vcmask 523264   ;;  %vm3288_vm9 = vcmask 785408  }
  0xb7   : > { %v1413_v32 = vor.u32 %v1412_v21, %v1408_v20  ;;  %v1533_v38 = vsel %vm1491_vm11, %v1531_v28, %v1532_v29 }
  0xb8   : > { %v10500_v5 = vld [vmem:[#allocation2 + $0xb4] sm:$0xff]   ;;  %v9601_v22 = vld [vmem:[#allocation2 + $0xbc] ss:$0 sps:$4 sm:$0x11]  }
  0xb9   : > { %v1422_v23 = vshll.u32 %v10500_v5, 16  ;;  %v1420_v33 = vshrl.u32 %v10500_v5, 16  ;;  %v1427_v36 = vshll.u32 %v9601_v22, 16  ;;  %v1418_v40 = vsel %vm1238_vm12, %v1413_v32, %v1417_v30 }
  0xba   : > { %v1538_v60 = vrot.slane %v9601_v22, 1 }
  0xbb   : > { %v1424_v34 = vrot.slane %v1422_v23, 1  ;;  %v1429_v41 = vrot.slane %v1427_v36, 1 }
  0xbd   : > { %v1425_v8 = vor.u32 %v1424_v34, %v1420_v33 }
  0xbf   : > { %v1430_v43 = vsel %vm1238_vm12, %v1425_v8, %v1429_v41 }
  0xe2   : > { %v1549_v18 = vpop.permute.xlu1 %1548 }
  0xe5   : > { %v1458_v48 = vpop.permute.xlu0 %1457 }
  0xe6   : > { %v1586_v50 = vsel %vm1582_vm13, %v9779_v49, %v1458_v48  ;;  %v10544_v48 = vld [vmem:[#allocation2 + $0xc0] sm:$0xff]  }
  0xe7   : > { %v10482_v51 = vsel %vm1619_vm15, %v1586_v50, %v1549_v18  ;;  %v1534_v18 = vrot.slane %v10486_v53, 1  ;;  %v1432_v14 = vshrl.u32 %v10544_v48, 16  ;;  %v1540_v33 = vrot.slane %v10544_v48, 1 }
  0xe8   : > { %1672 = vrot.lane.b32.xlu0 %v10482_v51, %s9841_s21 }
  0xe9   : > { %v1460_v52 = vpop.permute.xlu0 %1459  ;;  %v1462_v54 = vpop.permute.xlu1 %1461 }
  0xea   : > { %v1588_v57 = vsel %vm1582_vm13, %v9780_v55, %v1460_v52  ;;  %v1590_v63 = vsel %vm1582_vm13, %v9781_v62, %v1462_v54  ;;  %v10555_v55 = vld [vmem:[#allocation2 + $0xcc] sm:$0xff]   ;;  %v9603_v62 = vld [vmem:[#allocation2 + $0xc8] ss:$0 sps:$4 sm:$0x11]  }
  0xeb   : > { %v1439_v17 = vshll.u32 %v9603_v62, 16  ;;  %v1444_v22 = vshrl.u32 %v10555_v55, 16  ;;  %v1541_v34 = vrot.slane %v9603_v62, 1 }
  0xed   : > { %v1551_v47 = vpop.permute.xlu0 %1550  ;;  %v1553_v6 = vpop.permute.xlu1 %1552 }
  0xee   : > { %v10492_v61 = vsel %vm1619_vm15, %v1588_v57, %v1551_v47  ;;  %v10503_v10 = vsel %vm1619_vm15, %v1590_v63, %v1553_v6  ;;  %v1536_v57 = vsel %vm1491_vm11, %v1534_v18, %v1535_v46  ;;  %v1537_v47 = vrot.slane %v10500_v5, 1 }
  0xef   : > { %1674 = vrot.lane.b32.xlu1 %v10492_v61, %s9841_s21  ;;  %1705 = vrot.lane.b32.xlu0 %v10492_v61, %s9842_s22  ;;  %v1434_v63 = vshll.u32 %v10544_v48, 16 }
  0xf1   : > { %v1464_v7 = vpop.permute.xlu0 %1463  ;;  %v1466_v19 = vpop.permute.xlu1 %1465  ;;  %v1436_v16 = vrot.slane %v1434_v63, 1 }
  0xf2   : > { %v1592_v12 = vsel %vm1582_vm13, %v9782_v11, %v1464_v7  ;;  %v1594_v26 = vsel %vm1582_vm13, %v9783_v24, %v1466_v19  ;;  %v9605_v7 = vld [vmem:[#allocation2 + $0xd4] ss:$0 sps:$4 sm:$0x11]   ;;  %v1446_v11 = vshll.u32 %v10555_v55, 16 }
  0xf3   : > { %1707 = vrot.lane.b32.xlu1 %v10503_v10, %s9842_s22  ;;  %1676 = vrot.lane.b32.xlu0 %v10503_v10, %s9841_s21  ;;  %v1544_v8 = vrot.slane %v9605_v7, 1 }
  0xf4   : > { %v1448_v23 = vrot.slane %v1446_v11, 1 }
  0xf5   : > { %v1555_v59 = vpop.permute.xlu0 %1554  ;;  %v1557_v31 = vpop.permute.xlu1 %1556 }
  0xf6   : > { %v10517_v27 = vsel %vm1619_vm15, %v1592_v12, %v1555_v59  ;;  %v10528_v37 = vsel %vm1619_vm15, %v1594_v26, %v1557_v31  ;;  %v1539_v12 = vsel %vm1491_vm11, %v1537_v47, %v1538_v60  ;;  %v1451_v59 = vshll.u32 %v9605_v7, 16 }
  0xf7   : > { %1678 = vrot.lane.b32.xlu1 %v10517_v27, %s9841_s21  ;;  %1709 = vrot.lane.b32.xlu0 %v10517_v27, %s9842_s22  ;;  %v1437_v26 = vor.u32 %v1436_v16, %v1432_v14 }
  0xf8   : > { %v1453_v30 = vrot.slane %v1451_v59, 1 }
  0xfb   : > { %1711 = vrot.lane.b32.xlu1 %v10528_v37, %s9842_s22  ;;  %1570 = vrot.lane.b32.xlu0 %v1530_v39, %s9839_s30  ;;  %v1441_v39 = vrot.slane %v1439_v17, 1 }
  0xfd   : > { %v1442_v32 = vsel %vm1238_vm12, %v1437_v26, %v1441_v39 }
  0xff   : > { %1572 = vrot.lane.b32.xlu1 %v1533_v38, %s9839_s30  ;;  %1483 = vrot.lane.b32.xlu0 %v1418_v40, %s9840_s14  ;;  %v1468_v15 = vpop.permute.xlu0 %1467  ;;  %v1542_v38 = vsel %vm1491_vm11, %v1540_v33, %v1541_v34  ;;  %v1543_v40 = vrot.slane %v10555_v55, 1 }
 0x100   : > { %v1596_v45 = vsel %vm1582_vm13, %v9784_v44, %v1468_v15 }
 0x101   : > { %v1545_v41 = vsel %vm1491_vm11, %v1543_v40, %v1544_v8 }
 0x102   : > { %v1470_v49 = vpop.permute.xlu1 %1469 }
 0x103   : > { %1485 = vrot.lane.b32.xlu1 %v1430_v43, %s9840_s14  ;;  %1680 = vrot.lane.b32.xlu0 %v10528_v37, %s9841_s21  ;;  %v1559_v50 = vpop.permute.xlu0 %1558  ;;  %v1598_v54 = vsel %vm1582_vm13, %v10326_v58, %v1470_v49 }
 0x104   : > { %v10547_v52 = vsel %vm1619_vm15, %v1596_v45, %v1559_v50 }
 0x106   : > { %v1561_v4 = vpop.permute.xlu1 %1560 }
 0x107   : > { %1682 = vrot.lane.b32.xlu1 %v10547_v52, %s9841_s21  ;;  %1713 = vrot.lane.b32.xlu0 %v10547_v52, %s9842_s22  ;;  %v1563_v6 = vpop.permute.xlu0 %1562  ;;  %v10561_v58 = vsel %vm1619_vm15, %v1598_v54, %v1561_v4 }
 0x10a   : > { %v1565_v19 = vpop.permute.xlu1 %1564 }
 0x10b   : > { %1715 = vrot.lane.b32.xlu1 %v10561_v58, %s9842_s22  ;;  %1574 = vrot.lane.b32.xlu0 %v1536_v57, %s9839_s30  ;;  %v1472_v20 = vpop.permute.xlu0 %1471 }
 0x10c   : > { %v1600_v21 = vsel %vm1582_vm13, %v10337_v3, %v1472_v20  ;;  %v1449_v3 = vor.u32 %v1448_v23, %v1444_v22 }
 0x10d   : > { %v10576_v24 = vsel %vm1619_vm15, %v1600_v21, %v1563_v6 }
 0x10e   : > { %v1474_v28 = vpop.permute.xlu1 %1473  ;;  %v1454_v36 = vsel %vm1238_vm12, %v1449_v3, %v1453_v30 }
 0x10f   : > { %1576 = vrot.lane.b32.xlu1 %v1539_v12, %s9839_s30  ;;  %1684 = vrot.lane.b32.xlu0 %v10561_v58, %s9841_s21  ;;  %v1602_v29 = vsel %vm1582_vm13, %v10344_v25, %v1474_v28 }
 0x110   : > { %v10585_v31 = vsel %vm1619_vm15, %v1602_v29, %v1565_v19 }
 0x113   : > { %1686 = vrot.lane.b32.xlu1 %v10576_v24, %s9841_s21  ;;  %1717 = vrot.lane.b32.xlu0 %v10576_v24, %s9842_s22  ;;  %v1476_v25 = vpop.permute.xlu0 %1475 }
 0x114   : > { %v1604_v43 = vsel %vm1582_vm13, %v10378_v13, %v1476_v25 }
 0x117   : > { %1719 = vrot.lane.b32.xlu1 %v10585_v31, %s9842_s22  ;;  %1487 = vrot.lane.b32.xlu0 %v1442_v32, %s9840_s14  ;;  %v1567_v15 = vpop.permute.xlu0 %1566 }
 0x118   : > { %v10604_v45 = vsel %vm1619_vm15, %v1604_v43, %v1567_v15 }
 0x11a   : > { %v1478_v44 = vpop.permute.xlu1 %1477 }
 0x11b   : > { %1489 = vrot.lane.b32.xlu1 %v1454_v36, %s9840_s14  ;;  %1578 = vrot.lane.b32.xlu0 %v1542_v38, %s9839_s30  ;;  %v1606_v18 = vsel %vm1582_vm13, %v10400_v56, %v1478_v44  ;;  %v1456_v49 = vpop.permute.xlu0 %1455 }
 0x11c   : > { %v1584_v56 = vsel %vm1582_vm13, %v10357_v42, %v1456_v49 }
 0x11e   : > { %v1569_v13 = vpop.permute.xlu1 %1568 }
 0x11f   : > { %1580 = vrot.lane.b32.xlu1 %v1545_v41, %s9839_s30  ;;  %1688 = vrot.lane.b32.xlu0 %v10585_v31, %s9841_s21  ;;  %v10613_v46 = vsel %vm1619_vm15, %v1606_v18, %v1569_v13 }
 0x121   : > { %v1480_v54 = vpop.permute.xlu0 %1479 }
 0x122   : > { %v1547_v50 = vpop.permute.xlu1 %1546  ;;  %v1608_v20 = vsel %vm1582_vm13, %v10420_v35, %v1480_v54 }
 0x123   : > { %1690 = vrot.lane.b32.xlu1 %v10604_v45, %s9841_s21  ;;  %1721 = vrot.lane.b32.xlu0 %v10604_v45, %s9842_s22  ;;  %v1621_v60 = vsel %vm1619_vm15, %v1584_v56, %v1547_v50 }
 0x126   : > { %v1482_v57 = vpop.permute.xlu1 %1481 }
 0x127   : > { %1723 = vrot.lane.b32.xlu1 %v10613_v46, %s9842_s22  ;;  %1692 = vrot.lane.b32.xlu0 %v10613_v46, %s9841_s21  ;;  %v1610_v35 = vsel %vm1582_vm13, %v10442_v2, %v1482_v57 }
 0x15a   : > { %v1673_v47 = vpop.permute.xlu0 %1672 }
 0x15b   : > { %v1739_v62 = vsel %vm1737_vm0, %v1621_v60, %v1673_v47 }
 0x161   : > { %v1675_v63 = vpop.permute.xlu1 %1674  ;;  %v1706_v4 = vpop.permute.xlu0 %1705 }
 0x162   : > { %v1772_v6 = vsel %vm1770_vm1, %v1739_v62, %v1706_v4  ;;  %v1741_v7 = vsel %vm1737_vm0, %v10482_v51, %v1675_v63 }
 0x163   : > { %9348 = vmatprep.mubr.msk.bf16.mxu0 %vm1830_vm3, %v1772_v6 }
 0x165   : > { %v1708_v11 = vpop.permute.xlu1 %1707  ;;  %v1677_v42 = vpop.permute.xlu0 %1676 }
 0x166   : > { %v1774_v12 = vsel %vm1770_vm1, %v1741_v7, %v1708_v11  ;;  %v1743_v14 = vsel %vm1737_vm0, %v10492_v61, %v1677_v42 }
 0x167   : > { %9349 = vmatmul.mubr.msk.bf16.vlgmr.msra.gmra.mrb[0].mxu0 %vm1830_vm3, %v1774_v12 }
 0x169   : > { %v1679_v16 = vpop.permute.xlu1 %1678  ;;  %v1710_v17 = vpop.permute.xlu0 %1709 }
 0x16a   : > { %v1776_v19 = vsel %vm1770_vm1, %v1743_v14, %v1710_v17  ;;  %v1745_v51 = vsel %vm1737_vm0, %v10503_v10, %v1679_v16 }
 0x16b   : > { %9352 = vmatprep.mubr.msk.bf16.mxu0 %vm1830_vm3, %v1776_v19 }
 0x16d   : > { %v1712_v21 = vpop.permute.xlu1 %1711  ;;  %v1571_v22 = vpop.permute.xlu0 %1570 }
 0x16e   : > { %v1778_v23 = vsel %vm1770_vm1, %v1745_v51, %v1712_v21  ;;  %v10639_v59 = vsel %vm1619_vm15, %v1608_v20, %v1571_v22 }
 0x16f   : > { %9353 = vmatmul.mubr.msk.bf16.gmra.mrb[4].mxu0 %vm1830_vm3, %v1778_v23  ;;  %1725 = vrot.lane.b32.xlu0 %v10639_v59, %s9842_s22 }
 0x170   : > { %1694 = vrot.lane.b32.xlu1 %v10639_v59, %s9841_s21 }
 0x171   : > { %v1573_v61 = vpop.permute.xlu1 %1572  ;;  %v1484_v10 = vpop.permute.xlu0 %1483 }
 0x172   : > { %v10649_v26 = vsel %vm1619_vm15, %v1610_v35, %v1573_v61  ;;  %v1612_v32 = vsel %vm1582_vm13, %v10486_v53, %v1484_v10 }
 0x173   : > { %1696 = vrot.lane.b32.xlu0 %v10649_v26, %s9841_s21 }
 0x174   : > { %1727 = vrot.lane.b32.xlu1 %v10649_v26, %s9842_s22 }
 0x175   : > { %v1486_v39 = vpop.permute.xlu1 %1485  ;;  %v1681_v28 = vpop.permute.xlu0 %1680 }
 0x176   : > { %v1747_v29 = vsel %vm1737_vm0, %v10517_v27, %v1681_v28  ;;  %v1614_v27 = vsel %vm1582_vm13, %v10500_v5, %v1486_v39 }
 0x179   : > { %v1683_v3 = vpop.permute.xlu1 %1682  ;;  %v1714_v30 = vpop.permute.xlu0 %1713 }
 0x17a   : > { %v1780_v2 = vsel %vm1770_vm1, %v1747_v29, %v1714_v30  ;;  %v1749_v33 = vsel %vm1737_vm0, %v10528_v37, %v1683_v3 }
 0x17b   : > { %9356 = vmatprep.mubr.msk.bf16.mxu0 %vm1830_vm3, %v1780_v2 }
 0x17d   : > { %v1716_v34 = vpop.permute.xlu1 %1715  ;;  %v1575_v25 = vpop.permute.xlu0 %1574 }
 0x17e   : > { %v1782_v36 = vsel %vm1770_vm1, %v1749_v33, %v1716_v34  ;;  %v1649_v38 = vsel %vm1619_vm15, %v1612_v32, %v1575_v25 }
 0x17f   : > { %9357 = vmatmul.mubr.msk.bf16.gmra.mrb[8].mxu0 %vm1830_vm3, %v1782_v36  ;;  %1729 = vrot.lane.b32.xlu0 %v1649_v38, %s9842_s22 }
 0x180   : > { %1698 = vrot.lane.b32.xlu1 %v1649_v38, %s9841_s21 }
 0x181   : > { %v1577_v40 = vpop.permute.xlu1 %1576  ;;  %v1685_v53 = vpop.permute.xlu0 %1684 }
 0x182   : > { %v1651_v8 = vsel %vm1619_vm15, %v1614_v27, %v1577_v40  ;;  %v1751_v37 = vsel %vm1737_vm0, %v10547_v52, %v1685_v53 }
 0x183   : > { %1700 = vrot.lane.b32.xlu0 %v1651_v8, %s9841_s21 }
 0x184   : > { %1731 = vrot.lane.b32.xlu1 %v1651_v8, %s9842_s22 }
 0x185   : > { %v1687_v41 = vpop.permute.xlu1 %1686  ;;  %v1718_v43 = vpop.permute.xlu0 %1717 }
 0x186   : > { %v1784_v15 = vsel %vm1770_vm1, %v1751_v37, %v1718_v43  ;;  %v1753_v5 = vsel %vm1737_vm0, %v10561_v58, %v1687_v41 }
 0x187   : > { %9360 = vmatprep.mubr.msk.bf16.mxu0 %vm1830_vm3, %v1784_v15 }
 0x189   : > { %v1720_v44 = vpop.permute.xlu1 %1719  ;;  %v1488_v18 = vpop.permute.xlu0 %1487 }
 0x18a   : > { %v1786_v13 = vsel %vm1770_vm1, %v1753_v5, %v1720_v44  ;;  %v1616_v49 = vsel %vm1582_vm13, %v10544_v48, %v1488_v18 }
 0x18b   : > { %9361 = vmatmul.mubr.msk.bf16.gmra.mrb[12].mxu0 %vm1830_vm3, %v1786_v13 }
 0x18d   : > { %v1490_v50 = vpop.permute.xlu1 %1489  ;;  %v1579_v52 = vpop.permute.xlu0 %1578 }
 0x18e   : > { %v1653_v54 = vsel %vm1619_vm15, %v1616_v49, %v1579_v52  ;;  %v1618_v56 = vsel %vm1582_vm13, %v10555_v55, %v1490_v50 }
 0x18f   : > { %1733 = vrot.lane.b32.xlu0 %v1653_v54, %s9842_s22  ;;  %1702 = vrot.lane.b32.xlu1 %v1653_v54, %s9841_s21 }
 0x191   : > { %v1581_v58 = vpop.permute.xlu1 %1580  ;;  %v1689_v57 = vpop.permute.xlu0 %1688 }
 0x192   : > { %v1655_v47 = vsel %vm1619_vm15, %v1618_v56, %v1581_v58  ;;  %v1755_v48 = vsel %vm1737_vm0, %v10576_v24, %v1689_v57  ;;  %v2488_v57 = vld [vmem:[#allocation3 + $0x18] sm:$0xf] }
 0x193   : > { %1735 = vrot.lane.b32.xlu1 %v1655_v47, %s9842_s22 }
 0x195   : > { %v1691_v60 = vpop.permute.xlu1 %1690  ;;  %v1722_v62 = vpop.permute.xlu0 %1721 }
 0x196   : > { %v1788_v63 = vsel %vm1770_vm1, %v1755_v48, %v1722_v62  ;;  %v1757_v55 = vsel %vm1737_vm0, %v10585_v31, %v1691_v60 }
 0x197   : > { %9364 = vmatprep.mubr.msk.bf16.mxu0 %vm1830_vm3, %v1788_v63 }
 0x199   : > { %v1724_v4 = vpop.permute.xlu1 %1723  ;;  %v1693_v7 = vpop.permute.xlu0 %1692 }
 0x19a   : > { %v1790_v6 = vsel %vm1770_vm1, %v1757_v55, %v1724_v4  ;;  %v1759_v11 = vsel %vm1737_vm0, %v10604_v45, %v1693_v7 }
 0x19b   : > { %9365 = vmatmul.mubr.msk.bf16.gmra.mrb[16].mxu0 %vm1830_vm3, %v1790_v6  ;;  %v2479_v6 = vld [vmem:[#allocation3 + $0xc] sm:$0xf] }
 0x1e1   : > { %v1726_v42 = vpop.permute.xlu0 %1725 }
 0x1e2   : > { %v1695_v24 = vpop.permute.xlu1 %1694  ;;  %v1792_v12 = vsel %vm1770_vm1, %v1759_v11, %v1726_v42 }
 0x1e3   : > { %9368 = vmatprep.mubr.msk.bf16.mxu0 %vm1830_vm3, %v1792_v12  ;;  %v1761_v14 = vsel %vm1737_vm0, %v10613_v46, %v1695_v24 }
 0x1e5   : > { %v1697_v17 = vpop.permute.xlu0 %1696 }
 0x1e6   : > { %v1728_v16 = vpop.permute.xlu1 %1727  ;;  %v1763_v19 = vsel %vm1737_vm0, %v10639_v59, %v1697_v17 }
 0x1e7   : > { %v1794_v31 = vsel %vm1770_vm1, %v1761_v14, %v1728_v16  ;;  %v2492_v14 = vld [vmem:[#allocation3 + $0x20] sm:$0x1] }
 0x1e8   : > { %9369 = vmatmul.mubr.msk.bf16.gmra.mrb[20].mxu0 %vm1830_vm3, %v1794_v31 }
 0x1f1   : > { %v1730_v20 = vpop.permute.xlu0 %1729 }
 0x1f2   : > { %v1699_v45 = vpop.permute.xlu1 %1698  ;;  %v1796_v51 = vsel %vm1770_vm1, %v1763_v19, %v1730_v20 }
 0x1f3   : > { %9372 = vmatprep.mubr.msk.bf16.mxu0 %vm1830_vm3, %v1796_v51  ;;  %v1765_v21 = vsel %vm1737_vm0, %v10649_v26, %v1699_v45  ;;  %v10723_v26 = vld [vmem:[%s12743_s2] ss:$0 sm:$0xff]  ;;  %v2485_v45 = vld [vmem:[#allocation3 + $0x14] sm:$0x1] }
 0x1f5   : > { %v1701_v23 = vpop.permute.xlu0 %1700 }
 0x1f6   : > { %v1732_v22 = vpop.permute.xlu1 %1731  ;;  %v1767_v35 = vsel %vm1737_vm0, %v1649_v38, %v1701_v23 }
 0x1f7   : > { %v1798_v46 = vsel %vm1770_vm1, %v1765_v21, %v1732_v22 }
 0x1f8   : > { %9373 = vmatmul.mubr.msk.bf16.gmra.mrb[24].mxu0 %vm1830_vm3, %v1798_v46 }
 0x201   : > { %v1703_v61 = vpop.permute.xlu1 %1702  ;;  %v1734_v10 = vpop.permute.xlu0 %1733 }
 0x202   : > { %v1800_v59 = vsel %vm1770_vm1, %v1767_v35, %v1734_v10  ;;  %v1769_v39 = vsel %vm1737_vm0, %v1651_v8, %v1703_v61 }
 0x203   : > { %9376 = vmatprep.mubr.msk.bf16.mxu0 %vm1830_vm3, %v1800_v59 }
 0x205   : > { %v1736_v28 = vpop.permute.xlu1 %1735 }
 0x206   : > { %v1802_v29 = vsel %vm1770_vm1, %v1769_v39, %v1736_v28 }
 0x207   : > { %9377 = vmatmul.mubr.msk.bf16.gmra.mrb[28].mxu0 %vm1830_vm3, %v1802_v29 }
 0x23a   : > { %v9350_v3 = vpop.f32.mrb[0].mxu0 }
 0x23b   : > { %v1910_v30 = vadd.f32 %v9350_v3, %v10723_v26  ;;  %v1901_v2 = vpop.f32.mrb[1].mxu0 }
 0x23c   : > { %v1902_v32 = vadd.f32 %v10723_v26, %v1901_v2  ;;  %v9351_v33 = vpop.f32.mrb[2].mxu0 }
 0x23d   : > { %v2030_v34 = vmax.f32 %v1910_v30, 0.0  ;;  %v1913_v25 = vadd.f32 %v9351_v33, %v10723_v26  ;;  %v1904_v36 = vpop.f32.mrb[3].mxu0 }
 0x23e   : > { %v2028_v38 = vmax.f32 %v1902_v32, 0.0  ;;  %v1905_v27 = vadd.f32 %v10723_v26, %v1904_v36  ;;  %v2502_v32 = vld [vmem:[#allocation3 + $0x30] sm:$0xf] }
 0x23f   : > { %v8839_v40 = vpack.c.bf16 %v2030_v34, %v2030_v34  ;;  %v2031_v53 = vmax.f32 %v1913_v25, 0.0  ;;  %v10753_v25 = vld [vmem:[#allocation3] sm:$0xff]  }
 0x240   : > { %v8837_v8 = vpack.c.bf16 %v2028_v38, %v2028_v38  ;;  %v2029_v37 = vmax.f32 %v1905_v27, 0.0  ;;  %v2495_v38 = vld [vmem:[#allocation3 + $0x24] sm:$0xf] }
 0x241   : > { %v2174_v41 = vshrl.u32 %v8839_v40, 16  ;;  %v8840_v43 = vpack.c.bf16 %v2031_v53, %v2031_v53  ;;  %v2177_v15 = vshll.u32 %v8839_v40, 16 }
 0x242   : > { %v2157_v5 = vshrl.u32 %v8837_v8, 16  ;;  %v2160_v44 = vshll.u32 %v8837_v8, 16  ;;  %v8838_v18 = vpack.c.bf16 %v2029_v37, %v2029_v37  ;;  %v9354_v13 = vpop.f32.mrb[4].mxu0 }
 0x243   : > { %v2176_v49 = vrot.slane %v2174_v41, 7  ;;  %v2182_v50 = vshrl.u32 %v8840_v43, 16  ;;  %v2185_v52 = vshll.u32 %v8840_v43, 16  ;;  %v1926_v54 = vadd.f32 %v9354_v13, %v10723_v26  ;;  %v1917_v56 = vpop.f32.mrb[5].mxu0 }
 0x244   : > { %v2159_v47 = vrot.slane %v2157_v5, 7  ;;  %v2165_v48 = vshrl.u32 %v8838_v18, 16  ;;  %v2168_v60 = vshll.u32 %v8838_v18, 16  ;;  %v1918_v62 = vadd.f32 %v10723_v26, %v1917_v56  ;;  %v9355_v63 = vpop.f32.mrb[6].mxu0 }
 0x245   : > { %v2179_v55 = vor.u32 %v2177_v15, %v2176_v49  ;;  %v2180_v4 = vrot.slane %v2176_v49, 4  ;;  %v2184_v7 = vrot.slane %v2182_v50, 7  ;;  %v2034_v11 = vmax.f32 %v1926_v54, 0.0  ;;  %v1920_v42 = vpop.f32.mrb[7].mxu0  ;;  %v2499_v54 = vld [vmem:[#allocation3 + $0x2c] sm:$0x1] }
 0x246   : > { %v2162_v24 = vor.u32 %v2160_v44, %v2159_v47  ;;  %v2163_v12 = vrot.slane %v2159_v47, 4  ;;  %v2167_v16 = vrot.slane %v2165_v48, 7  ;;  %v2032_v31 = vmax.f32 %v1918_v62, 0.0 }
 0x247   : > { %v2489_v17 = vsel %vm10732_vm4, %v2179_v55, %v2488_v57  ;;  %v2187_v19 = vor.u32 %v2185_v52, %v2184_v7  ;;  %v2189_v20 = vrot.slane %v2184_v7, 4  ;;  %v8843_v51 = vpack.c.bf16 %v2034_v11, %v2034_v11  ;;  %v2506_v52 = vld [vmem:[#allocation3 + $0x38] sm:$0x1] }
 0x248   : > { %2490 = vst [vmem:[#allocation3 + $0x18] sm:$0xf] %v2489_v17  ;;  %v2480_v21 = vsel %vm10732_vm4, %v2162_v24, %v2479_v6  ;;  %v2170_v22 = vor.u32 %v2168_v60, %v2167_v16  ;;  %v2172_v46 = vrot.slane %v2167_v16, 4  ;;  %v8841_v23 = vpack.c.bf16 %v2032_v31, %v2032_v31 }
 0x249   : > { %2481 = vst [vmem:[#allocation3 + $0xc] sm:$0xf] %v2480_v21  ;;  %v2188_v35 = vsel %vm10200_vm8, %v2180_v4, %v2187_v19  ;;  %v2493_v61 = vsel %vm10192_vm7, %v2189_v20, %v2492_v14  ;;  %v2208_v10 = vshrl.u32 %v8843_v51, 16  ;;  %v2211_v3 = vshll.u32 %v8843_v51, 16 }
 0x24a   : > { %2491 = vst.msk [vmem:[#allocation3 + $0x1c] sm:$0xf] %vm511_vm2, %v2188_v35  ;;  %2494 = vst [vmem:[#allocation3 + $0x20] sm:$0x1] %v2493_v61  ;;  %v2171_v59 = vsel %vm10200_vm8, %v2163_v12, %v2170_v22  ;;  %v2486_v39 = vsel %vm10192_vm7, %v2172_v46, %v2485_v45  ;;  %v2191_v28 = vshrl.u32 %v8841_v23, 16  ;;  %v1929_v30 = vadd.f32 %v9355_v63, %v10723_v26 }
 0x24b   : > { %2482 = vst.msk [vmem:[#allocation3 + $0x10] sm:$0xf] %vm511_vm2, %v2171_v59  ;;  %2487 = vst [vmem:[#allocation3 + $0x14] sm:$0x1] %v2486_v39  ;;  %v2210_v29 = vrot.slane %v2208_v10, 7  ;;  %v1921_v2 = vadd.f32 %v10723_v26, %v1920_v42  ;;  %v2194_v34 = vshll.u32 %v8841_v23, 16 }
 0x24c   : > { %v2193_v33 = vrot.slane %v2191_v28, 7  ;;  %v2035_v27 = vmax.f32 %v1929_v30, 0.0  ;;  %v3043_v44 = vrot.slane %v10753_v25, 1 }
 0x24d   : > { %v2213_v36 = vor.u32 %v2211_v3, %v2210_v29  ;;  %v2033_v40 = vmax.f32 %v1921_v2, 0.0  ;;  %v2214_v43 = vrot.slane %v2210_v29, 4 }
 0x24e   : > { %v2196_v53 = vor.u32 %v2194_v34, %v2193_v33  ;;  %v8844_v37 = vpack.c.bf16 %v2035_v27, %v2035_v27  ;;  %v2197_v15 = vrot.slane %v2193_v33, 4 }
 0x24f   : > { %v2503_v8 = vsel %vm10732_vm4, %v2213_v36, %v2502_v32  ;;  %v8842_v41 = vpack.c.bf16 %v2033_v40, %v2033_v40 }
 0x250   : > { %2504 = vst [vmem:[#allocation3 + $0x30] sm:$0xf] %v2503_v8  ;;  %v2496_v5 = vsel %vm10732_vm4, %v2196_v53, %v2495_v38  ;;  %v2216_v18 = vshrl.u32 %v8844_v37, 16  ;;  %v2219_v13 = vshll.u32 %v8844_v37, 16  ;;  %v2516_v37 = vld [vmem:[#allocation3 + $0x48] sm:$0xf] }
 0x251   : > { %2497 = vst [vmem:[#allocation3 + $0x24] sm:$0xf] %v2496_v5  ;;  %v2199_v49 = vshrl.u32 %v8842_v41, 16  ;;  %v2202_v50 = vshll.u32 %v8842_v41, 16  ;;  %v10760_v56 = vld [vmem:[#allocation3 + $0x18] sm:$0xff]  }
 0x252   : > { %v9610_v57 = vld [vmem:[#allocation3 + $0x20] ss:$0 sps:$4 sm:$0x11]   ;;  %v2218_v47 = vrot.slane %v2216_v18, 7  ;;  %v9358_v60 = vpop.f32.mrb[8].mxu0  ;;  %v2816_v62 = vshrl.u32 %v10760_v56, 16 }
 0x253   : > { %v2201_v48 = vrot.slane %v2199_v49, 7  ;;  %v2818_v63 = vshll.u32 %v10760_v56, 16  ;;  %v2823_v55 = vshll.u32 %v9610_v57, 16  ;;  %v10764_v4 = vld [vmem:[#allocation3 + $0xc] sm:$0xff]   ;;  %v3049_v6 = vrot.slane %v10760_v56, 1  ;;  %v1933_v12 = vpop.f32.mrb[9].mxu0 }
 0x254   : > { %v2221_v7 = vor.u32 %v2219_v13, %v2218_v47  ;;  %v2223_v11 = vrot.slane %v2218_v47, 4  ;;  %v10767_v14 = vld [vmem:[#allocation3 + $0x14] ss:$0 sps:$4 sm:$0x11]   ;;  %v1942_v16 = vadd.f32 %v9358_v60, %v10723_v26  ;;  %v1934_v31 = vadd.f32 %v10723_v26, %v1933_v12  ;;  %v9359_v17 = vpop.f32.mrb[10].mxu0 }
 0x255   : > { %v2204_v42 = vor.u32 %v2202_v50, %v2201_v48  ;;  %v2206_v24 = vrot.slane %v2201_v48, 4  ;;  %v2820_v19 = vrot.slane %v2818_v63, 1  ;;  %v2825_v20 = vrot.slane %v2823_v55, 1  ;;  %v1936_v46 = vpop.f32.mrb[11].mxu0  ;;  %v2509_v49 = vld [vmem:[#allocation3 + $0x3c] sm:$0xf] }
 0x256   : > { %v2222_v45 = vsel %vm10200_vm8, %v2214_v43, %v2221_v7  ;;  %v2507_v51 = vsel %vm10192_vm7, %v2223_v11, %v2506_v52  ;;  %v2038_v23 = vmax.f32 %v1942_v16, 0.0  ;;  %v2036_v35 = vmax.f32 %v1934_v31, 0.0  ;;  %v2520_v7 = vld [vmem:[#allocation3 + $0x50] sm:$0x1] }
 0x257   : > { %v2205_v21 = vsel %vm10200_vm8, %v2197_v15, %v2204_v42  ;;  %v2500_v22 = vsel %vm10192_vm7, %v2206_v24, %v2499_v54  ;;  %2505 = vst.msk [vmem:[#allocation3 + $0x34] sm:$0xf] %vm511_vm2, %v2222_v45  ;;  %2508 = vst [vmem:[#allocation3 + $0x38] sm:$0x1] %v2507_v51  ;;  %v1945_v61 = vadd.f32 %v9359_v17, %v10723_v26  ;;  %v2804_v39 = vshrl.u32 %v10764_v4, 16 }
 0x258   : > { %2498 = vst.msk [vmem:[#allocation3 + $0x28] sm:$0xf] %vm511_vm2, %v2205_v21  ;;  %2501 = vst [vmem:[#allocation3 + $0x2c] sm:$0x1] %v2500_v22  ;;  %v1937_v10 = vadd.f32 %v10723_v26, %v1936_v46  ;;  %v2821_v59 = vor.u32 %v2820_v19, %v2816_v62  ;;  %v2806_v28 = vshll.u32 %v10764_v4, 16  ;;  %v2811_v29 = vshll.u32 %v10767_v14, 16 }
 0x259   : > { %v8847_v3 = vpack.c.bf16 %v2038_v23, %v2038_v23  ;;  %v8845_v30 = vpack.c.bf16 %v2036_v35, %v2036_v35  ;;  %v2039_v2 = vmax.f32 %v1945_v61, 0.0  ;;  %v3050_v38 = vrot.slane %v9610_v57, 1  ;;  %v2513_v24 = vld [vmem:[#allocation3 + $0x44] sm:$0x1] }
 0x25a   : > { %v2037_v32 = vmax.f32 %v1937_v10, 0.0  ;;  %v2826_v33 = vsel %vm1238_vm12, %v2821_v59, %v2825_v20  ;;  %v2808_v34 = vrot.slane %v2806_v28, 1  ;;  %v2813_v36 = vrot.slane %v2811_v29, 1 }
 0x25b   : > { %v2242_v27 = vshrl.u32 %v8847_v3, 16  ;;  %v2245_v40 = vshll.u32 %v8847_v3, 16  ;;  %v2225_v53 = vshrl.u32 %v8845_v30, 16  ;;  %v2228_v8 = vshll.u32 %v8845_v30, 16  ;;  %3011 = vrot.lane.b32.xlu1 %v2826_v33, %s9843_s27 }
 0x25c   : > { %v8848_v41 = vpack.c.bf16 %v2039_v2, %v2039_v2  ;;  %v8846_v43 = vpack.c.bf16 %v2037_v32, %v2037_v32  ;;  %v2809_v15 = vor.u32 %v2808_v34, %v2804_v39  ;;  %v3051_v5 = vsel %vm1491_vm11, %v3049_v6, %v3050_v38 }
 0x25d   : > { %v2244_v18 = vrot.slane %v2242_v27, 7  ;;  %v2227_v13 = vrot.slane %v2225_v53, 7  ;;  %v3046_v50 = vrot.slane %v10764_v4, 1  ;;  %v3047_v52 = vrot.slane %v10767_v14, 1 }
 0x25e   : > { %v2250_v54 = vshrl.u32 %v8848_v41, 16  ;;  %v2253_v57 = vshll.u32 %v8848_v41, 16  ;;  %v2233_v47 = vshrl.u32 %v8846_v43, 16  ;;  %v2236_v48 = vshll.u32 %v8846_v43, 16  ;;  %v9362_v11 = vpop.f32.mrb[12].mxu0  ;;  %v10818_v53 = vld [vmem:[#allocation3 + $0x30] sm:$0xff]  }
 0x25f   : > { %v2247_v60 = vor.u32 %v2245_v40, %v2244_v18  ;;  %v2248_v62 = vrot.slane %v2244_v18, 4  ;;  %v2230_v63 = vor.u32 %v2228_v8, %v2227_v13  ;;  %v2231_v55 = vrot.slane %v2227_v13, 4  ;;  %3101 = vrot.lane.b32.xlu1 %v3051_v5, %s9844_s28  ;;  %v1949_v16 = vpop.f32.mrb[13].mxu0  ;;  %v10801_v51 = vld [vmem:[#allocation3 + $0x24] sm:$0xff]   ;;  %v2530_v5 = vld [vmem:[#allocation3 + $0x60] sm:$0xf] }
 0x260   : > { %v2252_v6 = vrot.slane %v2250_v54, 7  ;;  %v2235_v42 = vrot.slane %v2233_v47, 7  ;;  %v2814_v12 = vsel %vm1238_vm12, %v2809_v15, %v2813_v36  ;;  %v1958_v14 = vadd.f32 %v9362_v11, %v10723_v26  ;;  %v9363_v20 = vpop.f32.mrb[14].mxu0  ;;  %v9614_v61 = vld [vmem:[#allocation3 + $0x2c] ss:$0 sps:$4 sm:$0x11]  }
 0x261   : > { %v2517_v31 = vsel %vm10732_vm4, %v2247_v60, %v2516_v37  ;;  %v2510_v17 = vsel %vm10732_vm4, %v2230_v63, %v2509_v49  ;;  %3009 = vrot.lane.b32.xlu0 %v2814_v12, %s9843_s27  ;;  %v1950_v19 = vadd.f32 %v10723_v26, %v1949_v16  ;;  %v3048_v45 = vsel %vm1491_vm11, %v3046_v50, %v3047_v52  ;;  %v1952_v35 = vpop.f32.mrb[15].mxu0  ;;  %v2523_v18 = vld [vmem:[#allocation3 + $0x54] sm:$0xf]  ;;  %v9616_v54 = vld [vmem:[#allocation3 + $0x38] ss:$0 sps:$4 sm:$0x11]  }
 0x262   : > { %2518 = vst [vmem:[#allocation3 + $0x48] sm:$0xf] %v2517_v31  ;;  %2511 = vst [vmem:[#allocation3 + $0x3c] sm:$0xf] %v2510_v17  ;;  %v2255_v21 = vor.u32 %v2253_v57, %v2252_v6  ;;  %v2257_v22 = vrot.slane %v2252_v6, 4  ;;  %v2238_v46 = vor.u32 %v2236_v48, %v2235_v42  ;;  %v2240_v23 = vrot.slane %v2235_v42, 4 }
 0x263   : > { %v2042_v10 = vmax.f32 %v1958_v14, 0.0  ;;  %v2040_v59 = vmax.f32 %v1950_v19, 0.0  ;;  %v1961_v39 = vadd.f32 %v9363_v20, %v10723_v26  ;;  %v1953_v28 = vadd.f32 %v10723_v26, %v1952_v35  ;;  %v2527_v14 = vld [vmem:[#allocation3 + $0x5c] sm:$0x1] }
 0x264   : > { %v2256_v29 = vsel %vm10200_vm8, %v2248_v62, %v2255_v21  ;;  %v2521_v3 = vsel %vm10192_vm7, %v2257_v22, %v2520_v7  ;;  %v2239_v30 = vsel %vm10200_vm8, %v2231_v55, %v2238_v46  ;;  %v2514_v2 = vsel %vm10192_vm7, %v2240_v23, %v2513_v24  ;;  %v2534_v24 = vld [vmem:[#allocation3 + $0x68] sm:$0x1] }
 0x265   : > { %2519 = vst.msk [vmem:[#allocation3 + $0x4c] sm:$0xf] %vm511_vm2, %v2256_v29  ;;  %2522 = vst [vmem:[#allocation3 + $0x50] sm:$0x1] %v2521_v3  ;;  %v8851_v32 = vpack.c.bf16 %v2042_v10, %v2042_v10  ;;  %v8849_v33 = vpack.c.bf16 %v2040_v59, %v2040_v59  ;;  %v2043_v34 = vmax.f32 %v1961_v39, 0.0  ;;  %3099 = vrot.lane.b32.xlu0 %v3048_v45, %s9844_s28  ;;  %v2041_v36 = vmax.f32 %v1953_v28, 0.0 }
 0x266   : > { %2512 = vst.msk [vmem:[#allocation3 + $0x40] sm:$0xf] %vm511_vm2, %v2239_v30  ;;  %2515 = vst [vmem:[#allocation3 + $0x44] sm:$0x1] %v2514_v2  ;;  %v3052_v38 = vrot.slane %v10801_v51, 1  ;;  %v3053_v27 = vrot.slane %v9614_v61, 1 }
 0x267   : > { %v2830_v40 = vshll.u32 %v10801_v51, 16  ;;  %v2794_v8 = vshll.u32 %v10753_v25, 16  ;;  %v2276_v37 = vshrl.u32 %v8851_v32, 16  ;;  %v2279_v41 = vshll.u32 %v8851_v32, 16 }
 0x268   : > { %v2259_v43 = vshrl.u32 %v8849_v33, 16  ;;  %v2828_v15 = vshrl.u32 %v10801_v51, 16  ;;  %v8852_v13 = vpack.c.bf16 %v2043_v34, %v2043_v34  ;;  %v8850_v49 = vpack.c.bf16 %v2041_v36, %v2041_v36 }
 0x269   : > { %v3054_v50 = vsel %vm1491_vm11, %v3052_v38, %v3053_v27  ;;  %v2832_v52 = vrot.slane %v2830_v40, 1  ;;  %v2278_v57 = vrot.slane %v2276_v37, 7  ;;  %v2262_v48 = vshll.u32 %v8849_v33, 16 }
 0x26a   : > { %v2261_v47 = vrot.slane %v2259_v43, 7  ;;  %3103 = vrot.lane.b32.xlu1 %v3054_v50, %s9844_s28  ;;  %v2835_v60 = vshll.u32 %v9614_v61, 16  ;;  %v2284_v62 = vshrl.u32 %v8852_v13, 16  ;;  %v2287_v63 = vshll.u32 %v8852_v13, 16 }
 0x26b   : > { %v2267_v55 = vshrl.u32 %v8850_v49, 16  ;;  %v3055_v7 = vrot.slane %v10818_v53, 1  ;;  %v2281_v11 = vor.u32 %v2279_v41, %v2278_v57  ;;  %v2282_v6 = vrot.slane %v2278_v57, 4 }
 0x26c   : > { %v2264_v42 = vor.u32 %v2262_v48, %v2261_v47  ;;  %v2270_v12 = vshll.u32 %v8850_v49, 16  ;;  %v2265_v16 = vrot.slane %v2261_v47, 4  ;;  %v2286_v31 = vrot.slane %v2284_v62, 7  ;;  %v10852_v57 = vld [vmem:[#allocation3 + $0x48] sm:$0xff]  }
 0x26d   : > { %v2269_v17 = vrot.slane %v2267_v55, 7  ;;  %v2833_v19 = vor.u32 %v2832_v52, %v2828_v15  ;;  %v2531_v20 = vsel %vm10732_vm4, %v2281_v11, %v2530_v5  ;;  %v2837_v21 = vrot.slane %v2835_v60, 1  ;;  %v10829_v10 = vld [vmem:[#allocation3 + $0x3c] sm:$0xff]   ;;  %v9618_v59 = vld [vmem:[#allocation3 + $0x44] ss:$0 sps:$4 sm:$0x11]  }
 0x26e   : > { %v2524_v45 = vsel %vm10732_vm4, %v2264_v42, %v2523_v18  ;;  %v3056_v22 = vrot.slane %v9616_v54, 1  ;;  %2532 = vst [vmem:[#allocation3 + $0x60] sm:$0xf] %v2531_v20  ;;  %v2289_v46 = vor.u32 %v2287_v63, %v2286_v31  ;;  %v2291_v23 = vrot.slane %v2286_v31, 4  ;;  %v9366_v30 = vpop.f32.mrb[16].mxu0 }
 0x26f   : > { %2525 = vst [vmem:[#allocation3 + $0x54] sm:$0xf] %v2524_v45  ;;  %v2272_v35 = vor.u32 %v2270_v12, %v2269_v17  ;;  %v2274_v61 = vrot.slane %v2269_v17, 4  ;;  %v2838_v39 = vsel %vm1238_vm12, %v2833_v19, %v2837_v21  ;;  %v2842_v29 = vshll.u32 %v10818_v53, 16  ;;  %v1965_v36 = vpop.f32.mrb[17].mxu0 }
 0x270   : > { %v3057_v28 = vsel %vm1491_vm11, %v3055_v7, %v3056_v22  ;;  %v2847_v3 = vshll.u32 %v9616_v54, 16  ;;  %v2290_v2 = vsel %vm10200_vm8, %v2282_v6, %v2289_v46  ;;  %v2535_v32 = vsel %vm10192_vm7, %v2291_v23, %v2534_v24  ;;  %3013 = vrot.lane.b32.xlu0 %v2838_v39, %s9843_s27  ;;  %v9367_v41 = vpop.f32.mrb[18].mxu0  ;;  %v10856_v63 = vld [vmem:[#allocation3 + $0x50] ss:$0 sps:$4 sm:$0x11]  }
 0x271   : > { %v2273_v33 = vsel %vm10200_vm8, %v2265_v16, %v2272_v35  ;;  %v2528_v34 = vsel %vm10192_vm7, %v2274_v61, %v2527_v14  ;;  %2533 = vst.msk [vmem:[#allocation3 + $0x64] sm:$0xf] %vm511_vm2, %v2290_v2  ;;  %2536 = vst [vmem:[#allocation3 + $0x68] sm:$0x1] %v2535_v32  ;;  %3105 = vrot.lane.b32.xlu1 %v3057_v28, %s9844_s28  ;;  %v2840_v38 = vshrl.u32 %v10818_v53, 16  ;;  %v2844_v27 = vrot.slane %v2842_v29, 1 }
 0x272   : > { %2526 = vst.msk [vmem:[#allocation3 + $0x58] sm:$0xf] %vm511_vm2, %v2273_v33  ;;  %2529 = vst [vmem:[#allocation3 + $0x5c] sm:$0x1] %v2528_v34  ;;  %v1974_v40 = vadd.f32 %v9366_v30, %v10723_v26  ;;  %v1966_v37 = vadd.f32 %v10723_v26, %v1965_v36  ;;  %v2849_v43 = vrot.slane %v2847_v3, 1  ;;  %v3058_v15 = vrot.slane %v10829_v10, 1 }
 0x273   : > { %v3059_v5 = vrot.slane %v9618_v59, 1  ;;  %v1977_v18 = vadd.f32 %v9367_v41, %v10723_v26  ;;  %v1968_v13 = vpop.f32.mrb[19].mxu0  ;;  %v2845_v49 = vor.u32 %v2844_v27, %v2840_v38  ;;  %v2854_v60 = vshll.u32 %v10829_v10, 16  ;;  %v2544_v20 = vld [vmem:[#allocation3 + $0x78] sm:$0xf] }
 0x274   : > { %v2046_v50 = vmax.f32 %v1974_v40, 0.0  ;;  %v2044_v52 = vmax.f32 %v1966_v37, 0.0  ;;  %v1969_v54 = vadd.f32 %v10723_v26, %v1968_v13  ;;  %v2859_v62 = vshll.u32 %v9618_v59, 16  ;;  %v2537_v21 = vld [vmem:[#allocation3 + $0x6c] sm:$0xf] }
 0x275   : > { %v3060_v47 = vsel %vm1491_vm11, %v3058_v15, %v3059_v5  ;;  %v2047_v48 = vmax.f32 %v1977_v18, 0.0  ;;  %v2850_v55 = vsel %vm1238_vm12, %v2845_v49, %v2849_v43  ;;  %v2852_v24 = vshrl.u32 %v10829_v10, 16  ;;  %v2548_v39 = vld [vmem:[#allocation3 + $0x80] sm:$0x1]  ;;  %v2541_v43 = vld [vmem:[#allocation3 + $0x74] sm:$0x1] }
 0x276   : > { %v8855_v7 = vpack.c.bf16 %v2046_v50, %v2046_v50  ;;  %v8853_v11 = vpack.c.bf16 %v2044_v52, %v2044_v52  ;;  %3107 = vrot.lane.b32.xlu1 %v3060_v47, %s9844_s28  ;;  %v2045_v6 = vmax.f32 %v1969_v54, 0.0  ;;  %3015 = vrot.lane.b32.xlu0 %v2850_v55, %s9843_s27  ;;  %v2856_v12 = vrot.slane %v2854_v60, 1  ;;  %v9626_v52 = vld [vmem:[#allocation3 + $0x8] ss:$0 sps:$4 sm:$0x11]  }
 0x277   : > { %v8856_v42 = vpack.c.bf16 %v2047_v48, %v2047_v48  ;;  %v2861_v14 = vrot.slane %v2859_v62, 1  ;;  %v3061_v19 = vrot.slane %v10852_v57, 1  ;;  %v3062_v28 = vrot.slane %v10856_v63, 1 }
 0x278   : > { %v2310_v16 = vshrl.u32 %v8855_v7, 16  ;;  %v2313_v31 = vshll.u32 %v8855_v7, 16  ;;  %v2293_v17 = vshrl.u32 %v8853_v11, 16  ;;  %v2296_v45 = vshll.u32 %v8853_v11, 16  ;;  %v10876_v50 = vld [vmem:[#allocation3 + $0x60] sm:$0xff]  }
 0x279   : > { %v2318_v22 = vshrl.u32 %v8856_v42, 16  ;;  %v8854_v46 = vpack.c.bf16 %v2045_v6, %v2045_v6  ;;  %v2857_v23 = vor.u32 %v2856_v12, %v2852_v24  ;;  %v2321_v59 = vshll.u32 %v8856_v42, 16  ;;  %v10864_v29 = vld [vmem:[#allocation3 + $0x54] sm:$0xff]   ;;  %v9622_v33 = vld [vmem:[#allocation3 + $0x5c] ss:$0 sps:$4 sm:$0x11]  }
 0x27a   : > { %v2312_v35 = vrot.slane %v2310_v16, 7  ;;  %v2295_v61 = vrot.slane %v2293_v17, 7  ;;  %v3063_v15 = vsel %vm1491_vm11, %v3061_v19, %v3062_v28  ;;  %v2866_v13 = vshll.u32 %v10852_v57, 16  ;;  %v9624_v62 = vld [vmem:[#allocation3 + $0x68] ss:$0 sps:$4 sm:$0x11]  }
 0x27b   : > { %v2320_v3 = vrot.slane %v2318_v22, 7  ;;  %v2301_v30 = vshrl.u32 %v8854_v46, 16  ;;  %v2304_v2 = vshll.u32 %v8854_v46, 16  ;;  %v2862_v32 = vsel %vm1238_vm12, %v2857_v23, %v2861_v14  ;;  %3109 = vrot.lane.b32.xlu1 %v3063_v15, %s9844_s28 }
 0x27c   : > { %v2315_v34 = vor.u32 %v2313_v31, %v2312_v35  ;;  %v2316_v36 = vrot.slane %v2312_v35, 4  ;;  %v2298_v38 = vor.u32 %v2296_v45, %v2295_v61  ;;  %v2299_v27 = vrot.slane %v2295_v61, 4  ;;  %3017 = vrot.lane.b32.xlu0 %v2862_v32, %s9843_s27 }
 0x27d   : > { %v2323_v40 = vor.u32 %v2321_v59, %v2320_v3  ;;  %v2325_v37 = vrot.slane %v2320_v3, 4  ;;  %v2303_v41 = vrot.slane %v2301_v30, 7  ;;  %v2871_v49 = vshll.u32 %v10856_v63, 16 }
 0x27e   : > { %v2545_v5 = vsel %vm10732_vm4, %v2315_v34, %v2544_v20  ;;  %v2538_v18 = vsel %vm10732_vm4, %v2298_v38, %v2537_v21  ;;  %v2864_v55 = vshrl.u32 %v10852_v57, 16  ;;  %v2868_v63 = vrot.slane %v2866_v13, 1 }
 0x27f   : > { %2546 = vst [vmem:[#allocation3 + $0x78] sm:$0xf] %v2545_v5  ;;  %2539 = vst [vmem:[#allocation3 + $0x6c] sm:$0xf] %v2538_v18  ;;  %v2324_v54 = vsel %vm10200_vm8, %v2316_v36, %v2323_v40  ;;  %v2549_v47 = vsel %vm10192_vm7, %v2325_v37, %v2548_v39  ;;  %v2306_v48 = vor.u32 %v2304_v2, %v2303_v41  ;;  %v2308_v60 = vrot.slane %v2303_v41, 4 }
 0x280   : > { %2547 = vst.msk [vmem:[#allocation3 + $0x7c] sm:$0xf] %vm511_vm2, %v2324_v54  ;;  %2550 = vst [vmem:[#allocation3 + $0x80] sm:$0x1] %v2549_v47  ;;  %v3064_v7 = vrot.slane %v10864_v29, 1  ;;  %v3065_v11 = vrot.slane %v9622_v33, 1  ;;  %v2869_v14 = vor.u32 %v2868_v63, %v2864_v55 }
 0x281   : > { %v2307_v6 = vsel %vm10200_vm8, %v2299_v27, %v2306_v48  ;;  %v2542_v42 = vsel %vm10192_vm7, %v2308_v60, %v2541_v43  ;;  %v2873_v24 = vrot.slane %v2871_v49, 1  ;;  %v2878_v12 = vshll.u32 %v10864_v29, 16  ;;  %v9645_v47 = vld [vmem:[%s12744_s3 + $0x40] sm:$0xff]   ;;  %v9647_v60 = vld [vmem:[%s12744_s3 + $0x48] sm:$0xff]   ;;  %v9649_v55 = vld [vmem:[%s12744_s3 + $0x50] sm:$0xff]  }
 0x282   : > { %2540 = vst.msk [vmem:[#allocation3 + $0x70] sm:$0xf] %vm511_vm2, %v2307_v6  ;;  %2543 = vst [vmem:[#allocation3 + $0x74] sm:$0x1] %v2542_v42  ;;  %v3066_v16 = vsel %vm1491_vm11, %v3064_v7, %v3065_v11  ;;  %v2883_v31 = vshll.u32 %v9622_v33, 16  ;;  %v3067_v17 = vrot.slane %v10876_v50, 1  ;;  %8952 = vmatprep.subr.bf16.mxu1 %v9645_v47 }
 0x283   : > { %3111 = vrot.lane.b32.xlu1 %v3066_v16, %s9844_s28  ;;  %v2876_v19 = vshrl.u32 %v10864_v29, 16  ;;  %v2880_v20 = vrot.slane %v2878_v12, 1  ;;  %v3068_v45 = vrot.slane %v9624_v62, 1  ;;  %v2890_v21 = vshll.u32 %v10876_v50, 16  ;;  %v9646_v48 = vld [vmem:[%s12744_s3] sm:$0xff]   ;;  %v9650_v63 = vld [vmem:[%s12744_s3 + $0x10] sm:$0xff]  }
 0x284   : > { %v2874_v22 = vsel %vm1238_vm12, %v2869_v14, %v2873_v24  ;;  %v3044_v46 = vrot.slane %v9626_v52, 1  ;;  %v2792_v23 = vshrl.u32 %v10753_v25, 16  ;;  %v2799_v35 = vshll.u32 %v9626_v52, 16  ;;  %8953 = vmatpush3.bf16.msra.mxu1 %v9646_v48  ;;  %v9651_v7 = vld [vmem:[%s12744_s3 + $0x58] sm:$0xff]   ;;  %v9653_v6 = vld [vmem:[%s12744_s3 + $0x60] sm:$0xff]   ;;  %v9655_v24 = vld [vmem:[%s12744_s3 + $0x68] sm:$0xff]  }
 0x285   : > { %3019 = vrot.lane.b32.xlu0 %v2874_v22, %s9843_s27  ;;  %v2881_v61 = vor.u32 %v2880_v20, %v2876_v19  ;;  %v2885_v59 = vrot.slane %v2883_v31, 1  ;;  %v2892_v39 = vrot.slane %v2890_v21, 1  ;;  %v2796_v28 = vrot.slane %v2794_v8, 1  ;;  %8954 = vmatprep.subr.bf16.mxu1 %v9647_v60  ;;  %v9652_v11 = vld [vmem:[%s12744_s3 + $0x18] sm:$0xff]   ;;  %v9654_v42 = vld [vmem:[%s12744_s3 + $0x20] sm:$0xff]   ;;  %v9656_v12 = vld [vmem:[%s12744_s3 + $0x28] sm:$0xff]  }
 0x286   : > { %v3069_v3 = vsel %vm1491_vm11, %v3067_v17, %v3068_v45  ;;  %v2888_v30 = vshrl.u32 %v10876_v50, 16  ;;  %v2895_v2 = vshll.u32 %v9624_v62, 16  ;;  %v3045_v34 = vsel %vm1491_vm11, %v3043_v44, %v3044_v46  ;;  %v9648_v62 = vld [vmem:[%s12744_s3 + $0x8] sm:$0xff]   ;;  %v9657_v14 = vld [vmem:[%s12744_s3 + $0x70] sm:$0xff]   ;;  %v9659_v31 = vld [vmem:[%s12744_s3 + $0x78] sm:$0xff]  }
 0x287   : > { %v2886_v32 = vsel %vm1238_vm12, %v2881_v61, %v2885_v59  ;;  %3113 = vrot.lane.b32.xlu1 %v3069_v3, %s9844_s28  ;;  %v2797_v8 = vor.u32 %v2796_v28, %v2792_v23  ;;  %v2801_v27 = vrot.slane %v2799_v35, 1  ;;  %v9658_v16 = vld [vmem:[%s12744_s3 + $0x30] sm:$0xff]  }
 0x288   : > { %v2893_v33 = vor.u32 %v2892_v39, %v2888_v30  ;;  %v2897_v38 = vrot.slane %v2895_v2, 1  ;;  %8955 = vmatpush3.bf16.msra.mxu1 %v9648_v62  ;;  %v2555_v62 = vld [vmem:[#allocation3 + $0x8c] sm:$0x1] }
 0x289   : > { %3021 = vrot.lane.b32.xlu0 %v2886_v32, %s9843_s27  ;;  %v10909_v36 = vld [vmem:[#allocation3 + $0x6c] sm:$0xff]   ;;  %v9628_v40 = vld [vmem:[#allocation3 + $0x74] ss:$0 sps:$4 sm:$0x11]   ;;  %v2802_v18 = vsel %vm1238_vm12, %v2797_v8, %v2801_v27  ;;  %8956 = vmatprep.subr.bf16.mxu1 %v9649_v55 }
 0x28a   : > { %v3070_v37 = vrot.slane %v10909_v36, 1  ;;  %v2902_v41 = vshll.u32 %v10909_v36, 16  ;;  %v2898_v43 = vsel %vm1238_vm12, %v2893_v33, %v2897_v38  ;;  %v3071_v15 = vrot.slane %v9628_v40, 1  ;;  %v2558_v27 = vld [vmem:[#allocation3 + $0x90] sm:$0xf] }
 0x28b   : > { %3097 = vrot.lane.b32.xlu1 %v3045_v34, %s9844_s28  ;;  %v2907_v25 = vshll.u32 %v9628_v40, 16  ;;  %v2900_v44 = vshrl.u32 %v10909_v36, 16 }
 0x28c   : > { %v2904_v5 = vrot.slane %v2902_v41, 1  ;;  %v3072_v13 = vsel %vm1491_vm11, %v3070_v37, %v3071_v15  ;;  %8957 = vmatpush3.bf16.msra.mxu1 %v9650_v63  ;;  %v2551_v15 = vld [vmem:[#allocation3 + $0x84] sm:$0xf] }
 0x28d   : > { %3023 = vrot.lane.b32.xlu0 %v2898_v43, %s9843_s27  ;;  %v2909_v52 = vrot.slane %v2907_v25, 1  ;;  %8958 = vmatprep.subr.bf16.mxu1 %v9651_v7 }
 0x28e   : > { %v2905_v49 = vor.u32 %v2904_v5, %v2900_v44  ;;  %v9661_v5 = vld [vmem:[%s12744_s3 + $0x80] sm:$0xff]  }
 0x28f   : > { %3115 = vrot.lane.b32.xlu1 %v3072_v13, %s9844_s28  ;;  %v2562_v13 = vld [vmem:[#allocation3 + $0x98] sm:$0x1]  ;;  %9380 = vmatprep.subr.bf16.mxu0 %v9661_v5 }
 0x290   : > { %v2910_v54 = vsel %vm1238_vm12, %v2905_v49, %v2909_v52  ;;  %8959 = vmatpush3.bf16.msra.mxu1 %v9652_v11  ;;  %9381 = vmatpush3.bf16.msra.mxu0 %v9661_v5 }
 0x291   : > { %3007 = vrot.lane.b32.xlu0 %v2802_v18, %s9843_s27  ;;  %8960 = vmatprep.subr.bf16.mxu1 %v9653_v6 }
 0x294   : > { %8961 = vmatpush3.bf16.msra.mxu1 %v9654_v42 }
 0x295   : > { %3025 = vrot.lane.b32.xlu0 %v2910_v54, %s9843_s27  ;;  %8962 = vmatprep.subr.bf16.mxu1 %v9655_v24  ;;  %v10986_v24 = vld [vmem:[#allocation3 + $0x78] sm:$0xff]  }
 0x298   : > { %8963 = vmatpush3.bf16.msra.mxu1 %v9656_v12 }
 0x299   : > { %8964 = vmatprep.subr.bf16.mxu1 %v9657_v14 }
 0x29c   : > { %8965 = vmatpush3.bf16.msra.mxu1 %v9658_v16 }
 0x29d   : > { %8966 = vmatprep.subr.bf16.mxu1 %v9659_v31  ;;  %v9630_v31 = vld [vmem:[#allocation3 + $0x80] ss:$0 sps:$4 sm:$0x11]  }
 0x2bb   : > { %v9370_v17 = vpop.f32.mrb[20].mxu0 }
 0x2bc   : > { %v1990_v19 = vadd.f32 %v9370_v17, %v10723_v26  ;;  %v1981_v20 = vpop.f32.mrb[21].mxu0  ;;  %v10997_v17 = vld [vmem:[%s12743_s2] ss:$0 sm:$0xff] }
 0x2bd   : > { %v1982_v45 = vadd.f32 %v10723_v26, %v1981_v20  ;;  %v9371_v21 = vpop.f32.mrb[22].mxu0 }
 0x2be   : > { %v2050_v22 = vmax.f32 %v1990_v19, 0.0  ;;  %v1993_v46 = vadd.f32 %v9371_v21, %v10723_v26  ;;  %v1984_v23 = vpop.f32.mrb[23].mxu0  ;;  %v2914_v21 = vshll.u32 %v10986_v24, 16 }
 0x2bf   : > { %v2048_v35 = vmax.f32 %v1982_v45, 0.0  ;;  %v1985_v61 = vadd.f32 %v10723_v26, %v1984_v23  ;;  %v9660_v26 = vld [vmem:[%s12744_s3 + $0x38] sm:$0xff]   ;;  %v9662_v23 = vld [vmem:[%s12744_s3 + $0x88] sm:$0xff]  }
 0x2c0   : > { %v8859_v59 = vpack.c.bf16 %v2050_v22, %v2050_v22  ;;  %v2051_v39 = vmax.f32 %v1993_v46, 0.0  ;;  %8967 = vmatpush3.bf16.msra.mxu1 %v9660_v26  ;;  %9382 = vmatprep.subr.bf16.mxu0 %v9662_v23 }
 0x2c1   : > { %v8857_v28 = vpack.c.bf16 %v2048_v35, %v2048_v35  ;;  %v2049_v3 = vmax.f32 %v1985_v61, 0.0  ;;  %9383 = vmatpush3.bf16.msra.mxu0 %v9662_v23 }
 0x2c2   : > { %v2344_v30 = vshrl.u32 %v8859_v59, 16  ;;  %v8860_v2 = vpack.c.bf16 %v2051_v39, %v2051_v39  ;;  %v2347_v38 = vshll.u32 %v8859_v59, 16  ;;  %v3073_v39 = vrot.slane %v10986_v24, 1 }
 0x2c3   : > { %v2327_v32 = vshrl.u32 %v8857_v28, 16  ;;  %v8858_v33 = vpack.c.bf16 %v2049_v3, %v2049_v3  ;;  %v2330_v37 = vshll.u32 %v8857_v28, 16 }
 0x2c4   : > { %v2346_v34 = vrot.slane %v2344_v30, 7  ;;  %v2352_v8 = vshrl.u32 %v8860_v2, 16  ;;  %v2355_v44 = vshll.u32 %v8860_v2, 16  ;;  %v3074_v30 = vrot.slane %v9630_v31, 1 }
 0x2c5   : > { %v2329_v40 = vrot.slane %v2327_v32, 7  ;;  %v2335_v41 = vshrl.u32 %v8858_v33, 16  ;;  %v2338_v52 = vshll.u32 %v8858_v33, 16  ;;  %v2919_v2 = vshll.u32 %v9630_v31, 16  ;;  %v2576_v31 = vld [vmem:[#allocation3 + $0xb0] sm:$0x1] }
 0x2c6   : > { %v2349_v43 = vor.u32 %v2347_v38, %v2346_v34  ;;  %v2354_v25 = vrot.slane %v2352_v8, 7  ;;  %v2350_v54 = vrot.slane %v2346_v34, 4  ;;  %v2916_v8 = vrot.slane %v2914_v21, 1 }
 0x2c7   : > { %v2332_v18 = vor.u32 %v2330_v37, %v2329_v40  ;;  %v2337_v49 = vrot.slane %v2335_v41, 7  ;;  %v2333_v55 = vrot.slane %v2329_v40, 4  ;;  %v2921_v5 = vrot.slane %v2919_v2, 1 }
 0x2c8   : > { %v2559_v47 = vsel %vm10732_vm4, %v2349_v43, %v2558_v27  ;;  %v2357_v48 = vor.u32 %v2355_v44, %v2354_v25  ;;  %v2359_v60 = vrot.slane %v2354_v25, 4  ;;  %v2912_v25 = vshrl.u32 %v10986_v24, 16 }
 0x2c9   : > { %2560 = vst [vmem:[#allocation3 + $0x90] sm:$0xf] %v2559_v47  ;;  %v2552_v63 = vsel %vm10732_vm4, %v2332_v18, %v2551_v15  ;;  %v2340_v7 = vor.u32 %v2338_v52, %v2337_v49  ;;  %v2342_v11 = vrot.slane %v2337_v49, 4  ;;  %v2572_v49 = vld [vmem:[#allocation3 + $0xa8] sm:$0xf] }
 0x2ca   : > { %2553 = vst [vmem:[#allocation3 + $0x84] sm:$0xf] %v2552_v63  ;;  %v2358_v6 = vsel %vm10200_vm8, %v2350_v54, %v2357_v48  ;;  %v2563_v42 = vsel %vm10192_vm7, %v2359_v60, %v2562_v13  ;;  %v2917_v54 = vor.u32 %v2916_v8, %v2912_v25 }
 0x2cb   : > { %2561 = vst.msk [vmem:[#allocation3 + $0x94] sm:$0xf] %vm511_vm2, %v2358_v6  ;;  %2564 = vst [vmem:[#allocation3 + $0x98] sm:$0x1] %v2563_v42  ;;  %v2341_v12 = vsel %vm10200_vm8, %v2333_v55, %v2340_v7  ;;  %v2556_v14 = vsel %vm10192_vm7, %v2342_v11, %v2555_v62  ;;  %v9374_v16 = vpop.f32.mrb[24].mxu0 }
 0x2cc   : > { %2554 = vst.msk [vmem:[#allocation3 + $0x88] sm:$0xf] %vm511_vm2, %v2341_v12  ;;  %2557 = vst [vmem:[#allocation3 + $0x8c] sm:$0x1] %v2556_v14  ;;  %v2006_v19 = vadd.f32 %v10997_v17, %v9374_v16  ;;  %v1997_v20 = vpop.f32.mrb[25].mxu0  ;;  %v2922_v2 = vsel %vm1238_vm12, %v2917_v54, %v2921_v5 }
 0x2cd   : > { %v3012_v45 = vpop.permute.xlu1 %3011  ;;  %v1998_v22 = vadd.f32 %v10997_v17, %v1997_v20  ;;  %v9375_v46 = vpop.f32.mrb[26].mxu0  ;;  %v2565_v7 = vld [vmem:[#allocation3 + $0x9c] sm:$0xf]  ;;  %v2569_v20 = vld [vmem:[#allocation3 + $0xa4] sm:$0x1] }
 0x2ce   : > { %v2054_v35 = vmax.f32 %v2006_v19, 0.0  ;;  %v2009_v61 = vadd.f32 %v10997_v17, %v9375_v46  ;;  %v2000_v59 = vpop.f32.mrb[27].mxu0  ;;  %v3139_v34 = vsel %vm3133_vm5, %v10760_v56, %v3012_v45  ;;  %v3075_v56 = vsel %vm1491_vm11, %v3073_v39, %v3074_v30 }
 0x2cf   : > { %v2052_v28 = vmax.f32 %v1998_v22, 0.0  ;;  %v2001_v3 = vadd.f32 %v10997_v17, %v2000_v59 }
 0x2d0   : > { %v8863_v32 = vpack.c.bf16 %v2054_v35, %v2054_v35  ;;  %v2055_v33 = vmax.f32 %v2009_v61, 0.0 }
 0x2d1   : > { %v3102_v38 = vpop.permute.xlu1 %3101  ;;  %v8861_v27 = vpack.c.bf16 %v2052_v28, %v2052_v28  ;;  %v2053_v40 = vmax.f32 %v2001_v3, 0.0 }
 0x2d2   : > { %v11011_v37 = vsel %vm3170_vm6, %v3139_v34, %v3102_v38  ;;  %v2378_v41 = vshrl.u32 %v8863_v32, 16  ;;  %v8864_v43 = vpack.c.bf16 %v2055_v33, %v2055_v33  ;;  %v2381_v13 = vshll.u32 %v8863_v32, 16  ;;  %v11032_v28 = vld [vmem:[#allocation3 + $0x90] sm:$0xff]  }
 0x2d3   : > { %v3010_v15 = vpop.permute.xlu0 %3009  ;;  %3256 = vrot.lane.b32.xlu1 %v11011_v37, %s9844_s28  ;;  %v2361_v44 = vshrl.u32 %v8861_v27, 16  ;;  %v8862_v26 = vpack.c.bf16 %v2053_v40, %v2053_v40  ;;  %v2364_v48 = vshll.u32 %v8861_v27, 16  ;;  %v11019_v55 = vld [vmem:[#allocation3 + $0x84] sm:$0xff]   ;;  %v9632_v23 = vld [vmem:[#allocation3 + $0x8c] ss:$0 sps:$4 sm:$0x11]  }
 0x2d4   : > { %v2380_v18 = vrot.slane %v2378_v41, 7  ;;  %v2386_v52 = vshrl.u32 %v8864_v43, 16  ;;  %v3137_v62 = vsel %vm3133_vm5, %v10764_v4, %v3010_v15  ;;  %v2389_v6 = vshll.u32 %v8864_v43, 16 }
 0x2d5   : > { %v2363_v47 = vrot.slane %v2361_v44, 7  ;;  %v2369_v60 = vshrl.u32 %v8862_v26, 16  ;;  %v2372_v42 = vshll.u32 %v8862_v26, 16  ;;  %v2926_v39 = vshll.u32 %v11019_v55, 16 }
 0x2d6   : > { %v2383_v63 = vor.u32 %v2381_v13, %v2380_v18  ;;  %v2388_v11 = vrot.slane %v2386_v52, 7  ;;  %v2384_v14 = vrot.slane %v2380_v18, 4  ;;  %v3076_v33 = vrot.slane %v11019_v55, 1 }
 0x2d7   : > { %v3100_v12 = vpop.permute.xlu0 %3099  ;;  %3117 = vrot.lane.b32.xlu1 %v3075_v56, %s9844_s28  ;;  %v2366_v16 = vor.u32 %v2364_v48, %v2363_v47  ;;  %v2371_v19 = vrot.slane %v2369_v60, 7  ;;  %v2367_v21 = vrot.slane %v2363_v47, 4  ;;  %v2928_v40 = vrot.slane %v2926_v39, 1  ;;  %v11053_v48 = vld [vmem:[#allocation3 + $0x98] ss:$0 sps:$4 sm:$0x11]  }
 0x2d8   : > { %v11023_v45 = vsel %vm3170_vm6, %v3137_v62, %v3100_v12  ;;  %v2573_v4 = vsel %vm10732_vm4, %v2383_v63, %v2572_v49  ;;  %v2391_v22 = vor.u32 %v2389_v6, %v2388_v11  ;;  %v2393_v46 = vrot.slane %v2388_v11, 4 }
 0x2d9   : > { %3223 = vrot.lane.b32.xlu0 %v11023_v45, %s9845_s24  ;;  %2574 = vst [vmem:[#allocation3 + $0xa8] sm:$0xf] %v2573_v4  ;;  %v2566_v35 = vsel %vm10732_vm4, %v2366_v16, %v2565_v7  ;;  %v2374_v61 = vor.u32 %v2372_v42, %v2371_v19  ;;  %v2376_v59 = vrot.slane %v2371_v19, 4  ;;  %v3077_v15 = vrot.slane %v9632_v23, 1 }
 0x2da   : > { %2567 = vst [vmem:[#allocation3 + $0x9c] sm:$0xf] %v2566_v35  ;;  %v2392_v3 = vsel %vm10200_vm8, %v2384_v14, %v2391_v22  ;;  %v2577_v30 = vsel %vm10192_vm7, %v2393_v46, %v2576_v31  ;;  %v9378_v32 = vpop.f32.mrb[28].mxu0  ;;  %v2924_v25 = vshrl.u32 %v11019_v55, 16  ;;  %v2931_v44 = vshll.u32 %v9632_v23, 16 }
 0x2db   : > { %2575 = vst.msk [vmem:[#allocation3 + $0xac] sm:$0xf] %vm511_vm2, %v2392_v3  ;;  %2578 = vst [vmem:[#allocation3 + $0xb0] sm:$0x1] %v2577_v30  ;;  %v2375_v34 = vsel %vm10200_vm8, %v2367_v21, %v2374_v61  ;;  %v2570_v38 = vsel %vm10192_vm7, %v2376_v59, %v2569_v20  ;;  %v2022_v8 = vadd.f32 %v10997_v17, %v9378_v32  ;;  %v2013_v27 = vpop.f32.mrb[29].mxu0  ;;  %v2938_v18 = vshll.u32 %v11032_v28, 16 }
 0x2dc   : > { %2568 = vst.msk [vmem:[#allocation3 + $0xa0] sm:$0xf] %vm511_vm2, %v2375_v34  ;;  %2571 = vst [vmem:[#allocation3 + $0xa4] sm:$0x1] %v2570_v38  ;;  %v2014_v41 = vadd.f32 %v10997_v17, %v2013_v27  ;;  %v9379_v43 = vpop.f32.mrb[30].mxu0  ;;  %v2929_v52 = vor.u32 %v2928_v40, %v2924_v25  ;;  %v3078_v63 = vsel %vm1491_vm11, %v3076_v33, %v3077_v15  ;;  %v2933_v7 = vrot.slane %v2931_v44, 1 }
 0x2dd   : > { %3027 = vrot.lane.b32.xlu0 %v2922_v2, %s9843_s27  ;;  %v2058_v26 = vmax.f32 %v2022_v8, 0.0  ;;  %v2025_v56 = vadd.f32 %v10997_v17, %v9379_v43  ;;  %v2016_v5 = vpop.f32.mrb[31].mxu0  ;;  %v2936_v12 = vshrl.u32 %v11032_v28, 16  ;;  %v2940_v14 = vrot.slane %v2938_v18, 1  ;;  %v2586_v31 = vld [vmem:[#allocation3 + $0xc0] sm:$0xf] }
 0x2de   : > { %v2056_v13 = vmax.f32 %v2014_v41, 0.0  ;;  %v2017_v49 = vadd.f32 %v10997_v17, %v2016_v5  ;;  %v3104_v17 = vpop.permute.xlu1 %3103  ;;  %v2934_v4 = vsel %vm1238_vm12, %v2929_v52, %v2933_v7  ;;  %v2579_v3 = vld [vmem:[#allocation3 + $0xb4] sm:$0xf]  ;;  %v2590_v38 = vld [vmem:[#allocation3 + $0xc8] sm:$0x1] }
 0x2df   : > { %v8867_v54 = vpack.c.bf16 %v2058_v26, %v2058_v26  ;;  %v2059_v47 = vmax.f32 %v2025_v56, 0.0  ;;  %v2941_v32 = vor.u32 %v2940_v14, %v2936_v12  ;;  %v2583_v26 = vld [vmem:[#allocation3 + $0xbc] sm:$0x1] }
 0x2e0   : > { %v8865_v60 = vpack.c.bf16 %v2056_v13, %v2056_v13  ;;  %v2057_v62 = vmax.f32 %v2017_v49, 0.0 }
 0x2e1   : > { %3225 = vrot.lane.b32.xlu0 %v11011_v37, %s9845_s24  ;;  %v2412_v6 = vshrl.u32 %v8867_v54, 16  ;;  %v8868_v42 = vpack.c.bf16 %v2059_v47, %v2059_v47  ;;  %v2415_v22 = vshll.u32 %v8867_v54, 16 }
 0x2e2   : > { %v3014_v11 = vpop.permute.xlu0 %3013  ;;  %v2395_v19 = vshrl.u32 %v8865_v60, 16  ;;  %v8866_v20 = vpack.c.bf16 %v2057_v62, %v2057_v62  ;;  %v2398_v61 = vshll.u32 %v8865_v60, 16  ;;  %v11097_v12 = vld [vmem:[#allocation3 + $0xa8] sm:$0xff]  }
 0x2e3   : > { %v3141_v16 = vsel %vm3133_vm5, %v10801_v51, %v3014_v11  ;;  %v2414_v21 = vrot.slane %v2412_v6, 7  ;;  %v2420_v23 = vshrl.u32 %v8868_v42, 16  ;;  %v2943_v51 = vshll.u32 %v11053_v48, 16  ;;  %v11069_v40 = vld [vmem:[#allocation3 + $0x9c] sm:$0xff]  }
 0x2e4   : > { %v11063_v46 = vsel %vm3170_vm6, %v3141_v16, %v3104_v17  ;;  %v2397_v35 = vrot.slane %v2395_v19, 7  ;;  %v2403_v59 = vshrl.u32 %v8866_v20, 16  ;;  %v2423_v2 = vshll.u32 %v8868_v42, 16  ;;  %v9636_v47 = vld [vmem:[#allocation3 + $0xa4] ss:$0 sps:$4 sm:$0x11]  }
 0x2e5   : > { %3258 = vrot.lane.b32.xlu1 %v11063_v46, %s9844_s28  ;;  %3029 = vrot.lane.b32.xlu0 %v2934_v4, %s9843_s27  ;;  %v2417_v39 = vor.u32 %v2415_v22, %v2414_v21  ;;  %v2422_v30 = vrot.slane %v2420_v23, 7  ;;  %v2418_v33 = vrot.slane %v2414_v21, 4  ;;  %v2406_v27 = vshll.u32 %v8866_v20, 16  ;;  %v9638_v21 = vld [vmem:[#allocation3 + $0xb0] ss:$0 sps:$4 sm:$0x11]  }
 0x2e6   : > { %v2400_v34 = vor.u32 %v2398_v61, %v2397_v35  ;;  %v2405_v8 = vrot.slane %v2403_v59, 7  ;;  %v2401_v15 = vrot.slane %v2397_v35, 4  ;;  %v2945_v54 = vrot.slane %v2943_v51, 1 }
 0x2e7   : > { %v2587_v41 = vsel %vm10732_vm4, %v2417_v39, %v2586_v31  ;;  %v2425_v25 = vor.u32 %v2423_v2, %v2422_v30  ;;  %v2427_v44 = vrot.slane %v2422_v30, 4  ;;  %v3079_v11 = vrot.slane %v11032_v28, 1 }
 0x2e8   : > { %v3016_v43 = vpop.permute.xlu0 %3015  ;;  %2588 = vst [vmem:[#allocation3 + $0xc0] sm:$0xf] %v2587_v41  ;;  %v2580_v5 = vsel %vm10732_vm4, %v2400_v34, %v2579_v3  ;;  %v2408_v18 = vor.u32 %v2406_v27, %v2405_v8  ;;  %v2410_v13 = vrot.slane %v2405_v8, 4  ;;  %v3080_v6 = vrot.slane %v11053_v48, 1 }
 0x2e9   : > { %v3143_v56 = vsel %vm3133_vm5, %v10818_v53, %v3016_v43  ;;  %3119 = vrot.lane.b32.xlu1 %v3078_v63, %s9844_s28  ;;  %3227 = vrot.lane.b32.xlu0 %v11063_v46, %s9845_s24  ;;  %2581 = vst [vmem:[#allocation3 + $0xb4] sm:$0xf] %v2580_v5  ;;  %v2426_v49 = vsel %vm10200_vm8, %v2418_v33, %v2425_v25  ;;  %v3106_v53 = vpop.permute.xlu1 %3105  ;;  %v2950_v63 = vshll.u32 %v11069_v40, 16  ;;  %v2948_v16 = vshrl.u32 %v11069_v40, 16 }
 0x2ea   : > { %v2591_v52 = vsel %vm10192_vm7, %v2427_v44, %v2590_v38  ;;  %2589 = vst.msk [vmem:[#allocation3 + $0xc4] sm:$0xf] %vm511_vm2, %v2426_v49  ;;  %v2409_v60 = vsel %vm10200_vm8, %v2401_v15, %v2408_v18  ;;  %v2584_v62 = vsel %vm10192_vm7, %v2410_v13, %v2583_v26  ;;  %v11092_v7 = vsel %vm3170_vm6, %v3143_v56, %v3106_v53 }
 0x2eb   : > { %2592 = vst [vmem:[#allocation3 + $0xc8] sm:$0x1] %v2591_v52  ;;  %2582 = vst.msk [vmem:[#allocation3 + $0xb8] sm:$0xf] %vm511_vm2, %v2409_v60  ;;  %v2946_v42 = vsel %vm1238_vm12, %v2941_v32, %v2945_v54  ;;  %v2952_v14 = vrot.slane %v2950_v63, 1  ;;  %v2955_v31 = vshll.u32 %v9636_v47, 16  ;;  %v3081_v19 = vsel %vm1491_vm11, %v3079_v11, %v3080_v6 }
 0x2ec   : > { %2585 = vst [vmem:[#allocation3 + $0xbc] sm:$0x1] %v2584_v62  ;;  %v2962_v4 = vshll.u32 %v11097_v12, 16  ;;  %v3082_v35 = vrot.slane %v11069_v40, 1  ;;  %v3083_v59 = vrot.slane %v9636_v47, 1  ;;  %v2960_v30 = vshrl.u32 %v11097_v12, 16 }
 0x2ed   : > { %3260 = vrot.lane.b32.xlu1 %v11092_v7, %s9844_s28  ;;  %3031 = vrot.lane.b32.xlu0 %v2946_v42, %s9843_s27  ;;  %v2953_v20 = vor.u32 %v2952_v14, %v2948_v16  ;;  %v2957_v22 = vrot.slane %v2955_v31, 1  ;;  %v3108_v23 = vpop.permute.xlu1 %3107  ;;  %v2967_v2 = vshll.u32 %v9638_v21, 16  ;;  %v3085_v15 = vrot.slane %v11097_v12, 1  ;;  %v11149_v63 = vld [vmem:[#allocation3 + $0xcc] sm:$0xff]  }
 0x2ee   : > { %v3018_v17 = vpop.permute.xlu0 %3017  ;;  %v2964_v39 = vrot.slane %v2962_v4, 1  ;;  %v3084_v32 = vsel %vm1491_vm11, %v3082_v35, %v3083_v59  ;;  %v3086_v44 = vrot.slane %v9638_v21, 1  ;;  %v2998_v4 = vshll.u32 %v11149_v63, 16 }
 0x2ef   : > { %v3145_v48 = vsel %vm3133_vm5, %v10829_v10, %v3018_v17  ;;  %v2958_v51 = vsel %vm1238_vm12, %v2953_v20, %v2957_v22  ;;  %v2969_v27 = vrot.slane %v2967_v2, 1  ;;  %v9644_v20 = vld [vmem:[#allocation3 + $0xd4] ss:$0 sps:$4 sm:$0x11]  }
 0x2f0   : > { %v11112_v61 = vsel %vm3170_vm6, %v3145_v48, %v3108_v23  ;;  %v2965_v33 = vor.u32 %v2964_v39, %v2960_v30  ;;  %v3087_v54 = vsel %vm1491_vm11, %v3085_v15, %v3086_v44  ;;  %v3000_v39 = vrot.slane %v2998_v4, 1 }
 0x2f1   : > { %3121 = vrot.lane.b32.xlu1 %v3081_v19, %s9844_s28  ;;  %3229 = vrot.lane.b32.xlu0 %v11092_v7, %s9845_s24  ;;  %v3110_v43 = vpop.permute.xlu1 %3109  ;;  %v11133_v5 = vld [vmem:[#allocation3 + $0xc0] sm:$0xff]   ;;  %v3095_v15 = vrot.slane %v9644_v20, 1 }
 0x2f2   : > { %v11115_v3 = vld [vmem:[#allocation3 + $0xb4] sm:$0xff]   ;;  %v2970_v26 = vsel %vm1238_vm12, %v2965_v33, %v2969_v27  ;;  %v2986_v60 = vshll.u32 %v11133_v5, 16  ;;  %v9642_v62 = vld [vmem:[#allocation3 + $0xc8] ss:$0 sps:$4 sm:$0x11]   ;;  %v2984_v31 = vshrl.u32 %v11133_v5, 16 }
 0x2f3   : > { %v2974_v34 = vshll.u32 %v11115_v3, 16  ;;  %v9640_v41 = vld [vmem:[#allocation3 + $0xbc] ss:$0 sps:$4 sm:$0x11]   ;;  %v2972_v18 = vshrl.u32 %v11115_v3, 16  ;;  %v3088_v6 = vrot.slane %v11115_v3, 1 }
 0x2f4   : > { %v2979_v13 = vshll.u32 %v9640_v41, 16  ;;  %v3089_v42 = vrot.slane %v9640_v41, 1  ;;  %v2988_v17 = vrot.slane %v2986_v60, 1  ;;  %v2991_v19 = vshll.u32 %v9642_v62, 16 }
 0x2f5   : > { %3262 = vrot.lane.b32.xlu1 %v11112_v61, %s9844_s28  ;;  %3033 = vrot.lane.b32.xlu0 %v2958_v51, %s9843_s27  ;;  %v2976_v56 = vrot.slane %v2974_v34, 1  ;;  %v3112_v49 = vpop.permute.xlu1 %3111  ;;  %v2996_v51 = vshrl.u32 %v11149_v63, 16  ;;  %v3091_v2 = vrot.slane %v11133_v5, 1 }
 0x2f6   : > { %v3090_v48 = vsel %vm1491_vm11, %v3088_v6, %v3089_v42  ;;  %v2989_v21 = vor.u32 %v2988_v17, %v2984_v31  ;;  %v2993_v59 = vrot.slane %v2991_v19, 1 }
 0x2f7   : > { %v3020_v10 = vpop.permute.xlu0 %3019  ;;  %v2977_v53 = vor.u32 %v2976_v56, %v2972_v18  ;;  %v3001_v34 = vor.u32 %v3000_v39, %v2996_v51  ;;  %v9786_v56 = vld [vmem:[#allocation3] sm:$0xff]  }
 0x2f8   : > { %v3147_v38 = vsel %vm3133_vm5, %v10852_v57, %v3020_v10  ;;  %v3003_v10 = vshll.u32 %v9644_v20, 16 }
 0x2f9   : > { %3123 = vrot.lane.b32.xlu1 %v3084_v32, %s9844_s28  ;;  %3231 = vrot.lane.b32.xlu0 %v11112_v61, %s9845_s24  ;;  %v11130_v25 = vsel %vm3170_vm6, %v3147_v38, %v3110_v43  ;;  %v3114_v16 = vpop.permute.xlu1 %3113  ;;  %v3092_v32 = vrot.slane %v9642_v62, 1  ;;  %v3094_v43 = vrot.slane %v11149_v63, 1 }
 0x2fa   : > { %v3005_v38 = vrot.slane %v3003_v10, 1 }
 0x2fb   : > { %v3022_v8 = vpop.permute.xlu0 %3021  ;;  %v3093_v27 = vsel %vm1491_vm11, %v3091_v2, %v3092_v32  ;;  %v3096_v44 = vsel %vm1491_vm11, %v3094_v43, %v3095_v15 }
 0x2fc   : > { %v3149_v57 = vsel %vm3133_vm5, %v10864_v29, %v3022_v8  ;;  %v2981_v29 = vrot.slane %v2979_v13, 1 }
 0x2fd   : > { %3264 = vrot.lane.b32.xlu1 %v11130_v25, %s9844_s28  ;;  %3035 = vrot.lane.b32.xlu0 %v2970_v26, %s9843_s27  ;;  %v11143_v47 = vsel %vm3170_vm6, %v3149_v57, %v3112_v49  ;;  %v3098_v23 = vpop.permute.xlu1 %3097 }
 0x2fe   : > { %v2982_v14 = vsel %vm1238_vm12, %v2977_v53, %v2981_v29 }
 0x2ff   : > { %v3024_v52 = vpop.permute.xlu0 %3023 }
 0x300   : > { %v3151_v22 = vsel %vm3133_vm5, %v10876_v50, %v3024_v52  ;;  %v2994_v50 = vsel %vm1238_vm12, %v2989_v21, %v2993_v59 }
 0x301   : > { %3125 = vrot.lane.b32.xlu1 %v3087_v54, %s9844_s28  ;;  %3266 = vrot.lane.b32.xlu0 %v11143_v47, %s9844_s28  ;;  %v11166_v30 = vsel %vm3170_vm6, %v3151_v22, %v3114_v16  ;;  %v3116_v8 = vpop.permute.xlu1 %3115 }
 0x303   : > { %v3008_v11 = vpop.permute.xlu0 %3007 }
 0x304   : > { %v3135_v57 = vsel %vm3133_vm5, %v9786_v56, %v3008_v11 }
 0x305   : > { %3233 = vrot.lane.b32.xlu1 %v11130_v25, %s9845_s24  ;;  %3037 = vrot.lane.b32.xlu0 %v2982_v14, %s9843_s27  ;;  %v3172_v13 = vsel %vm3170_vm6, %v3135_v57, %v3098_v23 }
 0x307   : > { %v3026_v35 = vpop.permute.xlu0 %3025 }
 0x308   : > { %v3153_v33 = vsel %vm3133_vm5, %v10909_v36, %v3026_v35  ;;  %v3006_v36 = vsel %vm1238_vm12, %v3001_v34, %v3005_v38 }
 0x309   : > { %3127 = vrot.lane.b32.xlu1 %v3090_v48, %s9844_s28  ;;  %3235 = vrot.lane.b32.xlu0 %v11143_v47, %s9845_s24  ;;  %v11177_v41 = vsel %vm3170_vm6, %v3153_v33, %v3116_v8 }
 0x30d   : > { %3268 = vrot.lane.b32.xlu1 %v11166_v30, %s9844_s28  ;;  %3039 = vrot.lane.b32.xlu0 %v2994_v50, %s9843_s27 }
 0x311   : > { %3129 = vrot.lane.b32.xlu1 %v3093_v27, %s9844_s28  ;;  %3270 = vrot.lane.b32.xlu0 %v11177_v41, %s9844_s28 }
 0x315   : > { %3237 = vrot.lane.b32.xlu1 %v11166_v30, %s9845_s24  ;;  %3041 = vrot.lane.b32.xlu0 %v3006_v36, %s9843_s27 }
 0x319   : > { %3131 = vrot.lane.b32.xlu1 %v3096_v44, %s9844_s28  ;;  %3239 = vrot.lane.b32.xlu0 %v11177_v41, %s9845_s24 }
 0x345   : > { %v3257_v26 = vpop.permute.xlu1 %3256 }
 0x346   : > { %9384 = vmatprep.mubr.msk.bf16.mxu0 %vm3133_vm5, %v3257_v26 }
 0x349   : > { %v3118_v53 = vpop.permute.xlu1 %3117 }
 0x34b   : > { %v3224_v18 = vpop.permute.xlu0 %3223 }
 0x34c   : > { %v3338_v49 = vsel %vm3170_vm6, %v3224_v18, %v3257_v26  ;;  %v3290_v52 = vsel %vm3288_vm9, %v3172_v13, %v3224_v18 }
 0x34d   : > { %3600 = vmatprep.mubr.bf16.mxu1 %v3338_v49 }
 0x34e   : > { %3601 = vmatmul.mubr.bf16.vlgmr.msra.gmra.mrb[0].mxu1 %v3290_v52 }
 0x34f   : > { %v3028_v54 = vpop.permute.xlu0 %3027 }
 0x350   : > { %v3155_v60 = vsel %vm3133_vm5, %v10986_v24, %v3028_v54 }
 0x351   : > { %v11199_v29 = vsel %vm3170_vm6, %v3155_v60, %v3118_v53 }
 0x352   : > { %3272 = vrot.lane.b32.xlu1 %v11199_v29, %s9844_s28 }
 0x353   : > { %v3226_v62 = vpop.permute.xlu0 %3225 }
 0x354   : > { %v3293_v6 = vsel %vm3288_vm9, %v11023_v45, %v3226_v62 }
 0x356   : > { %3241 = vrot.lane.b32.xlu1 %v11199_v29, %s9845_s24 }
 0x357   : > { %v3259_v11 = vpop.permute.xlu1 %3258  ;;  %v3030_v42 = vpop.permute.xlu0 %3029 }
 0x358   : > { %9385 = vmatmul.mubr.msk.bf16.vlgmr.msra.gmra.mrb[32].mxu0 %vm3133_vm5, %v3259_v11  ;;  %v3341_v14 = vsel %vm3170_vm6, %v3226_v62, %v3259_v11  ;;  %v3157_v24 = vsel %vm3133_vm5, %v11019_v55, %v3030_v42 }
 0x359   : > { %3608 = vmatprep.mubr.bf16.mxu1 %v3341_v14 }
 0x35a   : > { %3609 = vmatmul.mubr.bf16.gmra.mrb[4].mxu1 %v3293_v6 }
 0x35b   : > { %v3120_v17 = vpop.permute.xlu1 %3119  ;;  %v3228_v16 = vpop.permute.xlu0 %3227 }
 0x35c   : > { %v11212_v31 = vsel %vm3170_vm6, %v3157_v24, %v3120_v17  ;;  %v3296_v45 = vsel %vm3288_vm9, %v11011_v37, %v3228_v16 }
 0x35d   : > { %3274 = vrot.lane.b32.xlu0 %v11212_v31, %s9844_s28 }
 0x35f   : > { %v3261_v19 = vpop.permute.xlu1 %3260  ;;  %v3032_v20 = vpop.permute.xlu0 %3031 }
 0x360   : > { %9388 = vmatprep.mubr.msk.bf16.mxu0 %vm3133_vm5, %v3261_v19  ;;  %v3344_v4 = vsel %vm3170_vm6, %v3228_v16, %v3261_v19  ;;  %v3159_v55 = vsel %vm3133_vm5, %v11032_v28, %v3032_v20 }
 0x361   : > { %3616 = vmatprep.mubr.bf16.mxu1 %v3344_v4  ;;  %3243 = vrot.lane.b32.xlu0 %v11212_v31, %s9845_s24 }
 0x362   : > { %3617 = vmatmul.mubr.bf16.gmra.mrb[8].mxu1 %v3296_v45 }
 0x363   : > { %v3122_v48 = vpop.permute.xlu1 %3121  ;;  %v3230_v21 = vpop.permute.xlu0 %3229 }
 0x364   : > { %v11225_v22 = vsel %vm3170_vm6, %v3159_v55, %v3122_v48  ;;  %v3299_v23 = vsel %vm3288_vm9, %v11063_v46, %v3230_v21 }
 0x365   : > { %3276 = vrot.lane.b32.xlu1 %v11225_v22, %s9844_s28 }
 0x367   : > { %v3263_v37 = vpop.permute.xlu1 %3262  ;;  %v3034_v35 = vpop.permute.xlu0 %3033 }
 0x368   : > { %9389 = vmatmul.mubr.msk.bf16.gmra.mrb[36].mxu0 %vm3133_vm5, %v3263_v37  ;;  %v3347_v59 = vsel %vm3170_vm6, %v3230_v21, %v3263_v37  ;;  %v3161_v28 = vsel %vm3133_vm5, %v11069_v40, %v3034_v35 }
 0x369   : > { %3624 = vmatprep.mubr.bf16.mxu1 %v3347_v59  ;;  %3245 = vrot.lane.b32.xlu1 %v11225_v22, %s9845_s24 }
 0x36a   : > { %3625 = vmatmul.mubr.bf16.gmra.mrb[12].mxu1 %v3299_v23 }
 0x36b   : > { %v3124_v51 = vpop.permute.xlu1 %3123  ;;  %v3232_v39 = vpop.permute.xlu0 %3231 }
 0x36c   : > { %v11238_v10 = vsel %vm3170_vm6, %v3161_v28, %v3124_v51  ;;  %v3302_v2 = vsel %vm3288_vm9, %v11092_v7, %v3232_v39 }
 0x36d   : > { %3278 = vrot.lane.b32.xlu0 %v11238_v10, %s9844_s28 }
 0x36f   : > { %v3265_v46 = vpop.permute.xlu1 %3264  ;;  %v3036_v32 = vpop.permute.xlu0 %3035 }
 0x370   : > { %9392 = vmatprep.mubr.msk.bf16.mxu0 %vm3133_vm5, %v3265_v46  ;;  %v3350_v50 = vsel %vm3170_vm6, %v3232_v39, %v3265_v46  ;;  %v3163_v40 = vsel %vm3133_vm5, %v11097_v12, %v3036_v32 }
 0x371   : > { %3632 = vmatprep.mubr.bf16.mxu1 %v3350_v50  ;;  %3247 = vrot.lane.b32.xlu0 %v11238_v10, %s9845_s24 }
 0x372   : > { %3633 = vmatmul.mubr.bf16.gmra.mrb[16].mxu1 %v3302_v2 }
 0x373   : > { %v3126_v33 = vpop.permute.xlu1 %3125  ;;  %v3267_v34 = vpop.permute.xlu0 %3266 }
 0x374   : > { %v11251_v38 = vsel %vm3170_vm6, %v3163_v40, %v3126_v33  ;;  %9393 = vmatmul.mubr.msk.bf16.gmra.mrb[40].mxu0 %vm3133_vm5, %v3267_v34 }
 0x375   : > { %3280 = vrot.lane.b32.xlu1 %v11251_v38, %s9844_s28 }
 0x377   : > { %v3234_v7 = vpop.permute.xlu1 %3233  ;;  %v3038_v8 = vpop.permute.xlu0 %3037 }
 0x378   : > { %v3353_v27 = vsel %vm3170_vm6, %v3234_v7, %v3267_v34  ;;  %v3305_v12 = vsel %vm3288_vm9, %v11112_v61, %v3234_v7  ;;  %v3165_v36 = vsel %vm3133_vm5, %v11115_v3, %v3038_v8 }
 0x379   : > { %3640 = vmatprep.mubr.bf16.mxu1 %v3353_v27  ;;  %3249 = vrot.lane.b32.xlu1 %v11251_v38, %s9845_s24 }
 0x37a   : > { %3641 = vmatmul.mubr.bf16.gmra.mrb[20].mxu1 %v3305_v12 }
 0x37b   : > { %v3128_v43 = vpop.permute.xlu1 %3127  ;;  %v3236_v15 = vpop.permute.xlu0 %3235 }
 0x37c   : > { %v11264_v44 = vsel %vm3170_vm6, %v3165_v36, %v3128_v43  ;;  %v3308_v56 = vsel %vm3288_vm9, %v11130_v25, %v3236_v15 }
 0x37d   : > { %3282 = vrot.lane.b32.xlu0 %v11264_v44, %s9844_s28 }
 0x37f   : > { %v3269_v26 = vpop.permute.xlu1 %3268  ;;  %v3040_v57 = vpop.permute.xlu0 %3039 }
 0x380   : > { %9396 = vmatprep.mubr.msk.bf16.mxu0 %vm3133_vm5, %v3269_v26  ;;  %v3356_v61 = vsel %vm3170_vm6, %v3236_v15, %v3269_v26  ;;  %v3167_v3 = vsel %vm3133_vm5, %v11133_v5, %v3040_v57 }
 0x381   : > { %3648 = vmatprep.mubr.bf16.mxu1 %v3356_v61  ;;  %3251 = vrot.lane.b32.xlu0 %v11264_v44, %s9845_s24 }
 0x382   : > { %3649 = vmatmul.mubr.bf16.gmra.mrb[24].mxu1 %v3308_v56 }
 0x383   : > { %v3130_v18 = vpop.permute.xlu1 %3129  ;;  %v3271_v13 = vpop.permute.xlu0 %3270 }
 0x384   : > { %v3204_v49 = vsel %vm3170_vm6, %v3167_v3, %v3130_v18  ;;  %9397 = vmatmul.mubr.msk.bf16.gmra.mrb[44].mxu0 %vm3133_vm5, %v3271_v13 }
 0x385   : > { %3284 = vrot.lane.b32.xlu1 %v3204_v49, %s9844_s28 }
 0x387   : > { %v3238_v25 = vpop.permute.xlu1 %3237  ;;  %v3042_v52 = vpop.permute.xlu0 %3041 }
 0x388   : > { %v3359_v54 = vsel %vm3170_vm6, %v3238_v25, %v3271_v13  ;;  %v3311_v53 = vsel %vm3288_vm9, %v11143_v47, %v3238_v25  ;;  %v3169_v5 = vsel %vm3133_vm5, %v11149_v63, %v3042_v52 }
 0x389   : > { %3656 = vmatprep.mubr.bf16.mxu1 %v3359_v54  ;;  %3253 = vrot.lane.b32.xlu1 %v3204_v49, %s9845_s24 }
 0x38a   : > { %3657 = vmatmul.mubr.bf16.gmra.mrb[28].mxu1 %v3311_v53 }
 0x38b   : > { %v3132_v60 = vpop.permute.xlu1 %3131  ;;  %v3240_v11 = vpop.permute.xlu0 %3239 }
 0x38c   : > { %v3206_v62 = vsel %vm3170_vm6, %v3169_v5, %v3132_v60  ;;  %v3314_v14 = vsel %vm3288_vm9, %v11166_v30, %v3240_v11 }
 0x38d   : > { %3286 = vrot.lane.b32.xlu0 %v3206_v62, %s9844_s28 }
 0x3c4   : > { %v3273_v6 = vpop.permute.xlu1 %3272 }
 0x3c5   : > { %9400 = vmatprep.mubr.msk.bf16.mxu0 %vm3133_vm5, %v3273_v6  ;;  %v3362_v42 = vsel %vm3170_vm6, %v3240_v11, %v3273_v6 }
 0x3c6   : > { %3664 = vmatprep.mubr.bf16.mxu1 %v3362_v42 }
 0x3c7   : > { %3665 = vmatmul.mubr.bf16.gmra.mrb[32].mxu1 %v3314_v14 }
 0x3c8   : > { %v3242_v47 = vpop.permute.xlu1 %3241 }
 0x3c9   : > { %v3317_v17 = vsel %vm3288_vm9, %v11177_v41, %v3242_v47 }
 0x3cf   : > { %v3275_v24 = vpop.permute.xlu0 %3274 }
 0x3d0   : > { %9401 = vmatmul.mubr.msk.bf16.gmra.mrb[48].mxu0 %vm3133_vm5, %v3275_v24  ;;  %v3365_v63 = vsel %vm3170_vm6, %v3242_v47, %v3275_v24 }
 0x3d1   : > { %3672 = vmatprep.mubr.bf16.mxu1 %v3365_v63 }
 0x3d2   : > { %3673 = vmatmul.mubr.bf16.gmra.mrb[36].mxu1 %v3317_v17 }
 0x3d3   : > { %v3244_v16 = vpop.permute.xlu0 %3243 }
 0x3d4   : > { %v3320_v30 = vsel %vm3288_vm9, %v11199_v29, %v3244_v16 }
 0x3d7   : > { %v3277_v19 = vpop.permute.xlu1 %3276 }
 0x3d8   : > { %9404 = vmatprep.mubr.msk.bf16.mxu0 %vm3133_vm5, %v3277_v19  ;;  %v3368_v45 = vsel %vm3170_vm6, %v3244_v16, %v3277_v19 }
 0x3d9   : > { %3680 = vmatprep.mubr.bf16.mxu1 %v3368_v45 }
 0x3da   : > { %3681 = vmatmul.mubr.bf16.gmra.mrb[40].mxu1 %v3320_v30 }
 0x3db   : > { %v3246_v20 = vpop.permute.xlu1 %3245 }
 0x3dc   : > { %v3323_v41 = vsel %vm3288_vm9, %v11212_v31, %v3246_v20 }
 0x3df   : > { %v3279_v4 = vpop.permute.xlu0 %3278 }
 0x3e0   : > { %9405 = vmatmul.mubr.msk.bf16.gmra.mrb[52].mxu0 %vm3133_vm5, %v3279_v4  ;;  %v3371_v55 = vsel %vm3170_vm6, %v3246_v20, %v3279_v4 }
 0x3e1   : > { %3688 = vmatprep.mubr.bf16.mxu1 %v3371_v55  ;;  %v4338_v55 = vld [vmem:[#allocation3 + $0xc] sm:$0xf] }
 0x3e2   : > { %3689 = vmatmul.mubr.bf16.gmra.mrb[44].mxu1 %v3323_v41 }
 0x3e3   : > { %v3248_v48 = vpop.permute.xlu0 %3247 }
 0x3e4   : > { %v3326_v29 = vsel %vm3288_vm9, %v11225_v22, %v3248_v48 }
 0x3e7   : > { %v3281_v21 = vpop.permute.xlu1 %3280 }
 0x3e8   : > { %9408 = vmatprep.mubr.msk.bf16.mxu0 %vm3133_vm5, %v3281_v21  ;;  %v3374_v37 = vsel %vm3170_vm6, %v3248_v48, %v3281_v21 }
 0x3e9   : > { %3696 = vmatprep.mubr.bf16.mxu1 %v3374_v37 }
 0x3ea   : > { %3697 = vmatmul.mubr.bf16.gmra.mrb[48].mxu1 %v3326_v29 }
 0x3eb   : > { %v3250_v23 = vpop.permute.xlu1 %3249 }
 0x3ec   : > { %v3329_v31 = vsel %vm3288_vm9, %v11238_v10, %v3250_v23 }
 0x3ef   : > { %v3283_v35 = vpop.permute.xlu0 %3282 }
 0x3f0   : > { %9409 = vmatmul.mubr.msk.bf16.gmra.mrb[56].mxu0 %vm3133_vm5, %v3283_v35  ;;  %v3377_v59 = vsel %vm3170_vm6, %v3250_v23, %v3283_v35 }
 0x3f1   : > { %3704 = vmatprep.mubr.bf16.mxu1 %v3377_v59  ;;  %v4342_v59 = vld [vmem:[#allocation3 + $0x14] sm:$0x1] }
 0x3f2   : > { %3705 = vmatmul.mubr.bf16.gmra.mrb[52].mxu1 %v3329_v31 }
 0x3f3   : > { %v3252_v28 = vpop.permute.xlu0 %3251 }
 0x3f4   : > { %v3332_v22 = vsel %vm3288_vm9, %v11251_v38, %v3252_v28  ;;  %v11322_v38 = vld [vmem:[%s12745_s4] ss:$0 sm:$0xff] }
 0x3f7   : > { %v3285_v51 = vpop.permute.xlu1 %3284 }
 0x3f8   : > { %9412 = vmatprep.mubr.msk.bf16.mxu0 %vm3133_vm5, %v3285_v51  ;;  %v3380_v39 = vsel %vm3170_vm6, %v3252_v28, %v3285_v51 }
 0x3f9   : > { %3712 = vmatprep.mubr.bf16.mxu1 %v3380_v39 }
 0x3fa   : > { %3713 = vmatmul.mubr.bf16.gmra.mrb[56].mxu1 %v3332_v22 }
 0x3fb   : > { %v3254_v46 = vpop.permute.xlu1 %3253 }
 0x3fc   : > { %v3335_v10 = vsel %vm3288_vm9, %v11264_v44, %v3254_v46 }
 0x3ff   : > { %v3287_v2 = vpop.permute.xlu0 %3286 }
 0x400   : > { %9413 = vmatmul.mubr.msk.bf16.gmra.mrb[60].mxu0 %vm3133_vm5, %v3287_v2  ;;  %v3383_v32 = vsel %vm3170_vm6, %v3254_v46, %v3287_v2 }
 0x401   : > { %3720 = vmatprep.mubr.bf16.mxu1 %v3383_v32 }
 0x402   : > { %3721 = vmatmul.mubr.bf16.gmra.mrb[60].mxu1 %v3335_v10 }
 0x421   : > { %v8968_v50 = vpop.f32.mrb[0].mxu1 }
 0x422   : > { %v8969_v40 = vpop.f32.mrb[1].mxu1 }
 0x423   : > { %v8970_v33 = vadd.f32 %v8969_v40, %v8968_v50  ;;  %v8971_v34 = vpop.f32.mrb[2].mxu1 }
 0x424   : > { %v8972_v7 = vpop.f32.mrb[3].mxu1 }
 0x425   : > { %v8973_v8 = vadd.f32 %v8972_v7, %v8971_v34  ;;  %v3603_v27 = vadd.f32 %v8970_v33, %v11322_v38 }
 0x427   : > { %v3606_v36 = vadd.f32 %v8973_v8, %v11322_v38 }
 0x42b   : > { %v9386_v12 = vpop.f32.mrb[32].mxu0 }
 0x42c   : > { %v3763_v43 = vpop.f32.mrb[33].mxu0 }
 0x42d   : > { %v3764_v15 = vadd.f32 %v3763_v43, %v3603_v27  ;;  %v9387_v44 = vpop.f32.mrb[34].mxu0  ;;  %v8974_v26 = vpop.f32.mrb[4].mxu1  ;;  %v4345_v27 = vld [vmem:[#allocation3 + $0x18] sm:$0xf] }
 0x42e   : > { %v3766_v56 = vpop.f32.mrb[35].mxu0  ;;  %v8975_v57 = vpop.f32.mrb[5].mxu1 }
 0x42f   : > { %v3890_v61 = vmax.f32 %v3764_v15, 0.0  ;;  %v3767_v3 = vadd.f32 %v3766_v56, %v3606_v36  ;;  %v8976_v18 = vadd.f32 %v8975_v57, %v8974_v26  ;;  %v8977_v13 = vpop.f32.mrb[6].mxu1 }
 0x430   : > { %v8978_v49 = vpop.f32.mrb[7].mxu1 }
 0x431   : > { %v8869_v25 = vpack.c.bf16 %v3890_v61, %v3890_v61  ;;  %v3891_v52 = vmax.f32 %v3767_v3, 0.0  ;;  %v3611_v54 = vadd.f32 %v8976_v18, %v11322_v38  ;;  %v8979_v53 = vadd.f32 %v8978_v49, %v8977_v13 }
 0x433   : > { %v4019_v5 = vshrl.u32 %v8869_v25, 16  ;;  %v8870_v60 = vpack.c.bf16 %v3891_v52, %v3891_v52  ;;  %v3772_v62 = vadd.f32 %v9386_v12, %v3611_v54  ;;  %v3614_v11 = vadd.f32 %v8979_v53, %v11322_v38 }
 0x434   : > { %v4022_v42 = vshll.u32 %v8869_v25, 16  ;;  %v4349_v25 = vld [vmem:[#allocation3 + $0x20] sm:$0x1] }
 0x435   : > { %v4021_v6 = vrot.slane %v4019_v5, 7  ;;  %v4027_v14 = vshrl.u32 %v8870_v60, 16  ;;  %v3892_v47 = vmax.f32 %v3772_v62, 0.0  ;;  %v8980_v24 = vpop.f32.mrb[8].mxu1  ;;  %v3775_v63 = vadd.f32 %v9387_v44, %v3614_v11 }
 0x436   : > { %v8981_v17 = vpop.f32.mrb[9].mxu1  ;;  %v4030_v45 = vshll.u32 %v8870_v60, 16 }
 0x437   : > { %v4024_v16 = vor.u32 %v4022_v42, %v4021_v6  ;;  %v4029_v19 = vrot.slane %v4027_v14, 7  ;;  %v8871_v30 = vpack.c.bf16 %v3892_v47, %v3892_v47  ;;  %v8983_v20 = vpop.f32.mrb[10].mxu1  ;;  %v4025_v4 = vrot.slane %v4021_v6, 4 }
 0x438   : > { %v3893_v41 = vmax.f32 %v3775_v63, 0.0  ;;  %v8982_v48 = vadd.f32 %v8981_v17, %v8980_v24  ;;  %v8984_v21 = vpop.f32.mrb[11].mxu1 }
 0x439   : > { %v4339_v37 = vsel %vm10732_vm4, %v4024_v16, %v4338_v55  ;;  %v4032_v29 = vor.u32 %v4030_v45, %v4029_v19  ;;  %v4034_v23 = vrot.slane %v4029_v19, 4  ;;  %v4036_v35 = vshrl.u32 %v8871_v30, 16 }
 0x43a   : > { %4340 = vst [vmem:[#allocation3 + $0xc] sm:$0xf] %v4339_v37  ;;  %v8872_v31 = vpack.c.bf16 %v3893_v41, %v3893_v41  ;;  %v8985_v28 = vadd.f32 %v8984_v21, %v8983_v20  ;;  %v3619_v51 = vadd.f32 %v8982_v48, %v11322_v38  ;;  %v4039_v2 = vshll.u32 %v8871_v30, 16  ;;  %v4352_v20 = vld [vmem:[#allocation3 + $0x24] sm:$0xf] }
 0x43b   : > { %v4033_v39 = vsel %vm10200_vm8, %v4025_v4, %v4032_v29  ;;  %v4343_v22 = vsel %vm10192_vm7, %v4034_v23, %v4342_v59  ;;  %v4038_v46 = vrot.slane %v4036_v35, 7  ;;  %v9390_v32 = vpop.f32.mrb[36].mxu0 }
 0x43c   : > { %4341 = vst.msk [vmem:[#allocation3 + $0x10] sm:$0xf] %vm511_vm2, %v4033_v39  ;;  %4344 = vst [vmem:[#allocation3 + $0x14] sm:$0x1] %v4343_v22  ;;  %v4044_v10 = vshrl.u32 %v8872_v31, 16  ;;  %v3779_v50 = vpop.f32.mrb[37].mxu0  ;;  %v3622_v40 = vadd.f32 %v8985_v28, %v11322_v38 }
 0x43d   : > { %v4041_v33 = vor.u32 %v4039_v2, %v4038_v46  ;;  %v3780_v34 = vadd.f32 %v3779_v50, %v3619_v51  ;;  %v9391_v7 = vpop.f32.mrb[38].mxu0  ;;  %v8986_v8 = vpop.f32.mrb[12].mxu1  ;;  %v4047_v36 = vshll.u32 %v8872_v31, 16  ;;  %v4042_v3 = vrot.slane %v4038_v46, 4 }
 0x43e   : > { %v4046_v12 = vrot.slane %v4044_v10, 7  ;;  %v3782_v43 = vpop.f32.mrb[39].mxu0  ;;  %v8987_v15 = vpop.f32.mrb[13].mxu1 }
 0x43f   : > { %v4346_v44 = vsel %vm10732_vm4, %v4041_v33, %v4345_v27  ;;  %v3894_v26 = vmax.f32 %v3780_v34, 0.0  ;;  %v3783_v56 = vadd.f32 %v3782_v43, %v3622_v40  ;;  %v8988_v57 = vadd.f32 %v8987_v15, %v8986_v8  ;;  %v8989_v61 = vpop.f32.mrb[14].mxu1  ;;  %v4356_v40 = vld [vmem:[#allocation3 + $0x2c] sm:$0x1] }
 0x440   : > { %4347 = vst [vmem:[#allocation3 + $0x18] sm:$0xf] %v4346_v44  ;;  %v4049_v18 = vor.u32 %v4047_v36, %v4046_v12  ;;  %v4051_v13 = vrot.slane %v4046_v12, 4  ;;  %v8990_v49 = vpop.f32.mrb[15].mxu1 }
 0x441   : > { %v8873_v52 = vpack.c.bf16 %v3894_v26, %v3894_v26  ;;  %v3895_v54 = vmax.f32 %v3783_v56, 0.0  ;;  %v3627_v53 = vadd.f32 %v8988_v57, %v11322_v38  ;;  %v8991_v5 = vadd.f32 %v8990_v49, %v8989_v61 }
 0x442   : > { %v4050_v60 = vsel %vm10200_vm8, %v4042_v3, %v4049_v18  ;;  %v4350_v62 = vsel %vm10192_vm7, %v4051_v13, %v4349_v25 }
 0x443   : > { %4348 = vst.msk [vmem:[#allocation3 + $0x1c] sm:$0xf] %vm511_vm2, %v4050_v60  ;;  %4351 = vst [vmem:[#allocation3 + $0x20] sm:$0x1] %v4350_v62  ;;  %v4053_v11 = vshrl.u32 %v8873_v52, 16  ;;  %v8874_v6 = vpack.c.bf16 %v3895_v54, %v3895_v54  ;;  %v3788_v42 = vadd.f32 %v9390_v32, %v3627_v53  ;;  %v4056_v14 = vshll.u32 %v8873_v52, 16 }
 0x444   : > { %v3630_v47 = vadd.f32 %v8991_v5, %v11322_v38  ;;  %v11346_v24 = vld [vmem:[#allocation3 + $0xc] sm:$0xff]   ;;  %v11348_v63 = vld [vmem:[#allocation3 + $0x14] ss:$0 sps:$4 sm:$0x11]  }
 0x445   : > { %v4055_v17 = vrot.slane %v4053_v11, 7  ;;  %v4061_v16 = vshrl.u32 %v8874_v6, 16  ;;  %v4064_v19 = vshll.u32 %v8874_v6, 16  ;;  %v3896_v45 = vmax.f32 %v3788_v42, 0.0  ;;  %v8992_v30 = vpop.f32.mrb[16].mxu1 }
 0x446   : > { %v3791_v4 = vadd.f32 %v9391_v7, %v3630_v47  ;;  %v8993_v55 = vpop.f32.mrb[17].mxu1  ;;  %v4661_v41 = vshrl.u32 %v11346_v24, 16  ;;  %v4663_v48 = vshll.u32 %v11346_v24, 16  ;;  %v4668_v21 = vshll.u32 %v11348_v63, 16  ;;  %v4359_v53 = vld [vmem:[#allocation3 + $0x30] sm:$0xf] }
 0x447   : > { %v4058_v37 = vor.u32 %v4056_v14, %v4055_v17  ;;  %v4059_v29 = vrot.slane %v4055_v17, 4  ;;  %v4063_v23 = vrot.slane %v4061_v16, 7  ;;  %v8875_v35 = vpack.c.bf16 %v3896_v45, %v3896_v45  ;;  %v8995_v59 = vpop.f32.mrb[18].mxu1  ;;  %v11353_v31 = vpop.f32.mrb[40].mxu0 }
 0x448   : > { %v3897_v28 = vmax.f32 %v3791_v4, 0.0  ;;  %v8994_v51 = vadd.f32 %v8993_v55, %v8992_v30  ;;  %v8996_v39 = vpop.f32.mrb[19].mxu1  ;;  %v3795_v22 = vpop.f32.mrb[41].mxu0  ;;  %v4665_v46 = vrot.slane %v4663_v48, 1  ;;  %v4670_v2 = vrot.slane %v4668_v21, 1 }
 0x449   : > { %v4353_v32 = vsel %vm10732_vm4, %v4058_v37, %v4352_v20  ;;  %v4066_v10 = vor.u32 %v4064_v19, %v4063_v23  ;;  %v4068_v50 = vrot.slane %v4063_v23, 4  ;;  %v4070_v33 = vshrl.u32 %v8875_v35, 16  ;;  %v11357_v34 = vpop.f32.mrb[42].mxu0 }
 0x44a   : > { %4354 = vst [vmem:[#allocation3 + $0x24] sm:$0xf] %v4353_v32  ;;  %v4073_v7 = vshll.u32 %v8875_v35, 16  ;;  %v8876_v8 = vpack.c.bf16 %v3897_v28, %v3897_v28  ;;  %v8997_v27 = vadd.f32 %v8996_v39, %v8995_v59  ;;  %v3635_v12 = vadd.f32 %v8994_v51, %v11322_v38  ;;  %v3798_v36 = vpop.f32.mrb[43].mxu0  ;;  %v11364_v56 = vld [vmem:[#allocation3 + $0x18] sm:$0xff]  }
 0x44b   : > { %v4067_v43 = vsel %vm10200_vm8, %v4059_v29, %v4066_v10  ;;  %v4357_v15 = vsel %vm10192_vm7, %v4068_v50, %v4356_v40  ;;  %v4072_v44 = vrot.slane %v4070_v33, 7  ;;  %v4666_v26 = vor.u32 %v4665_v46, %v4661_v41  ;;  %v9666_v55 = vld [vmem:[#allocation3 + $0x20] ss:$0 sps:$4 sm:$0x11]   ;;  %v4363_v41 = vld [vmem:[#allocation3 + $0x38] sm:$0x1] }
 0x44c   : > { %4355 = vst.msk [vmem:[#allocation3 + $0x28] sm:$0xf] %vm511_vm2, %v4067_v43  ;;  %4358 = vst [vmem:[#allocation3 + $0x2c] sm:$0x1] %v4357_v15  ;;  %v4078_v57 = vshrl.u32 %v8876_v8, 16  ;;  %v4081_v61 = vshll.u32 %v8876_v8, 16  ;;  %v3796_v3 = vadd.f32 %v3795_v22, %v3635_v12  ;;  %v3638_v18 = vadd.f32 %v8997_v27, %v11322_v38 }
 0x44d   : > { %v4075_v13 = vor.u32 %v4073_v7, %v4072_v44  ;;  %v4076_v49 = vrot.slane %v4072_v44, 4  ;;  %v4671_v25 = vsel %vm1238_vm12, %v4666_v26, %v4670_v2  ;;  %v8998_v52 = vpop.f32.mrb[20].mxu1  ;;  %v4903_v54 = vrot.slane %v11346_v24, 1  ;;  %v4366_v40 = vld [vmem:[#allocation3 + $0x3c] sm:$0xf] }
 0x44e   : > { %v4080_v5 = vrot.slane %v4078_v57, 7  ;;  %v3898_v60 = vmax.f32 %v3796_v3, 0.0  ;;  %4866 = vrot.lane.b32.xlu0 %v4671_v25, %s9843_s27  ;;  %v8999_v62 = vpop.f32.mrb[21].mxu1  ;;  %v3799_v11 = vadd.f32 %v3798_v36, %v3638_v18  ;;  %v4904_v6 = vrot.slane %v11348_v63, 1 }
 0x44f   : > { %v4360_v42 = vsel %vm10732_vm4, %v4075_v13, %v4359_v53  ;;  %v9000_v14 = vadd.f32 %v8999_v62, %v8998_v52  ;;  %v9001_v47 = vpop.f32.mrb[22].mxu1  ;;  %v4673_v17 = vshrl.u32 %v11364_v56, 16  ;;  %v4675_v16 = vshll.u32 %v11364_v56, 16 }
 0x450   : > { %4361 = vst [vmem:[#allocation3 + $0x30] sm:$0xf] %v4360_v42  ;;  %v4083_v19 = vor.u32 %v4081_v61, %v4080_v5  ;;  %v4085_v45 = vrot.slane %v4080_v5, 4  ;;  %v8877_v30 = vpack.c.bf16 %v3898_v60, %v3898_v60  ;;  %v3899_v20 = vmax.f32 %v3799_v11, 0.0  ;;  %v9002_v4 = vpop.f32.mrb[23].mxu1 }
 0x451   : > { %v3643_v48 = vadd.f32 %v9000_v14, %v11322_v38  ;;  %v9003_v63 = vadd.f32 %v9002_v4, %v9001_v47  ;;  %v4905_v21 = vsel %vm1491_vm11, %v4903_v54, %v4904_v6  ;;  %v4677_v37 = vrot.slane %v4675_v16, 1  ;;  %v4370_v6 = vld [vmem:[#allocation3 + $0x44] sm:$0x1] }
 0x452   : > { %v4084_v29 = vsel %vm10200_vm8, %v4076_v49, %v4083_v19  ;;  %v4364_v23 = vsel %vm10192_vm7, %v4085_v45, %v4363_v41  ;;  %v4087_v35 = vshrl.u32 %v8877_v30, 16  ;;  %v4090_v59 = vshll.u32 %v8877_v30, 16  ;;  %4956 = vrot.lane.b32.xlu0 %v4905_v21, %s9844_s28  ;;  %v4373_v41 = vld [vmem:[#allocation3 + $0x48] sm:$0xf] }
 0x453   : > { %4362 = vst.msk [vmem:[#allocation3 + $0x34] sm:$0xf] %vm511_vm2, %v4084_v29  ;;  %4365 = vst [vmem:[#allocation3 + $0x38] sm:$0x1] %v4364_v23  ;;  %v3804_v28 = vadd.f32 %v11353_v31, %v3643_v48  ;;  %v8878_v51 = vpack.c.bf16 %v3899_v20, %v3899_v20  ;;  %v3646_v39 = vadd.f32 %v9003_v63, %v11322_v38  ;;  %v4680_v2 = vshll.u32 %v9666_v55, 16  ;;  %v11387_v50 = vld [vmem:[#allocation3 + $0x24] sm:$0xff]  }
 0x454   : > { %v4678_v22 = vor.u32 %v4677_v37, %v4673_v17  ;;  %v4089_v46 = vrot.slane %v4087_v35, 7  ;;  %v4906_v32 = vrot.slane %v11364_v56, 1  ;;  %v4907_v10 = vrot.slane %v9666_v55, 1  ;;  %v9668_v26 = vld [vmem:[#allocation3 + $0x2c] ss:$0 sps:$4 sm:$0x11]  }
 0x455   : > { %v3900_v33 = vmax.f32 %v3804_v28, 0.0  ;;  %v4095_v7 = vshrl.u32 %v8878_v51, 16  ;;  %v4098_v8 = vshll.u32 %v8878_v51, 16  ;;  %v3807_v27 = vadd.f32 %v11357_v34, %v3646_v39  ;;  %v9004_v12 = vpop.f32.mrb[24].mxu1 }
 0x456   : > { %v4092_v36 = vor.u32 %v4090_v59, %v4089_v46  ;;  %v4093_v31 = vrot.slane %v4089_v46, 4  ;;  %v4682_v43 = vrot.slane %v4680_v2, 1  ;;  %v9005_v15 = vpop.f32.mrb[25].mxu1  ;;  %v4908_v44 = vsel %vm1491_vm11, %v4906_v32, %v4907_v10 }
 0x457   : > { %v8879_v57 = vpack.c.bf16 %v3900_v33, %v3900_v33  ;;  %v4097_v61 = vrot.slane %v4095_v7, 7  ;;  %v3901_v56 = vmax.f32 %v3807_v27, 0.0  ;;  %v9006_v3 = vadd.f32 %v9005_v15, %v9004_v12  ;;  %v9007_v18 = vpop.f32.mrb[26].mxu1  ;;  %v11391_v13 = vpop.f32.mrb[44].mxu0 }
 0x458   : > { %v4367_v49 = vsel %vm10732_vm4, %v4092_v36, %v4366_v40  ;;  %v4683_v34 = vsel %vm1238_vm12, %v4678_v22, %v4682_v43  ;;  %v9008_v25 = vpop.f32.mrb[27].mxu1  ;;  %v4909_v52 = vrot.slane %v11387_v50, 1  ;;  %v4910_v54 = vrot.slane %v9668_v26, 1  ;;  %v3811_v53 = vpop.f32.mrb[45].mxu0  ;;  %v4377_v43 = vld [vmem:[#allocation3 + $0x50] sm:$0x1] }
 0x459   : > { %4368 = vst [vmem:[#allocation3 + $0x3c] sm:$0xf] %v4367_v49  ;;  %v4104_v5 = vshrl.u32 %v8879_v57, 16  ;;  %v4107_v60 = vshll.u32 %v8879_v57, 16  ;;  %v4100_v62 = vor.u32 %v4098_v8, %v4097_v61  ;;  %v4102_v11 = vrot.slane %v4097_v61, 4  ;;  %4868 = vrot.lane.b32.xlu1 %v4683_v34, %s9843_s27  ;;  %v11398_v42 = vpop.f32.mrb[46].mxu0 }
 0x45a   : > { %v8880_v14 = vpack.c.bf16 %v3901_v56, %v3901_v56  ;;  %v9009_v47 = vadd.f32 %v9008_v25, %v9007_v18  ;;  %v4911_v17 = vsel %vm1491_vm11, %v4909_v52, %v4910_v54  ;;  %v3651_v16 = vadd.f32 %v9006_v3, %v11322_v38  ;;  %v3814_v19 = vpop.f32.mrb[47].mxu0  ;;  %v11402_v45 = vld [vmem:[#allocation3 + $0x30] sm:$0xff]   ;;  %v9670_v51 = vld [vmem:[#allocation3 + $0x38] ss:$0 sps:$4 sm:$0x11]  }
 0x45b   : > { %v4106_v30 = vrot.slane %v4104_v5, 7  ;;  %v4101_v20 = vsel %vm10200_vm8, %v4093_v31, %v4100_v62  ;;  %v4371_v4 = vsel %vm10192_vm7, %v4102_v11, %v4370_v6  ;;  %v4685_v55 = vshrl.u32 %v11387_v50, 16 }
 0x45c   : > { %4369 = vst.msk [vmem:[#allocation3 + $0x40] sm:$0xf] %vm511_vm2, %v4101_v20  ;;  %4372 = vst [vmem:[#allocation3 + $0x44] sm:$0x1] %v4371_v4  ;;  %v4112_v48 = vshrl.u32 %v8880_v14, 16  ;;  %v4115_v63 = vshll.u32 %v8880_v14, 16  ;;  %v3812_v21 = vadd.f32 %v3811_v53, %v3651_v16  ;;  %v3654_v28 = vadd.f32 %v9009_v47, %v11322_v38 }
 0x45d   : > { %v4687_v37 = vshll.u32 %v11387_v50, 16  ;;  %v4109_v29 = vor.u32 %v4107_v60, %v4106_v30  ;;  %v4110_v23 = vrot.slane %v4106_v30, 4  ;;  %4958 = vrot.lane.b32.xlu1 %v4908_v44, %s9844_s28  ;;  %v4692_v35 = vshll.u32 %v9668_v26, 16  ;;  %v9010_v59 = vpop.f32.mrb[28].mxu1 }
 0x45e   : > { %v4114_v39 = vrot.slane %v4112_v48, 7  ;;  %v3902_v22 = vmax.f32 %v3812_v21, 0.0  ;;  %v9011_v2 = vpop.f32.mrb[29].mxu1  ;;  %v4912_v32 = vrot.slane %v11402_v45, 1  ;;  %v3815_v33 = vadd.f32 %v3814_v19, %v3654_v28 }
 0x45f   : > { %v4689_v46 = vrot.slane %v4687_v37, 1  ;;  %v4374_v10 = vsel %vm10732_vm4, %v4109_v29, %v4373_v41  ;;  %v4694_v40 = vrot.slane %v4692_v35, 1  ;;  %v9012_v50 = vadd.f32 %v9011_v2, %v9010_v59  ;;  %v9013_v7 = vpop.f32.mrb[30].mxu1  ;;  %v4384_v59 = vld [vmem:[#allocation3 + $0x5c] sm:$0x1] }
 0x460   : > { %4375 = vst [vmem:[#allocation3 + $0x48] sm:$0xf] %v4374_v10  ;;  %v4117_v8 = vor.u32 %v4115_v63, %v4114_v39  ;;  %v4119_v27 = vrot.slane %v4114_v39, 4  ;;  %v8881_v12 = vpack.c.bf16 %v3902_v22, %v3902_v22  ;;  %v9014_v31 = vpop.f32.mrb[31].mxu1  ;;  %v3903_v44 = vmax.f32 %v3815_v33, 0.0 }
 0x461   : > { %v4690_v36 = vor.u32 %v4689_v46, %v4685_v55  ;;  %4960 = vrot.lane.b32.xlu1 %v4911_v17, %s9844_s28  ;;  %v3659_v15 = vadd.f32 %v9012_v50, %v11322_v38  ;;  %v4913_v26 = vrot.slane %v9670_v51, 1  ;;  %v9015_v57 = vadd.f32 %v9014_v31, %v9013_v7  ;;  %v4380_v17 = vld [vmem:[#allocation3 + $0x54] sm:$0xf] }
 0x462   : > { %v4118_v61 = vsel %vm10200_vm8, %v4110_v23, %v4117_v8  ;;  %v4378_v56 = vsel %vm10192_vm7, %v4119_v27, %v4377_v43  ;;  %v4121_v3 = vshrl.u32 %v8881_v12, 16  ;;  %v8882_v34 = vpack.c.bf16 %v3903_v44, %v3903_v44 }
 0x463   : > { %4376 = vst.msk [vmem:[#allocation3 + $0x4c] sm:$0xf] %vm511_vm2, %v4118_v61  ;;  %4379 = vst [vmem:[#allocation3 + $0x50] sm:$0x1] %v4378_v56  ;;  %v4695_v18 = vsel %vm1238_vm12, %v4690_v36, %v4694_v40  ;;  %v3820_v49 = vadd.f32 %v11391_v13, %v3659_v15  ;;  %v4914_v25 = vsel %vm1491_vm11, %v4912_v32, %v4913_v26  ;;  %v9671_v52 = vld [vmem:[#allocation3 + $0x3c] sm:$0xff]   ;;  %v4124_v53 = vshll.u32 %v8881_v12, 16 }
 0x464   : > { %v4123_v54 = vrot.slane %v4121_v3, 7  ;;  %4870 = vrot.lane.b32.xlu0 %v4695_v18, %s9843_s27  ;;  %v3662_v5 = vadd.f32 %v9015_v57, %v11322_v38  ;;  %v4699_v60 = vshll.u32 %v11402_v45, 16  ;;  %v9672_v62 = vld [vmem:[#allocation3 + $0x44] ss:$0 sps:$4 sm:$0x11]   ;;  %v4129_v6 = vshrl.u32 %v8882_v34, 16 }
 0x465   : > { %v3904_v11 = vmax.f32 %v3820_v49, 0.0  ;;  %4962 = vrot.lane.b32.xlu1 %v4914_v25, %s9844_s28  ;;  %v4697_v14 = vshrl.u32 %v11402_v45, 16  ;;  %v4704_v13 = vshll.u32 %v9670_v51, 16  ;;  %v4132_v16 = vshll.u32 %v8882_v34, 16  ;;  %v4387_v15 = vld [vmem:[#allocation3 + $0x60] sm:$0xf] }
 0x466   : > { %v4126_v47 = vor.u32 %v4124_v53, %v4123_v54  ;;  %v3823_v19 = vadd.f32 %v11398_v42, %v3662_v5  ;;  %v4701_v30 = vrot.slane %v4699_v60, 1  ;;  %v4131_v4 = vrot.slane %v4129_v6, 7 }
 0x467   : > { %v8883_v20 = vpack.c.bf16 %v3904_v11, %v3904_v11  ;;  %v4706_v55 = vrot.slane %v4704_v13, 1  ;;  %v4915_v41 = vrot.slane %v9671_v52, 1  ;;  %v4916_v37 = vrot.slane %v9672_v62, 1 }
 0x468   : > { %v4381_v48 = vsel %vm10732_vm4, %v4126_v47, %v4380_v17  ;;  %v3905_v63 = vmax.f32 %v3823_v19, 0.0  ;;  %v4702_v21 = vor.u32 %v4701_v30, %v4697_v14  ;;  %v4127_v29 = vrot.slane %v4123_v54, 4  ;;  %v4391_v54 = vld [vmem:[#allocation3 + $0x68] sm:$0x1]  ;;  %v9679_v47 = vld [vmem:[#allocation3] sm:$0xff]  }
 0x469   : > { %4382 = vst [vmem:[#allocation3 + $0x54] sm:$0xf] %v4381_v48  ;;  %v4138_v45 = vshrl.u32 %v8883_v20, 16  ;;  %v4134_v23 = vor.u32 %v4132_v16, %v4131_v4  ;;  %v4136_v35 = vrot.slane %v4131_v4, 4  ;;  %v4141_v28 = vshll.u32 %v8883_v20, 16 }
 0x46a   : > { %v8884_v51 = vpack.c.bf16 %v3905_v63, %v3905_v63  ;;  %v4707_v42 = vsel %vm1238_vm12, %v4702_v21, %v4706_v55  ;;  %v4917_v39 = vsel %vm1491_vm11, %v4915_v41, %v4916_v37  ;;  %v9673_v22 = vld [vmem:[#allocation3 + $0x48] sm:$0xff]   ;;  %v4711_v10 = vshll.u32 %v9671_v52, 16  ;;  %v9674_v40 = vld [vmem:[#allocation3 + $0x50] ss:$0 sps:$4 sm:$0x11]  }
 0x46b   : > { %v4140_v46 = vrot.slane %v4138_v45, 7  ;;  %v4135_v2 = vsel %vm10200_vm8, %v4127_v29, %v4134_v23  ;;  %v4385_v32 = vsel %vm10192_vm7, %v4136_v35, %v4384_v59  ;;  %4872 = vrot.lane.b32.xlu0 %v4707_v42, %s9843_s27  ;;  %4964 = vrot.lane.b32.xlu1 %v4917_v39, %s9844_s28  ;;  %v4709_v33 = vshrl.u32 %v9671_v52, 16  ;;  %v9680_v21 = vld [vmem:[#allocation3 + $0x8] ss:$0 sps:$4 sm:$0x11]  }
 0x46c   : > { %4383 = vst.msk [vmem:[#allocation3 + $0x58] sm:$0xf] %vm511_vm2, %v4135_v2  ;;  %4386 = vst [vmem:[#allocation3 + $0x5c] sm:$0x1] %v4385_v32  ;;  %v4146_v50 = vshrl.u32 %v8884_v51, 16  ;;  %v4716_v7 = vshll.u32 %v9672_v62, 16 }
 0x46d   : > { %v4918_v8 = vrot.slane %v9673_v22, 1  ;;  %v4143_v27 = vor.u32 %v4141_v28, %v4140_v46  ;;  %v4149_v12 = vshll.u32 %v8884_v51, 16  ;;  %v4713_v36 = vrot.slane %v4711_v10, 1 }
 0x46e   : > { %v4919_v31 = vrot.slane %v9674_v40, 1  ;;  %v4144_v43 = vrot.slane %v4140_v46, 4  ;;  %v4148_v44 = vrot.slane %v4146_v50, 7  ;;  %v4718_v26 = vrot.slane %v4716_v7, 1 }
 0x46f   : > { %v4723_v57 = vshll.u32 %v9673_v22, 16  ;;  %v4388_v61 = vsel %vm10732_vm4, %v4143_v27, %v4387_v15  ;;  %v4714_v56 = vor.u32 %v4713_v36, %v4709_v33  ;;  %v4728_v18 = vshll.u32 %v9674_v40, 16  ;;  %v9697_v36 = vld [vmem:[%s12746_s5 + $0x40] sm:$0xff]   ;;  %v9700_v15 = vld [vmem:[%s12746_s5 + $0x8] sm:$0xff]  }
 0x470   : > { %v4920_v3 = vsel %vm1491_vm11, %v4918_v8, %v4919_v31  ;;  %4389 = vst [vmem:[#allocation3 + $0x60] sm:$0xf] %v4388_v61  ;;  %v4151_v49 = vor.u32 %v4149_v12, %v4148_v44  ;;  %v4153_v34 = vrot.slane %v4148_v44, 4  ;;  %v4721_v25 = vshrl.u32 %v9673_v22, 16  ;;  %v9698_v31 = vld [vmem:[%s12746_s5] sm:$0xff]   ;;  %9082 = vmatprep.subr.bf16.mxu0 %v9697_v36  ;;  %v9701_v44 = vld [vmem:[%s12746_s5 + $0x50] sm:$0xff]  }
 0x471   : > { %4966 = vrot.lane.b32.xlu1 %v4920_v3, %s9844_s28  ;;  %v4725_v52 = vrot.slane %v4723_v57, 1  ;;  %v4719_v53 = vsel %vm1238_vm12, %v4714_v56, %v4718_v26  ;;  %v4730_v11 = vrot.slane %v4728_v18, 1  ;;  %v4651_v41 = vshll.u32 %v9679_v47, 16  ;;  %9083 = vmatpush3.bf16.msra.mxu0 %v9698_v31  ;;  %v9702_v26 = vld [vmem:[%s12746_s5 + $0x10] sm:$0xff]   ;;  %v9703_v57 = vld [vmem:[%s12746_s5 + $0x58] sm:$0xff]   ;;  %v9705_v56 = vld [vmem:[%s12746_s5 + $0x60] sm:$0xff]  }
 0x472   : > { %v4152_v5 = vsel %vm10200_vm8, %v4144_v43, %v4151_v49  ;;  %v4392_v60 = vsel %vm10192_vm7, %v4153_v34, %v4391_v54  ;;  %4874 = vrot.lane.b32.xlu0 %v4719_v53, %s9843_s27  ;;  %v4649_v23 = vshrl.u32 %v9679_v47, 16  ;;  %v4656_v51 = vshll.u32 %v9680_v21, 16  ;;  %v9699_v43 = vld [vmem:[%s12746_s5 + $0x48] sm:$0xff]   ;;  %v9704_v61 = vld [vmem:[%s12746_s5 + $0x18] sm:$0xff]   ;;  %v9706_v3 = vld [vmem:[%s12746_s5 + $0x20] sm:$0xff]  }
 0x473   : > { %v4726_v62 = vor.u32 %v4725_v52, %v4721_v25  ;;  %4390 = vst.msk [vmem:[#allocation3 + $0x64] sm:$0xf] %vm511_vm2, %v4152_v5  ;;  %4393 = vst [vmem:[#allocation3 + $0x68] sm:$0x1] %v4392_v60  ;;  %v11454_v6 = vld [vmem:[#allocation3 + $0x54] sm:$0xff]   ;;  %v4653_v28 = vrot.slane %v4651_v41, 1  ;;  %9084 = vmatprep.subr.bf16.mxu0 %v9699_v43 }
 0x474   : > { %v9676_v13 = vld [vmem:[#allocation3 + $0x5c] ss:$0 sps:$4 sm:$0x11]   ;;  %v4921_v17 = vrot.slane %v11454_v6, 1  ;;  %v4735_v16 = vshll.u32 %v11454_v6, 16  ;;  %v4733_v20 = vshrl.u32 %v11454_v6, 16 }
 0x475   : > { %v4731_v14 = vsel %vm1238_vm12, %v4726_v62, %v4730_v11  ;;  %v4922_v19 = vrot.slane %v9676_v13, 1  ;;  %v4740_v30 = vshll.u32 %v9676_v13, 16  ;;  %v4900_v22 = vrot.slane %v9679_v47, 1  ;;  %9085 = vmatpush3.bf16.msra.mxu0 %v9700_v15  ;;  %v9707_v18 = vld [vmem:[%s12746_s5 + $0x68] sm:$0xff]  }
 0x476   : > { %4876 = vrot.lane.b32.xlu0 %v4731_v14, %s9843_s27  ;;  %v4737_v4 = vrot.slane %v4735_v16, 1  ;;  %v4901_v46 = vrot.slane %v9680_v21, 1  ;;  %v4654_v33 = vor.u32 %v4653_v28, %v4649_v23  ;;  %v4658_v7 = vrot.slane %v4656_v51, 1  ;;  %9086 = vmatprep.subr.bf16.mxu0 %v9701_v44  ;;  %v4398_v44 = vld [vmem:[#allocation3 + $0x74] sm:$0x1] }
 0x477   : > { %v4923_v55 = vsel %vm1491_vm11, %v4921_v17, %v4922_v19  ;;  %v4742_v63 = vrot.slane %v4740_v30, 1 }
 0x478   : > { %4968 = vrot.lane.b32.xlu1 %v4923_v55, %s9844_s28  ;;  %v4738_v48 = vor.u32 %v4737_v4, %v4733_v20  ;;  %v4902_v8 = vsel %vm1491_vm11, %v4900_v22, %v4901_v46  ;;  %v4659_v12 = vsel %vm1238_vm12, %v4654_v33, %v4658_v7  ;;  %v4394_v33 = vld [vmem:[#allocation3 + $0x6c] sm:$0xf] }
 0x479   : > { %9087 = vmatpush3.bf16.msra.mxu0 %v9702_v26 }
 0x47a   : > { %v11463_v37 = vld [vmem:[#allocation3 + $0x60] sm:$0xff]   ;;  %v4743_v29 = vsel %vm1238_vm12, %v4738_v48, %v4742_v63  ;;  %v9678_v45 = vld [vmem:[#allocation3 + $0x68] ss:$0 sps:$4 sm:$0x11]   ;;  %9088 = vmatprep.subr.bf16.mxu0 %v9703_v57 }
 0x47b   : > { %4878 = vrot.lane.b32.xlu0 %v4743_v29, %s9843_s27  ;;  %v4924_v35 = vrot.slane %v11463_v37, 1  ;;  %v4747_v59 = vshll.u32 %v11463_v37, 16  ;;  %v4925_v42 = vrot.slane %v9678_v45, 1  ;;  %v4752_v39 = vshll.u32 %v9678_v45, 16 }
 0x47c   : > { %v4745_v2 = vshrl.u32 %v11463_v37, 16 }
 0x47d   : > { %v4749_v32 = vrot.slane %v4747_v59, 1  ;;  %v4926_v10 = vsel %vm1491_vm11, %v4924_v35, %v4925_v42  ;;  %v4754_v50 = vrot.slane %v4752_v39, 1  ;;  %9089 = vmatpush3.bf16.msra.mxu0 %v9704_v61 }
 0x47e   : > { %4970 = vrot.lane.b32.xlu1 %v4926_v10, %s9844_s28  ;;  %9090 = vmatprep.subr.bf16.mxu0 %v9705_v56 }
 0x47f   : > { %v4750_v40 = vor.u32 %v4749_v32, %v4745_v2 }
 0x481   : > { %v4755_v27 = vsel %vm1238_vm12, %v4750_v40, %v4754_v50  ;;  %9091 = vmatpush3.bf16.msra.mxu0 %v9706_v3 }
 0x482   : > { %4880 = vrot.lane.b32.xlu0 %v4755_v27, %s9843_s27  ;;  %4954 = vrot.lane.b32.xlu1 %v4902_v8, %s9844_s28 }
 0x483   : > { %9092 = vmatprep.subr.bf16.mxu0 %v9707_v18 }
 0x486   : > { %4864 = vrot.lane.b32.xlu0 %v4659_v12, %s9843_s27 }
 0x49a   : > { %v9016_v49 = vpop.f32.mrb[32].mxu1 }
 0x49b   : > { %v9017_v34 = vpop.f32.mrb[33].mxu1 }
 0x49c   : > { %v9018_v25 = vadd.f32 %v9017_v34, %v9016_v49  ;;  %v9019_v52 = vpop.f32.mrb[34].mxu1  ;;  %v9708_v34 = vld [vmem:[%s12746_s5 + $0x28] sm:$0xff]  }
 0x49d   : > { %v9020_v54 = vpop.f32.mrb[35].mxu1  ;;  %9093 = vmatpush3.bf16.msra.mxu0 %v9708_v34 }
 0x49e   : > { %v9021_v53 = vadd.f32 %v9020_v54, %v9019_v52  ;;  %v3667_v60 = vadd.f32 %v9018_v25, %v11322_v38  ;;  %v9709_v25 = vld [vmem:[%s12746_s5 + $0x70] sm:$0xff]  }
 0x49f   : > { %9094 = vmatprep.subr.bf16.mxu0 %v9709_v25 }
 0x4a0   : > { %v3670_v47 = vadd.f32 %v9021_v53, %v11322_v38 }
 0x4a3   : > { %v9402_v5 = vpop.f32.mrb[48].mxu0 }
 0x4a4   : > { %v3827_v62 = vpop.f32.mrb[49].mxu0 }
 0x4a5   : > { %v3828_v11 = vadd.f32 %v3827_v62, %v3667_v60  ;;  %v9022_v14 = vpop.f32.mrb[36].mxu1  ;;  %v9403_v13 = vpop.f32.mrb[50].mxu0 }
 0x4a6   : > { %v9023_v17 = vpop.f32.mrb[37].mxu1  ;;  %v3830_v16 = vpop.f32.mrb[51].mxu0 }
 0x4a7   : > { %v3906_v19 = vmax.f32 %v3828_v11, 0.0  ;;  %v9024_v30 = vadd.f32 %v9023_v17, %v9022_v14  ;;  %v3831_v20 = vadd.f32 %v3830_v16, %v3670_v47  ;;  %v9025_v4 = vpop.f32.mrb[38].mxu1 }
 0x4a8   : > { %v9026_v55 = vpop.f32.mrb[39].mxu1 }
 0x4a9   : > { %v8885_v41 = vpack.c.bf16 %v3906_v19, %v3906_v19  ;;  %v3675_v48 = vadd.f32 %v9024_v30, %v11322_v38  ;;  %v3907_v63 = vmax.f32 %v3831_v20, 0.0  ;;  %v9027_v21 = vadd.f32 %v9026_v55, %v9025_v4 }
 0x4ab   : > { %v4155_v29 = vshrl.u32 %v8885_v41, 16  ;;  %v3836_v45 = vadd.f32 %v9402_v5, %v3675_v48  ;;  %v8886_v23 = vpack.c.bf16 %v3907_v63, %v3907_v63  ;;  %v3678_v35 = vadd.f32 %v9027_v21, %v11322_v38 }
 0x4ac   : > { %v4158_v28 = vshll.u32 %v8885_v41, 16 }
 0x4ad   : > { %v4157_v59 = vrot.slane %v4155_v29, 7  ;;  %v3908_v51 = vmax.f32 %v3836_v45, 0.0  ;;  %v4163_v42 = vshrl.u32 %v8886_v23, 16  ;;  %v9028_v39 = vpop.f32.mrb[40].mxu1  ;;  %v3839_v22 = vadd.f32 %v9403_v13, %v3678_v35  ;;  %v4401_v13 = vld [vmem:[#allocation3 + $0x78] sm:$0xf] }
 0x4ae   : > { %v9029_v46 = vpop.f32.mrb[41].mxu1  ;;  %v4166_v40 = vshll.u32 %v8886_v23, 16  ;;  %v11535_v23 = vld [vmem:[%s12745_s4] ss:$0 sm:$0xff] }
 0x4af   : > { %v4160_v2 = vor.u32 %v4158_v28, %v4157_v59  ;;  %v8887_v32 = vpack.c.bf16 %v3908_v51, %v3908_v51  ;;  %v4165_v10 = vrot.slane %v4163_v42, 7  ;;  %v9031_v50 = vpop.f32.mrb[42].mxu1  ;;  %v3909_v7 = vmax.f32 %v3839_v22, 0.0 }
 0x4b0   : > { %v9030_v8 = vadd.f32 %v9029_v46, %v9028_v39  ;;  %v9032_v27 = vpop.f32.mrb[43].mxu1  ;;  %v4161_v12 = vrot.slane %v4157_v59, 4 }
 0x4b1   : > { %v4395_v36 = vsel %vm10732_vm4, %v4160_v2, %v4394_v33  ;;  %v4172_v31 = vshrl.u32 %v8887_v32, 16  ;;  %v4168_v43 = vor.u32 %v4166_v40, %v4165_v10  ;;  %v4170_v15 = vrot.slane %v4165_v10, 4 }
 0x4b2   : > { %4396 = vst [vmem:[#allocation3 + $0x6c] sm:$0xf] %v4395_v36  ;;  %v8888_v26 = vpack.c.bf16 %v3909_v7, %v3909_v7  ;;  %v9033_v57 = vadd.f32 %v9032_v27, %v9031_v50  ;;  %v4175_v56 = vshll.u32 %v8887_v32, 16  ;;  %v3683_v49 = vadd.f32 %v9030_v8, %v11322_v38  ;;  %v9710_v50 = vld [vmem:[%s12746_s5 + $0x30] sm:$0xff]  }
 0x4b3   : > { %v4174_v61 = vrot.slane %v4172_v31, 7  ;;  %v4169_v3 = vsel %vm10200_vm8, %v4161_v12, %v4168_v43  ;;  %v9406_v18 = vpop.f32.mrb[52].mxu0  ;;  %v4399_v52 = vsel %vm10192_vm7, %v4170_v15, %v4398_v44  ;;  %9095 = vmatpush3.bf16.msra.mxu0 %v9710_v50 }
 0x4b4   : > { %4397 = vst.msk [vmem:[#allocation3 + $0x70] sm:$0xf] %vm511_vm2, %v4169_v3  ;;  %v4180_v54 = vshrl.u32 %v8888_v26, 16  ;;  %v3843_v53 = vpop.f32.mrb[53].mxu0  ;;  %4400 = vst [vmem:[#allocation3 + $0x74] sm:$0x1] %v4399_v52  ;;  %v3686_v14 = vadd.f32 %v9033_v57, %v11322_v38 }
 0x4b5   : > { %v4177_v5 = vor.u32 %v4175_v56, %v4174_v61  ;;  %v3844_v60 = vadd.f32 %v3843_v53, %v3683_v49  ;;  %v9034_v62 = vpop.f32.mrb[44].mxu1  ;;  %v9407_v11 = vpop.f32.mrb[54].mxu0  ;;  %v4183_v17 = vshll.u32 %v8888_v26, 16  ;;  %v4178_v48 = vrot.slane %v4174_v61, 4  ;;  %v4405_v38 = vld [vmem:[#allocation3 + $0x80] sm:$0x1] }
 0x4b6   : > { %v4182_v47 = vrot.slane %v4180_v54, 7  ;;  %v9035_v16 = vpop.f32.mrb[45].mxu1  ;;  %v3846_v19 = vpop.f32.mrb[55].mxu0  ;;  %v9711_v26 = vld [vmem:[%s12746_s5 + $0x78] sm:$0xff]  }
 0x4b7   : > { %v4402_v30 = vsel %vm10732_vm4, %v4177_v5, %v4401_v13  ;;  %v3910_v20 = vmax.f32 %v3844_v60, 0.0  ;;  %v9036_v4 = vadd.f32 %v9035_v16, %v9034_v62  ;;  %v3847_v55 = vadd.f32 %v3846_v19, %v3686_v14  ;;  %v9037_v41 = vpop.f32.mrb[46].mxu1  ;;  %v4408_v49 = vld [vmem:[#allocation3 + $0x84] sm:$0xf]  ;;  %9096 = vmatprep.subr.bf16.mxu0 %v9711_v26 }
 0x4b8   : > { %4403 = vst [vmem:[#allocation3 + $0x78] sm:$0xf] %v4402_v30  ;;  %v4185_v63 = vor.u32 %v4183_v17, %v4182_v47  ;;  %v4187_v21 = vrot.slane %v4182_v47, 4  ;;  %v9038_v29 = vpop.f32.mrb[47].mxu1  ;;  %v9712_v60 = vld [vmem:[%s12746_s5 + $0x38] sm:$0xff]  }
 0x4b9   : > { %v8889_v45 = vpack.c.bf16 %v3910_v20, %v3910_v20  ;;  %v3691_v35 = vadd.f32 %v11535_v23, %v9036_v4  ;;  %v3911_v59 = vmax.f32 %v3847_v55, 0.0  ;;  %v9039_v28 = vadd.f32 %v9038_v29, %v9037_v41  ;;  %9097 = vmatpush3.bf16.msra.mxu0 %v9712_v60  ;;  %v4412_v4 = vld [vmem:[#allocation3 + $0x8c] sm:$0x1] }
 0x4ba   : > { %v4186_v51 = vsel %vm10200_vm8, %v4178_v48, %v4185_v63  ;;  %v4406_v42 = vsel %vm10192_vm7, %v4187_v21, %v4405_v38 }
 0x4bb   : > { %4404 = vst.msk [vmem:[#allocation3 + $0x7c] sm:$0xf] %vm511_vm2, %v4186_v51  ;;  %4407 = vst [vmem:[#allocation3 + $0x80] sm:$0x1] %v4406_v42  ;;  %v4189_v39 = vshrl.u32 %v8889_v45, 16  ;;  %v4192_v22 = vshll.u32 %v8889_v45, 16  ;;  %v3852_v46 = vadd.f32 %v9406_v18, %v3691_v35  ;;  %v8890_v2 = vpack.c.bf16 %v3911_v59, %v3911_v59 }
 0x4bc   : > { %v11543_v32 = vld [vmem:[#allocation3 + $0x6c] sm:$0xff]   ;;  %v3694_v10 = vadd.f32 %v11535_v23, %v9039_v28  ;;  %v11546_v40 = vld [vmem:[#allocation3 + $0x74] ss:$0 sps:$4 sm:$0x11]  }
 0x4bd   : > { %v4191_v33 = vrot.slane %v4189_v39, 7  ;;  %v3912_v7 = vmax.f32 %v3852_v46, 0.0  ;;  %v4197_v8 = vshrl.u32 %v8890_v2, 16  ;;  %v4200_v27 = vshll.u32 %v8890_v2, 16  ;;  %v9040_v12 = vpop.f32.mrb[48].mxu1  ;;  %v9713_v59 = vld [vmem:[%s12746_s5 + $0x80] sm:$0xff]  }
 0x4be   : > { %v3855_v36 = vadd.f32 %v9407_v11, %v3694_v10  ;;  %v9041_v31 = vpop.f32.mrb[49].mxu1  ;;  %v4927_v43 = vrot.slane %v11543_v32, 1  ;;  %v4928_v15 = vrot.slane %v11546_v40, 1  ;;  %v4757_v44 = vshrl.u32 %v11543_v32, 16  ;;  %v4415_v10 = vld [vmem:[#allocation3 + $0x90] sm:$0xf]  ;;  %9416 = vmatprep.subr.bf16.mxu1 %v9713_v59 }
 0x4bf   : > { %v4194_v57 = vor.u32 %v4192_v22, %v4191_v33  ;;  %v4195_v61 = vrot.slane %v4191_v33, 4  ;;  %v8891_v56 = vpack.c.bf16 %v3912_v7, %v3912_v7  ;;  %v4199_v3 = vrot.slane %v4197_v8, 7  ;;  %v9043_v18 = vpop.f32.mrb[50].mxu1  ;;  %9417 = vmatpush3.bf16.msra.mxu1 %v9713_v59 }
 0x4c0   : > { %v3913_v34 = vmax.f32 %v3855_v36, 0.0  ;;  %v4867_v25 = vpop.permute.xlu0 %4866  ;;  %v9042_v52 = vadd.f32 %v9041_v31, %v9040_v12  ;;  %v9044_v54 = vpop.f32.mrb[51].mxu1  ;;  %v4929_v53 = vsel %vm1491_vm11, %v4927_v43, %v4928_v15  ;;  %v4759_v5 = vshll.u32 %v11543_v32, 16 }
 0x4c1   : > { %v4409_v62 = vsel %vm10732_vm4, %v4194_v57, %v4408_v49  ;;  %v4206_v11 = vshrl.u32 %v8891_v56, 16  ;;  %v4209_v14 = vshll.u32 %v8891_v56, 16  ;;  %v4202_v13 = vor.u32 %v4200_v27, %v4199_v3  ;;  %4972 = vrot.lane.b32.xlu1 %v4929_v53, %s9844_s28 }
 0x4c2   : > { %4410 = vst [vmem:[#allocation3 + $0x84] sm:$0xf] %v4409_v62  ;;  %v4204_v47 = vrot.slane %v4199_v3, 4  ;;  %v8892_v17 = vpack.c.bf16 %v3913_v34, %v3913_v34  ;;  %v4993_v16 = vsel %vm3133_vm5, %v11346_v24, %v4867_v25  ;;  %v9045_v19 = vadd.f32 %v9044_v54, %v9043_v18  ;;  %v11570_v63 = vld [vmem:[#allocation3 + $0x78] sm:$0xff]   ;;  %v9716_v3 = vld [vmem:[%s12746_s5 + $0x88] sm:$0xff]  }
 0x4c3   : > { %v4208_v30 = vrot.slane %v4206_v11, 7  ;;  %v4203_v20 = vsel %vm10200_vm8, %v4195_v61, %v4202_v13  ;;  %v9410_v55 = vpop.f32.mrb[56].mxu0  ;;  %v3699_v41 = vadd.f32 %v11535_v23, %v9042_v52  ;;  %v4761_v48 = vrot.slane %v4759_v5, 1  ;;  %v11582_v2 = vld [vmem:[#allocation3 + $0x80] ss:$0 sps:$4 sm:$0x11]   ;;  %9418 = vmatprep.subr.bf16.mxu1 %v9716_v3 }
 0x4c4   : > { %4411 = vst.msk [vmem:[#allocation3 + $0x88] sm:$0xf] %vm511_vm2, %v4203_v20  ;;  %v4413_v21 = vsel %vm10192_vm7, %v4204_v47, %v4412_v4  ;;  %v4214_v29 = vshrl.u32 %v8892_v17, 16  ;;  %v4217_v24 = vshll.u32 %v8892_v17, 16  ;;  %v4957_v38 = vpop.permute.xlu0 %4956  ;;  %v3859_v45 = vpop.f32.mrb[57].mxu0  ;;  %v4764_v35 = vshll.u32 %v11546_v40, 16  ;;  %9419 = vmatpush3.bf16.msra.mxu1 %v9716_v3 }
 0x4c5   : > { %v4211_v28 = vor.u32 %v4209_v14, %v4208_v30  ;;  %v4212_v51 = vrot.slane %v4208_v30, 4  ;;  %4414 = vst [vmem:[#allocation3 + $0x8c] sm:$0x1] %v4413_v21  ;;  %v11580_v42 = vsel %vm3170_vm6, %v4993_v16, %v4957_v38  ;;  %v3860_v39 = vadd.f32 %v3859_v45, %v3699_v41  ;;  %v9046_v22 = vpop.f32.mrb[52].mxu1  ;;  %v9411_v46 = vpop.f32.mrb[58].mxu0  ;;  %v9788_v17 = vld [vmem:[#allocation3 + $0x18] sm:$0xff]  }
 0x4c6   : > { %v4216_v50 = vrot.slane %v4214_v29, 7  ;;  %v4762_v33 = vor.u32 %v4761_v48, %v4757_v44  ;;  %v4766_v7 = vrot.slane %v4764_v35, 1  ;;  %v9047_v40 = vpop.f32.mrb[53].mxu1  ;;  %v3702_v8 = vadd.f32 %v11535_v23, %v9045_v19  ;;  %v3862_v27 = vpop.f32.mrb[59].mxu0  ;;  %v4419_v18 = vld [vmem:[#allocation3 + $0x98] sm:$0x1] }
 0x4c7   : > { %v4416_v12 = vsel %vm10732_vm4, %v4211_v28, %v4415_v10  ;;  %v3914_v36 = vmax.f32 %v3860_v39, 0.0  ;;  %v9048_v31 = vadd.f32 %v9047_v40, %v9046_v22  ;;  %v9049_v43 = vpop.f32.mrb[54].mxu1  ;;  %v4769_v15 = vshrl.u32 %v11570_v63, 16 }
 0x4c8   : > { %4417 = vst [vmem:[#allocation3 + $0x90] sm:$0xf] %v4416_v12  ;;  %v4219_v26 = vor.u32 %v4217_v24, %v4216_v50  ;;  %v4221_v57 = vrot.slane %v4216_v50, 4  ;;  %v4767_v44 = vsel %vm1238_vm12, %v4762_v33, %v4766_v7  ;;  %v3863_v61 = vadd.f32 %v3862_v27, %v3702_v8  ;;  %v9050_v56 = vpop.f32.mrb[55].mxu1 }
 0x4c9   : > { %v8893_v49 = vpack.c.bf16 %v3914_v36, %v3914_v36  ;;  %4882 = vrot.lane.b32.xlu0 %v4767_v44, %s9843_s27  ;;  %v3707_v34 = vadd.f32 %v11535_v23, %v9048_v31  ;;  %v9051_v25 = vadd.f32 %v9050_v56, %v9049_v43  ;;  %v4771_v52 = vshll.u32 %v11570_v63, 16  ;;  %v4426_v31 = vld [vmem:[#allocation3 + $0xa4] sm:$0x1] }
 0x4ca   : > { %v4220_v54 = vsel %vm10200_vm8, %v4212_v51, %v4219_v26  ;;  %v4420_v53 = vsel %vm10192_vm7, %v4221_v57, %v4419_v18  ;;  %v3915_v5 = vmax.f32 %v3863_v61, 0.0  ;;  %v4776_v60 = vshll.u32 %v11582_v2, 16 }
 0x4cb   : > { %4418 = vst.msk [vmem:[#allocation3 + $0x94] sm:$0xf] %vm511_vm2, %v4220_v54  ;;  %4421 = vst [vmem:[#allocation3 + $0x98] sm:$0x1] %v4420_v53  ;;  %v4869_v62 = vpop.permute.xlu1 %4868  ;;  %v4223_v11 = vshrl.u32 %v8893_v49, 16  ;;  %v4226_v14 = vshll.u32 %v8893_v49, 16  ;;  %v3868_v13 = vadd.f32 %v9410_v55, %v3707_v34  ;;  %v3710_v47 = vadd.f32 %v11535_v23, %v9051_v25 }
 0x4cc   : > { %v4995_v16 = vsel %vm3133_vm5, %v9788_v17, %v4869_v62  ;;  %v8894_v19 = vpack.c.bf16 %v3915_v5, %v3915_v5  ;;  %v4773_v30 = vrot.slane %v4771_v52, 1  ;;  %v4778_v20 = vrot.slane %v4776_v60, 1  ;;  %v11607_v50 = vld [vmem:[#allocation3 + $0x84] sm:$0xff]  }
 0x4cd   : > { %v4225_v4 = vrot.slane %v4223_v11, 7  ;;  %v3916_v41 = vmax.f32 %v3868_v13, 0.0  ;;  %v3871_v48 = vadd.f32 %v9411_v46, %v3710_v47  ;;  %5078 = vrot.lane.b32.xlu0 %v11580_v42, %s9845_s24  ;;  %v9052_v21 = vpop.f32.mrb[56].mxu1  ;;  %v4930_v29 = vrot.slane %v11570_v63, 1  ;;  %v4422_v46 = vld [vmem:[#allocation3 + $0x9c] sm:$0xf] }
 0x4ce   : > { %v4231_v24 = vshrl.u32 %v8894_v19, 16  ;;  %v4234_v55 = vshll.u32 %v8894_v19, 16  ;;  %v4774_v38 = vor.u32 %v4773_v30, %v4769_v15  ;;  %v4931_v45 = vrot.slane %v11582_v2, 1  ;;  %v9053_v35 = vpop.f32.mrb[57].mxu1  ;;  %v4429_v17 = vld [vmem:[#allocation3 + $0xa8] sm:$0xf] }
 0x4cf   : > { %v4228_v59 = vor.u32 %v4226_v14, %v4225_v4  ;;  %v4229_v28 = vrot.slane %v4225_v4, 4  ;;  %v8895_v51 = vpack.c.bf16 %v3916_v41, %v3916_v41  ;;  %v4959_v39 = vpop.permute.xlu1 %4958  ;;  %v3917_v22 = vmax.f32 %v3871_v48, 0.0  ;;  %v9055_v10 = vpop.f32.mrb[58].mxu1  ;;  %v11619_v15 = vld [vmem:[#allocation3 + $0x8c] ss:$0 sps:$4 sm:$0x11]  }
 0x4d0   : > { %v4233_v33 = vrot.slane %v4231_v24, 7  ;;  %v11610_v7 = vsel %vm3170_vm6, %v4995_v16, %v4959_v39  ;;  %v4779_v40 = vsel %vm1238_vm12, %v4774_v38, %v4778_v20  ;;  %v4932_v8 = vsel %vm1491_vm11, %v4930_v29, %v4931_v45  ;;  %v9056_v27 = vpop.f32.mrb[59].mxu1 }
 0x4d1   : > { %v4423_v2 = vsel %vm10732_vm4, %v4228_v59, %v4422_v46  ;;  %v4240_v12 = vshrl.u32 %v8895_v51, 16  ;;  %v4243_v36 = vshll.u32 %v8895_v51, 16  ;;  %v8896_v43 = vpack.c.bf16 %v3917_v22, %v3917_v22  ;;  %5111 = vrot.lane.b32.xlu1 %v11610_v7, %s9844_s28  ;;  %4884 = vrot.lane.b32.xlu0 %v4779_v40, %s9843_s27  ;;  %v4433_v59 = vld [vmem:[#allocation3 + $0xb0] sm:$0x1] }
 0x4d2   : > { %4424 = vst [vmem:[#allocation3 + $0x9c] sm:$0xf] %v4423_v2  ;;  %v4236_v26 = vor.u32 %v4234_v55, %v4233_v33  ;;  %v4238_v57 = vrot.slane %v4233_v33, 4  ;;  %v9054_v44 = vadd.f32 %v9053_v35, %v9052_v21  ;;  %v9057_v61 = vadd.f32 %v9056_v27, %v9055_v10  ;;  %v9789_v55 = vld [vmem:[#allocation3 + $0x24] sm:$0xff]   ;;  %v11638_v35 = vld [vmem:[#allocation3 + $0x90] sm:$0xff]  }
 0x4d3   : > { %v4242_v56 = vrot.slane %v4240_v12, 7  ;;  %v4248_v3 = vshrl.u32 %v8896_v43, 16  ;;  %v4251_v18 = vshll.u32 %v8896_v43, 16  ;;  %v9414_v49 = vpop.f32.mrb[60].mxu0  ;;  %v4781_v34 = vshrl.u32 %v11607_v50, 16  ;;  %v4961_v24 = vpop.permute.xlu1 %4960 }
 0x4d4   : > { %v4237_v25 = vsel %vm10200_vm8, %v4229_v28, %v4236_v26  ;;  %v4427_v52 = vsel %vm10192_vm7, %v4238_v57, %v4426_v31  ;;  %v3715_v54 = vadd.f32 %v11535_v23, %v9054_v44  ;;  %v3875_v53 = vpop.f32.mrb[61].mxu0  ;;  %v4783_v5 = vshll.u32 %v11607_v50, 16  ;;  %v9688_v2 = vld [vmem:[#allocation3 + $0x98] ss:$0 sps:$4 sm:$0x11]  }
 0x4d5   : > { %v4245_v60 = vor.u32 %v4243_v36, %v4242_v56  ;;  %v4246_v62 = vrot.slane %v4242_v56, 4  ;;  %4425 = vst.msk [vmem:[#allocation3 + $0xa0] sm:$0xf] %vm511_vm2, %v4237_v25  ;;  %4428 = vst [vmem:[#allocation3 + $0xa4] sm:$0x1] %v4427_v52  ;;  %v4250_v11 = vrot.slane %v4248_v3, 7  ;;  %4974 = vrot.lane.b32.xlu1 %v4932_v8, %s9844_s28  ;;  %5080 = vrot.lane.b32.xlu0 %v11610_v7, %s9845_s24 }
 0x4d6   : > { %v9058_v14 = vpop.f32.mrb[60].mxu1  ;;  %v9415_v13 = vpop.f32.mrb[62].mxu0  ;;  %v4788_v47 = vshll.u32 %v11619_v15, 16  ;;  %v3876_v19 = vadd.f32 %v3875_v53, %v3715_v54  ;;  %v4785_v30 = vrot.slane %v4783_v5, 1  ;;  %v3718_v4 = vadd.f32 %v11535_v23, %v9057_v61 }
 0x4d7   : > { %v4871_v16 = vpop.permute.xlu0 %4870  ;;  %v9059_v20 = vpop.f32.mrb[61].mxu1  ;;  %v4933_v41 = vrot.slane %v11607_v50, 1  ;;  %v4430_v48 = vsel %vm10732_vm4, %v4245_v60, %v4429_v17  ;;  %v4253_v21 = vor.u32 %v4251_v18, %v4250_v11  ;;  %v4255_v29 = vrot.slane %v4250_v11, 4 }
 0x4d8   : > { %v4997_v38 = vsel %vm3133_vm5, %v9789_v55, %v4871_v16  ;;  %v3878_v45 = vpop.f32.mrb[63].mxu0  ;;  %4431 = vst [vmem:[#allocation3 + $0xa8] sm:$0xf] %v4430_v48  ;;  %v3918_v51 = vmax.f32 %v3876_v19, 0.0  ;;  %v4786_v39 = vor.u32 %v4785_v30, %v4781_v34  ;;  %v4790_v22 = vrot.slane %v4788_v47, 1  ;;  %v9061_v10 = vpop.f32.mrb[62].mxu1 }
 0x4d9   : > { %v11641_v28 = vsel %vm3170_vm6, %v4997_v38, %v4961_v24  ;;  %v4254_v46 = vsel %vm10200_vm8, %v4246_v62, %v4253_v21  ;;  %v4434_v33 = vsel %vm10192_vm7, %v4255_v29, %v4433_v59  ;;  %v9060_v40 = vadd.f32 %v9059_v20, %v9058_v14  ;;  %v9062_v27 = vpop.f32.mrb[63].mxu1  ;;  %v4963_v5 = vpop.permute.xlu1 %4962  ;;  %v9790_v62 = vld [vmem:[#allocation3 + $0x30] sm:$0xff]  }
 0x4da   : > { %5113 = vrot.lane.b32.xlu1 %v11641_v28, %s9844_s28  ;;  %v3879_v8 = vadd.f32 %v3878_v45, %v3718_v4  ;;  %4432 = vst.msk [vmem:[#allocation3 + $0xac] sm:$0xf] %vm511_vm2, %v4254_v46  ;;  %4435 = vst [vmem:[#allocation3 + $0xb0] sm:$0x1] %v4434_v33  ;;  %v8897_v12 = vpack.c.bf16 %v3918_v51, %v3918_v51  ;;  %v4791_v36 = vsel %vm1238_vm12, %v4786_v39, %v4790_v22  ;;  %v4436_v16 = vld [vmem:[#allocation3 + $0xb4] sm:$0xf] }
 0x4db   : > { %v4934_v31 = vrot.slane %v11619_v15, 1  ;;  %v9063_v43 = vadd.f32 %v9062_v27, %v9061_v10  ;;  %4886 = vrot.lane.b32.xlu0 %v4791_v36, %s9843_s27  ;;  %v3723_v26 = vadd.f32 %v11535_v23, %v9060_v40  ;;  %v4793_v44 = vshrl.u32 %v11638_v35, 16  ;;  %v4440_v33 = vld [vmem:[#allocation3 + $0xbc] sm:$0x1] }
 0x4dc   : > { %v3919_v57 = vmax.f32 %v3879_v8, 0.0  ;;  %v4795_v61 = vshll.u32 %v11638_v35, 16  ;;  %v4257_v56 = vshrl.u32 %v8897_v12, 16  ;;  %v4260_v3 = vshll.u32 %v8897_v12, 16  ;;  %v11661_v17 = vld [vmem:[#allocation3 + $0x9c] sm:$0xff]  }
 0x4dd   : > { %v4935_v18 = vsel %vm1491_vm11, %v4933_v41, %v4934_v31  ;;  %v3726_v34 = vadd.f32 %v11535_v23, %v9063_v43  ;;  %v4873_v25 = vpop.permute.xlu0 %4872  ;;  %v3884_v52 = vadd.f32 %v9414_v49, %v3723_v26  ;;  %v4800_v53 = vshll.u32 %v9688_v2, 16  ;;  %v9690_v21 = vld [vmem:[#allocation3 + $0xa4] ss:$0 sps:$4 sm:$0x11]   ;;  %v4965_v26 = vpop.permute.xlu1 %4964 }
 0x4de   : > { %v8898_v54 = vpack.c.bf16 %v3919_v57, %v3919_v57  ;;  %4976 = vrot.lane.b32.xlu1 %v4935_v18, %s9844_s28  ;;  %v4797_v15 = vrot.slane %v4795_v61, 1  ;;  %v4259_v60 = vrot.slane %v4257_v56, 7  ;;  %v4999_v11 = vsel %vm3133_vm5, %v9790_v62, %v4873_v25  ;;  %v9791_v57 = vld [vmem:[#allocation3 + $0x3c] sm:$0xff]  }
 0x4df   : > { %v3887_v14 = vadd.f32 %v9415_v13, %v3726_v34  ;;  %v4936_v47 = vrot.slane %v11638_v35, 1  ;;  %v3920_v19 = vmax.f32 %v3884_v52, 0.0  ;;  %5082 = vrot.lane.b32.xlu0 %v11641_v28, %s9845_s24  ;;  %v11666_v49 = vsel %vm3170_vm6, %v4999_v11, %v4963_v5 }
 0x4e0   : > { %v4265_v23 = vshrl.u32 %v8898_v54, 16  ;;  %v4268_v30 = vshll.u32 %v8898_v54, 16  ;;  %v4262_v20 = vor.u32 %v4260_v3, %v4259_v60  ;;  %v4263_v4 = vrot.slane %v4259_v60, 4 }
 0x4e1   : > { %v3921_v41 = vmax.f32 %v3887_v14, 0.0  ;;  %v4798_v48 = vor.u32 %v4797_v15, %v4793_v44  ;;  %v8899_v13 = vpack.c.bf16 %v3920_v19, %v3920_v19  ;;  %v4802_v24 = vrot.slane %v4800_v53, 1  ;;  %v11688_v15 = vld [vmem:[#allocation3 + $0xa8] sm:$0xff]   ;;  %v4443_v53 = vld [vmem:[#allocation3 + $0xc0] sm:$0xf] }
 0x4e2   : > { %v4267_v29 = vrot.slane %v4265_v23, 7  ;;  %5115 = vrot.lane.b32.xlu1 %v11666_v49, %s9844_s28  ;;  %v4937_v55 = vrot.slane %v9688_v2, 1  ;;  %v4437_v38 = vsel %vm10732_vm4, %v4262_v20, %v4436_v16  ;;  %v4805_v59 = vshrl.u32 %v11661_v17, 16  ;;  %v9692_v20 = vld [vmem:[#allocation3 + $0xb0] ss:$0 sps:$4 sm:$0x11]  }
 0x4e3   : > { %v8900_v45 = vpack.c.bf16 %v3921_v41, %v3921_v41  ;;  %v4807_v51 = vshll.u32 %v11661_v17, 16  ;;  %4438 = vst [vmem:[#allocation3 + $0xb4] sm:$0xf] %v4437_v38  ;;  %v4274_v39 = vshrl.u32 %v8899_v13, 16  ;;  %v4277_v22 = vshll.u32 %v8899_v13, 16  ;;  %v9792_v41 = vld [vmem:[#allocation3 + $0x48] sm:$0xff]  }
 0x4e4   : > { %v4270_v10 = vor.u32 %v4268_v30, %v4267_v29  ;;  %v4272_v46 = vrot.slane %v4267_v29, 4  ;;  %v4803_v27 = vsel %vm1238_vm12, %v4798_v48, %v4802_v24  ;;  %v4938_v2 = vsel %vm1491_vm11, %v4936_v47, %v4937_v55  ;;  %v4875_v12 = vpop.permute.xlu0 %4874  ;;  %v4447_v47 = vld [vmem:[#allocation3 + $0xc8] sm:$0x1]  ;;  %v4967_v29 = vpop.permute.xlu1 %4966 }
 0x4e5   : > { %v4282_v40 = vshrl.u32 %v8900_v45, 16  ;;  %v4285_v8 = vshll.u32 %v8900_v45, 16  ;;  %v4276_v36 = vrot.slane %v4274_v39, 7  ;;  %4888 = vrot.lane.b32.xlu0 %v4803_v27, %s9843_s27  ;;  %v5001_v44 = vsel %vm3133_vm5, %v9791_v57, %v4875_v12 }
 0x4e6   : > { %v4271_v31 = vsel %vm10200_vm8, %v4263_v4, %v4270_v10  ;;  %v4441_v43 = vsel %vm10192_vm7, %v4272_v46, %v4440_v33  ;;  %4978 = vrot.lane.b32.xlu1 %v4938_v2, %s9844_s28  ;;  %v11685_v56 = vsel %vm3170_vm6, %v5001_v44, %v4965_v26  ;;  %v4809_v3 = vrot.slane %v4807_v51, 1 }
 0x4e7   : > { %4439 = vst.msk [vmem:[#allocation3 + $0xb8] sm:$0xf] %vm511_vm2, %v4271_v31  ;;  %4442 = vst [vmem:[#allocation3 + $0xbc] sm:$0x1] %v4441_v43  ;;  %v4284_v61 = vrot.slane %v4282_v40, 7  ;;  %v4812_v18 = vshll.u32 %v9690_v21, 16  ;;  %v4279_v34 = vor.u32 %v4277_v22, %v4276_v36 }
 0x4e8   : > { %v4280_v25 = vrot.slane %v4276_v36, 4  ;;  %v4939_v52 = vrot.slane %v11661_v17, 1  ;;  %v4940_v54 = vrot.slane %v9690_v21, 1  ;;  %v4810_v62 = vor.u32 %v4809_v3, %v4805_v59  ;;  %v4877_v16 = vpop.permute.xlu0 %4876 }
 0x4e9   : > { %v4287_v5 = vor.u32 %v4285_v8, %v4284_v61  ;;  %v4289_v60 = vrot.slane %v4284_v61, 4  ;;  %v4814_v11 = vrot.slane %v4812_v18, 1  ;;  %v4444_v14 = vsel %vm10732_vm4, %v4279_v34, %v4443_v53  ;;  %5117 = vrot.lane.b32.xlu0 %v11685_v56, %s9844_s28 }
 0x4ea   : > { %5084 = vrot.lane.b32.xlu1 %v11666_v49, %s9845_s24  ;;  %4445 = vst [vmem:[#allocation3 + $0xc0] sm:$0xf] %v4444_v14  ;;  %v4819_v4 = vshll.u32 %v11688_v15, 16  ;;  %v5003_v48 = vsel %vm3133_vm5, %v9792_v41, %v4877_v16  ;;  %v4941_v21 = vsel %vm1491_vm11, %v4939_v52, %v4940_v54  ;;  %v4817_v24 = vshrl.u32 %v11688_v15, 16  ;;  %v4969_v43 = vpop.permute.xlu1 %4968 }
 0x4eb   : > { %v4288_v19 = vsel %vm10200_vm8, %v4280_v25, %v4287_v5  ;;  %v4448_v23 = vsel %vm10192_vm7, %v4289_v60, %v4447_v47  ;;  %v4815_v30 = vsel %vm1238_vm12, %v4810_v62, %v4814_v11  ;;  %v4824_v55 = vshll.u32 %v9692_v20, 16 }
 0x4ec   : > { %4446 = vst.msk [vmem:[#allocation3 + $0xc4] sm:$0xf] %vm511_vm2, %v4288_v19  ;;  %4449 = vst [vmem:[#allocation3 + $0xc8] sm:$0x1] %v4448_v23  ;;  %v4821_v13 = vrot.slane %v4819_v4, 1  ;;  %v11711_v45 = vsel %vm3170_vm6, %v5003_v48, %v4967_v29  ;;  %v4942_v51 = vrot.slane %v11688_v15, 1 }
 0x4ed   : > { %4890 = vrot.lane.b32.xlu0 %v4815_v30, %s9843_s27  ;;  %v4943_v39 = vrot.slane %v9692_v20, 1  ;;  %v4879_v22 = vpop.permute.xlu0 %4878  ;;  %v4826_v33 = vrot.slane %v4824_v55, 1  ;;  %v11754_v30 = vld [vmem:[#allocation3 + $0xcc] sm:$0xff]   ;;  %v9715_v20 = vld [vmem:[#allocation3 + $0xd4] ss:$0 sps:$4 sm:$0x11]  }
 0x4ee   : > { %4980 = vrot.lane.b32.xlu1 %v4941_v21, %s9844_s28  ;;  %v11708_v38 = vld [vmem:[#allocation3 + $0xb4] sm:$0xff]   ;;  %v4822_v59 = vor.u32 %v4821_v13, %v4817_v24  ;;  %v9694_v10 = vld [vmem:[#allocation3 + $0xbc] ss:$0 sps:$4 sm:$0x11]   ;;  %v5005_v8 = vsel %vm3133_vm5, %v11454_v6, %v4879_v22  ;;  %v4951_v4 = vrot.slane %v11754_v30, 1  ;;  %v4952_v41 = vrot.slane %v9715_v20, 1 }
 0x4ef   : > { %v4831_v46 = vshll.u32 %v11708_v38, 16  ;;  %v4944_v2 = vsel %vm1491_vm11, %v4942_v51, %v4943_v39  ;;  %v4829_v12 = vshrl.u32 %v11708_v38, 16  ;;  %v4836_v36 = vshll.u32 %v9694_v10, 16 }
 0x4f0   : > { %v4827_v27 = vsel %vm1238_vm12, %v4822_v59, %v4826_v33  ;;  %v11729_v26 = vsel %vm3170_vm6, %v5005_v8, %v4969_v43  ;;  %v4945_v6 = vrot.slane %v11708_v38, 1  ;;  %v4946_v61 = vrot.slane %v9694_v10, 1  ;;  %v4971_v62 = vpop.permute.xlu1 %4970 }
 0x4f1   : > { %5086 = vrot.lane.b32.xlu0 %v11685_v56, %s9845_s24  ;;  %v4833_v40 = vrot.slane %v4831_v46, 1  ;;  %v4838_v44 = vrot.slane %v4836_v36, 1  ;;  %v4953_v48 = vsel %vm1491_vm11, %v4951_v4, %v4952_v41  ;;  %v4855_v21 = vshll.u32 %v11754_v30, 16 }
 0x4f2   : > { %5119 = vrot.lane.b32.xlu1 %v11711_v45, %s9844_s28  ;;  %v4947_v52 = vsel %vm1491_vm11, %v4945_v6, %v4946_v61  ;;  %v4853_v24 = vshrl.u32 %v11754_v30, 16  ;;  %v4860_v59 = vshll.u32 %v9715_v20, 16 }
 0x4f3   : > { %v11724_v31 = vld [vmem:[#allocation3 + $0xc0] sm:$0xff]   ;;  %v4834_v57 = vor.u32 %v4833_v40, %v4829_v12  ;;  %v9696_v25 = vld [vmem:[#allocation3 + $0xc8] ss:$0 sps:$4 sm:$0x11]   ;;  %v4857_v55 = vrot.slane %v4855_v21, 1 }
 0x4f4   : > { %v4843_v3 = vshll.u32 %v11724_v31, 16  ;;  %v4881_v18 = vpop.permute.xlu0 %4880  ;;  %v4841_v5 = vshrl.u32 %v11724_v31, 16  ;;  %v4848_v60 = vshll.u32 %v9696_v25, 16  ;;  %v4948_v47 = vrot.slane %v11724_v31, 1  ;;  %v4955_v29 = vpop.permute.xlu1 %4954 }
 0x4f5   : > { %4892 = vrot.lane.b32.xlu0 %v4827_v27, %s9843_s27  ;;  %v4839_v34 = vsel %vm1238_vm12, %v4834_v57, %v4838_v44  ;;  %v5007_v53 = vsel %vm3133_vm5, %v11463_v37, %v4881_v18  ;;  %v4949_v16 = vrot.slane %v9696_v25, 1  ;;  %v4858_v39 = vor.u32 %v4857_v55, %v4853_v24  ;;  %v9793_v27 = vld [vmem:[#allocation3] sm:$0xff]  }
 0x4f6   : > { %4982 = vrot.lane.b32.xlu1 %v4944_v2, %s9844_s28  ;;  %v4845_v54 = vrot.slane %v4843_v3, 1  ;;  %v11745_v11 = vsel %vm3170_vm6, %v5007_v53, %v4971_v62  ;;  %v4850_v37 = vrot.slane %v4848_v60, 1  ;;  %v4862_v22 = vrot.slane %v4860_v59, 1 }
 0x4f7   : > { %v4950_v23 = vsel %vm1491_vm11, %v4948_v47, %v4949_v16 }
 0x4f8   : > { %v4846_v14 = vor.u32 %v4845_v54, %v4841_v5  ;;  %v4865_v13 = vpop.permute.xlu0 %4864  ;;  %v4863_v8 = vsel %vm1238_vm12, %v4858_v39, %v4862_v22 }
 0x4f9   : > { %5121 = vrot.lane.b32.xlu0 %v11729_v26, %s9844_s28  ;;  %v4991_v2 = vsel %vm3133_vm5, %v9793_v27, %v4865_v13 }
 0x4fa   : > { %5088 = vrot.lane.b32.xlu1 %v11711_v45, %s9845_s24  ;;  %v4851_v19 = vsel %vm1238_vm12, %v4846_v14, %v4850_v37  ;;  %v5027_v43 = vsel %vm3170_vm6, %v4991_v2, %v4955_v29 }
 0x4fd   : > { %4894 = vrot.lane.b32.xlu0 %v4839_v34, %s9843_s27 }
 0x4fe   : > { %4984 = vrot.lane.b32.xlu1 %v4947_v52, %s9844_s28 }
 0x501   : > { %5090 = vrot.lane.b32.xlu0 %v11729_v26, %s9845_s24 }
 0x502   : > { %5123 = vrot.lane.b32.xlu1 %v11745_v11, %s9844_s28 }
 0x505   : > { %4896 = vrot.lane.b32.xlu0 %v4851_v19, %s9843_s27 }
 0x506   : > { %4986 = vrot.lane.b32.xlu1 %v4950_v23, %s9844_s28 }
 0x50a   : > { %5092 = vrot.lane.b32.xlu1 %v11745_v11, %s9845_s24 }
 0x50e   : > { %4988 = vrot.lane.b32.xlu1 %v4953_v48, %s9844_s28 }
 0x533   : > { %v4973_v10 = vpop.permute.xlu1 %4972 }
 0x53b   : > { %v4883_v51 = vpop.permute.xlu0 %4882 }
 0x53c   : > { %v5009_v46 = vsel %vm3133_vm5, %v11543_v32, %v4883_v51 }
 0x53d   : > { %v11768_v33 = vsel %vm3170_vm6, %v5009_v46, %v4973_v10 }
 0x53e   : > { %5125 = vrot.lane.b32.xlu0 %v11768_v33, %s9844_s28 }
 0x53f   : > { %v5079_v40 = vpop.permute.xlu0 %5078 }
 0x540   : > { %v5144_v57 = vsel %vm3288_vm9, %v5027_v43, %v5079_v40 }
 0x542   : > { %4898 = vrot.lane.b32.xlu0 %v4863_v8, %s9843_s27 }
 0x543   : > { %v5112_v12 = vpop.permute.xlu1 %5111  ;;  %v4885_v36 = vpop.permute.xlu0 %4884 }
 0x544   : > { %9420 = vmatprep.mubr.msk.bf16.mxu1 %vm3133_vm5, %v5112_v12  ;;  %v5192_v32 = vsel %vm3170_vm6, %v5079_v40, %v5112_v12  ;;  %v5011_v44 = vsel %vm3133_vm5, %v11570_v63, %v4885_v36 }
 0x545   : > { %5454 = vmatprep.mubr.bf16.mxu0 %v5192_v32 }
 0x546   : > { %5455 = vmatmul.mubr.bf16.vlgmr.msra.gmra.mrb[64].mxu0 %v5144_v57  ;;  %5094 = vrot.lane.b32.xlu0 %v11768_v33, %s9845_s24 }
 0x547   : > { %v4975_v6 = vpop.permute.xlu1 %4974  ;;  %v5081_v61 = vpop.permute.xlu0 %5080 }
 0x548   : > { %v11784_v3 = vsel %vm3170_vm6, %v5011_v44, %v4975_v6  ;;  %v5147_v63 = vsel %vm3288_vm9, %v11580_v42, %v5081_v61 }
 0x549   : > { %5127 = vrot.lane.b32.xlu1 %v11784_v3, %s9844_s28 }
 0x54c   : > { %v5114_v18 = vpop.permute.xlu1 %5113 }
 0x54d   : > { %9421 = vmatmul.mubr.msk.bf16.vlgmr.msra.gmra.mrb[64].mxu1 %vm3133_vm5, %v5114_v18  ;;  %v5195_v34 = vsel %vm3170_vm6, %v5081_v61, %v5114_v18  ;;  %5096 = vrot.lane.b32.xlu1 %v11784_v3, %s9845_s24  ;;  %v4887_v25 = vpop.permute.xlu0 %4886 }
 0x54e   : > { %5462 = vmatprep.mubr.bf16.mxu0 %v5195_v34  ;;  %v5013_v52 = vsel %vm3133_vm5, %v11607_v50, %v4887_v25 }
 0x54f   : > { %5463 = vmatmul.mubr.bf16.gmra.mrb[68].mxu0 %v5147_v63 }
 0x550   : > { %v4977_v54 = vpop.permute.xlu1 %4976 }
 0x551   : > { %v11797_v53 = vsel %vm3170_vm6, %v5013_v52, %v4977_v54  ;;  %v5083_v5 = vpop.permute.xlu0 %5082 }
 0x552   : > { %5129 = vrot.lane.b32.xlu0 %v11797_v53, %s9844_s28  ;;  %v5150_v42 = vsel %vm3288_vm9, %v11610_v7, %v5083_v5 }
 0x554   : > { %v5116_v60 = vpop.permute.xlu1 %5115 }
 0x555   : > { %9424 = vmatprep.mubr.msk.bf16.mxu1 %vm3133_vm5, %v5116_v60  ;;  %v5198_v62 = vsel %vm3170_vm6, %v5083_v5, %v5116_v60 }
 0x556   : > { %5098 = vrot.lane.b32.xlu0 %v11797_v53, %s9845_s24  ;;  %5470 = vmatprep.mubr.bf16.mxu0 %v5198_v62 }
 0x557   : > { %5471 = vmatmul.mubr.bf16.gmra.mrb[72].mxu0 %v5150_v42  ;;  %v4889_v50 = vpop.permute.xlu0 %4888 }
 0x558   : > { %v4979_v14 = vpop.permute.xlu1 %4978  ;;  %v5015_v47 = vsel %vm3133_vm5, %v11638_v35, %v4889_v50 }
 0x559   : > { %v11810_v16 = vsel %vm3170_vm6, %v5015_v47, %v4979_v14 }
 0x55a   : > { %5131 = vrot.lane.b32.xlu1 %v11810_v16, %s9844_s28 }
 0x55b   : > { %v5118_v37 = vpop.permute.xlu0 %5117 }
 0x55c   : > { %v5085_v19 = vpop.permute.xlu1 %5084  ;;  %9425 = vmatmul.mubr.msk.bf16.gmra.mrb[68].mxu1 %vm3133_vm5, %v5118_v37 }
 0x55d   : > { %v5201_v23 = vsel %vm3170_vm6, %v5085_v19, %v5118_v37  ;;  %v5153_v7 = vsel %vm3288_vm9, %v11641_v28, %v5085_v19 }
 0x55e   : > { %5478 = vmatprep.mubr.bf16.mxu0 %v5201_v23  ;;  %5100 = vrot.lane.b32.xlu1 %v11810_v16, %s9845_s24 }
 0x55f   : > { %5479 = vmatmul.mubr.bf16.gmra.mrb[76].mxu0 %v5153_v7  ;;  %v4891_v35 = vpop.permute.xlu0 %4890 }
 0x560   : > { %v4981_v20 = vpop.permute.xlu1 %4980  ;;  %v5017_v4 = vsel %vm3133_vm5, %v11661_v17, %v4891_v35 }
 0x561   : > { %v11823_v41 = vsel %vm3170_vm6, %v5017_v4, %v4981_v20 }
 0x562   : > { %5133 = vrot.lane.b32.xlu0 %v11823_v41, %s9844_s28 }
 0x563   : > { %v5087_v48 = vpop.permute.xlu0 %5086 }
 0x564   : > { %v5120_v21 = vpop.permute.xlu1 %5119  ;;  %v5156_v13 = vsel %vm3288_vm9, %v11666_v49, %v5087_v48 }
 0x565   : > { %9428 = vmatprep.mubr.msk.bf16.mxu1 %vm3133_vm5, %v5120_v21  ;;  %v5204_v28 = vsel %vm3170_vm6, %v5087_v48, %v5120_v21 }
 0x566   : > { %5486 = vmatprep.mubr.bf16.mxu0 %v5204_v28  ;;  %5102 = vrot.lane.b32.xlu0 %v11823_v41, %s9845_s24 }
 0x567   : > { %5487 = vmatmul.mubr.bf16.gmra.mrb[80].mxu0 %v5156_v13  ;;  %v4893_v17 = vpop.permute.xlu0 %4892 }
 0x568   : > { %v4983_v29 = vpop.permute.xlu1 %4982  ;;  %v5019_v24 = vsel %vm3133_vm5, %v11688_v15, %v4893_v17 }
 0x569   : > { %v11836_v55 = vsel %vm3170_vm6, %v5019_v24, %v4983_v29 }
 0x56a   : > { %5135 = vrot.lane.b32.xlu1 %v11836_v55, %s9844_s28 }
 0x56b   : > { %v5122_v59 = vpop.permute.xlu0 %5121 }
 0x56c   : > { %v5089_v51 = vpop.permute.xlu1 %5088  ;;  %9429 = vmatmul.mubr.msk.bf16.gmra.mrb[72].mxu1 %vm3133_vm5, %v5122_v59 }
 0x56d   : > { %v5207_v49 = vsel %vm3170_vm6, %v5089_v51, %v5122_v59  ;;  %v5159_v39 = vsel %vm3288_vm9, %v11685_v56, %v5089_v51 }
 0x56e   : > { %5494 = vmatprep.mubr.bf16.mxu0 %v5207_v49  ;;  %5104 = vrot.lane.b32.xlu1 %v11836_v55, %s9845_s24 }
 0x56f   : > { %5495 = vmatmul.mubr.bf16.gmra.mrb[84].mxu0 %v5159_v39  ;;  %v4895_v15 = vpop.permute.xlu0 %4894 }
 0x570   : > { %v4985_v22 = vpop.permute.xlu1 %4984  ;;  %v5021_v10 = vsel %vm3133_vm5, %v11708_v38, %v4895_v15 }
 0x571   : > { %v11849_v46 = vsel %vm3170_vm6, %v5021_v10, %v4985_v22 }
 0x572   : > { %5137 = vrot.lane.b32.xlu0 %v11849_v46, %s9844_s28 }
 0x573   : > { %v5091_v40 = vpop.permute.xlu0 %5090 }
 0x574   : > { %v5124_v8 = vpop.permute.xlu1 %5123  ;;  %v5162_v27 = vsel %vm3288_vm9, %v11711_v45, %v5091_v40 }
 0x575   : > { %9432 = vmatprep.mubr.msk.bf16.mxu1 %vm3133_vm5, %v5124_v8  ;;  %v5210_v56 = vsel %vm3170_vm6, %v5091_v40, %v5124_v8 }
 0x576   : > { %5502 = vmatprep.mubr.bf16.mxu0 %v5210_v56  ;;  %5106 = vrot.lane.b32.xlu0 %v11849_v46, %s9845_s24 }
 0x577   : > { %5503 = vmatmul.mubr.bf16.gmra.mrb[88].mxu0 %v5162_v27  ;;  %v4897_v38 = vpop.permute.xlu0 %4896 }
 0x578   : > { %v4987_v2 = vpop.permute.xlu1 %4986  ;;  %v5023_v12 = vsel %vm3133_vm5, %v11724_v31, %v4897_v38 }
 0x579   : > { %v5059_v36 = vsel %vm3170_vm6, %v5023_v12, %v4987_v2 }
 0x57a   : > { %5139 = vrot.lane.b32.xlu1 %v5059_v36, %s9844_s28 }
 0x57c   : > { %v5093_v43 = vpop.permute.xlu1 %5092 }
 0x57d   : > { %v5165_v57 = vsel %vm3288_vm9, %v11729_v26, %v5093_v43 }
 0x57e   : > { %5108 = vrot.lane.b32.xlu1 %v5059_v36, %s9845_s24 }
 0x580   : > { %v4989_v44 = vpop.permute.xlu1 %4988 }
 0x5b0   : > { %v5126_v32 = vpop.permute.xlu0 %5125 }
 0x5b1   : > { %9433 = vmatmul.mubr.msk.bf16.gmra.mrb[76].mxu1 %vm3133_vm5, %v5126_v32  ;;  %v5213_v45 = vsel %vm3170_vm6, %v5093_v43, %v5126_v32 }
 0x5b2   : > { %5510 = vmatprep.mubr.bf16.mxu0 %v5213_v45 }
 0x5b3   : > { %5511 = vmatmul.mubr.bf16.gmra.mrb[92].mxu0 %v5165_v57 }
 0x5b4   : > { %v4899_v6 = vpop.permute.xlu0 %4898 }
 0x5b5   : > { %v5025_v31 = vsel %vm3133_vm5, %v11754_v30, %v4899_v6 }
 0x5b6   : > { %v5061_v61 = vsel %vm3170_vm6, %v5025_v31, %v4989_v44 }
 0x5b7   : > { %5141 = vrot.lane.b32.xlu0 %v5061_v61, %s9844_s28 }
 0x5b8   : > { %v5095_v18 = vpop.permute.xlu0 %5094 }
 0x5b9   : > { %v5168_v63 = vsel %vm3288_vm9, %v11745_v11, %v5095_v18 }
 0x5bb   : > { %v5128_v34 = vpop.permute.xlu1 %5127 }
 0x5bc   : > { %9436 = vmatprep.mubr.msk.bf16.mxu1 %vm3133_vm5, %v5128_v34  ;;  %v5216_v25 = vsel %vm3170_vm6, %v5095_v18, %v5128_v34 }
 0x5bd   : > { %5518 = vmatprep.mubr.bf16.mxu0 %v5216_v25 }
 0x5be   : > { %5519 = vmatmul.mubr.bf16.gmra.mrb[96].mxu0 %v5168_v63 }
 0x5bf   : > { %v5097_v26 = vpop.permute.xlu1 %5096 }
 0x5c0   : > { %v5171_v54 = vsel %vm3288_vm9, %v11768_v33, %v5097_v26 }
 0x5c4   : > { %v5130_v52 = vpop.permute.xlu0 %5129 }
 0x5c5   : > { %9437 = vmatmul.mubr.msk.bf16.gmra.mrb[80].mxu1 %vm3133_vm5, %v5130_v52  ;;  %v5219_v30 = vsel %vm3170_vm6, %v5097_v26, %v5130_v52 }
 0x5c6   : > { %5526 = vmatprep.mubr.bf16.mxu0 %v5219_v30 }
 0x5c7   : > { %5527 = vmatmul.mubr.bf16.gmra.mrb[100].mxu0 %v5171_v54 }
 0x5c8   : > { %v5099_v5 = vpop.permute.xlu0 %5098 }
 0x5c9   : > { %v5174_v62 = vsel %vm3288_vm9, %v11784_v3, %v5099_v5 }
 0x5cc   : > { %v5132_v60 = vpop.permute.xlu1 %5131 }
 0x5cd   : > { %9440 = vmatprep.mubr.msk.bf16.mxu1 %vm3133_vm5, %v5132_v60  ;;  %v5222_v11 = vsel %vm3170_vm6, %v5099_v5, %v5132_v60 }
 0x5ce   : > { %5534 = vmatprep.mubr.bf16.mxu0 %v5222_v11 }
 0x5cf   : > { %5535 = vmatmul.mubr.bf16.gmra.mrb[104].mxu0 %v5174_v62 }
 0x5d0   : > { %v5101_v42 = vpop.permute.xlu1 %5100 }
 0x5d1   : > { %v5177_v33 = vsel %vm3288_vm9, %v11797_v53, %v5101_v42 }
 0x5d4   : > { %v5134_v50 = vpop.permute.xlu0 %5133 }
 0x5d5   : > { %9441 = vmatmul.mubr.msk.bf16.gmra.mrb[84].mxu1 %vm3133_vm5, %v5134_v50  ;;  %v5225_v14 = vsel %vm3170_vm6, %v5101_v42, %v5134_v50 }
 0x5d6   : > { %5542 = vmatprep.mubr.bf16.mxu0 %v5225_v14  ;;  %v6192_v14 = vld [vmem:[#allocation3 + $0xc] sm:$0xf] }
 0x5d7   : > { %5543 = vmatmul.mubr.bf16.gmra.mrb[108].mxu0 %v5177_v33 }
 0x5d8   : > { %v5103_v47 = vpop.permute.xlu0 %5102 }
 0x5d9   : > { %v5180_v3 = vsel %vm3288_vm9, %v11810_v16, %v5103_v47 }
 0x5dc   : > { %v5136_v37 = vpop.permute.xlu1 %5135 }
 0x5dd   : > { %9444 = vmatprep.mubr.msk.bf16.mxu1 %vm3133_vm5, %v5136_v37  ;;  %v5228_v19 = vsel %vm3170_vm6, %v5103_v47, %v5136_v37 }
 0x5de   : > { %5550 = vmatprep.mubr.bf16.mxu0 %v5228_v19 }
 0x5df   : > { %5551 = vmatmul.mubr.bf16.gmra.mrb[112].mxu0 %v5180_v3 }
 0x5e0   : > { %v5105_v23 = vpop.permute.xlu1 %5104 }
 0x5e1   : > { %v5183_v53 = vsel %vm3288_vm9, %v11823_v41, %v5105_v23  ;;  %v11903_v41 = vld [vmem:[%s12747_s6] ss:$0 sm:$0xff] }
 0x5e4   : > { %v5138_v7 = vpop.permute.xlu0 %5137 }
 0x5e5   : > { %9445 = vmatmul.mubr.msk.bf16.gmra.mrb[88].mxu1 %vm3133_vm5, %v5138_v7  ;;  %v5231_v35 = vsel %vm3170_vm6, %v5105_v23, %v5138_v7 }
 0x5e6   : > { %5558 = vmatprep.mubr.bf16.mxu0 %v5231_v35 }
 0x5e7   : > { %5559 = vmatmul.mubr.bf16.gmra.mrb[116].mxu0 %v5183_v53 }
 0x5e8   : > { %v5107_v20 = vpop.permute.xlu0 %5106 }
 0x5e9   : > { %v5186_v16 = vsel %vm3288_vm9, %v11836_v55, %v5107_v20 }
 0x5ec   : > { %v5140_v4 = vpop.permute.xlu1 %5139 }
 0x5ed   : > { %9448 = vmatprep.mubr.msk.bf16.mxu1 %vm3133_vm5, %v5140_v4  ;;  %v5234_v48 = vsel %vm3170_vm6, %v5107_v20, %v5140_v4 }
 0x5ee   : > { %5566 = vmatprep.mubr.bf16.mxu0 %v5234_v48 }
 0x5ef   : > { %5567 = vmatmul.mubr.bf16.gmra.mrb[120].mxu0 %v5186_v16 }
 0x5f0   : > { %v5109_v45 = vpop.permute.xlu1 %5108 }
 0x5f1   : > { %v5189_v5 = vsel %vm3288_vm9, %v11849_v46, %v5109_v45 }
 0x619   : > { %v9098_v21 = vpop.f32.mrb[64].mxu0 }
 0x61a   : > { %v9099_v28 = vpop.f32.mrb[65].mxu0 }
 0x61b   : > { %v9100_v13 = vadd.f32 %v9099_v28, %v9098_v21  ;;  %v9101_v17 = vpop.f32.mrb[66].mxu0  ;;  %v6196_v21 = vld [vmem:[#allocation3 + $0x14] sm:$0x1] }
 0x61c   : > { %v9102_v29 = vpop.f32.mrb[67].mxu0 }
 0x61d   : > { %v9103_v24 = vadd.f32 %v9102_v29, %v9101_v17  ;;  %v5457_v51 = vadd.f32 %v9100_v13, %v11903_v41 }
 0x61f   : > { %v5460_v55 = vadd.f32 %v9103_v24, %v11903_v41 }
 0x620   : > { %v9422_v59 = vpop.f32.mrb[64].mxu1 }
 0x621   : > { %v5617_v49 = vpop.f32.mrb[65].mxu1 }
 0x622   : > { %v5618_v39 = vadd.f32 %v5617_v49, %v5457_v51  ;;  %v9104_v15 = vpop.f32.mrb[68].mxu0  ;;  %v9423_v22 = vpop.f32.mrb[66].mxu1 }
 0x623   : > { %v9105_v10 = vpop.f32.mrb[69].mxu0  ;;  %v5620_v40 = vpop.f32.mrb[67].mxu1 }
 0x624   : > { %v5744_v8 = vmax.f32 %v5618_v39, 0.0  ;;  %v9106_v56 = vadd.f32 %v9105_v10, %v9104_v15  ;;  %v5621_v27 = vadd.f32 %v5620_v40, %v5460_v55  ;;  %v9107_v38 = vpop.f32.mrb[70].mxu0  ;;  %v6199_v15 = vld [vmem:[#allocation3 + $0x18] sm:$0xf] }
 0x625   : > { %v9108_v2 = vpop.f32.mrb[71].mxu0 }
 0x626   : > { %v8901_v12 = vpack.c.bf16 %v5744_v8, %v5744_v8  ;;  %v5465_v36 = vadd.f32 %v9106_v56, %v11903_v41  ;;  %v5745_v43 = vmax.f32 %v5621_v27, 0.0  ;;  %v9109_v32 = vadd.f32 %v9108_v2, %v9107_v38 }
 0x628   : > { %v5873_v57 = vshrl.u32 %v8901_v12, 16  ;;  %v5626_v44 = vadd.f32 %v9422_v59, %v5465_v36  ;;  %v8902_v6 = vpack.c.bf16 %v5745_v43, %v5745_v43  ;;  %v5468_v31 = vadd.f32 %v9109_v32, %v11903_v41 }
 0x629   : > { %v5876_v18 = vshll.u32 %v8901_v12, 16  ;;  %v5142_v26 = vpop.permute.xlu0 %5141 }
 0x62a   : > { %v5875_v61 = vrot.slane %v5873_v57, 7  ;;  %v5746_v34 = vmax.f32 %v5626_v44, 0.0  ;;  %v5881_v63 = vshrl.u32 %v8902_v6, 16  ;;  %v9110_v25 = vpop.f32.mrb[72].mxu0  ;;  %v5629_v52 = vadd.f32 %v9423_v22, %v5468_v31  ;;  %9449 = vmatmul.mubr.msk.bf16.gmra.mrb[92].mxu1 %vm3133_vm5, %v5142_v26 }
 0x62b   : > { %v9111_v30 = vpop.f32.mrb[73].mxu0  ;;  %v5237_v54 = vsel %vm3170_vm6, %v5109_v45, %v5142_v26  ;;  %v5884_v42 = vshll.u32 %v8902_v6, 16  ;;  %v6203_v45 = vld [vmem:[#allocation3 + $0x20] sm:$0x1] }
 0x62c   : > { %v5878_v60 = vor.u32 %v5876_v18, %v5875_v61  ;;  %v8903_v11 = vpack.c.bf16 %v5746_v34, %v5746_v34  ;;  %v5883_v62 = vrot.slane %v5881_v63, 7  ;;  %v9113_v50 = vpop.f32.mrb[74].mxu0  ;;  %5574 = vmatprep.mubr.bf16.mxu0 %v5237_v54  ;;  %v5747_v33 = vmax.f32 %v5629_v52, 0.0 }
 0x62d   : > { %v9112_v47 = vadd.f32 %v9111_v30, %v9110_v25  ;;  %v9114_v37 = vpop.f32.mrb[75].mxu0  ;;  %5575 = vmatmul.mubr.bf16.gmra.mrb[124].mxu0 %v5189_v5  ;;  %v5879_v19 = vrot.slane %v5875_v61, 4 }
 0x62e   : > { %v6193_v3 = vsel %vm10732_vm4, %v5878_v60, %v6192_v14  ;;  %v5890_v23 = vshrl.u32 %v8903_v11, 16  ;;  %v5886_v7 = vor.u32 %v5884_v42, %v5883_v62  ;;  %v5888_v35 = vrot.slane %v5883_v62, 4 }
 0x62f   : > { %6194 = vst [vmem:[#allocation3 + $0xc] sm:$0xf] %v6193_v3  ;;  %v8904_v46 = vpack.c.bf16 %v5747_v33, %v5747_v33  ;;  %v9115_v53 = vadd.f32 %v9114_v37, %v9113_v50  ;;  %v5473_v20 = vadd.f32 %v9112_v47, %v11903_v41  ;;  %v5893_v48 = vshll.u32 %v8903_v11, 16  ;;  %v9426_v28 = vpop.f32.mrb[68].mxu1 }
 0x630   : > { %v5892_v4 = vrot.slane %v5890_v23, 7  ;;  %v5887_v16 = vsel %vm10200_vm8, %v5879_v19, %v5886_v7  ;;  %v6197_v13 = vsel %vm10192_vm7, %v5888_v35, %v6196_v21  ;;  %v5633_v29 = vpop.f32.mrb[69].mxu1 }
 0x631   : > { %6195 = vst.msk [vmem:[#allocation3 + $0x10] sm:$0xf] %vm511_vm2, %v5887_v16  ;;  %v5898_v17 = vshrl.u32 %v8904_v46, 16  ;;  %v5476_v24 = vadd.f32 %v9115_v53, %v11903_v41  ;;  %6198 = vst [vmem:[#allocation3 + $0x14] sm:$0x1] %v6197_v13  ;;  %v5634_v51 = vadd.f32 %v5633_v29, %v5473_v20  ;;  %v9427_v49 = vpop.f32.mrb[70].mxu1 }
 0x632   : > { %v5895_v59 = vor.u32 %v5893_v48, %v5892_v4  ;;  %v9116_v39 = vpop.f32.mrb[76].mxu0  ;;  %v5901_v55 = vshll.u32 %v8904_v46, 16  ;;  %v5636_v10 = vpop.f32.mrb[71].mxu1  ;;  %v5896_v12 = vrot.slane %v5892_v4, 4  ;;  %v6206_v46 = vld [vmem:[#allocation3 + $0x24] sm:$0xf] }
 0x633   : > { %v5900_v22 = vrot.slane %v5898_v17, 7  ;;  %v9117_v40 = vpop.f32.mrb[77].mxu0  ;;  %v5748_v56 = vmax.f32 %v5634_v51, 0.0  ;;  %v5637_v27 = vadd.f32 %v5636_v10, %v5476_v24  ;;  %v6210_v17 = vld [vmem:[#allocation3 + $0x2c] sm:$0x1] }
 0x634   : > { %v6200_v8 = vsel %vm10732_vm4, %v5895_v59, %v6199_v15  ;;  %v9118_v38 = vadd.f32 %v9117_v40, %v9116_v39  ;;  %v9119_v2 = vpop.f32.mrb[78].mxu0 }
 0x635   : > { %6201 = vst [vmem:[#allocation3 + $0x18] sm:$0xf] %v6200_v8  ;;  %v5903_v36 = vor.u32 %v5901_v55, %v5900_v22  ;;  %v5905_v43 = vrot.slane %v5900_v22, 4  ;;  %v9120_v32 = vpop.f32.mrb[79].mxu0  ;;  %v8905_v57 = vpack.c.bf16 %v5748_v56, %v5748_v56  ;;  %v5749_v44 = vmax.f32 %v5637_v27, 0.0 }
 0x636   : > { %v5481_v6 = vadd.f32 %v9118_v38, %v11903_v41  ;;  %v9121_v31 = vadd.f32 %v9120_v32, %v9119_v2  ;;  %v6213_v8 = vld [vmem:[#allocation3 + $0x30] sm:$0xf] }
 0x637   : > { %v5904_v61 = vsel %vm10200_vm8, %v5896_v12, %v5903_v36  ;;  %v6204_v18 = vsel %vm10192_vm7, %v5905_v43, %v6203_v45  ;;  %v5907_v34 = vshrl.u32 %v8905_v57, 16  ;;  %v8906_v63 = vpack.c.bf16 %v5749_v44, %v5749_v44 }
 0x638   : > { %6202 = vst.msk [vmem:[#allocation3 + $0x1c] sm:$0xf] %vm511_vm2, %v5904_v61  ;;  %6205 = vst [vmem:[#allocation3 + $0x20] sm:$0x1] %v6204_v18  ;;  %v5642_v25 = vadd.f32 %v9426_v28, %v5481_v6  ;;  %v11930_v26 = vld [vmem:[#allocation3 + $0xc] sm:$0xff]   ;;  %v5910_v52 = vshll.u32 %v8905_v57, 16  ;;  %v5484_v30 = vadd.f32 %v9121_v31, %v11903_v41 }
 0x639   : > { %v11933_v54 = vld [vmem:[#allocation3 + $0x14] ss:$0 sps:$4 sm:$0x11]   ;;  %v5909_v5 = vrot.slane %v5907_v34, 7  ;;  %v5915_v60 = vshrl.u32 %v8906_v63, 16  ;;  %v5918_v11 = vshll.u32 %v8906_v63, 16 }
 0x63a   : > { %v5750_v62 = vmax.f32 %v5642_v25, 0.0  ;;  %v9122_v42 = vpop.f32.mrb[80].mxu0  ;;  %v5645_v50 = vadd.f32 %v9427_v49, %v5484_v30  ;;  %v6515_v33 = vshrl.u32 %v11930_v26, 16  ;;  %v6517_v47 = vshll.u32 %v11930_v26, 16 }
 0x63b   : > { %v9123_v14 = vpop.f32.mrb[81].mxu0  ;;  %v6522_v37 = vshll.u32 %v11933_v54, 16  ;;  %v5912_v19 = vor.u32 %v5910_v52, %v5909_v5  ;;  %v5913_v3 = vrot.slane %v5909_v5, 4  ;;  %v5917_v23 = vrot.slane %v5915_v60, 7 }
 0x63c   : > { %v8907_v7 = vpack.c.bf16 %v5750_v62, %v5750_v62  ;;  %v9125_v35 = vpop.f32.mrb[82].mxu0  ;;  %v5751_v53 = vmax.f32 %v5645_v50, 0.0  ;;  %v9124_v20 = vadd.f32 %v9123_v14, %v9122_v42  ;;  %v6519_v48 = vrot.slane %v6517_v47, 1  ;;  %v6217_v47 = vld [vmem:[#allocation3 + $0x38] sm:$0x1] }
 0x63d   : > { %v9126_v4 = vpop.f32.mrb[83].mxu0  ;;  %v6524_v16 = vrot.slane %v6522_v37, 1  ;;  %v6207_v21 = vsel %vm10732_vm4, %v5912_v19, %v6206_v46  ;;  %v5920_v28 = vor.u32 %v5918_v11, %v5917_v23  ;;  %v5922_v13 = vrot.slane %v5917_v23, 4 }
 0x63e   : > { %v5924_v29 = vshrl.u32 %v8907_v7, 16  ;;  %6208 = vst [vmem:[#allocation3 + $0x24] sm:$0xf] %v6207_v21  ;;  %v5927_v24 = vshll.u32 %v8907_v7, 16  ;;  %v8908_v59 = vpack.c.bf16 %v5751_v53, %v5751_v53  ;;  %v9127_v51 = vadd.f32 %v9126_v4, %v9125_v35 }
 0x63f   : > { %v5489_v49 = vadd.f32 %v9124_v20, %v11903_v41  ;;  %v11941_v39 = vld [vmem:[#allocation3 + $0x18] sm:$0xff]   ;;  %v5921_v15 = vsel %vm10200_vm8, %v5913_v3, %v5920_v28  ;;  %v6211_v22 = vsel %vm10192_vm7, %v5922_v13, %v6210_v17  ;;  %v9430_v10 = vpop.f32.mrb[72].mxu1  ;;  %v6520_v40 = vor.u32 %v6519_v48, %v6515_v33  ;;  %v11951_v6 = vld [vmem:[#allocation3 + $0x20] ss:$0 sps:$4 sm:$0x11]  }
 0x640   : > { %v5926_v55 = vrot.slane %v5924_v29, 7  ;;  %6209 = vst.msk [vmem:[#allocation3 + $0x28] sm:$0xf] %vm511_vm2, %v5921_v15  ;;  %6212 = vst [vmem:[#allocation3 + $0x2c] sm:$0x1] %v6211_v22  ;;  %v5932_v56 = vshrl.u32 %v8908_v59, 16  ;;  %v5492_v2 = vadd.f32 %v9127_v51, %v11903_v41 }
 0x641   : > { %v5935_v27 = vshll.u32 %v8908_v59, 16  ;;  %v5649_v38 = vpop.f32.mrb[73].mxu1  ;;  %v6757_v12 = vrot.slane %v11930_v26, 1  ;;  %v6525_v44 = vsel %vm1238_vm12, %v6520_v40, %v6524_v16  ;;  %v6758_v34 = vrot.slane %v11933_v54, 1 }
 0x642   : > { %v5929_v36 = vor.u32 %v5927_v24, %v5926_v55  ;;  %v5930_v43 = vrot.slane %v5926_v55, 4  ;;  %v5650_v32 = vadd.f32 %v5649_v38, %v5489_v49  ;;  %v9431_v45 = vpop.f32.mrb[74].mxu1  ;;  %v9128_v57 = vpop.f32.mrb[84].mxu0  ;;  %v5934_v31 = vrot.slane %v5932_v56, 7  ;;  %6720 = vrot.lane.b32.xlu0 %v6525_v44, %s9843_s27 }
 0x643   : > { %v5652_v61 = vpop.f32.mrb[75].mxu1  ;;  %v9129_v18 = vpop.f32.mrb[85].mxu0  ;;  %v6527_v63 = vshrl.u32 %v11941_v39, 16  ;;  %v6529_v25 = vshll.u32 %v11941_v39, 16  ;;  %v6759_v14 = vsel %vm1491_vm11, %v6757_v12, %v6758_v34  ;;  %v6534_v46 = vshll.u32 %v11951_v6, 16 }
 0x644   : > { %v6214_v52 = vsel %vm10732_vm4, %v5929_v36, %v6213_v8  ;;  %v5752_v30 = vmax.f32 %v5650_v32, 0.0  ;;  %v5653_v5 = vadd.f32 %v5652_v61, %v5492_v2  ;;  %v9130_v60 = vadd.f32 %v9129_v18, %v9128_v57  ;;  %v9131_v11 = vpop.f32.mrb[86].mxu0  ;;  %v6220_v12 = vld [vmem:[#allocation3 + $0x3c] sm:$0xf]  ;;  %v6224_v61 = vld [vmem:[#allocation3 + $0x44] sm:$0x1] }
 0x645   : > { %6215 = vst [vmem:[#allocation3 + $0x30] sm:$0xf] %v6214_v52  ;;  %v5937_v62 = vor.u32 %v5935_v27, %v5934_v31  ;;  %v5939_v42 = vrot.slane %v5934_v31, 4  ;;  %v9132_v50 = vpop.f32.mrb[87].mxu0  ;;  %v6531_v33 = vrot.slane %v6529_v25, 1  ;;  %v6536_v21 = vrot.slane %v6534_v46, 1 }
 0x646   : > { %v8909_v54 = vpack.c.bf16 %v5752_v30, %v5752_v30  ;;  %v5753_v37 = vmax.f32 %v5653_v5, 0.0  ;;  %v5497_v19 = vadd.f32 %v9130_v60, %v11903_v41  ;;  %v9133_v3 = vadd.f32 %v9132_v50, %v9131_v11  ;;  %6810 = vrot.lane.b32.xlu0 %v6759_v14, %s9844_s28 }
 0x647   : > { %v5938_v23 = vsel %vm10200_vm8, %v5930_v43, %v5937_v62  ;;  %v6218_v7 = vsel %vm10192_vm7, %v5939_v42, %v6217_v47  ;;  %v6532_v35 = vor.u32 %v6531_v33, %v6527_v63  ;;  %v6760_v28 = vrot.slane %v11941_v39, 1  ;;  %v9721_v13 = vld [vmem:[#allocation3 + $0x24] sm:$0xff]   ;;  %v9722_v40 = vld [vmem:[#allocation3 + $0x2c] ss:$0 sps:$4 sm:$0x11]  }
 0x648   : > { %6216 = vst.msk [vmem:[#allocation3 + $0x34] sm:$0xf] %vm511_vm2, %v5938_v23  ;;  %6219 = vst [vmem:[#allocation3 + $0x38] sm:$0x1] %v6218_v7  ;;  %v5941_v53 = vshrl.u32 %v8909_v54, 16  ;;  %v8910_v20 = vpack.c.bf16 %v5753_v37, %v5753_v37  ;;  %v5658_v4 = vadd.f32 %v9430_v10, %v5497_v19  ;;  %v5944_v48 = vshll.u32 %v8909_v54, 16 }
 0x649   : > { %v5500_v16 = vadd.f32 %v9133_v3, %v11903_v41  ;;  %v6761_v51 = vrot.slane %v11951_v6, 1  ;;  %v6537_v22 = vsel %vm1238_vm12, %v6532_v35, %v6536_v21  ;;  %v6763_v10 = vrot.slane %v9721_v13, 1  ;;  %v6227_v7 = vld [vmem:[#allocation3 + $0x48] sm:$0xf] }
 0x64a   : > { %v5943_v17 = vrot.slane %v5941_v53, 7  ;;  %v5949_v29 = vshrl.u32 %v8910_v20, 16  ;;  %v5754_v24 = vmax.f32 %v5658_v4, 0.0  ;;  %v9134_v59 = vpop.f32.mrb[88].mxu0  ;;  %v5952_v49 = vshll.u32 %v8910_v20, 16  ;;  %6722 = vrot.lane.b32.xlu1 %v6537_v22, %s9843_s27 }
 0x64b   : > { %v5661_v15 = vadd.f32 %v9431_v45, %v5500_v16  ;;  %v9135_v55 = vpop.f32.mrb[89].mxu0  ;;  %v6764_v57 = vrot.slane %v9722_v40, 1  ;;  %v6539_v44 = vshrl.u32 %v9721_v13, 16  ;;  %v6762_v25 = vsel %vm1491_vm11, %v6760_v28, %v6761_v51 }
 0x64c   : > { %v5946_v8 = vor.u32 %v5944_v48, %v5943_v17  ;;  %v5947_v56 = vrot.slane %v5943_v17, 4  ;;  %v5951_v27 = vrot.slane %v5949_v29, 7  ;;  %v8911_v38 = vpack.c.bf16 %v5754_v24, %v5754_v24  ;;  %v9137_v2 = vpop.f32.mrb[90].mxu0  ;;  %v6231_v29 = vld [vmem:[#allocation3 + $0x50] sm:$0x1] }
 0x64d   : > { %v5755_v36 = vmax.f32 %v5661_v15, 0.0  ;;  %v11973_v43 = vadd.f32 %v9135_v55, %v9134_v59  ;;  %v9138_v32 = vpop.f32.mrb[91].mxu0  ;;  %v6541_v62 = vshll.u32 %v9721_v13, 16  ;;  %v6765_v14 = vsel %vm1491_vm11, %v6763_v10, %v6764_v57 }
 0x64e   : > { %v6221_v45 = vsel %vm10732_vm4, %v5946_v8, %v6220_v12  ;;  %v5954_v6 = vor.u32 %v5952_v49, %v5951_v27  ;;  %v5956_v31 = vrot.slane %v5951_v27, 4  ;;  %v5958_v18 = vshrl.u32 %v8911_v38, 16  ;;  %6812 = vrot.lane.b32.xlu1 %v6762_v25, %s9844_s28 }
 0x64f   : > { %6222 = vst [vmem:[#allocation3 + $0x3c] sm:$0xf] %v6221_v45  ;;  %v5961_v34 = vshll.u32 %v8911_v38, 16  ;;  %v8912_v63 = vpack.c.bf16 %v5755_v36, %v5755_v36  ;;  %v11978_v52 = vadd.f32 %v9138_v32, %v9137_v2  ;;  %v11980_v30 = vld [vmem:[#allocation3 + $0x30] sm:$0xff]   ;;  %v6546_v33 = vshll.u32 %v9722_v40, 16 }
 0x650   : > { %v5955_v5 = vsel %vm10200_vm8, %v5947_v56, %v5954_v6  ;;  %v6225_v60 = vsel %vm10192_vm7, %v5956_v31, %v6224_v61  ;;  %v5960_v11 = vrot.slane %v5958_v18, 7  ;;  %v9724_v42 = vld [vmem:[#allocation3 + $0x38] ss:$0 sps:$4 sm:$0x11]   ;;  %v6766_v47 = vrot.slane %v11980_v30, 1 }
 0x651   : > { %6223 = vst.msk [vmem:[#allocation3 + $0x40] sm:$0xf] %vm511_vm2, %v5955_v5  ;;  %6226 = vst [vmem:[#allocation3 + $0x44] sm:$0x1] %v6225_v60  ;;  %v5966_v50 = vshrl.u32 %v8912_v63, 16  ;;  %v5969_v37 = vshll.u32 %v8912_v63, 16 }
 0x652   : > { %v5963_v54 = vor.u32 %v5961_v34, %v5960_v11  ;;  %v6543_v19 = vrot.slane %v6541_v62, 1  ;;  %v6767_v3 = vrot.slane %v9724_v42, 1  ;;  %v5964_v23 = vrot.slane %v5960_v11, 4  ;;  %6814 = vrot.lane.b32.xlu1 %v6765_v14, %s9844_s28 }
 0x653   : > { %v5968_v35 = vrot.slane %v5966_v50, 7  ;;  %v6548_v46 = vrot.slane %v6546_v33, 1  ;;  %v6553_v53 = vshll.u32 %v11980_v30, 16  ;;  %v6551_v48 = vshrl.u32 %v11980_v30, 16 }
 0x654   : > { %v6228_v20 = vsel %vm10732_vm4, %v5963_v54, %v6227_v7  ;;  %v6544_v4 = vor.u32 %v6543_v19, %v6539_v44  ;;  %v6558_v16 = vshll.u32 %v9724_v42, 16  ;;  %v6768_v13 = vsel %vm1491_vm11, %v6766_v47, %v6767_v3 }
 0x655   : > { %6229 = vst [vmem:[#allocation3 + $0x48] sm:$0xf] %v6228_v20  ;;  %v5971_v21 = vor.u32 %v5969_v37, %v5968_v35  ;;  %v5973_v28 = vrot.slane %v5968_v35, 4  ;;  %v6555_v17 = vrot.slane %v6553_v53, 1  ;;  %v5505_v42 = vadd.f32 %v11973_v43, %v11903_v41 }
 0x656   : > { %v6549_v24 = vsel %vm1238_vm12, %v6544_v4, %v6548_v46  ;;  %v6560_v15 = vrot.slane %v6558_v16, 1  ;;  %6816 = vrot.lane.b32.xlu1 %v6768_v13, %s9844_s28  ;;  %v5508_v54 = vadd.f32 %v11978_v52, %v11903_v41 }
 0x657   : > { %v5972_v59 = vsel %vm10200_vm8, %v5964_v23, %v5971_v21  ;;  %v6232_v51 = vsel %vm10192_vm7, %v5973_v28, %v6231_v29  ;;  %6724 = vrot.lane.b32.xlu0 %v6549_v24, %s9843_s27  ;;  %v6556_v49 = vor.u32 %v6555_v17, %v6551_v48 }
 0x658   : > { %6230 = vst.msk [vmem:[#allocation3 + $0x4c] sm:$0xf] %vm511_vm2, %v5972_v59  ;;  %6233 = vst [vmem:[#allocation3 + $0x50] sm:$0x1] %v6232_v51  ;;  %v12004_v22 = vld [vmem:[#allocation3 + $0x3c] sm:$0xff]  }
 0x659   : > { %v6561_v55 = vsel %vm1238_vm12, %v6556_v49, %v6560_v15  ;;  %v9726_v40 = vld [vmem:[#allocation3 + $0x44] ss:$0 sps:$4 sm:$0x11]   ;;  %v6769_v10 = vrot.slane %v12004_v22, 1  ;;  %v6565_v8 = vshll.u32 %v12004_v22, 16  ;;  %v6563_v38 = vshrl.u32 %v12004_v22, 16 }
 0x65a   : > { %v6770_v56 = vrot.slane %v9726_v40, 1  ;;  %v6570_v27 = vshll.u32 %v9726_v40, 16 }
 0x65b   : > { %6726 = vrot.lane.b32.xlu0 %v6561_v55, %s9843_s27  ;;  %v6567_v2 = vrot.slane %v6565_v8, 1  ;;  %v6234_v55 = vld [vmem:[#allocation3 + $0x54] sm:$0xf] }
 0x65c   : > { %v6771_v12 = vsel %vm1491_vm11, %v6769_v10, %v6770_v56  ;;  %v6572_v32 = vrot.slane %v6570_v27, 1 }
 0x65d   : > { %6818 = vrot.lane.b32.xlu1 %v6771_v12, %s9844_s28  ;;  %v6568_v36 = vor.u32 %v6567_v2, %v6563_v38 }
 0x65f   : > { %v12013_v57 = vld [vmem:[#allocation3 + $0x48] sm:$0xff]   ;;  %v6573_v44 = vsel %vm1238_vm12, %v6568_v36, %v6572_v32  ;;  %v9728_v45 = vld [vmem:[#allocation3 + $0x50] ss:$0 sps:$4 sm:$0x11]  }
 0x660   : > { %6728 = vrot.lane.b32.xlu0 %v6573_v44, %s9843_s27  ;;  %v6772_v6 = vrot.slane %v12013_v57, 1  ;;  %v6577_v31 = vshll.u32 %v12013_v57, 16  ;;  %v6773_v61 = vrot.slane %v9728_v45, 1  ;;  %v6582_v18 = vshll.u32 %v9728_v45, 16 }
 0x661   : > { %v6575_v34 = vshrl.u32 %v12013_v57, 16 }
 0x662   : > { %v6579_v63 = vrot.slane %v6577_v31, 1  ;;  %v6774_v25 = vsel %vm1491_vm11, %v6772_v6, %v6773_v61  ;;  %v6584_v60 = vrot.slane %v6582_v18, 1  ;;  %v6238_v61 = vld [vmem:[#allocation3 + $0x5c] sm:$0x1] }
 0x663   : > { %6820 = vrot.lane.b32.xlu1 %v6774_v25, %s9844_s28 }
 0x664   : > { %v6580_v5 = vor.u32 %v6579_v63, %v6575_v34  ;;  %v12034_v34 = vld [vmem:[#allocation3] sm:$0xff]  }
 0x666   : > { %v6585_v11 = vsel %vm1238_vm12, %v6580_v5, %v6584_v60  ;;  %v9747_v60 = vld [vmem:[%s12748_s7 + $0x40] sm:$0xff]  }
 0x667   : > { %6730 = vrot.lane.b32.xlu0 %v6585_v11, %s9843_s27  ;;  %v9748_v11 = vld [vmem:[%s12748_s7] sm:$0xff]   ;;  %9212 = vmatprep.subr.bf16.mxu1 %v9747_v60 }
 0x668   : > { %9213 = vmatpush3.bf16.msra.mxu1 %v9748_v11 }
 0x684   : > { %v9434_v62 = vpop.f32.mrb[76].mxu1 }
 0x685   : > { %v5665_v50 = vpop.f32.mrb[77].mxu1 }
 0x686   : > { %v5666_v14 = vadd.f32 %v5665_v50, %v5505_v42  ;;  %v9140_v33 = vpop.f32.mrb[92].mxu0  ;;  %v9435_v47 = vpop.f32.mrb[78].mxu1  ;;  %v12048_v50 = vld [vmem:[#allocation3 + $0x8] ss:$0 sps:$4 sm:$0x11]  }
 0x687   : > { %v9141_v37 = vpop.f32.mrb[93].mxu0  ;;  %v5668_v19 = vpop.f32.mrb[79].mxu1 }
 0x688   : > { %v5756_v3 = vmax.f32 %v5666_v14, 0.0  ;;  %v9142_v23 = vadd.f32 %v9141_v37, %v9140_v33  ;;  %v5669_v7 = vadd.f32 %v5668_v19, %v5508_v54  ;;  %v9143_v35 = vpop.f32.mrb[94].mxu0  ;;  %v6241_v14 = vld [vmem:[#allocation3 + $0x60] sm:$0xf] }
 0x689   : > { %v9144_v46 = vpop.f32.mrb[95].mxu0 }
 0x68a   : > { %v8913_v53 = vpack.c.bf16 %v5756_v3, %v5756_v3  ;;  %v5513_v20 = vadd.f32 %v9142_v23, %v11903_v41  ;;  %v5757_v4 = vmax.f32 %v5669_v7, 0.0  ;;  %v9145_v48 = vadd.f32 %v9144_v46, %v9143_v35  ;;  %v9750_v7 = vld [vmem:[%s12748_s7 + $0x8] sm:$0xff]  }
 0x68b   : > { %v6754_v23 = vrot.slane %v12034_v34, 1 }
 0x68c   : > { %v5975_v43 = vshrl.u32 %v8913_v53, 16  ;;  %v5674_v16 = vadd.f32 %v9434_v62, %v5513_v20  ;;  %v8914_v21 = vpack.c.bf16 %v5757_v4, %v5757_v4  ;;  %v5516_v28 = vadd.f32 %v9145_v48, %v11903_v41  ;;  %v9749_v62 = vld [vmem:[%s12748_s7 + $0x48] sm:$0xff]   ;;  %v6245_v20 = vld [vmem:[#allocation3 + $0x68] sm:$0x1] }
 0x68d   : > { %v5978_v17 = vshll.u32 %v8913_v53, 16  ;;  %9214 = vmatprep.subr.bf16.mxu1 %v9749_v62  ;;  %v9754_v62 = vld [vmem:[%s12748_s7 + $0x18] sm:$0xff]  }
 0x68e   : > { %v5977_v13 = vrot.slane %v5975_v43, 7  ;;  %v5758_v52 = vmax.f32 %v5674_v16, 0.0  ;;  %v5983_v29 = vshrl.u32 %v8914_v21, 16  ;;  %v5677_v24 = vadd.f32 %v9435_v47, %v5516_v28  ;;  %9215 = vmatpush3.bf16.msra.mxu1 %v9750_v7 }
 0x68f   : > { %v5986_v15 = vshll.u32 %v8914_v21, 16 }
 0x690   : > { %v5980_v59 = vor.u32 %v5978_v17, %v5977_v13  ;;  %v8915_v51 = vpack.c.bf16 %v5758_v52, %v5758_v52  ;;  %v5985_v49 = vrot.slane %v5983_v29, 7  ;;  %v5759_v40 = vmax.f32 %v5677_v24, 0.0 }
 0x691   : > { %v9146_v10 = vpop.f32.mrb[96].mxu0  ;;  %v5981_v8 = vrot.slane %v5977_v13, 4  ;;  %v6755_v13 = vrot.slane %v12048_v50, 1  ;;  %v6505_v17 = vshll.u32 %v12034_v34, 16 }
 0x692   : > { %v6235_v56 = vsel %vm10732_vm4, %v5980_v59, %v6234_v55  ;;  %v5992_v27 = vshrl.u32 %v8915_v51, 16  ;;  %v5988_v38 = vor.u32 %v5986_v15, %v5985_v49  ;;  %v9147_v2 = vpop.f32.mrb[97].mxu0  ;;  %v5990_v12 = vrot.slane %v5985_v49, 4  ;;  %v9751_v49 = vld [vmem:[%s12748_s7 + $0x50] sm:$0xff]  }
 0x693   : > { %6236 = vst [vmem:[#allocation3 + $0x54] sm:$0xf] %v6235_v56  ;;  %v8916_v36 = vpack.c.bf16 %v5759_v40, %v5759_v40  ;;  %v9148_v32 = vadd.f32 %v9147_v2, %v9146_v10  ;;  %v9149_v44 = vpop.f32.mrb[98].mxu0  ;;  %v5995_v6 = vshll.u32 %v8915_v51, 16  ;;  %v6503_v10 = vshrl.u32 %v12034_v34, 16  ;;  %9216 = vmatprep.subr.bf16.mxu1 %v9751_v49 }
 0x694   : > { %v5994_v45 = vrot.slane %v5992_v27, 7  ;;  %v5989_v31 = vsel %vm10200_vm8, %v5981_v8, %v5988_v38  ;;  %v9150_v18 = vpop.f32.mrb[99].mxu0  ;;  %v6239_v63 = vsel %vm10192_vm7, %v5990_v12, %v6238_v61  ;;  %v9752_v8 = vld [vmem:[%s12748_s7 + $0x10] sm:$0xff]   ;;  %v6510_v12 = vshll.u32 %v12048_v50, 16 }
 0x695   : > { %6237 = vst.msk [vmem:[#allocation3 + $0x58] sm:$0xf] %vm511_vm2, %v5989_v31  ;;  %v6000_v25 = vshrl.u32 %v8916_v36, 16  ;;  %v9151_v5 = vadd.f32 %v9150_v18, %v9149_v44  ;;  %6240 = vst [vmem:[#allocation3 + $0x5c] sm:$0x1] %v6239_v63  ;;  %v6003_v47 = vshll.u32 %v8916_v36, 16  ;;  %v5521_v37 = vadd.f32 %v9148_v32, %v11903_v41  ;;  %9217 = vmatpush3.bf16.msra.mxu1 %v9752_v8 }
 0x696   : > { %v5997_v42 = vor.u32 %v5995_v6, %v5994_v45  ;;  %v5998_v35 = vrot.slane %v5994_v45, 4  ;;  %v12078_v45 = vrot.slane %v6505_v17, 1  ;;  %v9753_v6 = vld [vmem:[%s12748_s7 + $0x58] sm:$0xff]   ;;  %v12097_v17 = vsel %vm1491_vm11, %v6754_v23, %v6755_v13  ;;  %v9757_v23 = vld [vmem:[%s12748_s7 + $0x60] sm:$0xff]  }
 0x697   : > { %v6002_v33 = vrot.slane %v6000_v25, 7  ;;  %v5524_v21 = vadd.f32 %v9151_v5, %v11903_v41  ;;  %9218 = vmatprep.subr.bf16.mxu1 %v9753_v6  ;;  %v9758_v13 = vld [vmem:[%s12748_s7 + $0x20] sm:$0xff]  }
 0x698   : > { %v9438_v54 = vpop.f32.mrb[80].mxu1  ;;  %v6242_v19 = vsel %vm10732_vm4, %v5997_v42, %v6241_v14 }
 0x699   : > { %v5681_v3 = vpop.f32.mrb[81].mxu1  ;;  %6243 = vst [vmem:[#allocation3 + $0x60] sm:$0xf] %v6242_v19  ;;  %v6005_v46 = vor.u32 %v6003_v47, %v6002_v33  ;;  %v6007_v53 = vrot.slane %v6002_v33, 4  ;;  %9219 = vmatpush3.bf16.msra.mxu1 %v9754_v62  ;;  %v9759_v62 = vld [vmem:[%s12748_s7 + $0x68] sm:$0xff]  }
 0x69a   : > { %v5682_v4 = vadd.f32 %v5681_v3, %v5521_v37  ;;  %v9152_v48 = vpop.f32.mrb[100].mxu0  ;;  %v9439_v43 = vpop.f32.mrb[82].mxu1  ;;  %v12089_v3 = vrot.slane %v6510_v12, 1  ;;  %9220 = vmatprep.subr.bf16.mxu1 %v9757_v23 }
 0x69b   : > { %v9153_v16 = vpop.f32.mrb[101].mxu0  ;;  %v5684_v28 = vpop.f32.mrb[83].mxu1  ;;  %v6006_v52 = vsel %vm10200_vm8, %v5998_v35, %v6005_v46  ;;  %v6246_v29 = vsel %vm10192_vm7, %v6007_v53, %v6245_v20  ;;  %v6248_v35 = vld [vmem:[#allocation3 + $0x6c] sm:$0xf] }
 0x69c   : > { %v5760_v24 = vmax.f32 %v5682_v4, 0.0  ;;  %v9154_v59 = vadd.f32 %v9153_v16, %v9152_v48  ;;  %v9155_v51 = vpop.f32.mrb[102].mxu0  ;;  %6244 = vst.msk [vmem:[#allocation3 + $0x64] sm:$0xf] %vm511_vm2, %v6006_v52  ;;  %6247 = vst [vmem:[#allocation3 + $0x68] sm:$0x1] %v6246_v29  ;;  %v5685_v15 = vadd.f32 %v5684_v28, %v5524_v21 }
 0x69d   : > { %v9156_v55 = vpop.f32.mrb[103].mxu0  ;;  %v12068_v40 = vld [vmem:[#allocation3 + $0x54] sm:$0xff]   ;;  %v9730_v2 = vld [vmem:[#allocation3 + $0x5c] ss:$0 sps:$4 sm:$0x11]   ;;  %9221 = vmatpush3.bf16.msra.mxu1 %v9758_v13 }
 0x69e   : > { %v8917_v56 = vpack.c.bf16 %v5760_v24, %v5760_v24  ;;  %v5529_v27 = vadd.f32 %v9154_v59, %v11903_v41  ;;  %v9157_v38 = vadd.f32 %v9156_v55, %v9155_v51  ;;  %v5761_v36 = vmax.f32 %v5685_v15, 0.0  ;;  %9222 = vmatprep.subr.bf16.mxu1 %v9759_v62 }
 0x69f   : > { %v6775_v32 = vrot.slane %v12068_v40, 1  ;;  %v6589_v44 = vshll.u32 %v12068_v40, 16  ;;  %v6587_v63 = vshrl.u32 %v12068_v40, 16  ;;  %v6776_v60 = vrot.slane %v9730_v2, 1 }
 0x6a0   : > { %v6009_v31 = vshrl.u32 %v8917_v56, 16  ;;  %v5690_v61 = vadd.f32 %v9438_v54, %v5529_v27  ;;  %v5532_v18 = vadd.f32 %v9157_v38, %v11903_v41  ;;  %v6012_v25 = vshll.u32 %v8917_v56, 16  ;;  %v6252_v38 = vld [vmem:[#allocation3 + $0x74] sm:$0x1] }
 0x6a1   : > { %v8918_v5 = vpack.c.bf16 %v5761_v36, %v5761_v36  ;;  %v6591_v11 = vrot.slane %v6589_v44, 1  ;;  %v6594_v33 = vshll.u32 %v9730_v2, 16  ;;  %v6777_v19 = vsel %vm1491_vm11, %v6775_v32, %v6776_v60  ;;  %v6255_v32 = vld [vmem:[#allocation3 + $0x78] sm:$0xf] }
 0x6a2   : > { %v6011_v42 = vrot.slane %v6009_v31, 7  ;;  %v5762_v50 = vmax.f32 %v5690_v61, 0.0  ;;  %v5693_v14 = vadd.f32 %v9439_v43, %v5532_v18  ;;  %v9158_v37 = vpop.f32.mrb[104].mxu0  ;;  %6822 = vrot.lane.b32.xlu1 %v6777_v19, %s9844_s28 }
 0x6a3   : > { %v6017_v47 = vshrl.u32 %v8918_v5, 16  ;;  %v6020_v54 = vshll.u32 %v8918_v5, 16  ;;  %v9159_v20 = vpop.f32.mrb[105].mxu0  ;;  %v6592_v4 = vor.u32 %v6591_v11, %v6587_v63  ;;  %v12092_v28 = vld [vmem:[#allocation3 + $0x60] sm:$0xff]   ;;  %v6596_v51 = vrot.slane %v6594_v33, 1 }
 0x6a4   : > { %v6014_v7 = vor.u32 %v6012_v25, %v6011_v42  ;;  %v8919_v46 = vpack.c.bf16 %v5762_v50, %v5762_v50  ;;  %v5763_v53 = vmax.f32 %v5693_v14, 0.0  ;;  %v6015_v48 = vrot.slane %v6011_v42, 4  ;;  %v9161_v21 = vpop.f32.mrb[106].mxu0  ;;  %v12101_v49 = vld [vmem:[#allocation3 + $0x68] ss:$0 sps:$4 sm:$0x11]  }
 0x6a5   : > { %v6019_v16 = vrot.slane %v6017_v47, 7  ;;  %v9160_v43 = vadd.f32 %v9159_v20, %v9158_v37  ;;  %v9162_v59 = vpop.f32.mrb[107].mxu0  ;;  %v6597_v36 = vsel %vm1238_vm12, %v6592_v4, %v6596_v51  ;;  %v6778_v18 = vrot.slane %v12092_v28, 1  ;;  %v9760_v42 = vld [vmem:[%s12748_s7 + $0x28] sm:$0xff]   ;;  %v6259_v20 = vld [vmem:[#allocation3 + $0x80] sm:$0x1] }
 0x6a6   : > { %v6249_v52 = vsel %vm10732_vm4, %v6014_v7, %v6248_v35  ;;  %v6026_v29 = vshrl.u32 %v8919_v46, 16  ;;  %v8920_v24 = vpack.c.bf16 %v5763_v53, %v5763_v53  ;;  %v6029_v15 = vshll.u32 %v8919_v46, 16  ;;  %6732 = vrot.lane.b32.xlu0 %v6597_v36, %s9843_s27  ;;  %9223 = vmatpush3.bf16.msra.mxu1 %v9760_v42  ;;  %v6262_v42 = vld [vmem:[#allocation3 + $0x84] sm:$0xf] }
 0x6a7   : > { %6250 = vst [vmem:[#allocation3 + $0x6c] sm:$0xf] %v6249_v52  ;;  %v6022_v55 = vor.u32 %v6020_v54, %v6019_v16  ;;  %v6024_v8 = vrot.slane %v6019_v16, 4  ;;  %v9163_v56 = vadd.f32 %v9162_v59, %v9161_v21  ;;  %v5537_v12 = vadd.f32 %v9160_v43, %v11903_v41 }
 0x6a8   : > { %v6028_v27 = vrot.slane %v6026_v29, 7  ;;  %v6034_v2 = vshrl.u32 %v8920_v24, 16  ;;  %v6037_v31 = vshll.u32 %v8920_v24, 16  ;;  %v9442_v61 = vpop.f32.mrb[84].mxu1  ;;  %v6779_v11 = vrot.slane %v12101_v49, 1 }
 0x6a9   : > { %v6023_v44 = vsel %vm10200_vm8, %v6015_v48, %v6022_v55  ;;  %v6253_v6 = vsel %vm10192_vm7, %v6024_v8, %v6252_v38  ;;  %v5697_v5 = vpop.f32.mrb[85].mxu1  ;;  %v5540_v60 = vadd.f32 %v9163_v56, %v11903_v41  ;;  %v6601_v54 = vshll.u32 %v12092_v28, 16 }
 0x6aa   : > { %v6031_v63 = vor.u32 %v6029_v15, %v6028_v27  ;;  %6251 = vst.msk [vmem:[#allocation3 + $0x70] sm:$0xf] %vm511_vm2, %v6023_v44  ;;  %6254 = vst [vmem:[#allocation3 + $0x74] sm:$0x1] %v6253_v6  ;;  %v6036_v25 = vrot.slane %v6034_v2, 7  ;;  %v6032_v50 = vrot.slane %v6028_v27, 4  ;;  %v5698_v14 = vadd.f32 %v5697_v5, %v5537_v12 }
 0x6ab   : > { %v9164_v33 = vpop.f32.mrb[108].mxu0  ;;  %v9443_v47 = vpop.f32.mrb[86].mxu1  ;;  %v6606_v37 = vshll.u32 %v12101_v49, 16  ;;  %v6780_v53 = vsel %vm1491_vm11, %v6778_v18, %v6779_v11  ;;  %v6603_v21 = vrot.slane %v6601_v54, 1  ;;  %v6599_v59 = vshrl.u32 %v12092_v28, 16 }
 0x6ac   : > { %v6256_v41 = vsel %vm10732_vm4, %v6031_v63, %v6255_v32  ;;  %v6039_v19 = vor.u32 %v6037_v31, %v6036_v25  ;;  %v6041_v7 = vrot.slane %v6036_v25, 4  ;;  %v9165_v35 = vpop.f32.mrb[109].mxu0  ;;  %v5700_v46 = vpop.f32.mrb[87].mxu1  ;;  %v5764_v4 = vmax.f32 %v5698_v14, 0.0  ;;  %6824 = vrot.lane.b32.xlu1 %v6780_v53, %s9844_s28  ;;  %v12144_v15 = vld [vmem:[%s12747_s6] ss:$0 sm:$0xff] }
 0x6ad   : > { %6257 = vst [vmem:[#allocation3 + $0x78] sm:$0xf] %v6256_v41  ;;  %v9166_v48 = vadd.f32 %v9165_v35, %v9164_v33  ;;  %v5701_v16 = vadd.f32 %v5700_v46, %v5540_v60  ;;  %v9167_v43 = vpop.f32.mrb[110].mxu0  ;;  %v6508_v51 = vor.u32 %v12078_v45, %v6503_v10  ;;  %v6604_v23 = vor.u32 %v6603_v21, %v6599_v59 }
 0x6ae   : > { %v6040_v52 = vsel %vm10200_vm8, %v6032_v50, %v6039_v19  ;;  %v6260_v29 = vsel %vm10192_vm7, %v6041_v7, %v6259_v20  ;;  %v9168_v24 = vpop.f32.mrb[111].mxu0  ;;  %v8921_v49 = vpack.c.bf16 %v5764_v4, %v5764_v4  ;;  %v6608_v13 = vrot.slane %v6606_v37, 1  ;;  %v9764_v37 = vld [vmem:[%s12748_s7 + $0x30] sm:$0xff]  }
 0x6af   : > { %6258 = vst.msk [vmem:[#allocation3 + $0x7c] sm:$0xf] %vm511_vm2, %v6040_v52  ;;  %6261 = vst [vmem:[#allocation3 + $0x80] sm:$0x1] %v6260_v29  ;;  %v5545_v55 = vadd.f32 %v12144_v15, %v9166_v48  ;;  %v5765_v8 = vmax.f32 %v5701_v16, 0.0  ;;  %v9169_v56 = vadd.f32 %v9168_v24, %v9167_v43  ;;  %v6513_v12 = vsel %vm1238_vm12, %v6508_v51, %v12089_v3  ;;  %v9765_v52 = vld [vmem:[%s12748_s7 + $0x78] sm:$0xff]  }
 0x6b0   : > { %v6043_v27 = vshrl.u32 %v8921_v49, 16  ;;  %6808 = vrot.lane.b32.xlu1 %v12097_v17, %s9844_s28  ;;  %v6046_v10 = vshll.u32 %v8921_v49, 16  ;;  %v6609_v2 = vsel %vm1238_vm12, %v6604_v23, %v6608_v13  ;;  %v9763_v17 = vld [vmem:[%s12748_s7 + $0x70] sm:$0xff]   ;;  %v9766_v29 = vld [vmem:[%s12748_s7 + $0x38] sm:$0xff]   ;;  %v9767_v24 = vld [vmem:[%s12748_s7 + $0x80] sm:$0xff]  }
 0x6b1   : > { %v5706_v34 = vadd.f32 %v9442_v61, %v5545_v55  ;;  %v8922_v38 = vpack.c.bf16 %v5765_v8, %v5765_v8  ;;  %v5548_v45 = vadd.f32 %v12144_v15, %v9169_v56  ;;  %v12153_v36 = vld [vmem:[#allocation3 + $0x6c] sm:$0xff]   ;;  %v12155_v32 = vld [vmem:[#allocation3 + $0x74] ss:$0 sps:$4 sm:$0x11]   ;;  %6734 = vrot.lane.b32.xlu0 %v6609_v2, %s9843_s27  ;;  %9224 = vmatprep.subr.bf16.mxu1 %v9763_v17 }
 0x6b2   : > { %v6045_v44 = vrot.slane %v6043_v27, 7  ;;  %v9170_v18 = vpop.f32.mrb[112].mxu0  ;;  %v6781_v5 = vrot.slane %v12153_v36, 1  ;;  %v6782_v3 = vrot.slane %v12155_v32, 1  ;;  %v6611_v60 = vshrl.u32 %v12153_v36, 16  ;;  %9225 = vmatpush3.bf16.msra.mxu1 %v9764_v37  ;;  %9452 = vmatprep.subr.bf16.mxu0 %v9767_v24 }
 0x6b3   : > { %v5766_v6 = vmax.f32 %v5706_v34, 0.0  ;;  %v6051_v31 = vshrl.u32 %v8922_v38, 16  ;;  %v6054_v61 = vshll.u32 %v8922_v38, 16  ;;  %v5709_v63 = vadd.f32 %v9443_v47, %v5548_v45  ;;  %v9171_v25 = vpop.f32.mrb[113].mxu0  ;;  %v6266_v49 = vld [vmem:[#allocation3 + $0x8c] sm:$0x1]  ;;  %9226 = vmatprep.subr.bf16.mxu1 %v9765_v52  ;;  %9453 = vmatpush3.bf16.msra.mxu0 %v9767_v24 }
 0x6b4   : > { %v6048_v11 = vor.u32 %v6046_v10, %v6045_v44  ;;  %v6049_v62 = vrot.slane %v6045_v44, 4  ;;  %v9173_v33 = vpop.f32.mrb[114].mxu0  ;;  %v6721_v54 = vpop.permute.xlu0 %6720  ;;  %v9172_v41 = vadd.f32 %v9171_v25, %v9170_v18  ;;  %v6783_v35 = vsel %vm1491_vm11, %v6781_v5, %v6782_v3  ;;  %v9770_v3 = vld [vmem:[%s12748_s7 + $0x88] sm:$0xff]  }
 0x6b5   : > { %v8923_v50 = vpack.c.bf16 %v5766_v6, %v5766_v6  ;;  %v6053_v14 = vrot.slane %v6051_v31, 7  ;;  %v5767_v47 = vmax.f32 %v5709_v63, 0.0  ;;  %v6847_v19 = vsel %vm3133_vm5, %v11930_v26, %v6721_v54  ;;  %v9174_v7 = vpop.f32.mrb[115].mxu0  ;;  %6718 = vrot.lane.b32.xlu0 %v6513_v12, %s9843_s27  ;;  %6826 = vrot.lane.b32.xlu1 %v6783_v35, %s9844_s28  ;;  %v6269_v12 = vld [vmem:[#allocation3 + $0x90] sm:$0xf] }
 0x6b6   : > { %v6263_v46 = vsel %vm10732_vm4, %v6048_v11, %v6262_v42  ;;  %v12174_v48 = vld [vmem:[#allocation3 + $0x78] sm:$0xff]   ;;  %v9175_v21 = vadd.f32 %v9174_v7, %v9173_v33  ;;  %v5553_v26 = vadd.f32 %v12144_v15, %v9172_v41  ;;  %v6613_v56 = vshll.u32 %v12153_v36, 16  ;;  %9227 = vmatpush3.bf16.msra.mxu1 %v9766_v29  ;;  %9454 = vmatprep.subr.bf16.mxu0 %v9770_v3 }
 0x6b7   : > { %v6060_v53 = vshrl.u32 %v8923_v50, 16  ;;  %v6063_v20 = vshll.u32 %v8923_v50, 16  ;;  %v6056_v4 = vor.u32 %v6054_v61, %v6053_v14  ;;  %6264 = vst [vmem:[#allocation3 + $0x84] sm:$0xf] %v6263_v46  ;;  %v6058_v16 = vrot.slane %v6053_v14, 4  ;;  %9455 = vmatpush3.bf16.msra.mxu0 %v9770_v3 }
 0x6b8   : > { %v8924_v43 = vpack.c.bf16 %v5767_v47, %v5767_v47  ;;  %v9446_v55 = vpop.f32.mrb[88].mxu1  ;;  %v6811_v8 = vpop.permute.xlu0 %6810  ;;  %v6618_v23 = vshll.u32 %v12155_v32, 16  ;;  %v6615_v6 = vrot.slane %v6613_v56, 1  ;;  %v5556_v63 = vadd.f32 %v12144_v15, %v9175_v21  ;;  %v6273_v35 = vld [vmem:[#allocation3 + $0x98] sm:$0x1] }
 0x6b9   : > { %v6062_v59 = vrot.slane %v6060_v53, 7  ;;  %v6057_v51 = vsel %vm10200_vm8, %v6049_v62, %v6056_v4  ;;  %v6267_v13 = vsel %vm10192_vm7, %v6058_v16, %v6266_v49  ;;  %v12194_v38 = vsel %vm3170_vm6, %v6847_v19, %v6811_v8  ;;  %v5713_v10 = vpop.f32.mrb[89].mxu1  ;;  %v9738_v19 = vld [vmem:[#allocation3 + $0x80] ss:$0 sps:$4 sm:$0x11]  }
 0x6ba   : > { %6265 = vst.msk [vmem:[#allocation3 + $0x88] sm:$0xf] %vm511_vm2, %v6057_v51  ;;  %v6068_v27 = vshrl.u32 %v8924_v43, 16  ;;  %v6071_v34 = vshll.u32 %v8924_v43, 16  ;;  %6268 = vst [vmem:[#allocation3 + $0x8c] sm:$0x1] %v6267_v13  ;;  %v5714_v44 = vadd.f32 %v5713_v10, %v5553_v26  ;;  %v6616_v42 = vor.u32 %v6615_v6, %v6611_v60 }
 0x6bb   : > { %v6065_v45 = vor.u32 %v6063_v20, %v6062_v59  ;;  %v6066_v2 = vrot.slane %v6062_v59, 4  ;;  %v9176_v32 = vpop.f32.mrb[116].mxu0  ;;  %v9447_v31 = vpop.f32.mrb[90].mxu1  ;;  %v6620_v18 = vrot.slane %v6618_v23, 1  ;;  %v6623_v5 = vshrl.u32 %v12174_v48, 16 }
 0x6bc   : > { %v6070_v61 = vrot.slane %v6068_v27, 7  ;;  %v9177_v17 = vpop.f32.mrb[117].mxu0  ;;  %v5716_v25 = vpop.f32.mrb[91].mxu1  ;;  %v5768_v62 = vmax.f32 %v5714_v44, 0.0  ;;  %v6625_v7 = vshll.u32 %v12174_v48, 16  ;;  %v6630_v49 = vshll.u32 %v9738_v19, 16 }
 0x6bd   : > { %v6270_v11 = vsel %vm10732_vm4, %v6065_v45, %v6269_v12  ;;  %v9178_v50 = vadd.f32 %v9177_v17, %v9176_v32  ;;  %v9179_v14 = vpop.f32.mrb[118].mxu0  ;;  %v6723_v37 = vpop.permute.xlu1 %6722  ;;  %v5717_v47 = vadd.f32 %v5716_v25, %v5556_v63  ;;  %v6621_v20 = vsel %vm1238_vm12, %v6616_v42, %v6620_v18  ;;  %v6276_v10 = vld [vmem:[#allocation3 + $0x9c] sm:$0xf] }
 0x6be   : > { %6271 = vst [vmem:[#allocation3 + $0x90] sm:$0xf] %v6270_v11  ;;  %v6073_v33 = vor.u32 %v6071_v34, %v6070_v61  ;;  %v6075_v54 = vrot.slane %v6070_v61, 4  ;;  %v9180_v41 = vpop.f32.mrb[119].mxu0  ;;  %v8925_v46 = vpack.c.bf16 %v5768_v62, %v5768_v62  ;;  %v6849_v53 = vsel %vm3133_vm5, %v11941_v39, %v6723_v37  ;;  %6736 = vrot.lane.b32.xlu0 %v6621_v20, %s9843_s27 }
 0x6bf   : > { %v5561_v60 = vadd.f32 %v12144_v15, %v9178_v50  ;;  %v5769_v43 = vmax.f32 %v5717_v47, 0.0  ;;  %v9181_v21 = vadd.f32 %v9180_v41, %v9179_v14  ;;  %v6627_v29 = vrot.slane %v6625_v7, 1 }
 0x6c0   : > { %v6074_v4 = vsel %vm10200_vm8, %v6066_v2, %v6073_v33  ;;  %v6274_v16 = vsel %vm10192_vm7, %v6075_v54, %v6273_v35  ;;  %v6077_v26 = vshrl.u32 %v8925_v46, 16  ;;  %v6080_v39 = vshll.u32 %v8925_v46, 16 }
 0x6c1   : > { %6272 = vst.msk [vmem:[#allocation3 + $0x94] sm:$0xf] %vm511_vm2, %v6074_v4  ;;  %6275 = vst [vmem:[#allocation3 + $0x98] sm:$0x1] %v6274_v16  ;;  %v5722_v52 = vadd.f32 %v9446_v55, %v5561_v60  ;;  %v8926_v24 = vpack.c.bf16 %v5769_v43, %v5769_v43  ;;  %v5564_v59 = vadd.f32 %v12144_v15, %v9181_v21  ;;  %v6813_v51 = vpop.permute.xlu1 %6812  ;;  %v6784_v8 = vrot.slane %v12174_v48, 1  ;;  %v12229_v63 = vld [vmem:[#allocation3 + $0x84] sm:$0xff]  }
 0x6c2   : > { %v6079_v56 = vrot.slane %v6077_v26, 7  ;;  %v12219_v13 = vsel %vm3170_vm6, %v6849_v53, %v6813_v51  ;;  %v9182_v27 = vpop.f32.mrb[120].mxu0  ;;  %v6628_v34 = vor.u32 %v6627_v29, %v6623_v5  ;;  %6932 = vrot.lane.b32.xlu0 %v12194_v38, %s9845_s24  ;;  %v12225_v44 = vld [vmem:[#allocation3 + $0x8c] ss:$0 sps:$4 sm:$0x11]   ;;  %v6632_v61 = vrot.slane %v6630_v49, 1 }
 0x6c3   : > { %v5770_v23 = vmax.f32 %v5722_v52, 0.0  ;;  %v6085_v45 = vshrl.u32 %v8926_v24, 16  ;;  %v6088_v2 = vshll.u32 %v8926_v24, 16  ;;  %v5725_v12 = vadd.f32 %v9447_v31, %v5564_v59  ;;  %6965 = vrot.lane.b32.xlu1 %v12219_v13, %s9844_s28  ;;  %v9183_v55 = vpop.f32.mrb[121].mxu0  ;;  %v9795_v26 = vld [vmem:[#allocation3 + $0x24] sm:$0xff]  }
 0x6c4   : > { %v6082_v6 = vor.u32 %v6080_v39, %v6079_v56  ;;  %v12227_v18 = vadd.f32 %v9183_v55, %v9182_v27  ;;  %v9185_v17 = vpop.f32.mrb[122].mxu0  ;;  %v6083_v25 = vrot.slane %v6079_v56, 4  ;;  %v6785_v3 = vrot.slane %v9738_v19, 1  ;;  %v6280_v19 = vld [vmem:[#allocation3 + $0xa4] sm:$0x1] }
 0x6c5   : > { %v8927_v32 = vpack.c.bf16 %v5770_v23, %v5770_v23  ;;  %v6087_v5 = vrot.slane %v6085_v45, 7  ;;  %v5771_v31 = vmax.f32 %v5725_v12, 0.0  ;;  %v9186_v11 = vpop.f32.mrb[123].mxu0  ;;  %v6633_v50 = vsel %vm1238_vm12, %v6628_v34, %v6632_v61  ;;  %v6815_v21 = vpop.permute.xlu1 %6814  ;;  %v6283_v24 = vld [vmem:[#allocation3 + $0xa8] sm:$0xf] }
 0x6c6   : > { %v6277_v62 = vsel %vm10732_vm4, %v6082_v6, %v6276_v10  ;;  %v12234_v14 = vadd.f32 %v9186_v11, %v9185_v17  ;;  %6738 = vrot.lane.b32.xlu0 %v6633_v50, %s9843_s27  ;;  %v6786_v47 = vsel %vm1491_vm11, %v6784_v8, %v6785_v3  ;;  %v6637_v46 = vshll.u32 %v12229_v63, 16 }
 0x6c7   : > { %v6094_v42 = vshrl.u32 %v8927_v32, 16  ;;  %6278 = vst [vmem:[#allocation3 + $0x9c] sm:$0xf] %v6277_v62  ;;  %v6090_v33 = vor.u32 %v6088_v2, %v6087_v5  ;;  %v6092_v54 = vrot.slane %v6087_v5, 4  ;;  %v8928_v37 = vpack.c.bf16 %v5771_v31, %v5771_v31  ;;  %6828 = vrot.lane.b32.xlu1 %v6786_v47, %s9844_s28 }
 0x6c8   : > { %v6097_v7 = vshll.u32 %v8927_v32, 16  ;;  %v6642_v53 = vshll.u32 %v12225_v44, 16  ;;  %v12245_v16 = vld [vmem:[#allocation3 + $0x90] sm:$0xff]   ;;  %v6635_v52 = vshrl.u32 %v12229_v63, 16  ;;  %v6639_v29 = vrot.slane %v6637_v46, 1 }
 0x6c9   : > { %v6096_v41 = vrot.slane %v6094_v42, 7  ;;  %v6725_v35 = vpop.permute.xlu0 %6724  ;;  %v6091_v20 = vsel %vm10200_vm8, %v6083_v25, %v6090_v33  ;;  %v6281_v60 = vsel %vm10192_vm7, %v6092_v54, %v6280_v19  ;;  %v6102_v4 = vshrl.u32 %v8928_v37, 16  ;;  %v9742_v10 = vld [vmem:[#allocation3 + $0x98] ss:$0 sps:$4 sm:$0x11]   ;;  %v6817_v42 = vpop.permute.xlu1 %6816 }
 0x6ca   : > { %6279 = vst.msk [vmem:[#allocation3 + $0xa0] sm:$0xf] %vm511_vm2, %v6091_v20  ;;  %6282 = vst [vmem:[#allocation3 + $0xa4] sm:$0x1] %v6281_v60  ;;  %v6851_v39 = vsel %vm3133_vm5, %v9795_v26, %v6725_v35  ;;  %v6105_v51 = vshll.u32 %v8928_v37, 16  ;;  %6934 = vrot.lane.b32.xlu0 %v12219_v13, %s9845_s24  ;;  %v6787_v8 = vrot.slane %v12229_v63, 1  ;;  %v6640_v23 = vor.u32 %v6639_v29, %v6635_v52 }
 0x6cb   : > { %v6099_v43 = vor.u32 %v6097_v7, %v6096_v41  ;;  %v6104_v59 = vrot.slane %v6102_v4, 7  ;;  %v12253_v49 = vsel %vm3170_vm6, %v6851_v39, %v6815_v21  ;;  %v6644_v27 = vrot.slane %v6642_v53, 1  ;;  %v6287_v32 = vld [vmem:[#allocation3 + $0xb0] sm:$0x1] }
 0x6cc   : > { %6967 = vrot.lane.b32.xlu1 %v12253_v49, %s9844_s28  ;;  %v6788_v34 = vrot.slane %v12225_v44, 1  ;;  %v6100_v45 = vrot.slane %v6096_v41, 4  ;;  %v6649_v6 = vshll.u32 %v12245_v16, 16  ;;  %v6647_v3 = vshrl.u32 %v12245_v16, 16 }
 0x6cd   : > { %v6284_v56 = vsel %vm10732_vm4, %v6099_v43, %v6283_v24  ;;  %v6107_v2 = vor.u32 %v6105_v51, %v6104_v59  ;;  %v6109_v12 = vrot.slane %v6104_v59, 4  ;;  %v6727_v55 = vpop.permute.xlu0 %6726  ;;  %v6645_v61 = vsel %vm1238_vm12, %v6640_v23, %v6644_v27 }
 0x6ce   : > { %6285 = vst [vmem:[#allocation3 + $0xa8] sm:$0xf] %v6284_v56  ;;  %6740 = vrot.lane.b32.xlu0 %v6645_v61, %s9843_s27  ;;  %v6789_v44 = vsel %vm1491_vm11, %v6787_v8, %v6788_v34  ;;  %v6651_v5 = vrot.slane %v6649_v6, 1  ;;  %v6853_v31 = vsel %vm3133_vm5, %v11980_v30, %v6727_v55  ;;  %v6654_v11 = vshll.u32 %v9742_v10, 16 }
 0x6cf   : > { %v6108_v17 = vsel %vm10200_vm8, %v6100_v45, %v6107_v2  ;;  %v6288_v25 = vsel %vm10192_vm7, %v6109_v12, %v6287_v32  ;;  %v12279_v54 = vsel %vm3170_vm6, %v6853_v31, %v6817_v42  ;;  %v6790_v37 = vrot.slane %v12245_v16, 1  ;;  %v6819_v21 = vpop.permute.xlu1 %6818 }
 0x6d0   : > { %6286 = vst.msk [vmem:[#allocation3 + $0xac] sm:$0xf] %vm511_vm2, %v6108_v17  ;;  %6289 = vst [vmem:[#allocation3 + $0xb0] sm:$0x1] %v6288_v25  ;;  %6830 = vrot.lane.b32.xlu1 %v6789_v44, %s9844_s28  ;;  %v6652_v50 = vor.u32 %v6651_v5, %v6647_v3  ;;  %v6791_v47 = vrot.slane %v9742_v10, 1  ;;  %v6656_v41 = vrot.slane %v6654_v11, 1  ;;  %v5569_v17 = vadd.f32 %v12144_v15, %v12227_v18 }
 0x6d1   : > { %v12274_v62 = vld [vmem:[#allocation3 + $0x9c] sm:$0xff]   ;;  %v9744_v33 = vld [vmem:[#allocation3 + $0xa4] ss:$0 sps:$4 sm:$0x11]   ;;  %v5572_v3 = vadd.f32 %v12144_v15, %v12234_v14 }
 0x6d2   : > { %6936 = vrot.lane.b32.xlu0 %v12253_v49, %s9845_s24  ;;  %v6661_v30 = vshll.u32 %v12274_v62, 16  ;;  %v6729_v7 = vpop.permute.xlu0 %6728  ;;  %v6657_v35 = vsel %vm1238_vm12, %v6652_v50, %v6656_v41  ;;  %v6659_v46 = vshrl.u32 %v12274_v62, 16  ;;  %v6666_v53 = vshll.u32 %v9744_v33, 16 }
 0x6d3   : > { %v6792_v20 = vsel %vm1491_vm11, %v6790_v37, %v6791_v47  ;;  %v6855_v4 = vsel %vm3133_vm5, %v12004_v22, %v6729_v7  ;;  %v6793_v29 = vrot.slane %v12274_v62, 1  ;;  %v6794_v24 = vrot.slane %v9744_v33, 1 }
 0x6d4   : > { %6969 = vrot.lane.b32.xlu1 %v12279_v54, %s9844_s28  ;;  %v6663_v19 = vrot.slane %v6661_v30, 1  ;;  %v6668_v26 = vrot.slane %v6666_v53, 1  ;;  %v12298_v52 = vsel %vm3170_vm6, %v6855_v4, %v6819_v21 }
 0x6d5   : > { %v6795_v56 = vsel %vm1491_vm11, %v6793_v29, %v6794_v24  ;;  %v6821_v10 = vpop.permute.xlu1 %6820 }
 0x6d6   : > { %6742 = vrot.lane.b32.xlu0 %v6657_v35, %s9843_s27  ;;  %v6664_v43 = vor.u32 %v6663_v19, %v6659_v46 }
 0x6d7   : > { %v12289_v60 = vld [vmem:[#allocation3 + $0xa8] sm:$0xff]   ;;  %v9746_v59 = vld [vmem:[#allocation3 + $0xb0] ss:$0 sps:$4 sm:$0x11]  }
 0x6d8   : > { %6832 = vrot.lane.b32.xlu1 %v6792_v20, %s9844_s28  ;;  %v6673_v39 = vshll.u32 %v12289_v60, 16  ;;  %v6669_v22 = vsel %vm1238_vm12, %v6664_v43, %v6668_v26  ;;  %v6671_v27 = vshrl.u32 %v12289_v60, 16  ;;  %v6678_v34 = vshll.u32 %v9746_v59, 16 }
 0x6d9   : > { %v6731_v51 = vpop.permute.xlu0 %6730  ;;  %v6796_v12 = vrot.slane %v12289_v60, 1  ;;  %v6797_v55 = vrot.slane %v9746_v59, 1  ;;  %v6290_v59 = vld [vmem:[#allocation3 + $0xb4] sm:$0xf] }
 0x6da   : > { %6938 = vrot.lane.b32.xlu0 %v12279_v54, %s9845_s24  ;;  %v6675_v8 = vrot.slane %v6673_v39, 1  ;;  %v6857_v23 = vsel %vm3133_vm5, %v12013_v57, %v6731_v51  ;;  %v6680_v57 = vrot.slane %v6678_v34, 1 }
 0x6db   : > { %v12313_v2 = vsel %vm3170_vm6, %v6857_v23, %v6821_v10  ;;  %v6798_v32 = vsel %vm1491_vm11, %v6796_v12, %v6797_v55  ;;  %v6294_v55 = vld [vmem:[#allocation3 + $0xbc] sm:$0x1] }
 0x6dc   : > { %6971 = vrot.lane.b32.xlu1 %v12298_v52, %s9844_s28  ;;  %v6676_v45 = vor.u32 %v6675_v8, %v6671_v27 }
 0x6de   : > { %6744 = vrot.lane.b32.xlu0 %v6669_v22, %s9843_s27  ;;  %v6681_v6 = vsel %vm1238_vm12, %v6676_v45, %v6680_v57 }
 0x6e0   : > { %6834 = vrot.lane.b32.xlu1 %v6795_v56, %s9844_s28 }
 0x6e2   : > { %6940 = vrot.lane.b32.xlu0 %v12298_v52, %s9845_s24 }
 0x6e4   : > { %6973 = vrot.lane.b32.xlu1 %v12313_v2, %s9844_s28 }
 0x6e6   : > { %6746 = vrot.lane.b32.xlu0 %v6681_v6, %s9843_s27 }
 0x6e8   : > { %6836 = vrot.lane.b32.xlu1 %v6798_v32, %s9844_s28 }
 0x6ea   : > { %6942 = vrot.lane.b32.xlu0 %v12313_v2, %s9845_s24 }
 0x6fd   : > { %v9450_v61 = vpop.f32.mrb[92].mxu1 }
 0x6fe   : > { %v5729_v25 = vpop.f32.mrb[93].mxu1 }
 0x6ff   : > { %v5730_v44 = vadd.f32 %v5729_v25, %v5569_v17  ;;  %v9451_v31 = vpop.f32.mrb[94].mxu1 }
 0x700   : > { %v9188_v5 = vpop.f32.mrb[124].mxu0  ;;  %v5732_v42 = vpop.f32.mrb[95].mxu1 }
 0x701   : > { %v9189_v11 = vpop.f32.mrb[125].mxu0  ;;  %v5772_v50 = vmax.f32 %v5730_v44, 0.0  ;;  %v5733_v37 = vadd.f32 %v5732_v42, %v5572_v3 }
 0x702   : > { %v9190_v33 = vadd.f32 %v9189_v11, %v9188_v5  ;;  %v9191_v47 = vpop.f32.mrb[126].mxu0  ;;  %v6301_v11 = vld [vmem:[#allocation3 + $0xc8] sm:$0x1] }
 0x703   : > { %v9192_v30 = vpop.f32.mrb[127].mxu0  ;;  %v8929_v41 = vpack.c.bf16 %v5772_v50, %v5772_v50  ;;  %v5773_v19 = vmax.f32 %v5733_v37, 0.0 }
 0x704   : > { %v5577_v7 = vadd.f32 %v12144_v15, %v9190_v33  ;;  %v9193_v35 = vadd.f32 %v9192_v30, %v9191_v47 }
 0x705   : > { %v6111_v18 = vshrl.u32 %v8929_v41, 16  ;;  %v8930_v53 = vpack.c.bf16 %v5773_v19, %v5773_v19  ;;  %v6114_v43 = vshll.u32 %v8929_v41, 16 }
 0x706   : > { %v5738_v46 = vadd.f32 %v9450_v61, %v5577_v7  ;;  %v5580_v20 = vadd.f32 %v12144_v15, %v9193_v35  ;;  %v6297_v61 = vld [vmem:[#allocation3 + $0xc0] sm:$0xf] }
 0x707   : > { %v6113_v4 = vrot.slane %v6111_v18, 7  ;;  %v6119_v21 = vshrl.u32 %v8930_v53, 16  ;;  %v6122_v22 = vshll.u32 %v8930_v53, 16 }
 0x708   : > { %v5774_v14 = vmax.f32 %v5738_v46, 0.0  ;;  %v5741_v26 = vadd.f32 %v9451_v31, %v5580_v20  ;;  %v12351_v46 = vld [vmem:[#allocation3 + $0xcc] sm:$0xff]  }
 0x709   : > { %v6116_v39 = vor.u32 %v6114_v43, %v6113_v4  ;;  %v6121_v24 = vrot.slane %v6119_v21, 7  ;;  %v6117_v8 = vrot.slane %v6113_v4, 4 }
 0x70a   : > { %v8931_v29 = vpack.c.bf16 %v5774_v14, %v5774_v14  ;;  %v5775_v51 = vmax.f32 %v5741_v26, 0.0  ;;  %v9769_v26 = vld [vmem:[#allocation3 + $0xd4] ss:$0 sps:$4 sm:$0x11]  }
 0x70b   : > { %v6291_v56 = vsel %vm10732_vm4, %v6116_v39, %v6290_v59  ;;  %v6124_v27 = vor.u32 %v6122_v22, %v6121_v24  ;;  %v6126_v34 = vrot.slane %v6121_v24, 4  ;;  %v6709_v39 = vshll.u32 %v12351_v46, 16 }
 0x70c   : > { %v6128_v23 = vshrl.u32 %v8931_v29, 16  ;;  %6292 = vst [vmem:[#allocation3 + $0xb4] sm:$0xf] %v6291_v56  ;;  %v8932_v15 = vpack.c.bf16 %v5775_v51, %v5775_v51  ;;  %v6131_v45 = vshll.u32 %v8931_v29, 16 }
 0x70d   : > { %v6125_v12 = vsel %vm10200_vm8, %v6117_v8, %v6124_v27  ;;  %v6295_v57 = vsel %vm10192_vm7, %v6126_v34, %v6294_v55  ;;  %v6707_v8 = vshrl.u32 %v12351_v46, 16  ;;  %v6711_v56 = vrot.slane %v6709_v39, 1 }
 0x70e   : > { %v6130_v10 = vrot.slane %v6128_v23, 7  ;;  %6293 = vst.msk [vmem:[#allocation3 + $0xb8] sm:$0xf] %vm511_vm2, %v6125_v12  ;;  %v6136_v6 = vshrl.u32 %v8932_v15, 16  ;;  %6296 = vst [vmem:[#allocation3 + $0xbc] sm:$0x1] %v6295_v57 }
 0x70f   : > { %v6139_v25 = vshll.u32 %v8932_v15, 16  ;;  %v6714_v23 = vshll.u32 %v9769_v26, 16  ;;  %v6712_v57 = vor.u32 %v6711_v56, %v6707_v8 }
 0x710   : > { %v6133_v32 = vor.u32 %v6131_v45, %v6130_v10  ;;  %v6138_v17 = vrot.slane %v6136_v6, 7  ;;  %v6134_v5 = vrot.slane %v6130_v10, 4 }
 0x711   : > { %v6716_v6 = vrot.slane %v6714_v23, 1 }
 0x712   : > { %v6298_v44 = vsel %vm10732_vm4, %v6133_v32, %v6297_v61  ;;  %v6141_v31 = vor.u32 %v6139_v25, %v6138_v17  ;;  %v6143_v3 = vrot.slane %v6138_v17, 4 }
 0x713   : > { %6299 = vst [vmem:[#allocation3 + $0xc0] sm:$0xf] %v6298_v44  ;;  %v6717_v17 = vsel %vm1238_vm12, %v6712_v57, %v6716_v6 }
 0x714   : > { %v6142_v42 = vsel %vm10200_vm8, %v6134_v5, %v6141_v31  ;;  %v6302_v50 = vsel %vm10192_vm7, %v6143_v3, %v6301_v11  ;;  %v6823_v19 = vpop.permute.xlu1 %6822  ;;  %v6805_v5 = vrot.slane %v12351_v46, 1  ;;  %v6806_v31 = vrot.slane %v9769_v26, 1  ;;  %v9796_v11 = vld [vmem:[#allocation3] sm:$0xff]  }
 0x715   : > { %6300 = vst.msk [vmem:[#allocation3 + $0xc4] sm:$0xf] %vm511_vm2, %v6142_v42  ;;  %6303 = vst [vmem:[#allocation3 + $0xc8] sm:$0x1] %v6302_v50  ;;  %v12344_v33 = vld [vmem:[#allocation3 + $0xb4] sm:$0xff]  }
 0x716   : > { %v9756_v37 = vld [vmem:[#allocation3 + $0xbc] ss:$0 sps:$4 sm:$0x11]   ;;  %v6685_v58 = vshll.u32 %v12344_v33, 16  ;;  %v6683_v30 = vshrl.u32 %v12344_v33, 16  ;;  %v6799_v18 = vrot.slane %v12344_v33, 1 }
 0x717   : > { %v6690_v47 = vshll.u32 %v9756_v37, 16  ;;  %v6800_v20 = vrot.slane %v9756_v37, 1 }
 0x718   : > { %v6687_v41 = vrot.slane %v6685_v58, 1  ;;  %v6733_v7 = vpop.permute.xlu0 %6732 }
 0x719   : > { %v6859_v9 = vsel %vm3133_vm5, %v12068_v40, %v6733_v7  ;;  %v6692_v1 = vrot.slane %v6690_v47, 1  ;;  %v6801_v29 = vsel %vm1491_vm11, %v6799_v18, %v6800_v20  ;;  %v6807_v47 = vsel %vm1491_vm11, %v6805_v5, %v6806_v31 }
 0x71a   : > { %v6688_v35 = vor.u32 %v6687_v41, %v6683_v30  ;;  %v12354_v53 = vsel %vm3170_vm6, %v6859_v9, %v6823_v19 }
 0x71b   : > { %6975 = vrot.lane.b32.xlu1 %v12354_v53, %s9844_s28 }
 0x71c   : > { %v12356_v4 = vld [vmem:[#allocation3 + $0xc0] sm:$0xff]   ;;  %v6693_v43 = vsel %vm1238_vm12, %v6688_v35, %v6692_v1  ;;  %v9762_v14 = vld [vmem:[#allocation3 + $0xc8] ss:$0 sps:$4 sm:$0x11]  }
 0x71d   : > { %6748 = vrot.lane.b32.xlu0 %v6693_v43, %s9843_s27  ;;  %v6697_v40 = vshll.u32 %v12356_v4, 16  ;;  %v6702_v21 = vshll.u32 %v9762_v14, 16  ;;  %v6695_v24 = vshrl.u32 %v12356_v4, 16  ;;  %v6802_v12 = vrot.slane %v12356_v4, 1 }
 0x71e   : > { %v6825_v34 = vpop.permute.xlu1 %6824  ;;  %v6803_v55 = vrot.slane %v9762_v14, 1 }
 0x71f   : > { %v6699_v22 = vrot.slane %v6697_v40, 1  ;;  %6838 = vrot.lane.b32.xlu1 %v6801_v29, %s9844_s28  ;;  %v6704_v51 = vrot.slane %v6702_v21, 1 }
 0x720   : > { %v6804_v32 = vsel %vm1491_vm11, %v6802_v12, %v6803_v55 }
 0x721   : > { %6944 = vrot.lane.b32.xlu0 %v12354_v53, %s9845_s24  ;;  %v6700_v59 = vor.u32 %v6699_v22, %v6695_v24 }
 0x723   : > { %v6735_v27 = vpop.permute.xlu0 %6734  ;;  %v6705_v10 = vsel %vm1238_vm12, %v6700_v59, %v6704_v51 }
 0x724   : > { %v6861_v15 = vsel %vm3133_vm5, %v12092_v28, %v6735_v27  ;;  %v6809_v28 = vpop.permute.xlu1 %6808 }
 0x725   : > { %v12374_v45 = vsel %vm3170_vm6, %v6861_v15, %v6825_v34  ;;  %6750 = vrot.lane.b32.xlu0 %v6705_v10, %s9843_s27 }
 0x726   : > { %6977 = vrot.lane.b32.xlu1 %v12374_v45, %s9844_s28 }
 0x727   : > { %v6719_v61 = vpop.permute.xlu0 %6718 }
 0x728   : > { %v6827_v25 = vpop.permute.xlu1 %6826  ;;  %v6845_v42 = vsel %vm3133_vm5, %v9796_v11, %v6719_v61 }
 0x729   : > { %6946 = vrot.lane.b32.xlu0 %v12374_v45, %s9845_s24  ;;  %v6881_v30 = vsel %vm3170_vm6, %v6845_v42, %v6809_v28 }
 0x72a   : > { %6840 = vrot.lane.b32.xlu1 %v6804_v32, %s9844_s28 }
 0x72d   : > { %6752 = vrot.lane.b32.xlu0 %v6717_v17, %s9843_s27  ;;  %s8836_s27 = sshll.u32 %s12773_s26, 6 }
 0x72e   : > { %s12704_s20 = scalar_lea.vmem %s12754_s13, %s8836_s27 }
 0x730   : > { %v6737_v44 = vpop.permute.xlu0 %6736 }
 0x731   : > { %v6863_v3 = vsel %vm3133_vm5, %v12153_v36, %v6737_v44 }
 0x732   : > { %v12391_v50 = vsel %vm3170_vm6, %v6863_v3, %v6827_v25 }
 0x733   : > { %6979 = vrot.lane.b32.xlu1 %v12391_v50, %s9844_s28  ;;  %6948 = vrot.lane.b32.xlu0 %v12391_v50, %s9845_s24 }
 0x734   : > { %v6933_v37 = vpop.permute.xlu0 %6932 }
 0x735   : > { %v6966_v58 = vpop.permute.xlu1 %6965  ;;  %v6998_v41 = vsel %vm3288_vm9, %v6881_v30, %v6933_v37 }
 0x736   : > { %9456 = vmatprep.mubr.msk.bf16.mxu0 %vm3133_vm5, %v6966_v58  ;;  %v7046_v36 = vsel %vm3170_vm6, %v6933_v37, %v6966_v58 }
 0x737   : > { %7308 = vmatprep.mubr.bf16.mxu1 %v7046_v36  ;;  %6842 = vrot.lane.b32.xlu1 %v6807_v47, %s9844_s28 }
 0x738   : > { %7309 = vmatmul.mubr.bf16.vlgmr.msra.gmra.mrb[96].mxu1 %v6998_v41  ;;  %v6739_v7 = vpop.permute.xlu0 %6738 }
 0x739   : > { %v6865_v19 = vsel %vm3133_vm5, %v12174_v48, %v6739_v7  ;;  %v6829_v9 = vpop.permute.xlu1 %6828 }
 0x73a   : > { %v12406_v35 = vsel %vm3170_vm6, %v6865_v19, %v6829_v9 }
 0x73b   : > { %6981 = vrot.lane.b32.xlu1 %v12406_v35, %s9844_s28  ;;  %6950 = vrot.lane.b32.xlu0 %v12406_v35, %s9845_s24 }
 0x73c   : > { %v6935_v1 = vpop.permute.xlu0 %6934 }
 0x73d   : > { %v7001_v48 = vsel %vm3288_vm9, %v12194_v38, %v6935_v1 }
 0x73e   : > { %v6968_v18 = vpop.permute.xlu1 %6967 }
 0x73f   : > { %9457 = vmatmul.mubr.msk.bf16.vlgmr.msra.gmra.mrb[128].mxu0 %vm3133_vm5, %v6968_v18  ;;  %v7049_v20 = vsel %vm3170_vm6, %v6935_v1, %v6968_v18 }
 0x740   : > { %7316 = vmatprep.mubr.bf16.mxu1 %v7049_v20  ;;  %v6741_v43 = vpop.permute.xlu0 %6740 }
 0x741   : > { %7317 = vmatmul.mubr.bf16.gmra.mrb[100].mxu1 %v7001_v48  ;;  %v6867_v14 = vsel %vm3133_vm5, %v12229_v63, %v6741_v43 }
 0x742   : > { %v6831_v40 = vpop.permute.xlu1 %6830 }
 0x743   : > { %v12419_v21 = vsel %vm3170_vm6, %v6867_v14, %v6831_v40 }
 0x744   : > { %6952 = vrot.lane.b32.xlu0 %v12419_v21, %s9845_s24  ;;  %6983 = vrot.lane.b32.xlu1 %v12419_v21, %s9844_s28  ;;  %v6937_v26 = vpop.permute.xlu0 %6936 }
 0x745   : > { %v7004_v63 = vsel %vm3288_vm9, %v12219_v13, %v6937_v26 }
 0x746   : > { %v6970_v39 = vpop.permute.xlu1 %6969 }
 0x747   : > { %9460 = vmatprep.mubr.msk.bf16.mxu0 %vm3133_vm5, %v6970_v39  ;;  %v7052_v38 = vsel %vm3170_vm6, %v6937_v26, %v6970_v39 }
 0x748   : > { %7324 = vmatprep.mubr.bf16.mxu1 %v7052_v38  ;;  %v6743_v29 = vpop.permute.xlu0 %6742 }
 0x749   : > { %7325 = vmatmul.mubr.bf16.gmra.mrb[104].mxu1 %v7004_v63  ;;  %v6869_v24 = vsel %vm3133_vm5, %v12245_v16, %v6743_v29 }
 0x74a   : > { %v6833_v22 = vpop.permute.xlu1 %6832 }
 0x74b   : > { %v12432_v59 = vsel %vm3170_vm6, %v6869_v24, %v6833_v22 }
 0x74c   : > { %6954 = vrot.lane.b32.xlu0 %v12432_v59, %s9845_s24  ;;  %6985 = vrot.lane.b32.xlu1 %v12432_v59, %s9844_s28  ;;  %v6939_v51 = vpop.permute.xlu0 %6938 }
 0x74d   : > { %v7007_v16 = vsel %vm3288_vm9, %v12253_v49, %v6939_v51 }
 0x74e   : > { %v6972_v8 = vpop.permute.xlu1 %6971 }
 0x74f   : > { %9461 = vmatmul.mubr.msk.bf16.gmra.mrb[132].mxu0 %vm3133_vm5, %v6972_v8  ;;  %v7055_v13 = vsel %vm3170_vm6, %v6939_v51, %v6972_v8 }
 0x750   : > { %7332 = vmatprep.mubr.bf16.mxu1 %v7055_v13  ;;  %v6745_v56 = vpop.permute.xlu0 %6744 }
 0x751   : > { %7333 = vmatmul.mubr.bf16.gmra.mrb[108].mxu1 %v7007_v16  ;;  %v6871_v23 = vsel %vm3133_vm5, %v12274_v62, %v6745_v56 }
 0x752   : > { %v6835_v27 = vpop.permute.xlu1 %6834 }
 0x753   : > { %v12445_v34 = vsel %vm3170_vm6, %v6871_v23, %v6835_v27 }
 0x754   : > { %6956 = vrot.lane.b32.xlu0 %v12445_v34, %s9845_s24  ;;  %6987 = vrot.lane.b32.xlu1 %v12445_v34, %s9844_s28  ;;  %v6941_v15 = vpop.permute.xlu0 %6940 }
 0x755   : > { %v7010_v62 = vsel %vm3288_vm9, %v12279_v54, %v6941_v15 }
 0x756   : > { %v6974_v10 = vpop.permute.xlu1 %6973 }
 0x757   : > { %9464 = vmatprep.mubr.msk.bf16.mxu0 %vm3133_vm5, %v6974_v10  ;;  %v7058_v49 = vsel %vm3170_vm6, %v6941_v15, %v6974_v10 }
 0x758   : > { %7340 = vmatprep.mubr.bf16.mxu1 %v7058_v49  ;;  %v6747_v12 = vpop.permute.xlu0 %6746 }
 0x759   : > { %7341 = vmatmul.mubr.bf16.gmra.mrb[112].mxu1 %v7010_v62  ;;  %v6873_v55 = vsel %vm3133_vm5, %v12289_v60, %v6747_v12 }
 0x75a   : > { %v6837_v57 = vpop.permute.xlu1 %6836 }
 0x75b   : > { %v12458_v6 = vsel %vm3170_vm6, %v6873_v55, %v6837_v57 }
 0x75c   : > { %6958 = vrot.lane.b32.xlu0 %v12458_v6, %s9845_s24  ;;  %6989 = vrot.lane.b32.xlu1 %v12458_v6, %s9844_s28  ;;  %v6943_v32 = vpop.permute.xlu0 %6942 }
 0x75d   : > { %v7013_v60 = vsel %vm3288_vm9, %v12298_v52, %v6943_v32 }
 0x78d   : > { %v6976_v28 = vpop.permute.xlu1 %6975 }
 0x78e   : > { %9465 = vmatmul.mubr.msk.bf16.gmra.mrb[136].mxu0 %vm3133_vm5, %v6976_v28  ;;  %v7061_v54 = vsel %vm3170_vm6, %v6943_v32, %v6976_v28 }
 0x78f   : > { %v6749_v61 = vpop.permute.xlu0 %6748  ;;  %7348 = vmatprep.mubr.bf16.mxu1 %v7061_v54 }
 0x790   : > { %v6875_v17 = vsel %vm3133_vm5, %v12344_v33, %v6749_v61  ;;  %7349 = vmatmul.mubr.bf16.gmra.mrb[116].mxu1 %v7013_v60 }
 0x791   : > { %v6839_v25 = vpop.permute.xlu1 %6838 }
 0x792   : > { %v12471_v44 = vsel %vm3170_vm6, %v6875_v17, %v6839_v25 }
 0x793   : > { %v6945_v5 = vpop.permute.xlu0 %6944  ;;  %6960 = vrot.lane.b32.xlu0 %v12471_v44, %s9845_s24  ;;  %6991 = vrot.lane.b32.xlu1 %v12471_v44, %s9844_s28 }
 0x794   : > { %v7016_v52 = vsel %vm3288_vm9, %v12313_v2, %v6945_v5 }
 0x797   : > { %v6751_v31 = vpop.permute.xlu0 %6750 }
 0x798   : > { %v6978_v3 = vpop.permute.xlu1 %6977  ;;  %v6877_v11 = vsel %vm3133_vm5, %v12356_v4, %v6751_v31 }
 0x799   : > { %9468 = vmatprep.mubr.msk.bf16.mxu0 %vm3133_vm5, %v6978_v3  ;;  %v7064_v33 = vsel %vm3170_vm6, %v6945_v5, %v6978_v3 }
 0x79a   : > { %7356 = vmatprep.mubr.bf16.mxu1 %v7064_v33 }
 0x79b   : > { %7357 = vmatmul.mubr.bf16.gmra.mrb[120].mxu1 %v7016_v52  ;;  %v6947_v58 = vpop.permute.xlu0 %6946 }
 0x79c   : > { %v6841_v42 = vpop.permute.xlu1 %6840  ;;  %v7019_v2 = vsel %vm3288_vm9, %v12354_v53, %v6947_v58 }
 0x79d   : > { %v6913_v37 = vsel %vm3170_vm6, %v6877_v11, %v6841_v42 }
 0x79e   : > { %6962 = vrot.lane.b32.xlu0 %v6913_v37, %s9845_s24  ;;  %6993 = vrot.lane.b32.xlu1 %v6913_v37, %s9844_s28 }
 0x79f   : > { %v6753_v47 = vpop.permute.xlu0 %6752 }
 0x7a0   : > { %v6879_v4 = vsel %vm3133_vm5, %v12351_v46, %v6753_v47 }
 0x7a5   : > { %v6980_v30 = vpop.permute.xlu1 %6979  ;;  %v6949_v19 = vpop.permute.xlu0 %6948 }
 0x7a6   : > { %9469 = vmatmul.mubr.msk.bf16.gmra.mrb[140].mxu0 %vm3133_vm5, %v6980_v30  ;;  %v7067_v36 = vsel %vm3170_vm6, %v6947_v58, %v6980_v30  ;;  %v7022_v1 = vsel %vm3288_vm9, %v12374_v45, %v6949_v19 }
 0x7a7   : > { %7364 = vmatprep.mubr.bf16.mxu1 %v7067_v36 }
 0x7a8   : > { %7365 = vmatmul.mubr.bf16.gmra.mrb[124].mxu1 %v7019_v2 }
 0x7a9   : > { %v6843_v41 = vpop.permute.xlu1 %6842 }
 0x7aa   : > { %v6915_v7 = vsel %vm3170_vm6, %v6879_v4, %v6843_v41 }
 0x7ab   : > { %6995 = vrot.lane.b32.xlu1 %v6915_v7, %s9844_s28 }
 0x7ad   : > { %v6982_v9 = vpop.permute.xlu1 %6981  ;;  %v6951_v18 = vpop.permute.xlu0 %6950 }
 0x7ae   : > { %9472 = vmatprep.mubr.msk.bf16.mxu0 %vm3133_vm5, %v6982_v9  ;;  %v7070_v53 = vsel %vm3170_vm6, %v6949_v19, %v6982_v9  ;;  %v7025_v48 = vsel %vm3288_vm9, %v12391_v50, %v6951_v18 }
 0x7af   : > { %7372 = vmatprep.mubr.bf16.mxu1 %v7070_v53 }
 0x7b0   : > { %7373 = vmatmul.mubr.bf16.gmra.mrb[128].mxu1 %v7022_v1 }
 0x7b6   : > { %v6984_v20 = vpop.permute.xlu1 %6983  ;;  %v6953_v43 = vpop.permute.xlu0 %6952 }
 0x7b7   : > { %9473 = vmatmul.mubr.msk.bf16.gmra.mrb[144].mxu0 %vm3133_vm5, %v6984_v20  ;;  %v7073_v46 = vsel %vm3170_vm6, %v6951_v18, %v6984_v20  ;;  %v7028_v45 = vsel %vm3288_vm9, %v12406_v35, %v6953_v43 }
 0x7b8   : > { %7380 = vmatprep.mubr.bf16.mxu1 %v7073_v46 }
 0x7b9   : > { %7381 = vmatmul.mubr.bf16.gmra.mrb[132].mxu1 %v7025_v48 }
 0x7be   : > { %v6986_v14 = vpop.permute.xlu1 %6985  ;;  %v6955_v26 = vpop.permute.xlu0 %6954 }
 0x7bf   : > { %9476 = vmatprep.mubr.msk.bf16.mxu0 %vm3133_vm5, %v6986_v14  ;;  %v7076_v40 = vsel %vm3170_vm6, %v6953_v43, %v6986_v14  ;;  %v7031_v50 = vsel %vm3288_vm9, %v12419_v21, %v6955_v26 }
 0x7c0   : > { %7388 = vmatprep.mubr.bf16.mxu1 %v7076_v40 }
 0x7c1   : > { %7389 = vmatmul.mubr.bf16.gmra.mrb[136].mxu1 %v7028_v45 }
 0x7c6   : > { %v6988_v39 = vpop.permute.xlu1 %6987  ;;  %v6957_v63 = vpop.permute.xlu0 %6956 }
 0x7c7   : > { %9477 = vmatmul.mubr.msk.bf16.gmra.mrb[148].mxu0 %vm3133_vm5, %v6988_v39  ;;  %v7079_v38 = vsel %vm3170_vm6, %v6955_v26, %v6988_v39  ;;  %v7034_v35 = vsel %vm3288_vm9, %v12432_v59, %v6957_v63  ;;  %v12521_v59 = vld [vmem:[%s12749_s8] ss:$0 sm:$0xff] }
 0x7c8   : > { %7396 = vmatprep.mubr.bf16.mxu1 %v7079_v38 }
 0x7c9   : > { %7397 = vmatmul.mubr.bf16.gmra.mrb[140].mxu1 %v7031_v50 }
 0x7ce   : > { %v6990_v29 = vpop.permute.xlu1 %6989  ;;  %v6959_v22 = vpop.permute.xlu0 %6958 }
 0x7cf   : > { %9480 = vmatprep.mubr.msk.bf16.mxu0 %vm3133_vm5, %v6990_v29  ;;  %v7082_v24 = vsel %vm3170_vm6, %v6957_v63, %v6990_v29  ;;  %v7037_v21 = vsel %vm3288_vm9, %v12445_v34, %v6959_v22 }
 0x7d0   : > { %7404 = vmatprep.mubr.bf16.mxu1 %v7082_v24 }
 0x7d1   : > { %7405 = vmatmul.mubr.bf16.gmra.mrb[144].mxu1 %v7034_v35 }
 0x805   : > { %v6992_v51 = vpop.permute.xlu1 %6991  ;;  %v6961_v10 = vpop.permute.xlu0 %6960 }
 0x806   : > { %9481 = vmatmul.mubr.msk.bf16.gmra.mrb[152].mxu0 %vm3133_vm5, %v6992_v51  ;;  %v7085_v8 = vsel %vm3170_vm6, %v6959_v22, %v6992_v51  ;;  %v7040_v57 = vsel %vm3288_vm9, %v12458_v6, %v6961_v10 }
 0x807   : > { %7412 = vmatprep.mubr.bf16.mxu1 %v7085_v8 }
 0x808   : > { %7413 = vmatmul.mubr.bf16.gmra.mrb[148].mxu1 %v7037_v21 }
 0x80b   : > { %v9228_v13 = vpop.f32.mrb[96].mxu1 }
 0x80c   : > { %v9229_v16 = vpop.f32.mrb[97].mxu1 }
 0x80d   : > { %v9230_v56 = vadd.f32 %v9229_v16, %v9228_v13  ;;  %v9231_v23 = vpop.f32.mrb[98].mxu1 }
 0x80e   : > { %v9232_v27 = vpop.f32.mrb[99].mxu1 }
 0x80f   : > { %v9233_v15 = vadd.f32 %v9232_v27, %v9231_v23  ;;  %v7311_v12 = vadd.f32 %v9230_v56, %v12521_v59 }
 0x810   : > { %v6994_v49 = vpop.permute.xlu1 %6993  ;;  %v6963_v58 = vpop.permute.xlu0 %6962 }
 0x811   : > { %9484 = vmatprep.mubr.msk.bf16.mxu0 %vm3133_vm5, %v6994_v49  ;;  %v7088_v34 = vsel %vm3170_vm6, %v6961_v10, %v6994_v49  ;;  %v7314_v61 = vadd.f32 %v9233_v15, %v12521_v59  ;;  %v7043_v19 = vsel %vm3288_vm9, %v12471_v44, %v6963_v58 }
 0x812   : > { %v9458_v62 = vpop.f32.mrb[128].mxu0  ;;  %7420 = vmatprep.mubr.bf16.mxu1 %v7088_v34 }
 0x813   : > { %v7471_v55 = vpop.f32.mrb[129].mxu0  ;;  %7421 = vmatmul.mubr.bf16.gmra.mrb[152].mxu1 %v7040_v57 }
 0x814   : > { %v12528_v32 = vadd.f32 %v7471_v55, %v7311_v12  ;;  %v9234_v28 = vpop.f32.mrb[100].mxu1  ;;  %v9459_v54 = vpop.f32.mrb[130].mxu0 }
 0x815   : > { %v9235_v60 = vpop.f32.mrb[101].mxu1  ;;  %v7474_v17 = vpop.f32.mrb[131].mxu0 }
 0x816   : > { %v9236_v25 = vadd.f32 %v9235_v60, %v9234_v28  ;;  %v12531_v5 = vadd.f32 %v7474_v17, %v7314_v61  ;;  %v9237_v31 = vpop.f32.mrb[102].mxu1 }
 0x817   : > { %v9238_v3 = vpop.f32.mrb[103].mxu1 }
 0x818   : > { %v7319_v52 = vadd.f32 %v9236_v25, %v12521_v59  ;;  %v9239_v33 = vadd.f32 %v9238_v3, %v9237_v31 }
 0x81a   : > { %v12534_v11 = vadd.f32 %v9458_v62, %v7319_v52  ;;  %v7322_v6 = vadd.f32 %v9239_v33, %v12521_v59 }
 0x81c   : > { %v12537_v42 = vadd.f32 %v9459_v54, %v7322_v6  ;;  %v9240_v37 = vpop.f32.mrb[104].mxu1 }
 0x81d   : > { %v9241_v47 = vpop.f32.mrb[105].mxu1  ;;  %v6996_v36 = vpop.permute.xlu1 %6995 }
 0x81e   : > { %v9242_v30 = vadd.f32 %v9241_v47, %v9240_v37  ;;  %v9243_v2 = vpop.f32.mrb[106].mxu1  ;;  %9485 = vmatmul.mubr.msk.bf16.gmra.mrb[156].mxu0 %vm3133_vm5, %v6996_v36  ;;  %v7091_v41 = vsel %vm3170_vm6, %v6963_v58, %v6996_v36 }
 0x81f   : > { %v9244_v4 = vpop.f32.mrb[107].mxu1  ;;  %7428 = vmatprep.mubr.bf16.mxu1 %v7091_v41  ;;  %7774 = vmatprep.mubr.bf16.mxu0 %v9838_v0 }
 0x820   : > { %v9245_v7 = vadd.f32 %v9244_v4, %v9243_v2  ;;  %7429 = vmatmul.mubr.bf16.gmra.mrb[156].mxu1 %v7043_v19  ;;  %v7327_v53 = vadd.f32 %v9242_v30, %v12521_v59 }
 0x821   : > { %7937 = vmatprep.mubr.bf16.mxu1 %v9838_v0 }
 0x822   : > { %v9462_v9 = vpop.f32.mrb[132].mxu0  ;;  %v7330_v48 = vadd.f32 %v9245_v7, %v12521_v59 }
 0x823   : > { %v7487_v1 = vpop.f32.mrb[133].mxu0 }
 0x824   : > { %v12546_v18 = vadd.f32 %v7487_v1, %v7327_v53  ;;  %v9246_v20 = vpop.f32.mrb[108].mxu1  ;;  %v9463_v46 = vpop.f32.mrb[134].mxu0 }
 0x825   : > { %v9247_v43 = vpop.f32.mrb[109].mxu1  ;;  %v7490_v14 = vpop.f32.mrb[135].mxu0 }
 0x826   : > { %v9248_v40 = vadd.f32 %v9247_v43, %v9246_v20  ;;  %v12549_v45 = vadd.f32 %v7490_v14, %v7330_v48  ;;  %v9249_v44 = vpop.f32.mrb[110].mxu1 }
 0x827   : > { %v9250_v26 = vpop.f32.mrb[111].mxu1 }
 0x828   : > { %v7335_v39 = vadd.f32 %v9248_v40, %v12521_v59  ;;  %v9251_v38 = vadd.f32 %v9250_v26, %v9249_v44 }
 0x82a   : > { %v12552_v50 = vadd.f32 %v9462_v9, %v7335_v39  ;;  %v7338_v63 = vadd.f32 %v9251_v38, %v12521_v59 }
 0x82c   : > { %v12555_v29 = vadd.f32 %v9463_v46, %v7338_v63  ;;  %v9252_v24 = vpop.f32.mrb[112].mxu1 }
 0x82d   : > { %v9253_v35 = vpop.f32.mrb[113].mxu1 }
 0x82e   : > { %v9254_v22 = vadd.f32 %v9253_v35, %v9252_v24  ;;  %v9255_v51 = vpop.f32.mrb[114].mxu1 }
 0x82f   : > { %v9256_v8 = vpop.f32.mrb[115].mxu1 }
 0x830   : > { %v9257_v21 = vadd.f32 %v9256_v8, %v9255_v51  ;;  %v7343_v16 = vadd.f32 %v9254_v22, %v12521_v59 }
 0x832   : > { %v7346_v10 = vadd.f32 %v9257_v21, %v12521_v59 }
 0x861   : > { %v9466_v13 = vpop.f32.mrb[136].mxu0 }
 0x862   : > { %v7503_v56 = vpop.f32.mrb[137].mxu0 }
 0x863   : > { %v12558_v23 = vadd.f32 %v7503_v56, %v7343_v16  ;;  %v9258_v27 = vpop.f32.mrb[116].mxu1  ;;  %v9467_v15 = vpop.f32.mrb[138].mxu0 }
 0x864   : > { %v9259_v49 = vpop.f32.mrb[117].mxu1  ;;  %v7506_v62 = vpop.f32.mrb[139].mxu0 }
 0x865   : > { %v9260_v12 = vadd.f32 %v9259_v49, %v9258_v27  ;;  %v12561_v34 = vadd.f32 %v7506_v62, %v7346_v10  ;;  %v9261_v55 = vpop.f32.mrb[118].mxu1  ;;  %v7598_v27 = vmax.f32 %v12528_v32, 0.0 }
 0x866   : > { %v9262_v57 = vpop.f32.mrb[119].mxu1 }
 0x867   : > { %v7351_v28 = vadd.f32 %v9260_v12, %v12521_v59  ;;  %v9263_v54 = vadd.f32 %v9262_v57, %v9261_v55  ;;  %v7599_v12 = vmax.f32 %v12531_v5, 0.0 }
 0x869   : > { %v12564_v61 = vadd.f32 %v9466_v13, %v7351_v28  ;;  %v7354_v60 = vadd.f32 %v9263_v54, %v12521_v59 }
 0x86b   : > { %v12567_v17 = vadd.f32 %v9467_v15, %v7354_v60 }
 0x86e   : > { %v9264_v25 = vpop.f32.mrb[120].mxu1 }
 0x86f   : > { %v9265_v31 = vpop.f32.mrb[121].mxu1 }
 0x870   : > { %v9266_v3 = vadd.f32 %v9265_v31, %v9264_v25  ;;  %v9267_v52 = vpop.f32.mrb[122].mxu1 }
 0x871   : > { %v9268_v33 = vpop.f32.mrb[123].mxu1 }
 0x872   : > { %v9269_v6 = vadd.f32 %v9268_v33, %v9267_v52  ;;  %v7359_v58 = vadd.f32 %v9266_v3, %v12521_v59  ;;  %v7600_v52 = vmax.f32 %v12534_v11, 0.0 }
 0x874   : > { %v7362_v4 = vadd.f32 %v9269_v6, %v12521_v59 }
 0x879   : > { %v9470_v37 = vpop.f32.mrb[140].mxu0 }
 0x87a   : > { %v7519_v47 = vpop.f32.mrb[141].mxu0 }
 0x87b   : > { %v12570_v30 = vadd.f32 %v7519_v47, %v7359_v58  ;;  %v9270_v2 = vpop.f32.mrb[124].mxu1  ;;  %v9471_v36 = vpop.f32.mrb[142].mxu0  ;;  %v7601_v58 = vmax.f32 %v12537_v42, 0.0 }
 0x87c   : > { %v9271_v41 = vpop.f32.mrb[125].mxu1  ;;  %v7522_v7 = vpop.f32.mrb[143].mxu0 }
 0x87d   : > { %v9272_v19 = vadd.f32 %v9271_v41, %v9270_v2  ;;  %v12573_v9 = vadd.f32 %v7522_v7, %v7362_v4  ;;  %v9273_v53 = vpop.f32.mrb[126].mxu1 }
 0x87e   : > { %v9274_v1 = vpop.f32.mrb[127].mxu1 }
 0x87f   : > { %v7367_v20 = vadd.f32 %v9272_v19, %v12521_v59  ;;  %v9275_v46 = vadd.f32 %v9274_v1, %v9273_v53 }
 0x881   : > { %v12576_v48 = vadd.f32 %v9470_v37, %v7367_v20  ;;  %v7370_v43 = vadd.f32 %v9275_v46, %v12521_v59 }
 0x883   : > { %v12579_v14 = vadd.f32 %v9471_v36, %v7370_v43  ;;  %v9276_v40 = vpop.f32.mrb[128].mxu1 }
 0x884   : > { %v9277_v44 = vpop.f32.mrb[129].mxu1 }
 0x885   : > { %v9278_v26 = vadd.f32 %v9277_v44, %v9276_v40  ;;  %v9279_v39 = vpop.f32.mrb[130].mxu1  ;;  %v7602_v44 = vmax.f32 %v12546_v18, 0.0  ;;  %v7604_v18 = vmax.f32 %v12552_v50, 0.0 }
 0x886   : > { %v9280_v38 = vpop.f32.mrb[131].mxu1 }
 0x887   : > { %v9281_v63 = vadd.f32 %v9280_v38, %v9279_v39  ;;  %v7375_v35 = vadd.f32 %v9278_v26, %v12521_v59 }
 0x889   : > { %v7378_v13 = vadd.f32 %v9281_v63, %v12521_v59 }
 0x88a   : > { %v9474_v24 = vpop.f32.mrb[144].mxu0 }
 0x88b   : > { %v7535_v22 = vpop.f32.mrb[145].mxu0 }
 0x88c   : > { %v7536_v51 = vadd.f32 %v7535_v22, %v7375_v35  ;;  %v9282_v8 = vpop.f32.mrb[132].mxu1  ;;  %v9475_v21 = vpop.f32.mrb[146].mxu0 }
 0x88d   : > { %v9283_v16 = vpop.f32.mrb[133].mxu1  ;;  %v7538_v56 = vpop.f32.mrb[147].mxu0 }
 0x88e   : > { %v7614_v15 = vmax.f32 %v7536_v51, 0.0  ;;  %v9284_v10 = vadd.f32 %v9283_v16, %v9282_v8  ;;  %v7539_v49 = vadd.f32 %v7538_v56, %v7378_v13  ;;  %v9285_v62 = vpop.f32.mrb[134].mxu1 }
 0x88f   : > { %v9286_v55 = vpop.f32.mrb[135].mxu1 }
 0x890   : > { %v9516_v57 = vpack.i.bf16 %v7598_v27, %v7614_v15  ;;  %v7383_v28 = vadd.f32 %v9284_v10, %v12521_v59  ;;  %v7615_v54 = vmax.f32 %v7539_v49, 0.0  ;;  %v9287_v60 = vadd.f32 %v9286_v55, %v9285_v62 }
 0x891   : > { %v7605_v62 = vmax.f32 %v12555_v29, 0.0 }
 0x892   : > { %v7544_v25 = vadd.f32 %v9474_v24, %v7383_v28  ;;  %v9518_v31 = vpack.i.bf16 %v7599_v12, %v7615_v54  ;;  %v7386_v3 = vadd.f32 %v9287_v60, %v12521_v59  ;;  %9517 = vxpose.xlu0.b32.start [1/16] (narrow) %v9516_v57, 32  ;;  %v7603_v24 = vmax.f32 %v12549_v45, 0.0 }
 0x894   : > { %v7616_v32 = vmax.f32 %v7544_v25, 0.0  ;;  %v7547_v33 = vadd.f32 %v9475_v21, %v7386_v3  ;;  %v9288_v6 = vpop.f32.mrb[136].mxu1 }
 0x895   : > { %v9289_v37 = vpop.f32.mrb[137].mxu1 }
 0x896   : > { %v7617_v5 = vmax.f32 %v7547_v33, 0.0  ;;  %v9290_v47 = vadd.f32 %v9289_v37, %v9288_v6  ;;  %9519 = vxpose.xlu0.b32.cont [2/16] (narrow) %v9518_v31, 32  ;;  %v9291_v2 = vpop.f32.mrb[138].mxu1  ;;  %v9520_v36 = vpack.i.bf16 %v7600_v52, %v7616_v32  ;;  %v7606_v37 = vmax.f32 %v12558_v23, 0.0 }
 0x897   : > { %v9292_v4 = vpop.f32.mrb[139].mxu1 }
 0x898   : > { %v9293_v41 = vadd.f32 %v9292_v4, %v9291_v2  ;;  %v9522_v7 = vpack.i.bf16 %v7601_v58, %v7617_v5  ;;  %v7391_v53 = vadd.f32 %v9290_v47, %v12521_v59 }
 0x89a   : > { %v9478_v19 = vpop.f32.mrb[148].mxu0  ;;  %9521 = vxpose.xlu0.b32.cont [3/16] (narrow) %v9520_v36, 32  ;;  %v7394_v43 = vadd.f32 %v9293_v41, %v12521_v59  ;;  %v7607_v36 = vmax.f32 %v12561_v34, 0.0  ;;  %v7609_v34 = vmax.f32 %v12567_v17, 0.0  ;;  %v7704_v17 = vld [vmem:[%s12751_s10 + $0x10] sm:$0xff] }
 0x89b   : > { %v7551_v1 = vpop.f32.mrb[149].mxu0 }
 0x89c   : > { %v7552_v11 = vadd.f32 %v7551_v1, %v7391_v53  ;;  %v9294_v20 = vpop.f32.mrb[140].mxu1  ;;  %v9479_v46 = vpop.f32.mrb[150].mxu0 }
 0x89d   : > { %v9295_v40 = vpop.f32.mrb[141].mxu1  ;;  %v7554_v42 = vpop.f32.mrb[151].mxu0 }
 0x89e   : > { %v7618_v26 = vmax.f32 %v7552_v11, 0.0  ;;  %v9296_v39 = vadd.f32 %v9295_v40, %v9294_v20  ;;  %v7555_v38 = vadd.f32 %v7554_v42, %v7394_v43  ;;  %9523 = vxpose.xlu0.b32.cont [4/16] (narrow) %v9522_v7, 32  ;;  %v9297_v63 = vpop.f32.mrb[142].mxu1  ;;  %v7702_v40 = vld [vmem:[%s12751_s10] sm:$0xff] }
 0x89f   : > { %v9298_v35 = vpop.f32.mrb[143].mxu1  ;;  %7708 = vperm.xlu1 %9568, %v7702_v40  }
 0x8a0   : > { %v9524_v22 = vpack.i.bf16 %v7602_v44, %v7618_v26  ;;  %v7399_v51 = vadd.f32 %v9296_v39, %v12521_v59  ;;  %v7619_v8 = vmax.f32 %v7555_v38, 0.0  ;;  %v9299_v21 = vadd.f32 %v9298_v35, %v9297_v63  ;;  %v7703_v39 = vld [vmem:[%s12751_s10 + $0x8] sm:$0xff] }
 0x8a2   : > { %v7560_v13 = vadd.f32 %v9478_v19, %v7399_v51  ;;  %v9526_v16 = vpack.i.bf16 %v7603_v24, %v7619_v8  ;;  %v7402_v56 = vadd.f32 %v9299_v21, %v12521_v59  ;;  %9525 = vxpose.xlu0.b32.cont [5/16] (narrow) %v9524_v22, 32  ;;  %v7705_v51 = vld [vmem:[%s12751_s10 + $0x18] sm:$0xff] }
 0x8a3   : > { %7713 = vperm.xlu1 %9568, %v7703_v39  }
 0x8a4   : > { %v7620_v27 = vmax.f32 %v7560_v13, 0.0  ;;  %v7563_v15 = vadd.f32 %v9479_v46, %v7402_v56  ;;  %v9300_v10 = vpop.f32.mrb[144].mxu1  ;;  %v7608_v46 = vmax.f32 %v12564_v61, 0.0 }
 0x8a5   : > { %v9301_v49 = vpop.f32.mrb[145].mxu1 }
 0x8a6   : > { %v7621_v45 = vmax.f32 %v7563_v15, 0.0  ;;  %v9302_v12 = vadd.f32 %v9301_v49, %v9300_v10  ;;  %9527 = vxpose.xlu0.b32.cont [6/16] (narrow) %v9526_v16, 32  ;;  %v9303_v55 = vpop.f32.mrb[146].mxu1  ;;  %v9528_v57 = vpack.i.bf16 %v7604_v18, %v7620_v27  ;;  %v7610_v49 = vmax.f32 %v12570_v30, 0.0 }
 0x8a7   : > { %v9304_v28 = vpop.f32.mrb[147].mxu1  ;;  %7718 = vperm.xlu1 %9568, %v7704_v17   ;;  %v7612_v30 = vmax.f32 %v12576_v48, 0.0  ;;  %v7971_v48 = vld [vmem:[%s12753_s12] sm:$0x1f] }
 0x8a8   : > { %v9305_v54 = vadd.f32 %v9304_v28, %v9303_v55  ;;  %v9530_v60 = vpack.i.bf16 %v7605_v62, %v7621_v45  ;;  %v7407_v31 = vadd.f32 %v9302_v12, %v12521_v59 }
 0x8aa   : > { %9529 = vxpose.xlu0.b32.cont [7/16] (narrow) %v9528_v57, 32  ;;  %v7410_v33 = vadd.f32 %v9305_v54, %v12521_v59  ;;  %v7611_v57 = vmax.f32 %v12573_v9, 0.0 }
 0x8ab   : > { %7723 = vperm.xlu1 %9568, %v7705_v51  }
 0x8ae   : > { %9531 = vxpose.xlu0.b32.cont [8/16] (narrow) %v9530_v60, 32 }
 0x8af   : > { %7871 = vperm.xlu1 %9568, %v7702_v40  }
 0x8b3   : > { %7876 = vperm.xlu1 %9568, %v7703_v39  }
 0x8b7   : > { %7881 = vperm.xlu1 %9568, %v7704_v17  }
 0x8bb   : > { %7886 = vperm.xlu1 %9568, %v7705_v51  }
 0x8bf   : > { %8035 = vperm.xlu1 %9568, %v7702_v40  }
 0x8c3   : > { %8040 = vperm.xlu1 %9568, %v7703_v39  }
 0x8c7   : > { %8045 = vperm.xlu1 %9568, %v7704_v17  }
 0x8cb   : > { %8050 = vperm.xlu1 %9568, %v7705_v51  }
 0x8cf   : > { %8199 = vperm.xlu1 %9568, %v7702_v40  }
 0x8d3   : > { %8204 = vperm.xlu1 %9568, %v7703_v39  }
 0x8d7   : > { %8209 = vperm.xlu1 %9568, %v7704_v17  }
 0x8d9   : > { %v9482_v25 = vpop.f32.mrb[152].mxu0 }
 0x8da   : > { %v7567_v50 = vpop.f32.mrb[153].mxu0 }
 0x8db   : > { %v7568_v3 = vadd.f32 %v7567_v50, %v7407_v31  ;;  %v9306_v52 = vpop.f32.mrb[148].mxu1  ;;  %v9483_v32 = vpop.f32.mrb[154].mxu0  ;;  %8214 = vperm.xlu1 %9568, %v7705_v51  }
 0x8dc   : > { %v9307_v29 = vpop.f32.mrb[149].mxu1  ;;  %v7570_v6 = vpop.f32.mrb[155].mxu0 }
 0x8dd   : > { %v7622_v58 = vmax.f32 %v7568_v3, 0.0  ;;  %v9308_v5 = vadd.f32 %v9307_v29, %v9306_v52  ;;  %v7571_v47 = vadd.f32 %v7570_v6, %v7410_v33  ;;  %v9309_v2 = vpop.f32.mrb[150].mxu1  ;;  %v7613_v29 = vmax.f32 %v12579_v14, 0.0  ;;  %v8135_v14 = vld [vmem:[%s12753_s12] sm:$0x1f] }
 0x8de   : > { %v9310_v4 = vpop.f32.mrb[151].mxu1 }
 0x8df   : > { %v9532_v41 = vpack.i.bf16 %v7606_v37, %v7622_v58  ;;  %v7415_v7 = vadd.f32 %v9308_v5, %v12521_v59  ;;  %v7623_v19 = vmax.f32 %v7571_v47, 0.0  ;;  %v9311_v53 = vadd.f32 %v9310_v4, %v9309_v2  ;;  %v8299_v58 = vld [vmem:[%s12753_s12] sm:$0x1f] }
 0x8e1   : > { %v7576_v1 = vadd.f32 %v9482_v25, %v7415_v7  ;;  %v9534_v11 = vpack.i.bf16 %v7607_v36, %v7623_v19  ;;  %v7418_v20 = vadd.f32 %v9311_v53, %v12521_v59  ;;  %9533 = vxpose.xlu0.b32.cont [9/16] (narrow) %v9532_v41, 32 }
 0x8e3   : > { %v7624_v23 = vmax.f32 %v7576_v1, 0.0  ;;  %v7579_v43 = vadd.f32 %v9483_v32, %v7418_v20 }
 0x8e5   : > { %v7625_v42 = vmax.f32 %v7579_v43, 0.0  ;;  %9535 = vxpose.xlu0.b32.cont [10/16] (narrow) %v9534_v11, 32  ;;  %v9536_v26 = vpack.i.bf16 %v7608_v46, %v7624_v23 }
 0x8e6   : > { %v9312_v44 = vpop.f32.mrb[152].mxu1 }
 0x8e7   : > { %v9313_v38 = vpop.f32.mrb[153].mxu1  ;;  %v9538_v24 = vpack.i.bf16 %v7609_v34, %v7625_v42  ;;  %v9771_v34 = vld [vmem:[%s12750_s9] sm:$0xff]   ;;  %v9773_v42 = vld [vmem:[%s12750_s9 + $0x10] sm:$0xff]  }
 0x8e8   : > { %v9314_v63 = vadd.f32 %v9313_v38, %v9312_v44  ;;  %v9315_v61 = vpop.f32.mrb[154].mxu1  ;;  %v9772_v44 = vld [vmem:[%s12750_s9 + $0x8] sm:$0xff]  }
 0x8e9   : > { %v9316_v35 = vpop.f32.mrb[155].mxu1  ;;  %9537 = vxpose.xlu0.b32.cont [11/16] (narrow) %v9536_v26, 32  ;;  %v9774_v26 = vld [vmem:[%s12750_s9 + $0x18] sm:$0xff]  }
 0x8ea   : > { %v9317_v22 = vadd.f32 %v9316_v35, %v9315_v61  ;;  %v7423_v21 = vadd.f32 %v9314_v63, %v12521_v59 }
 0x8ec   : > { %v7426_v27 = vadd.f32 %v9317_v22, %v12521_v59 }
 0x8ed   : > { %9539 = vxpose.xlu0.b32.cont [12/16] (narrow) %v9538_v24, 32 }
 0x8f1   : > { %v9486_v8 = vpop.f32.mrb[156].mxu0 }
 0x8f2   : > { %v7583_v13 = vpop.f32.mrb[157].mxu0 }
 0x8f3   : > { %v7584_v16 = vadd.f32 %v7583_v13, %v7423_v21  ;;  %v9318_v56 = vpop.f32.mrb[156].mxu1  ;;  %v9487_v18 = vpop.f32.mrb[158].mxu0 }
 0x8f4   : > { %v9319_v15 = vpop.f32.mrb[157].mxu1  ;;  %v7586_v10 = vpop.f32.mrb[159].mxu0 }
 0x8f5   : > { %v7626_v62 = vmax.f32 %v7584_v16, 0.0  ;;  %v9320_v45 = vadd.f32 %v9319_v15, %v9318_v56  ;;  %v7587_v12 = vadd.f32 %v7586_v10, %v7426_v27  ;;  %v9321_v55 = vpop.f32.mrb[158].mxu1 }
 0x8f6   : > { %v9322_v28 = vpop.f32.mrb[159].mxu1 }
 0x8f7   : > { %v9540_v54 = vpack.i.bf16 %v7610_v49, %v7626_v62  ;;  %v7431_v60 = vadd.f32 %v9320_v45, %v12521_v59  ;;  %v7627_v25 = vmax.f32 %v7587_v12, 0.0  ;;  %v9323_v31 = vadd.f32 %v9322_v28, %v9321_v55 }
 0x8f9   : > { %v7592_v50 = vadd.f32 %v9486_v8, %v7431_v60  ;;  %v9542_v3 = vpack.i.bf16 %v7611_v57, %v7627_v25  ;;  %v7434_v52 = vadd.f32 %v9323_v31, %v12521_v59  ;;  %9541 = vxpose.xlu0.b32.cont [13/16] (narrow) %v9540_v54, 32  ;;  %v7808_v59 = vld [vmem:[%s12753_s12] sm:$0x1f] }
 0x8fa   : > { %7811 = vperm.xlu1 %9568, %v7808_v59  }
 0x8fb   : > { %v7628_v32 = vmax.f32 %v7592_v50, 0.0  ;;  %v7595_v33 = vadd.f32 %v9487_v18, %v7434_v52 }
 0x8fd   : > { %v7629_v6 = vmax.f32 %v7595_v33, 0.0  ;;  %9543 = vxpose.xlu0.b32.cont [14/16] (narrow) %v9542_v3, 32  ;;  %v9544_v9 = vpack.i.bf16 %v7612_v30, %v7628_v32 }
 0x8fe   : > { %7974 = vperm.xlu1 %9568, %v7971_v48  }
 0x8ff   : > { %v9546_v37 = vpack.i.bf16 %v7613_v29, %v7629_v6 }
 0x901   : > { %9545 = vxpose.xlu0.b32.cont [15/16] (narrow) %v9544_v9, 32 }
 0x902   : > { %8138 = vperm.xlu1 %9568, %v8135_v14  }
 0x905   : > { %9547 = vxpose.xlu0.b32.end [16/16] (narrow) %v9546_v37, 32 }
 0x906   : > { %8302 = vperm.xlu1 %9568, %v8299_v58  }
 0x91e   : > { %v7709_v39 = vpop.permute.xlu1 %7708 }
 0x922   : > { %v7714_v38 = vpop.permute.xlu1 %7713 }
 0x926   : > { %v7719_v63 = vpop.permute.xlu1 %7718 }
 0x92a   : > { %v7724_v61 = vpop.permute.xlu1 %7723 }
 0x92e   : > { %9569 = vset.pattern.permute.xlu0 %v9838_v0  ;;  %v7872_v24 = vpop.permute.xlu1 %7871 }
 0x932   : > { %v7877_v35 = vpop.permute.xlu1 %7876 }
 0x936   : > { %v7882_v22 = vpop.permute.xlu1 %7881 }
 0x93a   : > { %v7887_v32 = vpop.permute.xlu1 %7886 }
 0x949   : > { %v9548_v5 = vpop.trf.xlu0 }
 0x94a   : > { %v9552_v47 = vunpack.i.h.bf16 %v9548_v5  ;;  %v9549_v2 = vunpack.i.l.bf16 %v9548_v5 }
 0x94d   : > { %v9553_v36 = vpop.trf.xlu0 }
 0x94e   : > { %v9557_v4 = vunpack.i.h.bf16 %v9553_v36  ;;  %v9554_v41 = vunpack.i.l.bf16 %v9553_v36 }
 0x950   : > { %v12638_v7 = vpack.c.bf16 %v9554_v41, %v9549_v2  ;;  %v12640_v19 = vpack.c.bf16 %v9557_v4, %v9552_v47 }
 0x951   : > { %v9558_v53 = vpop.trf.xlu0 }
 0x952   : > { %7742 = vmatprep.subr.bf16.mxu0 %v12638_v7  ;;  %7905 = vmatprep.subr.bf16.mxu1 %v12638_v7  ;;  %v9562_v1 = vunpack.i.h.bf16 %v9558_v53  ;;  %v9559_v11 = vunpack.i.l.bf16 %v9558_v53 }
 0x953   : > { %7743 = vmatpush1.bf16.msra.mxu0 %v12640_v19  ;;  %7906 = vmatpush1.bf16.msra.mxu1 %v12640_v19 }
 0x955   : > { %v9563_v20 = vpop.trf.xlu0 }
 0x956   : > { %v9567_v46 = vunpack.i.h.bf16 %v9563_v20  ;;  %v9564_v23 = vunpack.i.l.bf16 %v9563_v20 }
 0x958   : > { %v12646_v43 = vpack.c.bf16 %v9567_v46, %v9562_v1  ;;  %v12648_v40 = vpack.c.bf16 %v9564_v23, %v9559_v11 }
 0x95a   : > { %7744 = vmatprep.subr.bf16.mxu0 %v12648_v40  ;;  %7907 = vmatprep.subr.bf16.mxu1 %v12648_v40 }
 0x95b   : > { %7745 = vmatpush1.bf16.msra.mxu0 %v12646_v43  ;;  %7908 = vmatpush1.bf16.msra.mxu1 %v12646_v43 }
 0x95e   : > { %8797 = vmatmul.mubr.msk.bf16.vlgmr.msra.gmra.mrb[160].mxu0 %vm3133_vm5, %v9771_v34  ;;  %8806 = vmatmul.mubr.msk.bf16.vlgmr.msra.gmra.mrb[160].mxu1 %vm3133_vm5, %v9773_v42 }
 0x95f   : > { %7784 = vmatprep.mubr.bf16.mxu0 %v9838_v0  ;;  %7947 = vmatprep.mubr.bf16.mxu1 %v9838_v0 }
 0x966   : > { %8798 = vmatmul.mubr.msk.bf16.gmra.mrb[164].mxu0 %vm3133_vm5, %v9772_v44  ;;  %8807 = vmatmul.mubr.msk.bf16.gmra.mrb[164].mxu1 %vm3133_vm5, %v9774_v26 }
 0x967   : > { %7849 = vmatprep.mubr.bf16.mxu0 %v9838_v0  ;;  %8176 = vmatprep.mubr.bf16.mxu1 %v9838_v0 }
 0xa31   : > { %v7776_v17 = vpop.f32.mrb[160].mxu0  ;;  %v7939_v51 = vpop.f32.mrb[160].mxu1 }
 0xa32   : > { %v7777_v8 = vadd.f32 %v7776_v17, %v7709_v39  ;;  %v7778_v21 = vpop.f32.mrb[161].mxu0  ;;  %v7940_v13 = vadd.f32 %v7939_v51, %v7872_v24  ;;  %v7941_v16 = vpop.f32.mrb[161].mxu1  ;;  %v9775_v17 = vld [vmem:[%s12750_s9 + $0x20] sm:$0xff]   ;;  %v9776_v51 = vld [vmem:[%s12750_s9 + $0x28] sm:$0xff]  }
 0xa33   : > { %v7779_v56 = vadd.f32 %v7778_v21, %v7709_v39  ;;  %v7780_v18 = vpop.f32.mrb[162].mxu0  ;;  %v7942_v27 = vadd.f32 %v7941_v16, %v7872_v24  ;;  %v7943_v15 = vpop.f32.mrb[162].mxu1 }
 0xa34   : > { %v7781_v10 = vadd.f32 %v7780_v18, %v7714_v38  ;;  %v7782_v49 = vpop.f32.mrb[163].mxu0  ;;  %v7944_v62 = vadd.f32 %v7943_v15, %v7877_v35  ;;  %v7945_v45 = vpop.f32.mrb[163].mxu1  ;;  %v7795_v57 = vmax.f32 %v7777_v8, 0.0  ;;  %v7958_v54 = vmax.f32 %v7940_v13, 0.0 }
 0xa35   : > { %v7783_v12 = vadd.f32 %v7782_v49, %v7714_v38  ;;  %v7946_v55 = vadd.f32 %v7945_v45, %v7877_v35  ;;  %v7796_v25 = vmax.f32 %v7779_v56, 0.0  ;;  %v7959_v50 = vmax.f32 %v7942_v27, 0.0  ;;  %v8036_v8 = vpop.permute.xlu1 %8035 }
 0xa36   : > { %v7797_v28 = vmax.f32 %v7781_v10, 0.0  ;;  %v7960_v60 = vmax.f32 %v7944_v62, 0.0 }
 0xa37   : > { %v7798_v31 = vmax.f32 %v7783_v12, 0.0  ;;  %v7961_v3 = vmax.f32 %v7946_v55, 0.0 }
 0xa38   : > { %v7804_v52 = vpack.c.bf16 %v7797_v28, %v7795_v57  ;;  %v7967_v30 = vpack.c.bf16 %v7960_v60, %v7958_v54 }
 0xa39   : > { %v7805_v33 = vpack.c.bf16 %v7798_v31, %v7796_v25  ;;  %v7786_v29 = vpop.f32.mrb[164].mxu0  ;;  %v7968_v6 = vpack.c.bf16 %v7961_v3, %v7959_v50  ;;  %v7949_v9 = vpop.f32.mrb[164].mxu1 }
 0xa3a   : > { %v7787_v37 = vadd.f32 %v7786_v29, %v7719_v63  ;;  %v7788_v59 = vpop.f32.mrb[165].mxu0  ;;  %v7950_v48 = vadd.f32 %v7949_v9, %v7882_v22  ;;  %v7951_v14 = vpop.f32.mrb[165].mxu1 }
 0xa3b   : > { %v7789_v58 = vadd.f32 %v7788_v59, %v7719_v63  ;;  %v7790_v5 = vpop.f32.mrb[166].mxu0  ;;  %7817 = vmatprep.subr.bf16.mxu0 %v7805_v33  ;;  %v7952_v47 = vadd.f32 %v7951_v14, %v7882_v22  ;;  %v7953_v2 = vpop.f32.mrb[166].mxu1  ;;  %v7803_v22 = vld [vmem:[#allocation4] sm:$0x7] }
 0xa3c   : > { %v7791_v36 = vadd.f32 %v7790_v5, %v7724_v61  ;;  %v7792_v4 = vpop.f32.mrb[167].mxu0  ;;  %7818 = vmatpush1.bf16.msra.mxu0 %v7804_v52  ;;  %v7954_v41 = vadd.f32 %v7953_v2, %v7887_v32  ;;  %v7955_v53 = vpop.f32.mrb[167].mxu1  ;;  %v7799_v20 = vmax.f32 %v7787_v37, 0.0  ;;  %v7962_v23 = vmax.f32 %v7950_v48, 0.0 }
 0xa3d   : > { %v7793_v1 = vadd.f32 %v7792_v4, %v7724_v61  ;;  %v7956_v11 = vadd.f32 %v7955_v53, %v7887_v32  ;;  %v7800_v42 = vmax.f32 %v7789_v58, 0.0  ;;  %v7963_v26 = vmax.f32 %v7952_v47, 0.0  ;;  %v7966_v61 = vld [vmem:[#allocation4] sm:$0x7]  ;;  %v8041_v21 = vpop.permute.xlu1 %8040 }
 0xa3e   : > { %v7801_v46 = vmax.f32 %v7791_v36, 0.0  ;;  %v7964_v34 = vmax.f32 %v7954_v41, 0.0 }
 0xa3f   : > { %v7802_v44 = vmax.f32 %v7793_v1, 0.0  ;;  %v7965_v39 = vmax.f32 %v7956_v11, 0.0 }
 0xa40   : > { %v7806_v38 = vpack.c.bf16 %v7801_v46, %v7799_v20  ;;  %v7969_v63 = vpack.c.bf16 %v7964_v34, %v7962_v23 }
 0xa41   : > { %v7807_v24 = vpack.c.bf16 %v7802_v44, %v7800_v42  ;;  %v7970_v35 = vpack.c.bf16 %v7965_v39, %v7963_v26  ;;  %v8046_v13 = vpop.permute.xlu1 %8045  ;;  %v8130_v39 = vld [vmem:[#allocation4] sm:$0x7] }
 0xa43   : > { %7819 = vmatprep.subr.bf16.mxu0 %v7807_v24 }
 0xa44   : > { %7820 = vmatpush1.bf16.msra.mxu0 %v7806_v38  ;;  %v9777_v38 = vld [vmem:[%s12750_s9 + $0x30] sm:$0xff]  }
 0xa45   : > { %7980 = vmatprep.subr.bf16.mxu0 %v7968_v6  ;;  %v8051_v16 = vpop.permute.xlu1 %8050 }
 0xa47   : > { %8799 = vmatmul.mubr.msk.bf16.vlgmr.msra.gmra.mrb[168].mxu0 %vm3133_vm5, %v7803_v22 }
 0xa48   : > { %7981 = vmatpush1.bf16.msra.mxu0 %v7967_v30  ;;  %8012 = vmatprep.mubr.bf16.mxu0 %v9838_v0 }
 0xa49   : > { %7982 = vmatprep.subr.bf16.mxu0 %v7970_v35  ;;  %v12692_v56 = vpop.permute.xlu1 %8199 }
 0xa4c   : > { %7983 = vmatpush1.bf16.msra.mxu0 %v7969_v63 }
 0xa4d   : > { %8069 = vmatprep.subr.bf16.mxu0 %v12638_v7  ;;  %v12694_v18 = vpop.permute.xlu1 %8204 }
 0xa4f   : > { %8808 = vmatmul.mubr.msk.bf16.vlgmr.msra.gmra.mrb[172].mxu0 %vm3133_vm5, %v7966_v61 }
 0xa50   : > { %8070 = vmatpush1.bf16.msra.mxu0 %v12640_v19  ;;  %8101 = vmatprep.mubr.bf16.mxu0 %v9838_v0 }
 0xa51   : > { %8071 = vmatprep.subr.bf16.mxu0 %v12648_v40  ;;  %v12696_v27 = vpop.permute.xlu1 %8209 }
 0xa54   : > { %8072 = vmatpush1.bf16.msra.mxu0 %v12646_v43 }
 0xa55   : > { %v12698_v15 = vpop.permute.xlu1 %8214 }
 0xa57   : > { %8817 = vmatmul.mubr.msk.bf16.vlgmr.msra.gmra.mrb[176].mxu0 %vm3133_vm5, %v9775_v17 }
 0xa58   : > { %8111 = vmatprep.mubr.bf16.mxu0 %v9838_v0 }
 0xa59   : > { %v7812_v10 = vpop.permute.xlu1 %7811 }
 0xa5d   : > { %v7975_v28 = vpop.permute.xlu1 %7974 }
 0xa5f   : > { %8818 = vmatmul.mubr.msk.bf16.gmra.mrb[180].mxu0 %vm3133_vm5, %v9776_v51 }
 0xa60   : > { %8340 = vmatprep.mubr.bf16.mxu0 %v9838_v0 }
 0xb1a   : > { %v7851_v49 = vpop.f32.mrb[168].mxu0 }
 0xb1b   : > { %v7852_v62 = vadd.f32 %v7851_v49, %v7812_v10  ;;  %v7853_v45 = vpop.f32.mrb[169].mxu0 }
 0xb1c   : > { %v7854_v12 = vadd.f32 %v7853_v45, %v7812_v10  ;;  %v7855_v55 = vpop.f32.mrb[170].mxu0 }
 0xb1d   : > { %7858 = vst [vmem:[%s12704_s20] sm:$0x1f] %v7852_v62  ;;  %v7856_v57 = vpop.f32.mrb[171].mxu0 }
 0xb1e   : > { %7859 = vst [vmem:[%s12704_s20 + $0x8] sm:$0x1f] %v7854_v12 }
 0xb22   : > { %v8014_v54 = vpop.f32.mrb[172].mxu0 }
 0xb23   : > { %v8015_v60 = vadd.f32 %v8014_v54, %v7975_v28  ;;  %v8016_v25 = vpop.f32.mrb[173].mxu0 }
 0xb24   : > { %v8017_v31 = vadd.f32 %v8016_v25, %v7975_v28  ;;  %v8018_v50 = vpop.f32.mrb[174].mxu0 }
 0xb25   : > { %8809 = vst [vmem:[%s12704_s20 + $0x10] sm:$0x1f] %v8015_v60  ;;  %v8019_v3 = vpop.f32.mrb[175].mxu0 }
 0xb26   : > { %8810 = vst [vmem:[%s12704_s20 + $0x18] sm:$0x1f] %v8017_v31 }
 0xb2a   : > { %v8103_v52 = vpop.f32.mrb[176].mxu0 }
 0xb2b   : > { %v8104_v30 = vadd.f32 %v8103_v52, %v8036_v8  ;;  %v8105_v32 = vpop.f32.mrb[177].mxu0 }
 0xb2c   : > { %v8106_v33 = vadd.f32 %v8105_v32, %v8036_v8  ;;  %v8107_v29 = vpop.f32.mrb[178].mxu0 }
 0xb2d   : > { %v8108_v6 = vadd.f32 %v8107_v29, %v8041_v21  ;;  %v8109_v9 = vpop.f32.mrb[179].mxu0  ;;  %v8122_v59 = vmax.f32 %v8104_v30, 0.0  ;;  %v8294_v29 = vld [vmem:[#allocation4] sm:$0x7] }
 0xb2e   : > { %v8110_v37 = vadd.f32 %v8109_v9, %v8041_v21  ;;  %v8123_v14 = vmax.f32 %v8106_v33, 0.0 }
 0xb2f   : > { %v8124_v48 = vmax.f32 %v8108_v6, 0.0 }
 0xb30   : > { %v8125_v58 = vmax.f32 %v8110_v37, 0.0 }
 0xb31   : > { %v8131_v5 = vpack.c.bf16 %v8124_v48, %v8122_v59 }
 0xb32   : > { %v8132_v47 = vpack.c.bf16 %v8125_v58, %v8123_v14  ;;  %v8113_v2 = vpop.f32.mrb[180].mxu0 }
 0xb33   : > { %v8114_v36 = vadd.f32 %v8113_v2, %v8046_v13  ;;  %v8115_v4 = vpop.f32.mrb[181].mxu0 }
 0xb34   : > { %v8116_v41 = vadd.f32 %v8115_v4, %v8046_v13  ;;  %v8117_v53 = vpop.f32.mrb[182].mxu0  ;;  %8144 = vmatprep.subr.bf16.mxu1 %v8132_v47 }
 0xb35   : > { %v8118_v1 = vadd.f32 %v8117_v53, %v8051_v16  ;;  %v8119_v11 = vpop.f32.mrb[183].mxu0  ;;  %8145 = vmatpush1.bf16.msra.mxu1 %v8131_v5  ;;  %v8126_v46 = vmax.f32 %v8114_v36, 0.0 }
 0xb36   : > { %v8120_v20 = vadd.f32 %v8119_v11, %v8051_v16  ;;  %v8127_v34 = vmax.f32 %v8116_v41, 0.0 }
 0xb37   : > { %v8128_v23 = vmax.f32 %v8118_v1, 0.0 }
 0xb38   : > { %v8129_v42 = vmax.f32 %v8120_v20, 0.0 }
 0xb39   : > { %v8133_v44 = vpack.c.bf16 %v8128_v23, %v8126_v46 }
 0xb3a   : > { %v8134_v26 = vpack.c.bf16 %v8129_v42, %v8127_v34 }
 0xb3c   : > { %8146 = vmatprep.subr.bf16.mxu1 %v8134_v26 }
 0xb3d   : > { %8147 = vmatpush1.bf16.msra.mxu1 %v8133_v44 }
 0xb3e   : > { %8233 = vmatprep.subr.bf16.mxu1 %v12638_v7  ;;  %v9778_v7 = vld [vmem:[%s12750_s9 + $0x38] sm:$0xff]  }
 0xb40   : > { %8819 = vmatmul.mubr.msk.bf16.vlgmr.msra.gmra.mrb[168].mxu1 %vm3133_vm5, %v8130_v39 }
 0xb41   : > { %8234 = vmatpush1.bf16.msra.mxu1 %v12640_v19  ;;  %8265 = vmatprep.mubr.bf16.mxu1 %v9838_v0  ;;  %v8139_v19 = vpop.permute.xlu1 %8138 }
 0xb42   : > { %8235 = vmatprep.subr.bf16.mxu1 %v12648_v40 }
 0xb45   : > { %8236 = vmatpush1.bf16.msra.mxu1 %v12646_v43 }
 0xb48   : > { %8828 = vmatmul.mubr.msk.bf16.vlgmr.msra.gmra.mrb[172].mxu1 %vm3133_vm5, %v9777_v38 }
 0xb49   : > { %8275 = vmatprep.mubr.bf16.mxu1 %v9838_v0 }
 0xb50   : > { %8829 = vmatmul.mubr.msk.bf16.gmra.mrb[176].mxu1 %vm3133_vm5, %v9778_v7 }
 0xc13   : > { %v8178_v63 = vpop.f32.mrb[168].mxu1 }
 0xc14   : > { %v8179_v24 = vadd.f32 %v8178_v63, %v8139_v19  ;;  %v8180_v40 = vpop.f32.mrb[169].mxu1 }
 0xc15   : > { %v8181_v35 = vadd.f32 %v8180_v40, %v8139_v19  ;;  %v8182_v22 = vpop.f32.mrb[170].mxu1 }
 0xc16   : > { %8820 = vst [vmem:[%s12704_s20 + $0x20] sm:$0x1f] %v8179_v24  ;;  %v8183_v61 = vpop.f32.mrb[171].mxu1 }
 0xc17   : > { %8821 = vst [vmem:[%s12704_s20 + $0x28] sm:$0x1f] %v8181_v35 }
 0xc1b   : > { %v8267_v43 = vpop.f32.mrb[172].mxu1 }
 0xc1c   : > { %v8268_v17 = vadd.f32 %v8267_v43, %v12692_v56  ;;  %v8269_v51 = vpop.f32.mrb[173].mxu1 }
 0xc1d   : > { %v8270_v0 = vadd.f32 %v8269_v51, %v12692_v56  ;;  %v8271_v8 = vpop.f32.mrb[174].mxu1 }
 0xc1e   : > { %v8272_v21 = vadd.f32 %v8271_v8, %v12694_v18  ;;  %v8273_v13 = vpop.f32.mrb[175].mxu1  ;;  %v8286_v10 = vmax.f32 %v8268_v17, 0.0 }
 0xc1f   : > { %v8274_v16 = vadd.f32 %v8273_v13, %v12694_v18  ;;  %v8287_v62 = vmax.f32 %v8270_v0, 0.0 }
 0xc20   : > { %v8288_v49 = vmax.f32 %v8272_v21, 0.0 }
 0xc21   : > { %v8289_v45 = vmax.f32 %v8274_v16, 0.0 }
 0xc22   : > { %v8295_v12 = vpack.c.bf16 %v8288_v49, %v8286_v10 }
 0xc23   : > { %v8296_v55 = vpack.c.bf16 %v8289_v45, %v8287_v62  ;;  %v8277_v57 = vpop.f32.mrb[176].mxu1 }
 0xc24   : > { %v8278_v28 = vadd.f32 %v8277_v57, %v12696_v27  ;;  %v8279_v54 = vpop.f32.mrb[177].mxu1 }
 0xc25   : > { %v8280_v60 = vadd.f32 %v8279_v54, %v12696_v27  ;;  %v8281_v25 = vpop.f32.mrb[178].mxu1  ;;  %8308 = vmatprep.subr.bf16.mxu0 %v8296_v55  ;;  %v8303_v27 = vpop.permute.xlu1 %8302 }
 0xc26   : > { %v8282_v56 = vadd.f32 %v8281_v25, %v12698_v15  ;;  %v8283_v31 = vpop.f32.mrb[179].mxu1  ;;  %8309 = vmatpush1.bf16.msra.mxu0 %v8295_v12  ;;  %v8290_v50 = vmax.f32 %v8278_v28, 0.0 }
 0xc27   : > { %v8284_v18 = vadd.f32 %v8283_v31, %v12698_v15  ;;  %v8291_v52 = vmax.f32 %v8280_v60, 0.0 }
 0xc28   : > { %v8292_v3 = vmax.f32 %v8282_v56, 0.0 }
 0xc29   : > { %v8293_v30 = vmax.f32 %v8284_v18, 0.0 }
 0xc2a   : > { %v8297_v32 = vpack.c.bf16 %v8292_v3, %v8290_v50 }
 0xc2b   : > { %v8298_v33 = vpack.c.bf16 %v8293_v30, %v8291_v52 }
 0xc2d   : > { %8310 = vmatprep.subr.bf16.mxu0 %v8298_v33 }
 0xc2e   : > { %8311 = vmatpush1.bf16.msra.mxu0 %v8297_v32 }
 0xc31   : > { %8830 = vmatmul.mubr.msk.bf16.vlgmr.msra.gmra.mrb[184].mxu0 %vm3133_vm5, %v8294_v29 }
 0xd04   : > { %v8342_v6 = vpop.f32.mrb[184].mxu0 }
 0xd05   : > { %v8343_v9 = vadd.f32 %v8342_v6, %v8303_v27  ;;  %v8344_v37 = vpop.f32.mrb[185].mxu0 }
 0xd06   : > { %v8345_v59 = vadd.f32 %v8344_v37, %v8303_v27  ;;  %v8346_v48 = vpop.f32.mrb[186].mxu0 }
 0xd07   : > { %8831 = vst [vmem:[%s12704_s20 + $0x30] sm:$0x1f] %v8343_v9  ;;  %v8347_v15 = vpop.f32.mrb[187].mxu0 }
 0xd08   : > { %8832 = vst [vmem:[%s12704_s20 + $0x38] sm:$0x1f] %v8345_v59 }
 0xd09 PF: > { %s24_s25 = sadd.s32 1, %s9835_s25  }
 0xd0a   : > { %p21_p2 = scmp.ge.s32.totalorder %s24_s25, 4  }
 0xd0c   :  { %23 = sbr.rel (!%p21_p2) target bundleno = 1 (0x1), region = 115 }
 0xd13   :  { %8373 = vsyncpa [#allocation5], 1 }
 0xd14   :  { %8375 = vsyncpa [#allocation5 + $0x1], 1 }

</bundles_post_ra>
